<compile_context>
chip_gen: v7x
topology: tpu7x:2x2x1
jax: 0.10.0
libtpu: 0.0.40
codegen_flags: <defaults>
</compile_context>

<pallas_src>
import functools

import jax
import jax.numpy as jnp
from jax.experimental import pallas as pl
from jax.experimental.pallas import tpu as pltpu


_MASK_VALUE = -1e30  # large finite negative; -inf risks NaN on fully-masked rows


# ---------------------------------------------------------------------------
# Kernel
# ---------------------------------------------------------------------------
def _mha_kernel(x_ref, wqkv_ref, wp_ref, bp_ref, o_ref, *, num_heads, causal):
    # x_ref:    (Bt, T, C)   Bt batch elements per grid step
    # wqkv_ref: (C, 3C)      fused [Wq | Wk | Wv], scale folded into Wq
    # wp_ref:   (C, C)       pre-transposed output projection
    # bp_ref:   (1, C)       output projection bias (f32)
    # o_ref:    (Bt, T, C)
    Bt, T, C = x_ref.shape
    H = num_heads
    hs = C // H
    cdt = wqkv_ref.dtype                       # MXU operand dtype (f32 or bf16)

    # ---- fused QKV projection: one MXU matmul, N = 3C, f32 accumulation ----
    x2d = x_ref[...].reshape(Bt * T, C).astype(cdt)
    qkv = jnp.dot(x2d, wqkv_ref[...], preferred_element_type=jnp.float32)

    q = qkv[:, 0 * C:1 * C].astype(cdt).reshape(Bt, T, C)
    k = qkv[:, 1 * C:2 * C].astype(cdt).reshape(Bt, T, C)
    v = qkv[:, 2 * C:3 * C].astype(cdt).reshape(Bt, T, C)

    # ---- head-batched attention (heads -> leading batch dim) ----
    def to_heads(a):                           # (Bt, T, C) -> (Bt*H, T, hs)
        a = jnp.stack([a[:, :, h * hs:(h + 1) * hs] for h in range(H)], axis=1)
        return a.reshape(Bt * H, T, hs)

    qh, kh, vh = to_heads(q), to_heads(k), to_heads(v)

    # scores (attention scale already folded into the Q weights)
    s = jnp.einsum('bqd,bkd->bqk', qh, kh,
                   preferred_element_type=jnp.float32)      # (Bt*H, T, T) f32

    if causal:
        # built once per grid step (hoisted out of any per-head work)
        row = jax.lax.broadcasted_iota(jnp.int32, (T, T), 0)
        col = jax.lax.broadcasted_iota(jnp.int32, (T, T), 1)
        s = jnp.where((col <= row)[None], s, _MASK_VALUE)

    p = jax.nn.softmax(s, axis=-1)             # f32 softmax / exp on EUP
    # TODO(synk): attention-weight dropout omitted (eval mode).

    pv = jnp.einsum('bqk,bkd->bqd', p.astype(cdt), vh,
                    preferred_element_type=jnp.float32)     # (Bt*H, T, hs)
    pv = pv.reshape(Bt, H, T, hs)
    att = jnp.concatenate([pv[:, h] for h in range(H)], axis=-1)  # (Bt, T, C)
    att = att.reshape(Bt * T, C).astype(cdt)

    # ---- output projection ----
    y = jnp.dot(att, wp_ref[...], preferred_element_type=jnp.float32)
    y = y + bp_ref[...]                        # (1, C) broadcasts over rows
    # TODO(synk): output dropout omitted (eval mode).
    o_ref[...] = y.reshape(Bt, T, C).astype(o_ref.dtype)


# ---------------------------------------------------------------------------
# Parameter prep (one-time; hoist out of the hot path / cache under jit)
# ---------------------------------------------------------------------------
def prepare_mha_params(wq_heads, wk_heads, wv_heads, wp, bp, *, n_embd,
                       compute_dtype=None):
    """Torch-layout params -> kernel-layout params.

    wq/wk/wv_heads: (H, head_size, C) per-head Linear weights (torch layout).
    wp: (C, C) torch Linear weight, bp: (C,).
    Returns (wqkv, wp_t, bp_row) with:
      * wqkv (C, 3C): columns = [q heads | k heads | v heads], scale folded
        into the q columns,
      * wp_t (C, C):  pre-transposed projection,
      * bp_row (1, C) f32 bias (added to the f32 accumulator).
    compute_dtype (e.g. jnp.bfloat16 on v6e/v7x) casts MXU operands only.
    """
    C = n_embd
    scale = float(C) ** -0.5                   # matches torch: C ** (-0.5)

    def stack(w_heads):                        # (H, hs, C) -> (C, H*hs)
        H, hs, Cw = w_heads.shape
        return jnp.transpose(w_heads, (2, 0, 1)).reshape(Cw, H * hs)

    wq = stack(wq_heads) * scale               # fold attention scale into Wq
    wk = stack(wk_heads)
    wv = stack(wv_heads)
    wqkv = jnp.concatenate([wq, wk, wv], axis=1)        # (C, 3C)
    wp_t = wp.T                                          # (C, C)
    bp_row = bp.reshape(1, C).astype(jnp.float32)        # (1, C) f32

    if compute_dtype is not None:
        wqkv = wqkv.astype(compute_dtype)
        wp_t = wp_t.astype(compute_dtype)
    return wqkv, wp_t, bp_row


def _pick_block_b(batch, seq):
    """Largest divisor of `batch` with <= 512 rows per step; prefer keeping
    >= 2 grid steps (megacore sharding) when a half-size block still fills
    >= 128 MXU rows."""
    best = 1
    for d in range(1, batch + 1):
        if batch % d == 0 and d * seq <= 512:
            best = d
    if best == batch and batch % 2 == 0 and (batch // 2) * seq >= 128:
        best = batch // 2
    return best


# ---------------------------------------------------------------------------
# Forward wrapper
# ---------------------------------------------------------------------------
def multi_head_attention(x, wqkv, wp_t, bp_row, *, num_heads, causal=False,
                         block_b=None):
    """x: (B, T, C). wqkv/wp_t/bp_row from prepare_mha_params."""
    B, T, C = x.shape
    assert C % num_heads == 0
    assert C % 128 == 0, "n_embd must be lane-aligned (multiple of 128)"
    assert T % 8 == 0, "T must be a multiple of 8 (sublane alignment)"
    assert wqkv.shape == (C, 3 * C) and wp_t.shape == (C, C)
    hs = C // num_heads

    if block_b is None:
        block_b = _pick_block_b(B, T)
    assert B % block_b == 0, (B, block_b)

    kernel = functools.partial(_mha_kernel, num_heads=num_heads, causal=causal)

    x_bytes = jnp.dtype(x.dtype).itemsize
    w_bytes = jnp.dtype(wqkv.dtype).itemsize
    flops = int(B * (2 * T * C * (3 * C)                  # fused QKV
                     + num_heads * 2 * (2 * T * T * hs)   # scores + P@V
                     + 2 * T * C * C))                    # output projection
    transcendentals = int(B * num_heads * T * T)          # softmax exp
    bytes_accessed = int(2 * B * T * C * x_bytes + 4 * C * C * w_bytes + 4 * C)

    return pl.pallas_call(
        kernel,
        out_shape=jax.ShapeDtypeStruct((B, T, C), x.dtype),
        grid=(B // block_b,),
        in_specs=[
            pl.BlockSpec((block_b, T, C), lambda b: (b, 0, 0)),   # x tile
            pl.BlockSpec((C, 3 * C), lambda b: (0, 0)),           # Wqkv
            pl.BlockSpec((C, C), lambda b: (0, 0)),               # Wproj^T
            pl.BlockSpec((1, C), lambda b: (0, 0)),               # bias
        ],
        out_specs=pl.BlockSpec((block_b, T, C), lambda b: (b, 0, 0)),
        compiler_params=pltpu.CompilerParams(
            dimension_semantics=("parallel",),     # shard batch over cores
            vmem_limit_bytes=48 * 1024 * 1024,     # roomy v5e/v6e, safe v7x
        ),
        cost_estimate=pl.CostEstimate(
            flops=flops,
            transcendentals=transcendentals,
            bytes_accessed=bytes_accessed,
        ),
    )(x, wqkv, wp_t, bp_row)


# ---------------------------------------------------------------------------
# Pure-JAX reference (mirrors the PyTorch module, dropout = identity)
# ---------------------------------------------------------------------------
def _reference_mha(x, wq_heads, wk_heads, wv_heads, wp, bp, causal=False):
    B, T, C = x.shape
    H = wq_heads.shape[0]
    scale = float(C) ** -0.5
    outs = []
    for h in range(H):
        q = x @ wq_heads[h].T
        k = x @ wk_heads[h].T
        v = x @ wv_heads[h].T
        s = jnp.einsum("btd,bsd->bts", q, k) * scale
        if causal:
            mask = jnp.tril(jnp.ones((T, T), dtype=bool))
            s = jnp.where(mask, s, -jnp.inf)
        p = jax.nn.softmax(s, axis=-1)
        outs.append(jnp.einsum("bts,bsd->btd", p, v))
    att = jnp.concatenate(outs, axis=-1)
    return att @ wp.T + bp


if __name__ == "__main__":
    # Module-implied shapes: n_embd=128, head_size=16 -> num_heads=8.
    B, T = 16, 16
    n_embd = 128
    num_heads = 8
    head_size = n_embd // num_heads   # 16

    key = jax.random.PRNGKey(0)
    kx, kq, kk, kv, kp, kb = jax.random.split(key, 6)

    x = jax.random.normal(kx, (B, T, n_embd), dtype=jnp.float32)

    # Torch-style parameter layouts (deterministic synthetic init).
    w_scale = (1.0 / n_embd) ** 0.5
    wq_heads = jax.random.normal(
        kq, (num_heads, head_size, n_embd), jnp.float32) * w_scale
    wk_heads = jax.random.normal(
        kk, (num_heads, head_size, n_embd), jnp.float32) * w_scale
    wv_heads = jax.random.normal(
        kv, (num_heads, head_size, n_embd), jnp.float32) * w_scale
    wp = jax.random.normal(kp, (n_embd, n_embd), jnp.float32) * w_scale
    bp = jax.random.normal(kb, (n_embd,), jnp.float32) * 0.01

    # --- f32 path, non-causal (module default: is_decoder=False) ---
    params = prepare_mha_params(wq_heads, wk_heads, wv_heads, wp, bp,
                                n_embd=n_embd)
    out = multi_head_attention(x, *params, num_heads=num_heads, causal=False)
    out = jax.block_until_ready(out)
    ref = _reference_mha(x, wq_heads, wk_heads, wv_heads, wp, bp, causal=False)
    assert out.shape == (B, T, n_embd), out.shape
    assert jnp.allclose(out, ref, atol=1e-3, rtol=1e-3), "mismatch (non-causal)"

    # --- f32 path, causal (is_decoder=True) ---
    out_c = multi_head_attention(x, *params, num_heads=num_heads, causal=True)
    out_c = jax.block_until_ready(out_c)
    ref_c = _reference_mha(x, wq_heads, wk_heads, wv_heads, wp, bp, causal=True)
    assert jnp.allclose(out_c, ref_c, atol=1e-3, rtol=1e-3), "mismatch (causal)"

    # --- bf16 MXU-operand path (v6e/v7x recommendation; f32 accumulation) ---
    params_bf16 = prepare_mha_params(wq_heads, wk_heads, wv_heads, wp, bp,
                                     n_embd=n_embd,
                                     compute_dtype=jnp.bfloat16)
    out_bf = multi_head_attention(x.astype(jnp.bfloat16), *params_bf16,
                                  num_heads=num_heads, causal=False)
    out_bf = jax.block_until_ready(out_bf)
    err = float(jnp.max(jnp.abs(out_bf.astype(jnp.float32) - ref)))
    assert err < 0.1, f"bf16 path deviates too much: {err}"

    print("KERNEL_OK")
</pallas_src>

<mosaic_0001>
module attributes {stable_mosaic.version = 11 : i64} {
  func.func @_mha_kernel(%arg0: i32, %arg1: memref<8x16x128xf32, #tpu.memory_space<vmem>>, %arg2: memref<128x384xf32, #tpu.memory_space<vmem>>, %arg3: memref<128x128xf32, #tpu.memory_space<vmem>>, %arg4: memref<1x128xf32, #tpu.memory_space<vmem>>, %arg5: memref<8x16x128xf32, #tpu.memory_space<vmem>>) attributes {dimension_semantics = [#tpu.dimension_semantics<parallel>], iteration_bounds = array<i64: 2>, scalar_prefetch = 0 : i64, scratch_operands = 0 : i64, tpu.core_type = #tpu.core_type<tc>, window_params = [{transform_indices = @transform_0, window_bounds = array<i64: 8, 16, 128>}, {pipeline_mode = #tpu.pipeline_mode<synchronous>, transform_indices = @transform_1, window_bounds = array<i64: 128, 384>}, {pipeline_mode = #tpu.pipeline_mode<synchronous>, transform_indices = @transform_2, window_bounds = array<i64: 128, 128>}, {pipeline_mode = #tpu.pipeline_mode<synchronous>, transform_indices = @transform_3, window_bounds = array<i64: 1, 128>}, {transform_indices = @transform_4, window_bounds = array<i64: 8, 16, 128>}]} {
    %c0 = arith.constant 0 : index
    %c0_0 = arith.constant 0 : index
    %c0_1 = arith.constant 0 : index
    %0 = vector.load %arg1[%c0, %c0_0, %c0_1] : memref<8x16x128xf32, #tpu.memory_space<vmem>>, vector<8x16x128xf32>
    %1 = vector.shape_cast %0 : vector<8x16x128xf32> to vector<128x128xf32>
    %c0_2 = arith.constant 0 : index
    %c0_3 = arith.constant 0 : index
    %2 = vector.load %arg2[%c0_2, %c0_3] : memref<128x384xf32, #tpu.memory_space<vmem>>, vector<128x384xf32>
    %cst = arith.constant dense<0.000000e+00> : vector<128x384xf32>
    %3 = tpu.matmul %1, %2, %cst {dimension_numbers = #tpu.dot_dimension_numbers<[1], [0], [0], [1], [0, 0, 1, 1], [], []>} : vector<128x128xf32>, vector<128x384xf32>, vector<128x384xf32> -> vector<128x384xf32>
    %4 = vector.extract_strided_slice %3 {offsets = [0, 0], sizes = [128, 128], strides = [1, 1]} : vector<128x384xf32> to vector<128x128xf32>
    %5 = vector.shape_cast %4 : vector<128x128xf32> to vector<8x16x128xf32>
    %6 = vector.extract_strided_slice %3 {offsets = [0, 128], sizes = [128, 128], strides = [1, 1]} : vector<128x384xf32> to vector<128x128xf32>
    %7 = vector.shape_cast %6 : vector<128x128xf32> to vector<8x16x128xf32>
    %8 = vector.extract_strided_slice %3 {offsets = [0, 256], sizes = [128, 128], strides = [1, 1]} : vector<128x384xf32> to vector<128x128xf32>
    %9 = vector.shape_cast %8 : vector<128x128xf32> to vector<8x16x128xf32>
    %10 = vector.extract_strided_slice %5 {offsets = [0, 0, 0], sizes = [8, 16, 16], strides = [1, 1, 1]} : vector<8x16x128xf32> to vector<8x16x16xf32>
    %11 = vector.extract_strided_slice %5 {offsets = [0, 0, 16], sizes = [8, 16, 16], strides = [1, 1, 1]} : vector<8x16x128xf32> to vector<8x16x16xf32>
    %12 = vector.extract_strided_slice %5 {offsets = [0, 0, 32], sizes = [8, 16, 16], strides = [1, 1, 1]} : vector<8x16x128xf32> to vector<8x16x16xf32>
    %13 = vector.extract_strided_slice %5 {offsets = [0, 0, 48], sizes = [8, 16, 16], strides = [1, 1, 1]} : vector<8x16x128xf32> to vector<8x16x16xf32>
    %14 = vector.extract_strided_slice %5 {offsets = [0, 0, 64], sizes = [8, 16, 16], strides = [1, 1, 1]} : vector<8x16x128xf32> to vector<8x16x16xf32>
    %15 = vector.extract_strided_slice %5 {offsets = [0, 0, 80], sizes = [8, 16, 16], strides = [1, 1, 1]} : vector<8x16x128xf32> to vector<8x16x16xf32>
    %16 = vector.extract_strided_slice %5 {offsets = [0, 0, 96], sizes = [8, 16, 16], strides = [1, 1, 1]} : vector<8x16x128xf32> to vector<8x16x16xf32>
    %17 = vector.extract_strided_slice %5 {offsets = [0, 0, 112], sizes = [8, 16, 16], strides = [1, 1, 1]} : vector<8x16x128xf32> to vector<8x16x16xf32>
    %18 = vector.shape_cast %10 : vector<8x16x16xf32> to vector<8x1x16x16xf32>
    %19 = vector.shape_cast %11 : vector<8x16x16xf32> to vector<8x1x16x16xf32>
    %20 = vector.shape_cast %12 : vector<8x16x16xf32> to vector<8x1x16x16xf32>
    %21 = vector.shape_cast %13 : vector<8x16x16xf32> to vector<8x1x16x16xf32>
    %22 = vector.shape_cast %14 : vector<8x16x16xf32> to vector<8x1x16x16xf32>
    %23 = vector.shape_cast %15 : vector<8x16x16xf32> to vector<8x1x16x16xf32>
    %24 = vector.shape_cast %16 : vector<8x16x16xf32> to vector<8x1x16x16xf32>
    %25 = vector.shape_cast %17 : vector<8x16x16xf32> to vector<8x1x16x16xf32>
    %26 = tpu.concatenate %18, %19, %20, %21, %22, %23, %24, %25 in 1 : vector<8x1x16x16xf32>, vector<8x1x16x16xf32>, vector<8x1x16x16xf32>, vector<8x1x16x16xf32>, vector<8x1x16x16xf32>, vector<8x1x16x16xf32>, vector<8x1x16x16xf32>, vector<8x1x16x16xf32> -> vector<8x8x16x16xf32>
    %27 = vector.shape_cast %26 : vector<8x8x16x16xf32> to vector<64x16x16xf32>
    %28 = vector.extract_strided_slice %7 {offsets = [0, 0, 0], sizes = [8, 16, 16], strides = [1, 1, 1]} : vector<8x16x128xf32> to vector<8x16x16xf32>
    %29 = vector.extract_strided_slice %7 {offsets = [0, 0, 16], sizes = [8, 16, 16], strides = [1, 1, 1]} : vector<8x16x128xf32> to vector<8x16x16xf32>
    %30 = vector.extract_strided_slice %7 {offsets = [0, 0, 32], sizes = [8, 16, 16], strides = [1, 1, 1]} : vector<8x16x128xf32> to vector<8x16x16xf32>
    %31 = vector.extract_strided_slice %7 {offsets = [0, 0, 48], sizes = [8, 16, 16], strides = [1, 1, 1]} : vector<8x16x128xf32> to vector<8x16x16xf32>
    %32 = vector.extract_strided_slice %7 {offsets = [0, 0, 64], sizes = [8, 16, 16], strides = [1, 1, 1]} : vector<8x16x128xf32> to vector<8x16x16xf32>
    %33 = vector.extract_strided_slice %7 {offsets = [0, 0, 80], sizes = [8, 16, 16], strides = [1, 1, 1]} : vector<8x16x128xf32> to vector<8x16x16xf32>
    %34 = vector.extract_strided_slice %7 {offsets = [0, 0, 96], sizes = [8, 16, 16], strides = [1, 1, 1]} : vector<8x16x128xf32> to vector<8x16x16xf32>
    %35 = vector.extract_strided_slice %7 {offsets = [0, 0, 112], sizes = [8, 16, 16], strides = [1, 1, 1]} : vector<8x16x128xf32> to vector<8x16x16xf32>
    %36 = vector.shape_cast %28 : vector<8x16x16xf32> to vector<8x1x16x16xf32>
    %37 = vector.shape_cast %29 : vector<8x16x16xf32> to vector<8x1x16x16xf32>
    %38 = vector.shape_cast %30 : vector<8x16x16xf32> to vector<8x1x16x16xf32>
    %39 = vector.shape_cast %31 : vector<8x16x16xf32> to vector<8x1x16x16xf32>
    %40 = vector.shape_cast %32 : vector<8x16x16xf32> to vector<8x1x16x16xf32>
    %41 = vector.shape_cast %33 : vector<8x16x16xf32> to vector<8x1x16x16xf32>
    %42 = vector.shape_cast %34 : vector<8x16x16xf32> to vector<8x1x16x16xf32>
    %43 = vector.shape_cast %35 : vector<8x16x16xf32> to vector<8x1x16x16xf32>
    %44 = tpu.concatenate %36, %37, %38, %39, %40, %41, %42, %43 in 1 : vector<8x1x16x16xf32>, vector<8x1x16x16xf32>, vector<8x1x16x16xf32>, vector<8x1x16x16xf32>, vector<8x1x16x16xf32>, vector<8x1x16x16xf32>, vector<8x1x16x16xf32>, vector<8x1x16x16xf32> -> vector<8x8x16x16xf32>
    %45 = vector.shape_cast %44 : vector<8x8x16x16xf32> to vector<64x16x16xf32>
    %46 = vector.extract_strided_slice %9 {offsets = [0, 0, 0], sizes = [8, 16, 16], strides = [1, 1, 1]} : vector<8x16x128xf32> to vector<8x16x16xf32>
    %47 = vector.extract_strided_slice %9 {offsets = [0, 0, 16], sizes = [8, 16, 16], strides = [1, 1, 1]} : vector<8x16x128xf32> to vector<8x16x16xf32>
    %48 = vector.extract_strided_slice %9 {offsets = [0, 0, 32], sizes = [8, 16, 16], strides = [1, 1, 1]} : vector<8x16x128xf32> to vector<8x16x16xf32>
    %49 = vector.extract_strided_slice %9 {offsets = [0, 0, 48], sizes = [8, 16, 16], strides = [1, 1, 1]} : vector<8x16x128xf32> to vector<8x16x16xf32>
    %50 = vector.extract_strided_slice %9 {offsets = [0, 0, 64], sizes = [8, 16, 16], strides = [1, 1, 1]} : vector<8x16x128xf32> to vector<8x16x16xf32>
    %51 = vector.extract_strided_slice %9 {offsets = [0, 0, 80], sizes = [8, 16, 16], strides = [1, 1, 1]} : vector<8x16x128xf32> to vector<8x16x16xf32>
    %52 = vector.extract_strided_slice %9 {offsets = [0, 0, 96], sizes = [8, 16, 16], strides = [1, 1, 1]} : vector<8x16x128xf32> to vector<8x16x16xf32>
    %53 = vector.extract_strided_slice %9 {offsets = [0, 0, 112], sizes = [8, 16, 16], strides = [1, 1, 1]} : vector<8x16x128xf32> to vector<8x16x16xf32>
    %54 = vector.shape_cast %46 : vector<8x16x16xf32> to vector<8x1x16x16xf32>
    %55 = vector.shape_cast %47 : vector<8x16x16xf32> to vector<8x1x16x16xf32>
    %56 = vector.shape_cast %48 : vector<8x16x16xf32> to vector<8x1x16x16xf32>
    %57 = vector.shape_cast %49 : vector<8x16x16xf32> to vector<8x1x16x16xf32>
    %58 = vector.shape_cast %50 : vector<8x16x16xf32> to vector<8x1x16x16xf32>
    %59 = vector.shape_cast %51 : vector<8x16x16xf32> to vector<8x1x16x16xf32>
    %60 = vector.shape_cast %52 : vector<8x16x16xf32> to vector<8x1x16x16xf32>
    %61 = vector.shape_cast %53 : vector<8x16x16xf32> to vector<8x1x16x16xf32>
    %62 = tpu.concatenate %54, %55, %56, %57, %58, %59, %60, %61 in 1 : vector<8x1x16x16xf32>, vector<8x1x16x16xf32>, vector<8x1x16x16xf32>, vector<8x1x16x16xf32>, vector<8x1x16x16xf32>, vector<8x1x16x16xf32>, vector<8x1x16x16xf32>, vector<8x1x16x16xf32> -> vector<8x8x16x16xf32>
    %63 = vector.shape_cast %62 : vector<8x8x16x16xf32> to vector<64x16x16xf32>
    "tpu.trace_start"() <{level = 10 : i32, message = "bqd,bkd->bqk"}> : () -> ()
    %cst_4 = arith.constant dense<0.000000e+00> : vector<64x16x16xf32>
    %64 = tpu.matmul %27, %45, %cst_4 {dimension_numbers = #tpu.dot_dimension_numbers<[2], [2], [1], [1], [0, 0, 0, 1, 1, 1], [0], [0]>} : vector<64x16x16xf32>, vector<64x16x16xf32>, vector<64x16x16xf32> -> vector<64x16x16xf32>
    "tpu.trace_stop"() : () -> ()
    %cst_5 = arith.constant dense<0xFF800000> : vector<64x16xf32>
    %65 = vector.multi_reduction <maximumf>, %64, %cst_5 [2] : vector<64x16x16xf32> to vector<64x16xf32>
    %cst_6 = arith.constant 0xFF800000 : f32
    %66 = vector.broadcast %cst_6 : f32 to vector<64x16xf32>
    %67 = arith.maximumf %66, %65 : vector<64x16xf32>
    %68 = vector.shape_cast %67 : vector<64x16xf32> to vector<64x16x1xf32>
    %69 = vector.broadcast %68 : vector<64x16x1xf32> to vector<64x16x16xf32>
    %70 = arith.subf %64, %69 : vector<64x16x16xf32>
    %71 = math.exp %70 : vector<64x16x16xf32>
    %cst_7 = arith.constant dense<0.000000e+00> : vector<64x16xf32>
    %72 = vector.multi_reduction <add>, %71, %cst_7 [2] : vector<64x16x16xf32> to vector<64x16xf32>
    %73 = vector.shape_cast %72 : vector<64x16xf32> to vector<64x16x1xf32>
    %74 = vector.broadcast %73 : vector<64x16x1xf32> to vector<64x16x16xf32>
    %75 = arith.divf %71, %74 : vector<64x16x16xf32>
    "tpu.trace_start"() <{level = 10 : i32, message = "bqk,bkd->bqd"}> : () -> ()
    %cst_8 = arith.constant dense<0.000000e+00> : vector<64x16x16xf32>
    %76 = tpu.matmul %75, %63, %cst_8 {dimension_numbers = #tpu.dot_dimension_numbers<[2], [1], [1], [2], [0, 0, 0, 1, 1, 2], [0], [0]>} : vector<64x16x16xf32>, vector<64x16x16xf32>, vector<64x16x16xf32> -> vector<64x16x16xf32>
    "tpu.trace_stop"() : () -> ()
    %77 = vector.shape_cast %76 : vector<64x16x16xf32> to vector<8x8x16x16xf32>
    %78 = vector.extract_strided_slice %77 {offsets = [0, 0, 0, 0], sizes = [8, 1, 16, 16], strides = [1, 1, 1, 1]} : vector<8x8x16x16xf32> to vector<8x1x16x16xf32>
    %79 = vector.shape_cast %78 : vector<8x1x16x16xf32> to vector<8x16x16xf32>
    %80 = vector.extract_strided_slice %77 {offsets = [0, 1, 0, 0], sizes = [8, 1, 16, 16], strides = [1, 1, 1, 1]} : vector<8x8x16x16xf32> to vector<8x1x16x16xf32>
    %81 = vector.shape_cast %80 : vector<8x1x16x16xf32> to vector<8x16x16xf32>
    %82 = vector.extract_strided_slice %77 {offsets = [0, 2, 0, 0], sizes = [8, 1, 16, 16], strides = [1, 1, 1, 1]} : vector<8x8x16x16xf32> to vector<8x1x16x16xf32>
    %83 = vector.shape_cast %82 : vector<8x1x16x16xf32> to vector<8x16x16xf32>
    %84 = vector.extract_strided_slice %77 {offsets = [0, 3, 0, 0], sizes = [8, 1, 16, 16], strides = [1, 1, 1, 1]} : vector<8x8x16x16xf32> to vector<8x1x16x16xf32>
    %85 = vector.shape_cast %84 : vector<8x1x16x16xf32> to vector<8x16x16xf32>
    %86 = vector.extract_strided_slice %77 {offsets = [0, 4, 0, 0], sizes = [8, 1, 16, 16], strides = [1, 1, 1, 1]} : vector<8x8x16x16xf32> to vector<8x1x16x16xf32>
    %87 = vector.shape_cast %86 : vector<8x1x16x16xf32> to vector<8x16x16xf32>
    %88 = vector.extract_strided_slice %77 {offsets = [0, 5, 0, 0], sizes = [8, 1, 16, 16], strides = [1, 1, 1, 1]} : vector<8x8x16x16xf32> to vector<8x1x16x16xf32>
    %89 = vector.shape_cast %88 : vector<8x1x16x16xf32> to vector<8x16x16xf32>
    %90 = vector.extract_strided_slice %77 {offsets = [0, 6, 0, 0], sizes = [8, 1, 16, 16], strides = [1, 1, 1, 1]} : vector<8x8x16x16xf32> to vector<8x1x16x16xf32>
    %91 = vector.shape_cast %90 : vector<8x1x16x16xf32> to vector<8x16x16xf32>
    %92 = vector.extract_strided_slice %77 {offsets = [0, 7, 0, 0], sizes = [8, 1, 16, 16], strides = [1, 1, 1, 1]} : vector<8x8x16x16xf32> to vector<8x1x16x16xf32>
    %93 = vector.shape_cast %92 : vector<8x1x16x16xf32> to vector<8x16x16xf32>
    %94 = tpu.concatenate %79, %81, %83, %85, %87, %89, %91, %93 in 2 : vector<8x16x16xf32>, vector<8x16x16xf32>, vector<8x16x16xf32>, vector<8x16x16xf32>, vector<8x16x16xf32>, vector<8x16x16xf32>, vector<8x16x16xf32>, vector<8x16x16xf32> -> vector<8x16x128xf32>
    %95 = vector.shape_cast %94 : vector<8x16x128xf32> to vector<128x128xf32>
    %c0_9 = arith.constant 0 : index
    %c0_10 = arith.constant 0 : index
    %96 = vector.load %arg3[%c0_9, %c0_10] : memref<128x128xf32, #tpu.memory_space<vmem>>, vector<128x128xf32>
    %cst_11 = arith.constant dense<0.000000e+00> : vector<128x128xf32>
    %97 = tpu.matmul %95, %96, %cst_11 {dimension_numbers = #tpu.dot_dimension_numbers<[1], [0], [0], [1], [0, 0, 1, 1], [], []>} : vector<128x128xf32>, vector<128x128xf32>, vector<128x128xf32> -> vector<128x128xf32>
    %c0_12 = arith.constant 0 : index
    %c0_13 = arith.constant 0 : index
    %98 = vector.load %arg4[%c0_12, %c0_13] : memref<1x128xf32, #tpu.memory_space<vmem>>, vector<1x128xf32>
    %99 = vector.broadcast %98 : vector<1x128xf32> to vector<128x128xf32>
    %100 = arith.addf %97, %99 : vector<128x128xf32>
    %101 = vector.shape_cast %100 : vector<128x128xf32> to vector<8x16x128xf32>
    %c0_14 = arith.constant 0 : index
    %c0_15 = arith.constant 0 : index
    %c0_16 = arith.constant 0 : index
    %102 = vector.load %arg5[%c0_14, %c0_15, %c0_16] : memref<8x16x128xf32, #tpu.memory_space<vmem>>, vector<8x16x128xf32>
    tpu.vector_store %arg5[%c0_14, %c0_15, %c0_16], %101 {strides = array<i32>} : memref<8x16x128xf32, #tpu.memory_space<vmem>>, vector<8x16x128xf32>,
    return
  }
  func.func @transform_0(%arg0: i32) -> (i32, i32, i32) {
    %c0_i32 = arith.constant 0 : i32
    %c0_i32_0 = arith.constant 0 : i32
    %c0_i32_1 = arith.constant 0 : i32
    return %arg0, %c0_i32, %c0_i32_0 : i32, i32, i32
  }
  func.func @transform_1(%arg0: i32) -> (i32, i32) {
    %c0_i32 = arith.constant 0 : i32
    %c0_i32_0 = arith.constant 0 : i32
    %c0_i32_1 = arith.constant 0 : i32
    return %c0_i32, %c0_i32_0 : i32, i32
  }
  func.func @transform_2(%arg0: i32) -> (i32, i32) {
    %c0_i32 = arith.constant 0 : i32
    %c0_i32_0 = arith.constant 0 : i32
    %c0_i32_1 = arith.constant 0 : i32
    return %c0_i32, %c0_i32_0 : i32, i32
  }
  func.func @transform_3(%arg0: i32) -> (i32, i32) {
    %c0_i32 = arith.constant 0 : i32
    %c0_i32_0 = arith.constant 0 : i32
    %c0_i32_1 = arith.constant 0 : i32
    return %c0_i32, %c0_i32_0 : i32, i32
  }
  func.func @transform_4(%arg0: i32) -> (i32, i32, i32) {
    %c0_i32 = arith.constant 0 : i32
    %c0_i32_0 = arith.constant 0 : i32
    %c0_i32_1 = arith.constant 0 : i32
    return %arg0, %c0_i32, %c0_i32_0 : i32, i32, i32
  }
}

</mosaic_0001>

<bundles_post_ra>
// kernel: tpu_custom_call.1
= control target key start
LH: loop header
LB: loop body
LE: loop exit
PB: predicated region body
PF: predicated region fallthrough
CT: control target
= control target key end

     0   :  { %9 = vsyncpa [#allocation3], 0  ;;  %s23041_s0 = inlined_call_operand.hbm [shape: f32[16,16,128], index: 0, kind: input, shape index: {}]   ;;  %s23042_s1 = inlined_call_operand.hbm [shape: f32[128,384], index: 1, kind: input, shape index: {}]   ;;  %s23043_s2 = inlined_call_operand.hbm [shape: f32[128,128], index: 2, kind: input, shape index: {}]   ;;  %s23044_s3 = inlined_call_operand.vmem [shape: f32[1,128], index: 3, kind: input, shape index: {}]   ;;  %s23045_s4 = inlined_call_operand.hbm [shape: f32[16,16,128], index: 4, kind: output, shape index: {}]  }
   0x1   :  { %11 = vsyncpa [#allocation3 + $0x1], 0 }
   0x2   :  { %12 = vsyncpa [#allocation6], 0 }
   0x3   :  { %13 = vsyncpa [#allocation4], 0 }
   0x4   :  { %15 = vsyncpa [#allocation4 + $0x1], 0  ;;  %s18591_s15 = smov 0   ;;  %s18593_s16 = smov 0  }
   0x5   :  { %s18595_s17 = smov 0   ;;  %s18597_s18 = smov 0  }
   0x6 LB: > { %s18612_s19 = sadd.s32 4294967295, %s18546_s18   ;;  %s14212_s20 = sadd.s32 4294967294, %s18546_s18   ;;  %s18546_s18 = sphi %s18597_s18, %s24145_s18   ;;  %s18542_s17 = sphi %s18595_s17, %s24144_s17   ;;  %s18538_s16 = sphi %s18593_s16, %s24143_s16   ;;  %s18534_s15 = sphi %s18591_s15, %s24142_s15  }
   0x7   : > { %p41_p0 = scmp.ne.s32.totalorder %s18538_s16, %s18534_s15  ;;  %p23046_p1 = scmp.eq.s32.totalorder %s18612_s19, 0 }
   0x8   : > { %p134_p3 = scmp.eq.s32.totalorder %s14212_s20, 1  ;;  %p14213_p5 = scmp.ge.s32.totalorder %s18546_s18, 1 }
   0x9   : > { %p18621_p4 = por %p23046_p1, %p41_p0  ;;  %p141_p7 = scmp.lt.s32.totalorder %s18546_s18, 3 }
   0xa   : > { %p18626_p6 = por %p134_p3, %p41_p0  ;;  %s18548_s24 = smov [#allocation5]  }
   0xb   : > { %s23355_s21 = scalar_select %p18621_p4, 1, 0 }
   0xc   : > { %s23356_s22 = scalar_select %p18626_p6, 1, 0 }
   0xd   : > { %p18631_p8 = pnand %p14213_p5, %p141_p7  ;;  %s153_s25 = sshll.u32 %s18548_s24, 4  ;;  %s18635_s25 = int_to_ptr.vmem [resolvable:$true] %s153_s25 }
   0xe   : > { %s18549_s27 = smov [#allocation7]   ;;  %s18390_s5 = scalar_lea.hbm %s23042_s1, 6144 }
   0xf   : > { %p16969_p9 = pneg %p18631_p8  ;;  %s166_s28 = sshll.u32 %s18549_s27, 4  ;;  %s18646_s28 = int_to_ptr.vmem [resolvable:$true] %s166_s28 }
  0x10   : > { %p18391_p12 = scmp.ne.s32.totalorder %s23042_s1, %s18390_s5  ;;  %p18397_p5 = scmp.lt.u32.totalorder %s18390_s5, %s23042_s1 }
  0x11   : > { %p18642_p11 = pnand %p16969_p9, %p23046_p1 }
  0x13   : > { %p18392_p13 = pneg %p18642_p11 }
  0x15   : > { %p18393_p0 = pnand %p18392_p13, %p18391_p12 }
  0x17   : > { %p18394_p3 = pneg %p18393_p0 }
  0x19   : > { %p18399_p7 = pnand %p18397_p5, %p18394_p3 }
  0x1b   : > { %18402 = shalt.err (!%p18399_p7)
}
  0x1c   : > { %s18403_s10 = scalar_lea.vmem %s18635_s25, 6144  ;;  %p18411_p2 = scmp.lt.s32.totalorder %s18635_s25, %s18635_s25 }
  0x1d   : > { %p18404_p9 = scmp.ne.s32.totalorder %s18635_s25, %s18403_s10  ;;  %p18412_p12 = scmp.lt.s32.totalorder %s18403_s10, %s18403_s10 }
  0x1f   : > { %p18406_p10 = pnand %p18404_p9, %p18392_p13  ;;  %p18413_p0 = por %p18412_p12, %p18411_p2 }
  0x21   : > { %p18407_p1 = pneg %p18406_p10 }
  0x23   : > { %p18414_p6 = pnand %p18413_p0, %p18407_p1 }
  0x25   : > { %18417 = shalt.err (!%p18414_p6)
}
  0x26   : > { %s18550_s11 = smov 384   ;;  %s18551_s12 = smov 24  }
  0x27   : > { %16972 = dma.hbm_to_vmem [thread:$0]  (!%p18642_p11), %s23042_s1, 6144, %s18635_s25, [#allocation6], %s18550_s11, %s18550_s11, %s18551_s12  }
  0x28   : > { %s18418_s27 = scalar_lea.hbm %s23043_s2, 2048 }
  0x29   : > { %p18419_p2 = scmp.ne.s32.totalorder %s23043_s2, %s18418_s27  ;;  %p18425_p10 = scmp.lt.u32.totalorder %s18418_s27, %s23043_s2 }
  0x2b   : > { %p18421_p1 = pnand %p18419_p2, %p18392_p13 }
  0x2d   : > { %p18422_p6 = pneg %p18421_p1 }
  0x2f   : > { %p18427_p3 = pnand %p18425_p10, %p18422_p6 }
  0x31   : > { %18430 = shalt.err (!%p18427_p3)
}
  0x32   : > { %s18431_s25 = scalar_lea.vmem %s18646_s28, 2048  ;;  %p18439_p12 = scmp.lt.s32.totalorder %s18646_s28, %s18646_s28 }
  0x33   : > { %p18432_p5 = scmp.ne.s32.totalorder %s18646_s28, %s18431_s25  ;;  %p18440_p0 = scmp.lt.s32.totalorder %s18431_s25, %s18431_s25 }
  0x35   : > { %p18434_p7 = pnand %p18432_p5, %p18392_p13  ;;  %p18441_p2 = por %p18440_p0, %p18439_p12 }
  0x37   : > { %p18435_p9 = pneg %p18434_p7 }
  0x39   : > { %p18442_p1 = pnand %p18441_p2, %p18435_p9 }
  0x3b   : > { %18445 = shalt.err (!%p18442_p1)
}
  0x3c   : > { %s18552_s7 = smov 128   ;;  %s18553_s8 = smov 8  }
  0x3d   : > { %16975 = dma.hbm_to_vmem [thread:$0]  (!%p18642_p11), %s23043_s2, 2048, %s18646_s28, [#allocation6], %s18552_s7, %s18552_s7, %s18553_s8  }
  0x3e   : > { %s18704_s11 = sadd.s32 1, %s18546_s18   ;;  %s28_s13 = sadd.s32 1, %s18542_s17 }
  0x3f   : > { %s25_s12 = ssub.s32 %s18546_s18, %s18704_s11  ;;  %p35_p6 = scmp.ne.s32.totalorder %s18542_s17, %s18538_s16 }
  0x40   : > { %p26_p13 = scmp.eq.s32.totalorder %s25_s12, 0  ;;  %p36_p10 = scmp.eq.s32.totalorder %s18546_s18, 0 }
  0x41   : > { %p23359_p5 = scmp.eq.s32.totalorder %s18612_s19, 1  ;;  %p16986_p9 = scmp.lt.s32.totalorder %s18546_s18, 2 }
  0x42   : > { %s18713_s14 = scalar_select %p26_p13, %s18542_s17, %s28_s13  }
  0x43   : > { %p37_p3 = por %p36_p10, %p35_p6  ;;  %p18717_p7 = por %p23359_p5, %p35_p6 }
  0x44   : > { %s183_s20 = sand.u32 1, %s18542_s17   ;;  %s14618_s28 = sshll.u32 %s18546_s18, 11 }
  0x45   : > { %s23360_s26 = scalar_select %p18717_p7, 1, 0 }
  0x46   : > { %s14217_s24 = sshll.u32 %s183_s20, 7  ;;  %s18727_s30 = scalar_lea.hbm %s23041_s0, %s14618_s28 }
  0x47   : > { %s187_s5 = scalar_lea.vmem [#allocation2], %s14217_s24  ;;  %p18731_p11 = pnand %p16986_p9, %p37_p3 }
  0x48   : > { %s195_s6 = sshll.u32 %s187_s5, 4  ;;  %s18735_s9 = scalar_lea.sflag [#allocation3], %s183_s20  ;;  %s18729_s6 = int_to_ptr.vmem [resolvable:$true] %s195_s6 }
  0x49   : > { %s18446_s10 = scalar_lea.hbm %s18727_s30, 2048  ;;  %p18448_p0 = pneg %p18731_p11 }
  0x4a   : > { %p18447_p12 = scmp.ne.s32.totalorder %s18727_s30, %s18446_s10  ;;  %s18451_s24 = scalar_lea.hbm %s23041_s0, 4096 }
  0x4b   : > { %p18452_p13 = scmp.lt.u32.totalorder %s18727_s30, %s23041_s0  ;;  %p18453_p6 = scmp.lt.u32.totalorder %s18451_s24, %s18446_s10 }
  0x4c   : > { %p18449_p2 = pnand %p18448_p0, %p18447_p12  ;;  %p18455_p3 = scmp.lt.u32.totalorder %s18446_s10, %s18727_s30 }
  0x4d   : > { %p18454_p10 = por %p18453_p6, %p18452_p13 }
  0x4e   : > { %p18450_p1 = pneg %p18449_p2 }
  0x4f   : > { %p18456_p5 = por %p18455_p3, %p18454_p10 }
  0x51   : > { %p18457_p9 = pnand %p18456_p5, %p18450_p1 }
  0x53   : > { %18460 = shalt.err (!%p18457_p9)
}
  0x54   : > { %s18461_s20 = scalar_lea.vmem %s18729_s6, 2048  ;;  %s18554_s29 = smov [#allocation2]  }
  0x55   : > { %p18462_p12 = scmp.ne.s32.totalorder %s18729_s6, %s18461_s20  ;;  %s18466_s5 = sshll.u32 %s18554_s29, 4  ;;  %s18467_s5 = int_to_ptr.vmem [resolvable:$false] %s18466_s5 }
  0x56   : > { %s18468_s12 = scalar_lea.vmem %s18467_s5, 4096  ;;  %p18469_p4 = scmp.lt.s32.totalorder %s18729_s6, %s18467_s5 }
  0x57   : > { %p18464_p2 = pnand %p18462_p12, %p18448_p0  ;;  %p18470_p13 = scmp.lt.s32.totalorder %s18468_s12, %s18461_s20 }
  0x59   : > { %p18465_p7 = pneg %p18464_p2  ;;  %p18471_p6 = por %p18470_p13, %p18469_p4 }
  0x5b   : > { %p18472_p10 = pnand %p18471_p6, %p18465_p7 }
  0x5d   : > { %18475 = shalt.err (!%p18472_p10)
}
  0x5e   : > { %16979 = dma.hbm_to_vmem [thread:$0]  (!%p18731_p11), %s18727_s30, 2048, %s18729_s6, %s18735_s9, %s18552_s7, %s18552_s7, %s18553_s8  }
  0x5f   : > { %207 = sbr.rel (%p18631_p8) target bundleno = 2312 (0x908), region = 36 }
  0x66   : > { %s18769_s10 = sand.u32 1, %s18538_s16   ;;  %p23362_p4 = scmp.ne.s32.totalorder %s23355_s21, 0 }
  0x67   : > { %s14222_s13 = sshll.u32 %s18769_s10, 7  ;;  %s210_s24 = scalar_lea.sflag [#allocation3], %s18769_s10 }
  0x68   : > { %s18775_s25 = scalar_lea.vmem [#allocation2], %s14222_s13 }
  0x69   : > { %18521 = dma.done.wait (%p23362_p4), %s210_s24, 2048  }
  0x6a   : > { %18523 = vsyncadd (%p23362_p4), %s210_s24, 4294965248  ;;  %p23363_p7 = scmp.eq.s32.totalorder %s18612_s19, 0 }
  0x6c   : > { %18525 = dma.done.wait (%p23363_p7), [#allocation6], 8192   ;;  %p23364_p8 = pmov %p23363_p7 }
  0x6d   : > { %v18555_v0 = vmov 0.0   ;;  %v265_v1 = vld [vmem:[#allocation5 + $0x8] sm:$0xff]  ;;  %v268_v2 = vld [vmem:[#allocation5 + $0x20] sm:$0xff]  ;;  %v267_v5 = vld [vmem:[#allocation5 + $0x18] sm:$0xff]  ;;  %vm1450_vm0 = vcmask 130048   ;;  %s18556_s21 = smov 112  }
  0x6e   : > { %18527 = vsyncadd (%p23364_p8), [#allocation6], 4294959104  ;;  %376 = vmatprep.mubr.f32.mxu0 %v18555_v0  ;;  %v264_v3 = vld [vmem:[#allocation5] sm:$0xff]  ;;  %v16205_v4 = vpack.c.bf16 %v268_v2, %v265_v1  ;;  %v271_v6 = vld [vmem:[#allocation5 + $0x38] sm:$0xff]  ;;  %s18557_s23 = smov 96   ;;  %s18558_s7 = smov 80  }
  0x6f   : > { %v274_v7 = vld [vmem:[#allocation5 + $0x50] sm:$0xff]  ;;  %v16207_v8 = vpack.c.bf16 %v267_v5, %v264_v3  ;;  %v273_v11 = vld [vmem:[#allocation5 + $0x48] sm:$0xff]  ;;  %v280_v13 = vld [vmem:[#allocation5 + $0x80] sm:$0xff]  ;;  %s18559_s8 = smov 64   ;;  %s18560_s30 = smov 48   ;;  %vm13819_vm2 = vcmask 261120  }
  0x70   : > { %v16209_v9 = vpack.c.bf16 %v274_v7, %v271_v6  ;;  %v270_v10 = vld [vmem:[#allocation5 + $0x30] sm:$0xff]  ;;  %v277_v12 = vld [vmem:[#allocation5 + $0x68] sm:$0xff]  ;;  %16206 = vmatprep.subr.bf16.mxu0 %v16205_v4  ;;  %v276_v16 = vld [vmem:[#allocation5 + $0x60] sm:$0xff]  ;;  %s18561_s6 = smov 32   ;;  %s18562_s9 = smov 16   ;;  %vm13836_vm3 = vcmask 392192  }
  0x71   : > { %16208 = vmatpush1.bf16.msra.mxu0 %v16207_v8  ;;  %v16211_v14 = vpack.c.bf16 %v273_v11, %v270_v10  ;;  %v16213_v15 = vpack.c.bf16 %v280_v13, %v277_v12  ;;  %v279_v17 = vld [vmem:[#allocation5 + $0x78] sm:$0xff]  ;;  %v286_v19 = vld [vmem:[#allocation5 + $0xb0] sm:$0xff]  ;;  %v285_v23 = vld [vmem:[#allocation5 + $0xa8] sm:$0xff]  ;;  %vm13853_vm4 = vcmask 523264   ;;  %vm13870_vm5 = vcmask 654336   ;;  %s22972_s20 = scalar_lea.vmem [#allocation8], %s14222_s13 }
  0x72   : > { %16210 = vmatprep.subr.bf16.mxu0 %v16209_v9  ;;  %v283_v18 = vld [vmem:[#allocation5 + $0x98] sm:$0xff]  ;;  %v16215_v20 = vpack.c.bf16 %v279_v17, %v276_v16  ;;  %v282_v22 = vld [vmem:[#allocation5 + $0x90] sm:$0xff]  ;;  %v289_v24 = vld [vmem:[#allocation5 + $0xc8] sm:$0xff]  ;;  %vm13887_vm6 = vcmask 785408   ;;  %vm13904_vm7 = vcmask 916480   ;;  %s14620_s29 = sshll.u32 %s18612_s19, 11 }
  0x73   : > { %v16217_v21 = vpack.c.bf16 %v286_v19, %v283_v18  ;;  %v292_v25 = vld [vmem:[#allocation5 + $0xe0] sm:$0xff]  ;;  %v16219_v27 = vpack.c.bf16 %v285_v23, %v282_v22  ;;  %v291_v29 = vld [vmem:[#allocation5 + $0xd8] sm:$0xff]  ;;  %v266_v32 = vld [vmem:[#allocation5 + $0x10] sm:$0xff]  ;;  %s14120_s5 = sshll.u32 %s22972_s20, 4  ;;  %s22991_s24 = scalar_lea.hbm %s23045_s4, %s14620_s29  ;;  %s22993_s5 = int_to_ptr.vmem [resolvable:$true] %s14120_s5 }
  0x74   : > { %v18787_v26 = vld [vmem:[%s18775_s25] sm:$0xff]  ;;  %v16221_v30 = vpack.c.bf16 %v292_v25, %v289_v24  ;;  %v295_v31 = vld [vmem:[#allocation5 + $0xf8] sm:$0xff]  ;;  %v269_v33 = vld [vmem:[#allocation5 + $0x28] sm:$0xff]  ;;  %s14106_s19 = scalar_lea.sflag [#allocation4], %s18769_s10  ;;  %p24139_p0 = scmp.ne.s32.totalorder %s23360_s26, 0 }
  0x75   : > { %16212 = vmatpush1.bf16.msra.mxu0 %v16211_v14  ;;  %15229 = vmatprep.mubr.f32.mxu1 %v18787_v26  ;;  %v288_v28 = vld [vmem:[#allocation5 + $0xc0] sm:$0xff]  ;;  %v298_v34 = vld [vmem:[#allocation5 + $0x110] sm:$0xff]  ;;  %v16237_v35 = vpack.c.bf16 %v269_v33, %v266_v32  ;;  %v275_v37 = vld [vmem:[#allocation5 + $0x58] sm:$0xff] }
  0x76   : > { %16214 = vmatprep.subr.bf16.mxu0 %v16213_v15  ;;  %v272_v36 = vld [vmem:[#allocation5 + $0x40] sm:$0xff]  ;;  %v278_v39 = vld [vmem:[#allocation5 + $0x70] sm:$0xff]  ;;  %v281_v40 = vld [vmem:[#allocation5 + $0x88] sm:$0xff]  ;;  %v16223_v41 = vpack.c.bf16 %v291_v29, %v288_v28  ;;  %v16225_v42 = vpack.c.bf16 %v298_v34, %v295_v31 }
  0x77   : > { %v16241_v38 = vpack.c.bf16 %v275_v37, %v272_v36  ;;  %16238 = vmatprep.subr.bf16.mxu1 %v16237_v35  ;;  %v294_v43 = vld [vmem:[#allocation5 + $0xf0] sm:$0xff]  ;;  %v297_v44 = vld [vmem:[#allocation5 + $0x108] sm:$0xff]  ;;  %v304_v46 = vld [vmem:[#allocation5 + $0x140] sm:$0xff]  ;;  %v16245_v47 = vpack.c.bf16 %v281_v40, %v278_v39 }
  0x78   : > { %16240 = vmatpush3.bf16.msra.mxu1 %v16237_v35  ;;  %v301_v45 = vld [vmem:[#allocation5 + $0x128] sm:$0xff]  ;;  %v284_v48 = vld [vmem:[#allocation5 + $0xa0] sm:$0xff]  ;;  %v287_v49 = vld [vmem:[#allocation5 + $0xb8] sm:$0xff]  ;;  %v16227_v50 = vpack.c.bf16 %v297_v44, %v294_v43 }
  0x79   : > { %16216 = vmatpush1.bf16.msra.mxu0 %v16215_v20  ;;  %16242 = vmatprep.subr.bf16.mxu1 %v16241_v38  ;;  %v16229_v51 = vpack.c.bf16 %v304_v46, %v301_v45  ;;  %v300_v52 = vld [vmem:[#allocation5 + $0x120] sm:$0xff]  ;;  %v303_v53 = vld [vmem:[#allocation5 + $0x138] sm:$0xff]  ;;  %v310_v55 = vld [vmem:[#allocation5 + $0x170] sm:$0xff]  ;;  %v16249_v56 = vpack.c.bf16 %v287_v49, %v284_v48 }
  0x7a   : > { %16218 = vmatprep.subr.bf16.mxu0 %v16217_v21  ;;  %v307_v54 = vld [vmem:[#allocation5 + $0x158] sm:$0xff]  ;;  %v290_v57 = vld [vmem:[#allocation5 + $0xd0] sm:$0xff]  ;;  %v293_v58 = vld [vmem:[#allocation5 + $0xe8] sm:$0xff]  ;;  %v16231_v59 = vpack.c.bf16 %v303_v53, %v300_v52 }
  0x7b   : > { %v16233_v60 = vpack.c.bf16 %v310_v55, %v307_v54  ;;  %v306_v61 = vld [vmem:[#allocation5 + $0x150] sm:$0xff]  ;;  %v309_v62 = vld [vmem:[#allocation5 + $0x168] sm:$0xff]  ;;  %v16253_v63 = vpack.c.bf16 %v293_v58, %v290_v57  ;;  %v296_v1 = vld [vmem:[#allocation5 + $0x100] sm:$0xff] }
  0x7c   : > { %16244 = vmatpush3.bf16.msra.mxu1 %v16241_v38  ;;  %v299_v2 = vld [vmem:[#allocation5 + $0x118] sm:$0xff]  ;;  %v16235_v3 = vpack.c.bf16 %v309_v62, %v306_v61  ;;  %v302_v5 = vld [vmem:[#allocation5 + $0x130] sm:$0xff]  ;;  %v305_v6 = vld [vmem:[#allocation5 + $0x148] sm:$0xff] }
  0x7d   : > { %16220 = vmatpush1.bf16.msra.mxu0 %v16219_v27  ;;  %16246 = vmatprep.subr.bf16.mxu1 %v16245_v47  ;;  %v16257_v4 = vpack.c.bf16 %v299_v2, %v296_v1  ;;  %v16261_v7 = vpack.c.bf16 %v305_v6, %v302_v5  ;;  %v308_v8 = vld [vmem:[#allocation5 + $0x160] sm:$0xff]  ;;  %v311_v9 = vld [vmem:[#allocation5 + $0x178] sm:$0xff]  ;;  %v249_v10 = vld [vmem:[%s18775_s25 + $0x8] sm:$0xff] }
  0x7e   : > { %16222 = vmatprep.subr.bf16.mxu0 %v16221_v30  ;;  %v16265_v11 = vpack.c.bf16 %v311_v9, %v308_v8  ;;  %v250_v12 = vld [vmem:[%s18775_s25 + $0x10] sm:$0xff]  ;;  %v251_v13 = vld [vmem:[%s18775_s25 + $0x18] sm:$0xff]  ;;  %v252_v14 = vld [vmem:[%s18775_s25 + $0x20] sm:$0xff] }
  0x7f   : > { %v253_v15 = vld [vmem:[%s18775_s25 + $0x28] sm:$0xff]  ;;  %v254_v16 = vld [vmem:[%s18775_s25 + $0x30] sm:$0xff]  ;;  %v255_v17 = vld [vmem:[%s18775_s25 + $0x38] sm:$0xff] }
  0x80   : > { %16248 = vmatpush3.bf16.msra.mxu1 %v16245_v47  ;;  %v256_v18 = vld [vmem:[%s18775_s25 + $0x40] sm:$0xff]  ;;  %v257_v19 = vld [vmem:[%s18775_s25 + $0x48] sm:$0xff]  ;;  %v258_v20 = vld [vmem:[%s18775_s25 + $0x50] sm:$0xff] }
  0x81   : > { %16224 = vmatpush1.bf16.msra.mxu0 %v16223_v41  ;;  %16250 = vmatprep.subr.bf16.mxu1 %v16249_v56  ;;  %v259_v21 = vld [vmem:[%s18775_s25 + $0x58] sm:$0xff]  ;;  %v260_v22 = vld [vmem:[%s18775_s25 + $0x60] sm:$0xff]  ;;  %v261_v23 = vld [vmem:[%s18775_s25 + $0x68] sm:$0xff] }
  0x82   : > { %16226 = vmatprep.subr.bf16.mxu0 %v16225_v42  ;;  %v262_v24 = vld [vmem:[%s18775_s25 + $0x70] sm:$0xff]  ;;  %v263_v25 = vld [vmem:[%s18775_s25 + $0x78] sm:$0xff]  ;;  %vm18827_vm1 = vmpackc.low %vm1450_vm0, %vm1450_vm0  ;;  %s18476_s25 = scalar_lea.vmem %s22993_s5, 2048 }
  0x83   : > { %p18477_p11 = scmp.ne.s32.totalorder %s22993_s5, %s18476_s25 }
  0x84   : > { %16252 = vmatpush3.bf16.msra.mxu1 %v16249_v56 }
  0x85   : > { %16228 = vmatpush1.bf16.msra.mxu0 %v16227_v50  ;;  %16254 = vmatprep.subr.bf16.mxu1 %v16253_v63  ;;  %p18478_p1 = pnand %p18477_p11, %p24139_p0 }
  0x86   : > { %16230 = vmatprep.subr.bf16.mxu0 %v16229_v51 }
  0x87   : > { %p18479_p3 = pneg %p18478_p1 }
  0x88   : > { %16256 = vmatpush3.bf16.msra.mxu1 %v16253_v63 }
  0x89   : > { %16232 = vmatpush1.bf16.msra.mxu0 %v16231_v59  ;;  %16258 = vmatprep.subr.bf16.mxu1 %v16257_v4 }
  0x8a   : > { %16234 = vmatprep.subr.bf16.mxu0 %v16233_v60 }
  0x8c   : > { %16260 = vmatpush3.bf16.msra.mxu1 %v16257_v4 }
  0x8d   : > { %16236 = vmatpush1.bf16.msra.mxu0 %v16235_v3  ;;  %16262 = vmatprep.subr.bf16.mxu1 %v16261_v7 }
  0x90   : > { %377 = vmatmul.mubr.f32.vlgmr.msra.gmra.mrb[0].mxu0 %v18787_v26  ;;  %16264 = vmatpush3.bf16.msra.mxu1 %v16261_v7 }
  0x91   : > { %382 = vmatprep.mubr.f32.mxu0 %v18555_v0  ;;  %16266 = vmatprep.subr.bf16.mxu1 %v16265_v11 }
  0x94   : > { %383 = vmatmul.mubr.f32.gmra.mrb[2].mxu0 %v249_v10  ;;  %16268 = vmatpush3.bf16.msra.mxu1 %v16265_v11 }
  0x95   : > { %388 = vmatprep.mubr.f32.mxu0 %v18555_v0 }
  0x97   : > { %15230 = vmatmul.mubr.f32.vlgmr.msra.gmra.mrb[0].mxu1 %v249_v10 }
  0x98   : > { %389 = vmatmul.mubr.f32.gmra.mrb[4].mxu0 %v250_v12  ;;  %15232 = vmatprep.mubr.f32.mxu1 %v250_v12 }
  0x99   : > { %394 = vmatprep.mubr.f32.mxu0 %v18555_v0 }
  0x9b   : > { %15233 = vmatmul.mubr.f32.gmra.mrb[2].mxu1 %v251_v13 }
  0x9c   : > { %395 = vmatmul.mubr.f32.gmra.mrb[6].mxu0 %v251_v13  ;;  %15235 = vmatprep.mubr.f32.mxu1 %v252_v14 }
  0x9d   : > { %400 = vmatprep.mubr.f32.mxu0 %v18555_v0 }
  0x9f   : > { %15236 = vmatmul.mubr.f32.gmra.mrb[4].mxu1 %v253_v15 }
  0xa0   : > { %401 = vmatmul.mubr.f32.gmra.mrb[8].mxu0 %v252_v14  ;;  %15238 = vmatprep.mubr.f32.mxu1 %v254_v16 }
  0xa1   : > { %406 = vmatprep.mubr.f32.mxu0 %v18555_v0 }
  0xa3   : > { %15239 = vmatmul.mubr.f32.gmra.mrb[6].mxu1 %v255_v17 }
  0xa4   : > { %407 = vmatmul.mubr.f32.gmra.mrb[10].mxu0 %v253_v15  ;;  %15241 = vmatprep.mubr.f32.mxu1 %v256_v18 }
  0xa5   : > { %412 = vmatprep.mubr.f32.mxu0 %v18555_v0 }
  0xa7   : > { %15242 = vmatmul.mubr.f32.gmra.mrb[8].mxu1 %v257_v19 }
  0xa8   : > { %413 = vmatmul.mubr.f32.gmra.mrb[12].mxu0 %v254_v16  ;;  %15244 = vmatprep.mubr.f32.mxu1 %v258_v20 }
  0xa9   : > { %418 = vmatprep.mubr.f32.mxu0 %v18555_v0 }
  0xab   : > { %15245 = vmatmul.mubr.f32.gmra.mrb[10].mxu1 %v259_v21 }
  0xac   : > { %419 = vmatmul.mubr.f32.gmra.mrb[14].mxu0 %v255_v17  ;;  %15247 = vmatprep.mubr.f32.mxu1 %v260_v22 }
  0xad   : > { %424 = vmatprep.mubr.f32.mxu0 %v18555_v0 }
  0xaf   : > { %15248 = vmatmul.mubr.f32.gmra.mrb[12].mxu1 %v261_v23 }
  0xb0   : > { %425 = vmatmul.mubr.f32.gmra.mrb[16].mxu0 %v256_v18  ;;  %15250 = vmatprep.mubr.f32.mxu1 %v262_v24 }
  0xb1   : > { %430 = vmatprep.mubr.f32.mxu0 %v18555_v0 }
  0xb3   : > { %15251 = vmatmul.mubr.f32.gmra.mrb[14].mxu1 %v263_v25 }
  0xb4   : > { %431 = vmatmul.mubr.f32.gmra.mrb[18].mxu0 %v257_v19 }
  0xb5   : > { %436 = vmatprep.mubr.f32.mxu0 %v18555_v0 }
  0xb8   : > { %437 = vmatmul.mubr.f32.gmra.mrb[20].mxu0 %v258_v20 }
  0xb9   : > { %442 = vmatprep.mubr.f32.mxu0 %v18555_v0 }
  0xbc   : > { %443 = vmatmul.mubr.f32.gmra.mrb[22].mxu0 %v259_v21 }
  0xbd   : > { %448 = vmatprep.mubr.f32.mxu0 %v18555_v0 }
  0xc0   : > { %449 = vmatmul.mubr.f32.gmra.mrb[24].mxu0 %v260_v22 }
  0xc1   : > { %454 = vmatprep.mubr.f32.mxu0 %v18555_v0 }
  0xc4   : > { %455 = vmatmul.mubr.f32.gmra.mrb[26].mxu0 %v261_v23 }
  0xc5   : > { %460 = vmatprep.mubr.f32.mxu0 %v18555_v0 }
  0xc8   : > { %461 = vmatmul.mubr.f32.gmra.mrb[28].mxu0 %v262_v24 }
  0xc9   : > { %466 = vmatprep.mubr.f32.mxu0 %v18555_v0 }
  0xcc   : > { %467 = vmatmul.mubr.f32.gmra.mrb[30].mxu0 %v263_v25 }
 0x163   : > { %v378_v26 = vpop.f32.mrb[0].mxu0 }
 0x164   : > { %634 = vrot.lane.b32.xlu0 %v378_v26, %s18556_s21  ;;  %v380_v27 = vpop.f32.mrb[1].mxu0  ;;  %15257 = vmatprep.mubr.msk.f32.mxu1 %vm1450_vm0, %v378_v26 }
 0x167   : > { %v384_v28 = vpop.f32.mrb[2].mxu0 }
 0x168   : > { %666 = vrot.lane.b32.xlu0 %v378_v26, %s18557_s23  ;;  %668 = vrot.lane.b32.xlu1 %v384_v28, %s18557_s23  ;;  %v386_v29 = vpop.f32.mrb[3].mxu0 }
 0x169   : > { %v16269_v30 = vpack.c.bf16 %v386_v29, %v380_v27  ;;  %v17058_v31 = vpack.i.bf16 %v386_v29, %v380_v27 }
 0x16a   : > { %v18934_v62 = vpop.f32.mrb[0].mxu1 }
 0x16b   : > { %16271 = vmatprep.subr.msk.bf16.mxu1 %vm18827_vm1, %v16269_v30  ;;  %v18833_v32 = vpop.f32.mrb[4].mxu0  ;;  %v18936_v63 = vpop.f32.mrb[1].mxu1 }
 0x16c   : > { %698 = vrot.lane.b32.xlu0 %v378_v26, %s18558_s7  ;;  %700 = vrot.lane.b32.xlu1 %v384_v28, %s18558_s7  ;;  %v392_v33 = vpop.f32.mrb[5].mxu0 }
 0x16d   : > { %16274 = vmatpush3.bf16.xpose.msk.msra.mxu1 %vm18827_vm1, %v16269_v30 }
 0x16e   : > { %v18940_v1 = vpop.f32.mrb[2].mxu1 }
 0x16f   : > { %v18839_v34 = vpop.f32.mrb[6].mxu0  ;;  %v18944_v2 = vpop.f32.mrb[3].mxu1 }
 0x170   : > { %730 = vrot.lane.b32.xlu0 %v378_v26, %s18559_s8  ;;  %732 = vrot.lane.b32.xlu1 %v384_v28, %s18559_s8  ;;  %v398_v35 = vpop.f32.mrb[7].mxu0 }
 0x171   : > { %v18843_v36 = vpack.i.bf16 %v398_v35, %v392_v33  ;;  %v18845_v37 = vpack.c.bf16 %v398_v35, %v392_v33 }
 0x172   : > { %v18946_v3 = vpop.f32.mrb[4].mxu1 }
 0x173   : > { %v18847_v38 = vpop.f32.mrb[8].mxu0  ;;  %v18948_v4 = vpop.f32.mrb[5].mxu1 }
 0x174   : > { %15258 = vmatmul.mubr.msk.f32.vlgmr.msra.gmra.mrb[16].mxu1 %vm1450_vm0, %v384_v28  ;;  %762 = vrot.lane.b32.xlu0 %v378_v26, %s18560_s30  ;;  %v404_v39 = vpop.f32.mrb[9].mxu0 }
 0x175   : > { %764 = vrot.lane.b32.xlu1 %v384_v28, %s18560_s30 }
 0x176   : > { %v18952_v5 = vpop.f32.mrb[6].mxu1 }
 0x177   : > { %v18852_v40 = vpop.f32.mrb[10].mxu0  ;;  %v18956_v6 = vpop.f32.mrb[7].mxu1 }
 0x178   : > { %794 = vrot.lane.b32.xlu0 %v378_v26, %s18561_s6  ;;  %v410_v41 = vpop.f32.mrb[11].mxu0 }
 0x179   : > { %796 = vrot.lane.b32.xlu1 %v384_v28, %s18561_s6  ;;  %v18856_v42 = vpack.i.bf16 %v410_v41, %v404_v39  ;;  %v18858_v43 = vpack.c.bf16 %v410_v41, %v404_v39 }
 0x17a   : > { %v18958_v7 = vpop.f32.mrb[8].mxu1 }
 0x17b   : > { %v18860_v44 = vpop.f32.mrb[12].mxu0  ;;  %v18960_v8 = vpop.f32.mrb[9].mxu1 }
 0x17c   : > { %826 = vrot.lane.b32.xlu0 %v378_v26, %s18562_s9  ;;  %v416_v45 = vpop.f32.mrb[13].mxu0 }
 0x17d   : > { %828 = vrot.lane.b32.xlu1 %v384_v28, %s18562_s9 }
 0x17e   : > { %v18964_v9 = vpop.f32.mrb[10].mxu1 }
 0x17f   : > { %v18864_v46 = vpop.f32.mrb[14].mxu0  ;;  %v18968_v10 = vpop.f32.mrb[11].mxu1 }
 0x180   : > { %636 = vrot.lane.b32.xlu0 %v384_v28, %s18556_s21  ;;  %v422_v47 = vpop.f32.mrb[15].mxu0 }
 0x181   : > { %17059 = vrot.lane.b32.xlu1 %v17058_v31, %s18560_s30  ;;  %v18868_v48 = vpack.i.bf16 %v422_v47, %v416_v45  ;;  %v18870_v49 = vpack.c.bf16 %v422_v47, %v416_v45 }
 0x182   : > { %v18970_v11 = vpop.f32.mrb[12].mxu1 }
 0x183   : > { %v18872_v50 = vpop.f32.mrb[16].mxu0  ;;  %v18972_v12 = vpop.f32.mrb[13].mxu1 }
 0x184   : > { %17039 = vrot.lane.b32.xlu0 %v17058_v31, %s18556_s21  ;;  %v428_v51 = vpop.f32.mrb[17].mxu0 }
 0x185   : > { %17069 = vrot.lane.b32.xlu1 %v17058_v31, %s18562_s9 }
 0x186   : > { %v18976_v13 = vpop.f32.mrb[14].mxu1 }
 0x187   : > { %v18876_v52 = vpop.f32.mrb[18].mxu0  ;;  %v18980_v14 = vpop.f32.mrb[15].mxu1 }
 0x188   : > { %17044 = vrot.lane.b32.xlu0 %v17058_v31, %s18557_s23  ;;  %v434_v53 = vpop.f32.mrb[19].mxu0 }
 0x189   : > { %638 = vrot.lane.b32.xlu1 %v18833_v32, %s18556_s21  ;;  %v18881_v54 = vpack.i.bf16 %v434_v53, %v428_v51  ;;  %v18883_v55 = vpack.c.bf16 %v434_v53, %v428_v51 }
 0x18b   : > { %23367 = vst [vmem:[#allocation12_spill] sm:$0xff] %v18883_v55  ;;  %v18918_v56 = vpop.f32.mrb[20].mxu0 }
 0x18c   : > { %17049 = vrot.lane.b32.xlu0 %v17058_v31, %s18558_s7  ;;  %v440_v57 = vpop.f32.mrb[21].mxu0 }
 0x18d   : > { %640 = vrot.lane.b32.xlu1 %v18839_v34, %s18556_s21 }
 0x18f   : > { %v18920_v58 = vpop.f32.mrb[22].mxu0 }
 0x190   : > { %17054 = vrot.lane.b32.xlu0 %v17058_v31, %s18559_s8  ;;  %v446_v59 = vpop.f32.mrb[23].mxu0 }
 0x191   : > { %672 = vrot.lane.b32.xlu1 %v18839_v34, %s18557_s23  ;;  %v18926_v60 = vpack.i.bf16 %v446_v59, %v440_v57  ;;  %v18928_v61 = vpack.c.bf16 %v446_v59, %v440_v57 }
 0x193   : > { %23368 = vst [vmem:[#allocation13_spill] sm:$0xff] %v18928_v61  ;;  %v18994_v15 = vpop.f32.mrb[24].mxu0 }
 0x194   : > { %17064 = vrot.lane.b32.xlu0 %v17058_v31, %s18561_s6  ;;  %v452_v16 = vpop.f32.mrb[25].mxu0 }
 0x195   : > { %704 = vrot.lane.b32.xlu1 %v18839_v34, %s18558_s7 }
 0x197   : > { %v18996_v17 = vpop.f32.mrb[26].mxu0 }
 0x198   : > { %670 = vrot.lane.b32.xlu0 %v18833_v32, %s18557_s23  ;;  %v458_v18 = vpop.f32.mrb[27].mxu0 }
 0x199   : > { %736 = vrot.lane.b32.xlu1 %v18839_v34, %s18559_s8  ;;  %v19002_v20 = vpack.i.bf16 %v458_v18, %v452_v16  ;;  %v19005_v21 = vpack.c.bf16 %v458_v18, %v452_v16 }
 0x19b   : > { %23369 = vst [vmem:[#allocation14_spill] sm:$0xff] %v19005_v21 }
 0x19c   : > { %702 = vrot.lane.b32.xlu0 %v18833_v32, %s18558_s7 }
 0x19d   : > { %768 = vrot.lane.b32.xlu1 %v18839_v34, %s18560_s30 }
 0x1a0   : > { %734 = vrot.lane.b32.xlu0 %v18833_v32, %s18559_s8 }
 0x1a1   : > { %800 = vrot.lane.b32.xlu1 %v18839_v34, %s18561_s6 }
 0x1a4   : > { %766 = vrot.lane.b32.xlu0 %v18833_v32, %s18560_s30 }
 0x1a5   : > { %832 = vrot.lane.b32.xlu1 %v18839_v34, %s18562_s9 }
 0x1a8   : > { %798 = vrot.lane.b32.xlu0 %v18833_v32, %s18561_s6 }
 0x1a9   : > { %17074 = vrot.lane.b32.xlu1 %v18843_v36, %s18556_s21 }
 0x1ac   : > { %830 = vrot.lane.b32.xlu0 %v18833_v32, %s18562_s9 }
 0x1ad   : > { %17084 = vrot.lane.b32.xlu1 %v18843_v36, %s18558_s7 }
 0x1b0   : > { %17079 = vrot.lane.b32.xlu0 %v18843_v36, %s18557_s23 }
 0x1b1   : > { %17094 = vrot.lane.b32.xlu1 %v18843_v36, %s18560_s30 }
 0x1b4   : > { %17089 = vrot.lane.b32.xlu0 %v18843_v36, %s18559_s8 }
 0x1b5   : > { %17104 = vrot.lane.b32.xlu1 %v18843_v36, %s18562_s9 }
 0x1b8   : > { %17099 = vrot.lane.b32.xlu0 %v18843_v36, %s18561_s6 }
 0x1b9   : > { %644 = vrot.lane.b32.xlu1 %v18852_v40, %s18556_s21 }
 0x1bc   : > { %642 = vrot.lane.b32.xlu0 %v18847_v38, %s18556_s21 }
 0x1bd   : > { %676 = vrot.lane.b32.xlu1 %v18852_v40, %s18557_s23 }
 0x1c0   : > { %674 = vrot.lane.b32.xlu0 %v18847_v38, %s18557_s23 }
 0x1c1   : > { %708 = vrot.lane.b32.xlu1 %v18852_v40, %s18558_s7 }
 0x1c4   : > { %706 = vrot.lane.b32.xlu0 %v18847_v38, %s18558_s7 }
 0x1c5   : > { %740 = vrot.lane.b32.xlu1 %v18852_v40, %s18559_s8 }
 0x1c8   : > { %738 = vrot.lane.b32.xlu0 %v18847_v38, %s18559_s8 }
 0x1c9   : > { %772 = vrot.lane.b32.xlu1 %v18852_v40, %s18560_s30 }
 0x1cc   : > { %770 = vrot.lane.b32.xlu0 %v18847_v38, %s18560_s30 }
 0x1cd   : > { %804 = vrot.lane.b32.xlu1 %v18852_v40, %s18561_s6 }
 0x1d0   : > { %802 = vrot.lane.b32.xlu0 %v18847_v38, %s18561_s6 }
 0x1d1   : > { %836 = vrot.lane.b32.xlu1 %v18852_v40, %s18562_s9 }
 0x1d4   : > { %834 = vrot.lane.b32.xlu0 %v18847_v38, %s18562_s9 }
 0x1d5   : > { %17129 = vrot.lane.b32.xlu1 %v18856_v42, %s18560_s30 }
 0x1d6   : > { %v635_v19 = vpop.permute.xlu0 %634 }
 0x1d7   : > { %15264 = vmatprep.mubr.msk.f32.mxu1 %vm1450_vm0, %v635_v19 }
 0x1d8   : > { %17109 = vrot.lane.b32.xlu0 %v18856_v42, %s18556_s21 }
 0x1d9   : > { %17139 = vrot.lane.b32.xlu1 %v18856_v42, %s18562_s9 }
 0x1da   : > { %v19011_v22 = vpop.permute.xlu0 %666  ;;  %v19013_v23 = vpop.permute.xlu1 %668 }
 0x1dc   : > { %17114 = vrot.lane.b32.xlu0 %v18856_v42, %s18557_s23 }
 0x1dd   : > { %648 = vrot.lane.b32.xlu1 %v18864_v46, %s18556_s21 }
 0x1de   : > { %v19019_v24 = vpop.permute.xlu0 %698  ;;  %v19021_v25 = vpop.permute.xlu1 %700 }
 0x1e0   : > { %17119 = vrot.lane.b32.xlu0 %v18856_v42, %s18558_s7 }
 0x1e1   : > { %680 = vrot.lane.b32.xlu1 %v18864_v46, %s18557_s23 }
 0x1e2   : > { %v731_v26 = vpop.permute.xlu0 %730  ;;  %v19027_v27 = vpop.permute.xlu1 %732 }
 0x1e3   : > { %15285 = vmatprep.mubr.msk.f32.mxu0 %vm1450_vm0, %v731_v26 }
 0x1e4   : > { %17124 = vrot.lane.b32.xlu0 %v18856_v42, %s18559_s8 }
 0x1e5   : > { %712 = vrot.lane.b32.xlu1 %v18864_v46, %s18558_s7 }
 0x1e6   : > { %v19034_v28 = vpop.permute.xlu0 %762 }
 0x1e7   : > { %v19036_v29 = vpop.permute.xlu1 %764 }
 0x1e8   : > { %17134 = vrot.lane.b32.xlu0 %v18856_v42, %s18561_s6  ;;  %v19062_v42 = vpop.f32.mrb[28].mxu0 }
 0x1e9   : > { %744 = vrot.lane.b32.xlu1 %v18864_v46, %s18559_s8  ;;  %v464_v53 = vpop.f32.mrb[29].mxu0 }
 0x1ea   : > { %v19042_v30 = vpop.permute.xlu0 %794  ;;  %v19068_v57 = vpop.f32.mrb[30].mxu0 }
 0x1eb   : > { %v19044_v31 = vpop.permute.xlu1 %796  ;;  %v470_v16 = vpop.f32.mrb[31].mxu0 }
 0x1ec   : > { %646 = vrot.lane.b32.xlu0 %v18860_v44, %s18556_s21  ;;  %v19072_v19 = vpack.i.bf16 %v470_v16, %v464_v53 }
 0x1ed   : > { %776 = vrot.lane.b32.xlu1 %v18864_v46, %s18560_s30 }
 0x1ee   : > { %v19050_v33 = vpop.permute.xlu0 %826  ;;  %23370 = vst [vmem:[#allocation15_spill] sm:$0xff] %v19072_v19 }
 0x1ef   : > { %v19052_v35 = vpop.permute.xlu1 %828 }
 0x1f0   : > { %678 = vrot.lane.b32.xlu0 %v18860_v44, %s18557_s23 }
 0x1f1   : > { %808 = vrot.lane.b32.xlu1 %v18864_v46, %s18561_s6 }
 0x1f2   : > { %v637_v36 = vpop.permute.xlu0 %636 }
 0x1f3   : > { %v17060_v39 = vpop.permute.xlu1 %17059 }
 0x1f4   : > { %710 = vrot.lane.b32.xlu0 %v18860_v44, %s18558_s7 }
 0x1f5   : > { %840 = vrot.lane.b32.xlu1 %v18864_v46, %s18562_s9 }
 0x1f6   : > { %v17040_v41 = vpop.permute.xlu0 %17039 }
 0x1f7   : > { %v19064_v45 = vpop.permute.xlu1 %17069  ;;  %v17042_v47 = vunpack.i.h.bf16 %v17040_v41  ;;  %v17041_v51 = vunpack.i.l.bf16 %v17040_v41  ;;  %v19082_v41 = vpack.c.bf16 %v470_v16, %v464_v53 }
 0x1f8   : > { %742 = vrot.lane.b32.xlu0 %v18860_v44, %s18559_s8 }
 0x1f9   : > { %v16275_v59 = vpack.c.bf16 %v17042_v47, %v17041_v51  ;;  %17144 = vrot.lane.b32.xlu1 %v18868_v48, %s18556_s21  ;;  %23371 = vst [vmem:[#allocation16_spill] sm:$0xff] %v19082_v41 }
 0x1fa   : > { %v17045_v18 = vpop.permute.xlu0 %17044 }
 0x1fb   : > { %v17047_v26 = vunpack.i.h.bf16 %v17045_v18  ;;  %v17046_v21 = vunpack.i.l.bf16 %v17045_v18  ;;  %v19074_v61 = vpop.permute.xlu1 %638  ;;  %16277 = vmatprep.subr.msk.bf16.mxu1 %vm18827_vm1, %v16275_v59 }
 0x1fc   : > { %16280 = vmatpush3.bf16.xpose.msk.msra.mxu1 %vm18827_vm1, %v16275_v59  ;;  %774 = vrot.lane.b32.xlu0 %v18860_v44, %s18560_s30 }
 0x1fd   : > { %v16281_v47 = vpack.c.bf16 %v17047_v26, %v17046_v21  ;;  %17149 = vrot.lane.b32.xlu1 %v18868_v48, %s18557_s23 }
 0x1fe   : > { %v17050_v51 = vpop.permute.xlu0 %17049 }
 0x1ff   : > { %v19086_v19 = vpop.permute.xlu1 %640  ;;  %16283 = vmatprep.subr.msk.bf16.mxu1 %vm18827_vm1, %v16281_v47  ;;  %v17052_v18 = vunpack.i.h.bf16 %v17050_v51  ;;  %v17051_v55 = vunpack.i.l.bf16 %v17050_v51 }
 0x200   : > { %806 = vrot.lane.b32.xlu0 %v18860_v44, %s18561_s6 }
 0x201   : > { %17164 = vrot.lane.b32.xlu1 %v18868_v48, %s18560_s30  ;;  %v16287_v26 = vpack.c.bf16 %v17052_v18, %v17051_v55 }
 0x202   : > { %v17055_v53 = vpop.permute.xlu0 %17054 }
 0x203   : > { %v17057_v59 = vunpack.i.h.bf16 %v17055_v53  ;;  %v17056_v21 = vunpack.i.l.bf16 %v17055_v53  ;;  %v19094_v16 = vpop.permute.xlu1 %672  ;;  %15265 = vmatmul.mubr.msk.f32.vlgmr.msra.gmra.mrb[18].mxu1 %vm1450_vm0, %v637_v36 }
 0x204   : > { %16286 = vmatpush3.bf16.xpose.msk.msra.mxu1 %vm18827_vm1, %v16281_v47  ;;  %15271 = vmatprep.mubr.msk.f32.mxu1 %vm1450_vm0, %v19011_v22  ;;  %v17062_v47 = vunpack.i.h.bf16 %v17060_v39  ;;  %v17061_v22 = vunpack.i.l.bf16 %v17060_v39 }
 0x205   : > { %v16293_v51 = vpack.c.bf16 %v17057_v59, %v17056_v21  ;;  %838 = vrot.lane.b32.xlu0 %v18860_v44, %s18562_s9  ;;  %17174 = vrot.lane.b32.xlu1 %v18868_v48, %s18562_s9 }
 0x206   : > { %16289 = vmatprep.subr.msk.bf16.mxu1 %vm18827_vm1, %v16287_v26  ;;  %v17065_v53 = vpop.permute.xlu0 %17064  ;;  %v16299_v39 = vpack.c.bf16 %v17062_v47, %v17061_v22 }
 0x207   : > { %v17067_v41 = vunpack.i.h.bf16 %v17065_v53  ;;  %v17066_v36 = vunpack.i.l.bf16 %v17065_v53  ;;  %v19107_v55 = vpop.permute.xlu1 %704  ;;  %16295 = vmatprep.subr.msk.bf16.mxu0 %vm18827_vm1, %v16293_v51 }
 0x208   : > { %16298 = vmatpush3.bf16.xpose.msk.msra.mxu0 %vm18827_vm1, %v16293_v51 }
 0x209   : > { %v16305_v18 = vpack.c.bf16 %v17067_v41, %v17066_v36  ;;  %17154 = vrot.lane.b32.xlu0 %v18868_v48, %s18558_s7  ;;  %652 = vrot.lane.b32.xlu1 %v18876_v52, %s18556_s21 }
 0x20a   : > { %v671_v59 = vpop.permute.xlu0 %670 }
 0x20b   : > { %v19117_v21 = vpop.permute.xlu1 %736  ;;  %15272 = vmatmul.mubr.msk.f32.vlgmr.msra.gmra.mrb[20].mxu1 %vm1450_vm0, %v19013_v23  ;;  %16307 = vmatprep.subr.msk.bf16.mxu0 %vm18827_vm1, %v16305_v18 }
 0x20c   : > { %16292 = vmatpush3.bf16.xpose.msk.msra.mxu1 %vm18827_vm1, %v16287_v26  ;;  %15278 = vmatprep.mubr.msk.f32.mxu1 %vm1450_vm0, %v19019_v24  ;;  %v17072_v26 = vunpack.i.h.bf16 %v19064_v45  ;;  %v17071_v24 = vunpack.i.l.bf16 %v19064_v45 }
 0x20d   : > { %17159 = vrot.lane.b32.xlu0 %v18868_v48, %s18559_s8  ;;  %684 = vrot.lane.b32.xlu1 %v18876_v52, %s18557_s23 }
 0x20e   : > { %16301 = vmatprep.subr.msk.bf16.mxu1 %vm18827_vm1, %v16299_v39  ;;  %v19133_v23 = vpop.permute.xlu0 %702  ;;  %v16311_v45 = vpack.c.bf16 %v17072_v26, %v17071_v24 }
 0x20f   : > { %v19135_v41 = vpop.permute.xlu1 %768  ;;  %15286 = vmatmul.mubr.msk.f32.vlgmr.msra.gmra.mrb[32].mxu0 %vm1450_vm0, %v19027_v27 }
 0x210   : > { %16310 = vmatpush3.bf16.xpose.msk.msra.mxu0 %vm18827_vm1, %v16305_v18  ;;  %15299 = vmatprep.mubr.msk.f32.mxu0 %vm1450_vm0, %v19042_v30 }
 0x211   : > { %17169 = vrot.lane.b32.xlu0 %v18868_v48, %s18561_s6  ;;  %716 = vrot.lane.b32.xlu1 %v18876_v52, %s18558_s7 }
 0x212   : > { %16319 = vmatprep.subr.msk.bf16.mxu0 %vm18827_vm1, %v18845_v37  ;;  %v19152_v27 = vpop.permute.xlu0 %734 }
 0x213   : > { %v19154_v51 = vpop.permute.xlu1 %800  ;;  %15279 = vmatmul.mubr.msk.f32.vlgmr.msra.gmra.mrb[22].mxu1 %vm1450_vm0, %v19021_v25 }
 0x214   : > { %16304 = vmatpush3.bf16.xpose.msk.msra.mxu1 %vm18827_vm1, %v16299_v39  ;;  %15292 = vmatprep.mubr.msk.f32.mxu1 %vm1450_vm0, %v19034_v28 }
 0x215   : > { %650 = vrot.lane.b32.xlu0 %v18872_v50, %s18556_s21  ;;  %748 = vrot.lane.b32.xlu1 %v18876_v52, %s18559_s8 }
 0x216   : > { %16313 = vmatprep.subr.msk.bf16.mxu1 %vm18827_vm1, %v16311_v45  ;;  %v19168_v48 = vpop.permute.xlu0 %766 }
 0x217   : > { %v19170_v30 = vpop.permute.xlu1 %832  ;;  %15300 = vmatmul.mubr.msk.f32.vlgmr.msra.gmra.mrb[34].mxu0 %vm1450_vm0, %v19044_v31 }
 0x218   : > { %16322 = vmatpush3.bf16.xpose.msk.msra.mxu0 %vm18827_vm1, %v18845_v37  ;;  %15313 = vmatprep.mubr.msk.f32.mxu0 %vm1450_vm0, %v18833_v32 }
 0x219   : > { %682 = vrot.lane.b32.xlu0 %v18872_v50, %s18557_s23  ;;  %780 = vrot.lane.b32.xlu1 %v18876_v52, %s18560_s30 }
 0x21a   : > { %v19183_v25 = vpop.permute.xlu0 %798 }
 0x21b   : > { %v17075_v28 = vpop.permute.xlu1 %17074  ;;  %15293 = vmatmul.mubr.msk.f32.vlgmr.msra.gmra.mrb[24].mxu1 %vm1450_vm0, %v19036_v29 }
 0x21c   : > { %v17077_v31 = vunpack.i.h.bf16 %v17075_v28  ;;  %v17076_v53 = vunpack.i.l.bf16 %v17075_v28  ;;  %16316 = vmatpush3.bf16.xpose.msk.msra.mxu1 %vm18827_vm1, %v16311_v45  ;;  %15306 = vmatprep.mubr.msk.f32.mxu1 %vm1450_vm0, %v19050_v33 }
 0x21d   : > { %714 = vrot.lane.b32.xlu0 %v18872_v50, %s18558_s7  ;;  %812 = vrot.lane.b32.xlu1 %v18876_v52, %s18561_s6 }
 0x21e   : > { %v16323_v32 = vpack.c.bf16 %v17077_v31, %v17076_v53  ;;  %v19195_v37 = vpop.permute.xlu0 %830 }
 0x21f   : > { %v17085_v36 = vpop.permute.xlu1 %17084  ;;  %15314 = vmatmul.mubr.msk.f32.vlgmr.msra.gmra.mrb[36].mxu0 %vm1450_vm0, %v18839_v34 }
 0x220   : > { %v17087_v29 = vunpack.i.h.bf16 %v17085_v36  ;;  %v17086_v47 = vunpack.i.l.bf16 %v17085_v36  ;;  %16325 = vmatprep.subr.msk.bf16.mxu1 %vm18827_vm1, %v16323_v32  ;;  %15327 = vmatprep.mubr.msk.f32.mxu0 %vm1450_vm0, %v671_v59 }
 0x221   : > { %746 = vrot.lane.b32.xlu0 %v18872_v50, %s18559_s8  ;;  %844 = vrot.lane.b32.xlu1 %v18876_v52, %s18562_s9 }
 0x222   : > { %v17080_v33 = vpop.permute.xlu0 %17079  ;;  %v16335_v34 = vpack.c.bf16 %v17087_v29, %v17086_v47  ;;  %v19232_v29 = vpack.c.bf16 %v18934_v62, %v18936_v63 }
 0x223   : > { %v17082_v22 = vunpack.i.h.bf16 %v17080_v33  ;;  %v17081_v18 = vunpack.i.l.bf16 %v17080_v33  ;;  %v17095_v39 = vpop.permute.xlu1 %17094  ;;  %15307 = vmatmul.mubr.msk.f32.vlgmr.msra.gmra.mrb[26].mxu1 %vm1450_vm0, %v19052_v35 }
 0x224   : > { %16328 = vmatpush3.bf16.xpose.msk.msra.mxu1 %vm18827_vm1, %v16323_v32  ;;  %15320 = vmatprep.mubr.msk.f32.mxu1 %vm1450_vm0, %v19074_v61  ;;  %v17097_v26 = vunpack.i.h.bf16 %v17095_v39  ;;  %v17096_v24 = vunpack.i.l.bf16 %v17095_v39  ;;  %v19222_v61 = vpack.i.bf16 %v18934_v62, %v18936_v63  ;;  %23372 = vst [vmem:[#allocation17_spill] sm:$0xff] %v19232_v29 }
 0x225   : > { %v16329_v59 = vpack.c.bf16 %v17082_v22, %v17081_v18  ;;  %778 = vrot.lane.b32.xlu0 %v18872_v50, %s18560_s30  ;;  %17179 = vrot.lane.b32.xlu1 %v18881_v54, %s18556_s21  ;;  %v19242_v18 = vpack.i.bf16 %v18940_v1, %v18944_v2 }
 0x226   : > { %16337 = vmatprep.subr.msk.bf16.mxu1 %vm18827_vm1, %v16335_v34  ;;  %v17090_v35 = vpop.permute.xlu0 %17089  ;;  %v16347_v32 = vpack.c.bf16 %v17097_v26, %v17096_v24 }
 0x227   : > { %v17092_v45 = vunpack.i.h.bf16 %v17090_v35  ;;  %v17091_v28 = vunpack.i.l.bf16 %v17090_v35  ;;  %v17105_v31 = vpop.permute.xlu1 %17104  ;;  %16331 = vmatprep.subr.msk.bf16.mxu0 %vm18827_vm1, %v16329_v59 }
 0x228   : > { %16334 = vmatpush3.bf16.xpose.msk.msra.mxu0 %vm18827_vm1, %v16329_v59  ;;  %v17107_v62 = vunpack.i.h.bf16 %v17105_v31  ;;  %v17106_v39 = vunpack.i.l.bf16 %v17105_v31 }
 0x229   : > { %v16341_v53 = vpack.c.bf16 %v17092_v45, %v17091_v28  ;;  %810 = vrot.lane.b32.xlu0 %v18872_v50, %s18561_s6  ;;  %17184 = vrot.lane.b32.xlu1 %v18881_v54, %s18557_s23 }
 0x22a   : > { %v17100_v36 = vpop.permute.xlu0 %17099 }
 0x22b   : > { %v17102_v47 = vunpack.i.h.bf16 %v17100_v36  ;;  %v17101_v33 = vunpack.i.l.bf16 %v17100_v36  ;;  %v19234_v22 = vpop.permute.xlu1 %644  ;;  %15321 = vmatmul.mubr.msk.f32.vlgmr.msra.gmra.mrb[28].mxu1 %vm1450_vm0, %v19086_v19  ;;  %16343 = vmatprep.subr.msk.bf16.mxu0 %vm18827_vm1, %v16341_v53  ;;  %v19256_v19 = vpack.c.bf16 %v18940_v1, %v18944_v2  ;;  %v19278_v2 = vpack.c.bf16 %v18946_v3, %v18948_v4 }
 0x22c   : > { %16340 = vmatpush3.bf16.xpose.msk.msra.mxu1 %vm18827_vm1, %v16335_v34  ;;  %15334 = vmatprep.mubr.msk.f32.mxu1 %vm1450_vm0, %v19133_v23  ;;  %v19264_v23 = vpack.i.bf16 %v18946_v3, %v18948_v4  ;;  %v19302_v4 = vpack.c.bf16 %v18952_v5, %v18956_v6 }
 0x22d   : > { %842 = vrot.lane.b32.xlu0 %v18872_v50, %s18562_s9  ;;  %17199 = vrot.lane.b32.xlu1 %v18881_v54, %s18560_s30  ;;  %23373 = vst [vmem:[#allocation18_spill] sm:$0xff] %v19256_v19  ;;  %v16353_v34 = vpack.c.bf16 %v17102_v47, %v17101_v33  ;;  %23375 = vst [vmem:[#allocation20_spill] sm:$0xff] %v19278_v2 }
 0x22e   : > { %16349 = vmatprep.subr.msk.bf16.mxu1 %vm18827_vm1, %v16347_v32  ;;  %v643_v63 = vpop.permute.xlu0 %642  ;;  %23374 = vst [vmem:[#allocation19_spill] sm:$0xff] %v19264_v23  ;;  %23377 = vst [vmem:[#allocation22_spill] sm:$0xff] %v19302_v4 }
 0x22f   : > { %v19258_v59 = vpop.permute.xlu1 %676  ;;  %15328 = vmatmul.mubr.msk.f32.vlgmr.msra.gmra.mrb[38].mxu0 %vm1450_vm0, %v19094_v16  ;;  %v16359_v16 = vpack.c.bf16 %v17107_v62, %v17106_v39 }
 0x230   : > { %16346 = vmatpush3.bf16.xpose.msk.msra.mxu0 %vm18827_vm1, %v16341_v53  ;;  %15341 = vmatprep.mubr.msk.f32.mxu0 %vm1450_vm0, %v19152_v27  ;;  %v19286_v27 = vpack.i.bf16 %v18952_v5, %v18956_v6  ;;  %v19327_v6 = vpack.c.bf16 %v18958_v7, %v18960_v8 }
 0x231   : > { %17189 = vrot.lane.b32.xlu0 %v18881_v54, %s18558_s7  ;;  %17209 = vrot.lane.b32.xlu1 %v18881_v54, %s18562_s9 }
 0x232   : > { %16355 = vmatprep.subr.msk.bf16.mxu0 %vm18827_vm1, %v16353_v34  ;;  %v675_v1 = vpop.permute.xlu0 %674  ;;  %23376 = vst [vmem:[#allocation21_spill] sm:$0xff] %v19286_v27  ;;  %23379 = vst [vmem:[#allocation24_spill] sm:$0xff] %v19327_v6 }
 0x233   : > { %v19280_v26 = vpop.permute.xlu1 %708  ;;  %15335 = vmatmul.mubr.msk.f32.vlgmr.msra.gmra.mrb[30].mxu1 %vm1450_vm0, %v19107_v55 }
 0x234   : > { %16352 = vmatpush3.bf16.xpose.msk.msra.mxu1 %vm18827_vm1, %v16347_v32  ;;  %15348 = vmatprep.mubr.msk.f32.mxu1 %vm1450_vm0, %v19168_v48  ;;  %v19310_v48 = vpack.i.bf16 %v18958_v7, %v18960_v8  ;;  %v19349_v8 = vpack.c.bf16 %v18964_v9, %v18968_v10 }
 0x235   : > { %17194 = vrot.lane.b32.xlu0 %v18881_v54, %s18559_s8  ;;  %656 = vrot.lane.b32.xlu1 %v18920_v58, %s18556_s21 }
 0x236   : > { %16361 = vmatprep.subr.msk.bf16.mxu1 %vm18827_vm1, %v16359_v16  ;;  %v19298_v3 = vpop.permute.xlu0 %706  ;;  %23378 = vst [vmem:[#allocation23_spill] sm:$0xff] %v19310_v48  ;;  %23381 = vst [vmem:[#allocation26_spill] sm:$0xff] %v19349_v8 }
 0x237   : > { %v19304_v55 = vpop.permute.xlu1 %740  ;;  %15342 = vmatmul.mubr.msk.f32.vlgmr.msra.gmra.mrb[40].mxu0 %vm1450_vm0, %v19117_v21 }
 0x238   : > { %16358 = vmatpush3.bf16.xpose.msk.msra.mxu0 %vm18827_vm1, %v16353_v34  ;;  %15355 = vmatprep.mubr.msk.f32.mxu0 %vm1450_vm0, %v19183_v25  ;;  %v19357_v25 = vpack.i.bf16 %v18970_v11, %v18972_v12 }
 0x239   : > { %17204 = vrot.lane.b32.xlu0 %v18881_v54, %s18561_s6  ;;  %688 = vrot.lane.b32.xlu1 %v18920_v58, %s18557_s23  ;;  %v19335_v54 = vpack.i.bf16 %v18964_v9, %v18968_v10  ;;  %v19372_v10 = vpack.c.bf16 %v18970_v11, %v18972_v12  ;;  %v19391_v11 = vpack.c.bf16 %v18976_v13, %v18980_v14 }
 0x23a   : > { %16367 = vmatprep.subr.msk.bf16.mxu0 %vm18827_vm1, %v18858_v43  ;;  %v19323_v5 = vpop.permute.xlu0 %738  ;;  %23382 = vst [vmem:[#allocation27_spill] sm:$0xff] %v19357_v25 }
 0x23b   : > { %v19329_v21 = vpop.permute.xlu1 %772  ;;  %15349 = vmatmul.mubr.msk.f32.vlgmr.msra.gmra.mrb[32].mxu1 %vm1450_vm0, %v19135_v41  ;;  %23380 = vst [vmem:[#allocation25_spill] sm:$0xff] %v19335_v54  ;;  %23383 = vst [vmem:[#allocation28_spill] sm:$0xff] %v19372_v10 }
 0x23c   : > { %16364 = vmatpush3.bf16.xpose.msk.msra.mxu1 %vm18827_vm1, %v16359_v16  ;;  %15362 = vmatprep.mubr.msk.f32.mxu1 %vm1450_vm0, %v19195_v37  ;;  %23385 = vst [vmem:[#allocation30_spill] sm:$0xff] %v19391_v11 }
 0x23d   : > { %654 = vrot.lane.b32.xlu0 %v18918_v56, %s18556_s21  ;;  %720 = vrot.lane.b32.xlu1 %v18920_v58, %s18558_s7 }
 0x23e   : > { %v19345_v7 = vpop.permute.xlu0 %770 }
 0x23f   : > { %v19351_v41 = vpop.permute.xlu1 %804  ;;  %15356 = vmatmul.mubr.msk.f32.vlgmr.msra.gmra.mrb[42].mxu0 %vm1450_vm0, %v19154_v51 }
 0x240   : > { %16370 = vmatpush3.bf16.xpose.msk.msra.mxu0 %vm18827_vm1, %v18858_v43  ;;  %15369 = vmatprep.mubr.msk.f32.mxu0 %vm1450_vm0, %v18847_v38  ;;  %v19380_v38 = vpack.i.bf16 %v18976_v13, %v18980_v14 }
 0x241   : > { %686 = vrot.lane.b32.xlu0 %v18918_v56, %s18557_s23  ;;  %752 = vrot.lane.b32.xlu1 %v18920_v58, %s18559_s8 }
 0x242   : > { %v19368_v9 = vpop.permute.xlu0 %802  ;;  %23384 = vst [vmem:[#allocation29_spill] sm:$0xff] %v19380_v38 }
 0x243   : > { %v19374_v51 = vpop.permute.xlu1 %836  ;;  %15363 = vmatmul.mubr.msk.f32.vlgmr.msra.gmra.mrb[34].mxu1 %vm1450_vm0, %v19170_v30 }
 0x244   : > { %15376 = vmatprep.mubr.msk.f32.mxu1 %vm1450_vm0, %v643_v63 }
 0x245   : > { %718 = vrot.lane.b32.xlu0 %v18918_v56, %s18558_s7  ;;  %784 = vrot.lane.b32.xlu1 %v18920_v58, %s18560_s30 }
 0x246   : > { %v19387_v43 = vpop.permute.xlu0 %834 }
 0x247   : > { %v19393_v12 = vpop.f32.mrb[16].mxu1  ;;  %v17130_v30 = vpop.permute.xlu1 %17129  ;;  %15370 = vmatmul.mubr.msk.f32.vlgmr.msra.gmra.mrb[44].mxu0 %vm1450_vm0, %v18852_v40 }
 0x248   : > { %v19397_v37 = vpop.f32.mrb[17].mxu1  ;;  %15383 = vmatprep.mubr.msk.f32.mxu0 %vm1450_vm0, %v675_v1  ;;  %v17132_v63 = vunpack.i.h.bf16 %v17130_v30  ;;  %v17131_v39 = vunpack.i.l.bf16 %v17130_v30 }
 0x249   : > { %750 = vrot.lane.b32.xlu0 %v18918_v56, %s18559_s8  ;;  %816 = vrot.lane.b32.xlu1 %v18920_v58, %s18561_s6 }
 0x24a   : > { %v17110_v24 = vpop.permute.xlu0 %17109  ;;  %v16395_v30 = vpack.c.bf16 %v17132_v63, %v17131_v39 }
 0x24b   : > { %v17140_v35 = vpop.permute.xlu1 %17139  ;;  %v17112_v13 = vunpack.i.h.bf16 %v17110_v24  ;;  %v17111_v14 = vunpack.i.l.bf16 %v17110_v24 }
 0x24d   : > { %v16371_v45 = vpack.c.bf16 %v17112_v13, %v17111_v14  ;;  %782 = vrot.lane.b32.xlu0 %v18918_v56, %s18560_s30  ;;  %848 = vrot.lane.b32.xlu1 %v18920_v58, %s18562_s9 }
 0x24e   : > { %v17115_v40 = vpop.permute.xlu0 %17114 }
 0x24f   : > { %v17117_v28 = vunpack.i.h.bf16 %v17115_v40  ;;  %v17116_v31 = vunpack.i.l.bf16 %v17115_v40  ;;  %v19408_v53 = vpop.permute.xlu1 %648  ;;  %16373 = vmatprep.subr.msk.bf16.mxu1 %vm18827_vm1, %v16371_v45 }
 0x250   : > { %16376 = vmatpush3.bf16.xpose.msk.msra.mxu1 %vm18827_vm1, %v16371_v45 }
 0x251   : > { %v16377_v32 = vpack.c.bf16 %v17117_v28, %v17116_v31  ;;  %814 = vrot.lane.b32.xlu0 %v18918_v56, %s18561_s6  ;;  %17214 = vrot.lane.b32.xlu1 %v18926_v60, %s18556_s21  ;;  %v17141_v31 = vunpack.i.l.bf16 %v17140_v35 }
 0x252   : > { %v17120_v36 = vpop.permute.xlu0 %17119 }
 0x253   : > { %v17122_v47 = vunpack.i.h.bf16 %v17120_v36  ;;  %v17121_v33 = vunpack.i.l.bf16 %v17120_v36  ;;  %v19418_v62 = vpop.permute.xlu1 %680  ;;  %16379 = vmatprep.subr.msk.bf16.mxu0 %vm18827_vm1, %v16377_v32 }
 0x254   : > { %16382 = vmatpush3.bf16.xpose.msk.msra.mxu0 %vm18827_vm1, %v16377_v32 }
 0x255   : > { %v16383_v34 = vpack.c.bf16 %v17122_v47, %v17121_v33  ;;  %846 = vrot.lane.b32.xlu0 %v18918_v56, %s18562_s9  ;;  %17224 = vrot.lane.b32.xlu1 %v18926_v60, %s18558_s7 }
 0x256   : > { %v17125_v1 = vpop.permute.xlu0 %17124 }
 0x257   : > { %v17127_v16 = vunpack.i.h.bf16 %v17125_v1  ;;  %v17126_v24 = vunpack.i.l.bf16 %v17125_v1  ;;  %v19428_v13 = vpop.permute.xlu1 %712  ;;  %15377 = vmatmul.mubr.msk.f32.vlgmr.msra.gmra.mrb[36].mxu1 %vm1450_vm0, %v19234_v22  ;;  %16385 = vmatprep.subr.msk.bf16.mxu1 %vm18827_vm1, %v16383_v34 }
 0x258   : > { %16388 = vmatpush3.bf16.xpose.msk.msra.mxu1 %vm18827_vm1, %v16383_v34  ;;  %15390 = vmatprep.mubr.msk.f32.mxu1 %vm1450_vm0, %v19298_v3  ;;  %v17142_v3 = vunpack.i.h.bf16 %v17140_v35 }
 0x259   : > { %v16389_v14 = vpack.c.bf16 %v17127_v16, %v17126_v24  ;;  %17219 = vrot.lane.b32.xlu0 %v18926_v60, %s18557_s23  ;;  %660 = vrot.lane.b32.xlu1 %v18996_v17, %s18556_s21 }
 0x25a   : > { %16397 = vmatprep.subr.msk.bf16.mxu1 %vm18827_vm1, %v16395_v30  ;;  %v17135_v22 = vpop.permute.xlu0 %17134  ;;  %v16407_v35 = vpack.c.bf16 %v17142_v3, %v17141_v31 }
 0x25b   : > { %v17137_v45 = vunpack.i.h.bf16 %v17135_v22  ;;  %v17136_v40 = vunpack.i.l.bf16 %v17135_v22  ;;  %v19444_v28 = vpop.permute.xlu1 %744  ;;  %15384 = vmatmul.mubr.msk.f32.vlgmr.msra.gmra.mrb[46].mxu0 %vm1450_vm0, %v19258_v59  ;;  %16391 = vmatprep.subr.msk.bf16.mxu0 %vm18827_vm1, %v16389_v14 }
 0x25c   : > { %16394 = vmatpush3.bf16.xpose.msk.msra.mxu0 %vm18827_vm1, %v16389_v14  ;;  %15397 = vmatprep.mubr.msk.f32.mxu0 %vm1450_vm0, %v19323_v5 }
 0x25d   : > { %v16401_v32 = vpack.c.bf16 %v17137_v45, %v17136_v40  ;;  %658 = vrot.lane.b32.xlu0 %v18994_v15, %s18556_s21  ;;  %692 = vrot.lane.b32.xlu1 %v18996_v17, %s18557_s23 }
 0x25e   : > { %v647_v36 = vpop.permute.xlu0 %646 }
 0x25f   : > { %v19458_v59 = vpop.permute.xlu1 %776  ;;  %15391 = vmatmul.mubr.msk.f32.vlgmr.msra.gmra.mrb[38].mxu1 %vm1450_vm0, %v19280_v26  ;;  %16403 = vmatprep.subr.msk.bf16.mxu0 %vm18827_vm1, %v16401_v32 }
 0x260   : > { %16400 = vmatpush3.bf16.xpose.msk.msra.mxu1 %vm18827_vm1, %v16395_v30  ;;  %15404 = vmatprep.mubr.msk.f32.mxu1 %vm1450_vm0, %v19345_v7 }
 0x261   : > { %690 = vrot.lane.b32.xlu0 %v18994_v15, %s18557_s23  ;;  %724 = vrot.lane.b32.xlu1 %v18996_v17, %s18558_s7 }
 0x262   : > { %16409 = vmatprep.subr.msk.bf16.mxu1 %vm18827_vm1, %v16407_v35  ;;  %v679_v26 = vpop.permute.xlu0 %678 }
 0x263   : > { %v19474_v5 = vpop.permute.xlu1 %808  ;;  %15398 = vmatmul.mubr.msk.f32.vlgmr.msra.gmra.mrb[48].mxu0 %vm1450_vm0, %v19304_v55 }
 0x264   : > { %16406 = vmatpush3.bf16.xpose.msk.msra.mxu0 %vm18827_vm1, %v16401_v32  ;;  %15411 = vmatprep.mubr.msk.f32.mxu0 %vm1450_vm0, %v19368_v9 }
 0x265   : > { %722 = vrot.lane.b32.xlu0 %v18994_v15, %s18558_s7  ;;  %756 = vrot.lane.b32.xlu1 %v18996_v17, %s18559_s8 }
 0x266   : > { %16415 = vmatprep.subr.msk.bf16.mxu0 %vm18827_vm1, %v18870_v49  ;;  %v711_v7 = vpop.permute.xlu0 %710 }
 0x267   : > { %v19489_v47 = vpop.permute.xlu1 %840  ;;  %15405 = vmatmul.mubr.msk.f32.vlgmr.msra.gmra.mrb[40].mxu1 %vm1450_vm0, %v19329_v21 }
 0x268   : > { %16412 = vmatpush3.bf16.xpose.msk.msra.mxu1 %vm18827_vm1, %v16407_v35  ;;  %15418 = vmatprep.mubr.msk.f32.mxu1 %vm1450_vm0, %v19387_v43 }
 0x269   : > { %754 = vrot.lane.b32.xlu0 %v18994_v15, %s18559_s8  ;;  %788 = vrot.lane.b32.xlu1 %v18996_v17, %s18560_s30 }
 0x26a   : > { %v743_v55 = vpop.permute.xlu0 %742 }
 0x26b   : > { %v17145_v9 = vpop.permute.xlu1 %17144  ;;  %15412 = vmatmul.mubr.msk.f32.vlgmr.msra.gmra.mrb[50].mxu0 %vm1450_vm0, %v19351_v41 }
 0x26c   : > { %v17147_v33 = vunpack.i.h.bf16 %v17145_v9  ;;  %v17146_v63 = vunpack.i.l.bf16 %v17145_v9  ;;  %16418 = vmatpush3.bf16.xpose.msk.msra.mxu0 %vm18827_vm1, %v18870_v49  ;;  %15425 = vmatprep.mubr.msk.f32.mxu0 %vm1450_vm0, %v18860_v44 }
 0x26d   : > { %786 = vrot.lane.b32.xlu0 %v18994_v15, %s18560_s30  ;;  %820 = vrot.lane.b32.xlu1 %v18996_v17, %s18561_s6 }
 0x26e   : > { %v16419_v21 = vpack.c.bf16 %v17147_v33, %v17146_v63  ;;  %v19512_v43 = vpop.permute.xlu0 %774 }
 0x26f   : > { %v17150_v39 = vpop.permute.xlu1 %17149  ;;  %15419 = vmatmul.mubr.msk.f32.vlgmr.msra.gmra.mrb[42].mxu1 %vm1450_vm0, %v19374_v51 }
 0x270   : > { %v17152_v41 = vunpack.i.h.bf16 %v17150_v39  ;;  %v17151_v34 = vunpack.i.l.bf16 %v17150_v39  ;;  %16421 = vmatprep.subr.msk.bf16.mxu1 %vm18827_vm1, %v16419_v21  ;;  %15432 = vmatprep.mubr.msk.f32.mxu1 %vm1450_vm0, %v647_v36 }
 0x271   : > { %16424 = vmatpush3.bf16.xpose.msk.msra.mxu1 %vm18827_vm1, %v16419_v21  ;;  %818 = vrot.lane.b32.xlu0 %v18994_v15, %s18561_s6 }
 0x272   : > { %v16425_v44 = vpack.c.bf16 %v17152_v41, %v17151_v34  ;;  %852 = vrot.lane.b32.xlu1 %v18996_v17, %s18562_s9  ;;  %v807_v49 = vpop.permute.xlu0 %806 }
 0x273   : > { %v17165_v1 = vpop.permute.xlu1 %17164  ;;  %15426 = vmatmul.mubr.msk.f32.vlgmr.msra.gmra.mrb[52].mxu0 %vm1450_vm0, %v18864_v46 }
 0x274   : > { %16427 = vmatprep.subr.msk.bf16.mxu0 %vm18827_vm1, %v16425_v44  ;;  %15439 = vmatprep.mubr.msk.f32.mxu0 %vm1450_vm0, %v679_v26  ;;  %v17167_v30 = vunpack.i.h.bf16 %v17165_v1  ;;  %v17166_v14 = vunpack.i.l.bf16 %v17165_v1 }
 0x275   : > { %16430 = vmatpush3.bf16.xpose.msk.msra.mxu0 %vm18827_vm1, %v16425_v44  ;;  %850 = vrot.lane.b32.xlu0 %v18994_v15, %s18562_s9 }
 0x276   : > { %17234 = vrot.lane.b32.xlu1 %v19002_v20, %s18557_s23  ;;  %v16443_v31 = vpack.c.bf16 %v17167_v30, %v17166_v14 }
 0x277   : > { %v839_v51 = vpop.permute.xlu0 %838  ;;  %v17175_v16 = vpop.permute.xlu1 %17174 }
 0x278   : > { %15433 = vmatmul.mubr.msk.f32.vlgmr.msra.gmra.mrb[44].mxu1 %vm1450_vm0, %v19408_v53  ;;  %v17177_v9 = vunpack.i.h.bf16 %v17175_v16  ;;  %v17176_v33 = vunpack.i.l.bf16 %v17175_v16 }
 0x279   : > { %15446 = vmatprep.mubr.msk.f32.mxu1 %vm1450_vm0, %v711_v7  ;;  %17229 = vrot.lane.b32.xlu0 %v19002_v20, %s18556_s21 }
 0x27a   : > { %17249 = vrot.lane.b32.xlu1 %v19002_v20, %s18559_s8  ;;  %v16455_v41 = vpack.c.bf16 %v17177_v9, %v17176_v33 }
 0x27b   : > { %v17155_v46 = vpop.permute.xlu0 %17154  ;;  %v19543_v24 = vpop.permute.xlu1 %652 }
 0x27c   : > { %v17157_v22 = vunpack.i.h.bf16 %v17155_v46  ;;  %v17156_v45 = vunpack.i.l.bf16 %v17155_v46  ;;  %15440 = vmatmul.mubr.msk.f32.vlgmr.msra.gmra.mrb[54].mxu0 %vm1450_vm0, %v19418_v62 }
 0x27d   : > { %15453 = vmatprep.mubr.msk.f32.mxu0 %vm1450_vm0, %v743_v55  ;;  %17239 = vrot.lane.b32.xlu0 %v19002_v20, %s18558_s7 }
 0x27e   : > { %v16431_v53 = vpack.c.bf16 %v17157_v22, %v17156_v45  ;;  %664 = vrot.lane.b32.xlu1 %v19068_v57, %s18556_s21 }
 0x27f   : > { %v17160_v40 = vpop.permute.xlu0 %17159  ;;  %v19552_v3 = vpop.permute.xlu1 %684 }
 0x280   : > { %v17162_v32 = vunpack.i.h.bf16 %v17160_v40  ;;  %v17161_v36 = vunpack.i.l.bf16 %v17160_v40  ;;  %16433 = vmatprep.subr.msk.bf16.mxu1 %vm18827_vm1, %v16431_v53 }
 0x281   : > { %16436 = vmatpush3.bf16.xpose.msk.msra.mxu1 %vm18827_vm1, %v16431_v53  ;;  %662 = vrot.lane.b32.xlu0 %v19062_v42, %s18556_s21 }
 0x282   : > { %v16437_v62 = vpack.c.bf16 %v17162_v32, %v17161_v36  ;;  %696 = vrot.lane.b32.xlu1 %v19068_v57, %s18557_s23  ;;  %16445 = vmatprep.subr.msk.bf16.mxu1 %vm18827_vm1, %v16443_v31 }
 0x283   : > { %v17170_v35 = vpop.permute.xlu0 %17169  ;;  %v19564_v26 = vpop.permute.xlu1 %716 }
 0x284   : > { %v17172_v7 = vunpack.i.h.bf16 %v17170_v35  ;;  %v17171_v55 = vunpack.i.l.bf16 %v17170_v35  ;;  %16439 = vmatprep.subr.msk.bf16.mxu0 %vm18827_vm1, %v16437_v62 }
 0x285   : > { %16442 = vmatpush3.bf16.xpose.msk.msra.mxu0 %vm18827_vm1, %v16437_v62  ;;  %694 = vrot.lane.b32.xlu0 %v19062_v42, %s18557_s23 }
 0x286   : > { %v16449_v63 = vpack.c.bf16 %v17172_v7, %v17171_v55  ;;  %728 = vrot.lane.b32.xlu1 %v19068_v57, %s18558_s7 }
 0x287   : > { %v651_v21 = vpop.permute.xlu0 %650  ;;  %v19574_v39 = vpop.permute.xlu1 %748 }
 0x288   : > { %15447 = vmatmul.mubr.msk.f32.vlgmr.msra.gmra.mrb[46].mxu1 %vm1450_vm0, %v19428_v13  ;;  %16451 = vmatprep.subr.msk.bf16.mxu0 %vm18827_vm1, %v16449_v63 }
 0x289   : > { %16448 = vmatpush3.bf16.xpose.msk.msra.mxu1 %vm18827_vm1, %v16443_v31  ;;  %15460 = vmatprep.mubr.msk.f32.mxu1 %vm1450_vm0, %v19512_v43  ;;  %v23386_v43 = vld [vmem:[#allocation12_spill] sm:$0xff] }
 0x28a   : > { %726 = vrot.lane.b32.xlu0 %v19062_v42, %s18558_s7  ;;  %760 = vrot.lane.b32.xlu1 %v19068_v57, %s18559_s8 }
 0x28b   : > { %16457 = vmatprep.subr.msk.bf16.mxu1 %vm18827_vm1, %v16455_v41  ;;  %v683_v13 = vpop.permute.xlu0 %682  ;;  %v19590_v34 = vpop.permute.xlu1 %780 }
 0x28c   : > { %15454 = vmatmul.mubr.msk.f32.vlgmr.msra.gmra.mrb[56].mxu0 %vm1450_vm0, %v19444_v28 }
 0x28d   : > { %16454 = vmatpush3.bf16.xpose.msk.msra.mxu0 %vm18827_vm1, %v16449_v63  ;;  %15467 = vmatprep.mubr.msk.f32.mxu0 %vm1450_vm0, %v807_v49 }
 0x28e   : > { %758 = vrot.lane.b32.xlu0 %v19062_v42, %s18559_s8  ;;  %792 = vrot.lane.b32.xlu1 %v19068_v57, %s18560_s30 }
 0x28f   : > { %16463 = vmatprep.subr.msk.bf16.mxu0 %vm18827_vm1, %v23386_v43  ;;  %v715_v44 = vpop.permute.xlu0 %714  ;;  %v19604_v1 = vpop.permute.xlu1 %812 }
 0x290   : > { %15461 = vmatmul.mubr.msk.f32.vlgmr.msra.gmra.mrb[48].mxu1 %vm1450_vm0, %v19458_v59 }
 0x291   : > { %16460 = vmatpush3.bf16.xpose.msk.msra.mxu1 %vm18827_vm1, %v16455_v41  ;;  %15474 = vmatprep.mubr.msk.f32.mxu1 %vm1450_vm0, %v839_v51 }
 0x292   : > { %790 = vrot.lane.b32.xlu0 %v19062_v42, %s18560_s30  ;;  %824 = vrot.lane.b32.xlu1 %v19068_v57, %s18561_s6 }
 0x293   : > { %v747_v28 = vpop.permute.xlu0 %746  ;;  %v19615_v49 = vpop.permute.xlu1 %844 }
 0x294   : > { %15468 = vmatmul.mubr.msk.f32.vlgmr.msra.gmra.mrb[58].mxu0 %vm1450_vm0, %v19474_v5 }
 0x295   : > { %16466 = vmatpush3.bf16.xpose.msk.msra.mxu0 %vm18827_vm1, %v23386_v43  ;;  %15481 = vmatprep.mubr.msk.f32.mxu0 %vm1450_vm0, %v18872_v50  ;;  %v23387_v50 = vld [vmem:[#allocation15_spill] sm:$0xff] }
 0x296   : > { %822 = vrot.lane.b32.xlu0 %v19062_v42, %s18561_s6  ;;  %856 = vrot.lane.b32.xlu1 %v19068_v57, %s18562_s9 }
 0x297   : > { %v19628_v59 = vpop.permute.xlu0 %778  ;;  %v17180_v51 = vpop.permute.xlu1 %17179 }
 0x298   : > { %v17182_v16 = vunpack.i.h.bf16 %v17180_v51  ;;  %v17181_v46 = vunpack.i.l.bf16 %v17180_v51  ;;  %15475 = vmatmul.mubr.msk.f32.vlgmr.msra.gmra.mrb[50].mxu1 %vm1450_vm0, %v19489_v47 }
 0x299   : > { %15488 = vmatprep.mubr.msk.f32.mxu1 %vm1450_vm0, %v651_v21 }
 0x29a   : > { %v16467_v5 = vpack.c.bf16 %v17182_v16, %v17181_v46  ;;  %854 = vrot.lane.b32.xlu0 %v19062_v42, %s18562_s9  ;;  %17254 = vrot.lane.b32.xlu1 %v23387_v50, %s18556_s21 }
 0x29b   : > { %v19637_v30 = vpop.permute.xlu0 %810  ;;  %v17185_v14 = vpop.permute.xlu1 %17184 }
 0x29c   : > { %v17187_v22 = vunpack.i.h.bf16 %v17185_v14  ;;  %v17186_v45 = vunpack.i.l.bf16 %v17185_v14  ;;  %15482 = vmatmul.mubr.msk.f32.vlgmr.msra.gmra.mrb[60].mxu0 %vm1450_vm0, %v18876_v52  ;;  %16469 = vmatprep.subr.msk.bf16.mxu1 %vm18827_vm1, %v16467_v5 }
 0x29d   : > { %16472 = vmatpush3.bf16.xpose.msk.msra.mxu1 %vm18827_vm1, %v16467_v5  ;;  %15495 = vmatprep.mubr.msk.f32.mxu0 %vm1450_vm0, %v683_v13 }
 0x29e   : > { %v16473_v47 = vpack.c.bf16 %v17187_v22, %v17186_v45  ;;  %17244 = vrot.lane.b32.xlu0 %v18926_v60, %s18559_s8  ;;  %17259 = vrot.lane.b32.xlu1 %v23387_v50, %s18557_s23 }
 0x29f   : > { %v19650_v53 = vpop.permute.xlu0 %842  ;;  %v17200_v40 = vpop.permute.xlu1 %17199 }
 0x2a0   : > { %16475 = vmatprep.subr.msk.bf16.mxu0 %vm18827_vm1, %v16473_v47  ;;  %v17202_v62 = vunpack.i.h.bf16 %v17200_v40  ;;  %v17201_v35 = vunpack.i.l.bf16 %v17200_v40 }
 0x2a1   : > { %16478 = vmatpush3.bf16.xpose.msk.msra.mxu0 %vm18827_vm1, %v16473_v47 }
 0x2a2   : > { %17269 = vrot.lane.b32.xlu0 %v23387_v50, %s18559_s8  ;;  %17264 = vrot.lane.b32.xlu1 %v23387_v50, %s18558_s7 }
 0x2a3   : > { %v17190_v52 = vpop.permute.xlu0 %17189  ;;  %v17210_v31 = vpop.permute.xlu1 %17209 }
 0x2a4   : > { %v17192_v32 = vunpack.i.h.bf16 %v17190_v52  ;;  %v17191_v36 = vunpack.i.l.bf16 %v17190_v52  ;;  %15489 = vmatmul.mubr.msk.f32.vlgmr.msra.gmra.mrb[52].mxu1 %vm1450_vm0, %v19543_v24  ;;  %v16491_v24 = vpack.c.bf16 %v17202_v62, %v17201_v35 }
 0x2a5   : > { %15502 = vmatprep.mubr.msk.f32.mxu1 %vm1450_vm0, %v715_v44  ;;  %v17212_v44 = vunpack.i.h.bf16 %v17210_v31 }
 0x2a6   : > { %v16479_v7 = vpack.c.bf16 %v17192_v32, %v17191_v36  ;;  %17279 = vrot.lane.b32.xlu0 %v19002_v20, %s18560_s30  ;;  %17274 = vrot.lane.b32.xlu1 %v18926_v60, %s18560_s30 }
 0x2a7   : > { %v17195_v55 = vpop.permute.xlu0 %17194  ;;  %v19667_v9 = vpop.permute.xlu1 %656 }
 0x2a8   : > { %v17197_v33 = vunpack.i.h.bf16 %v17195_v55  ;;  %v17196_v63 = vunpack.i.l.bf16 %v17195_v55  ;;  %15496 = vmatmul.mubr.msk.f32.vlgmr.msra.gmra.mrb[62].mxu0 %vm1450_vm0, %v19552_v3  ;;  %16481 = vmatprep.subr.msk.bf16.mxu1 %vm18827_vm1, %v16479_v7 }
 0x2a9   : > { %16484 = vmatpush3.bf16.xpose.msk.msra.mxu1 %vm18827_vm1, %v16479_v7  ;;  %15509 = vmatprep.mubr.msk.f32.mxu0 %vm1450_vm0, %v747_v28  ;;  %v17211_v28 = vunpack.i.l.bf16 %v17210_v31 }
 0x2aa   : > { %v16485_v21 = vpack.c.bf16 %v17197_v33, %v17196_v63  ;;  %17289 = vrot.lane.b32.xlu0 %v18926_v60, %s18561_s6  ;;  %17284 = vrot.lane.b32.xlu1 %v23387_v50, %s18560_s30 }
 0x2ab   : > { %16493 = vmatprep.subr.msk.bf16.mxu1 %vm18827_vm1, %v16491_v24  ;;  %v17205_v3 = vpop.permute.xlu0 %17204  ;;  %v19682_v41 = vpop.permute.xlu1 %688  ;;  %v16503_v5 = vpack.c.bf16 %v17212_v44, %v17211_v28 }
 0x2ac   : > { %v17207_v13 = vunpack.i.h.bf16 %v17205_v3  ;;  %v17206_v43 = vunpack.i.l.bf16 %v17205_v3  ;;  %16487 = vmatprep.subr.msk.bf16.mxu0 %vm18827_vm1, %v16485_v21 }
 0x2ad   : > { %16490 = vmatpush3.bf16.xpose.msk.msra.mxu0 %vm18827_vm1, %v16485_v21 }
 0x2ae   : > { %v16497_v51 = vpack.c.bf16 %v17207_v13, %v17206_v43  ;;  %17299 = vrot.lane.b32.xlu0 %v19002_v20, %s18561_s6  ;;  %17294 = vrot.lane.b32.xlu1 %v18926_v60, %s18562_s9 }
 0x2af   : > { %v655_v16 = vpop.permute.xlu0 %654  ;;  %v19692_v46 = vpop.permute.xlu1 %720 }
 0x2b0   : > { %15503 = vmatmul.mubr.msk.f32.vlgmr.msra.gmra.mrb[54].mxu1 %vm1450_vm0, %v19564_v26  ;;  %16499 = vmatprep.subr.msk.bf16.mxu0 %vm18827_vm1, %v16497_v51 }
 0x2b1   : > { %16496 = vmatpush3.bf16.xpose.msk.msra.mxu1 %vm18827_vm1, %v16491_v24  ;;  %15516 = vmatprep.mubr.msk.f32.mxu1 %vm1450_vm0, %v19628_v59 }
 0x2b2   : > { %17309 = vrot.lane.b32.xlu0 %v19002_v20, %s18562_s9  ;;  %17304 = vrot.lane.b32.xlu1 %v23387_v50, %s18561_s6  ;;  %v23388_v20 = vld [vmem:[#allocation13_spill] sm:$0xff] }
 0x2b3   : > { %16505 = vmatprep.subr.msk.bf16.mxu1 %vm18827_vm1, %v16503_v5  ;;  %v687_v60 = vpop.permute.xlu0 %686  ;;  %v19708_v26 = vpop.permute.xlu1 %752 }
 0x2b4   : > { %15510 = vmatmul.mubr.msk.f32.vlgmr.msra.gmra.mrb[64].mxu0 %vm1450_vm0, %v19574_v39 }
 0x2b5   : > { %16502 = vmatpush3.bf16.xpose.msk.msra.mxu0 %vm18827_vm1, %v16497_v51  ;;  %15523 = vmatprep.mubr.msk.f32.mxu0 %vm1450_vm0, %v19637_v30 }
 0x2b6   : > { %17319 = vrot.lane.b32.xlu0 %v19222_v61, %s18556_s21  ;;  %17314 = vrot.lane.b32.xlu1 %v23387_v50, %s18562_s9 }
 0x2b7   : > { %16511 = vmatprep.subr.msk.bf16.mxu0 %vm18827_vm1, %v23388_v20  ;;  %v719_v59 = vpop.permute.xlu0 %718  ;;  %v19723_v14 = vpop.permute.xlu1 %784 }
 0x2b8   : > { %15517 = vmatmul.mubr.msk.f32.vlgmr.msra.gmra.mrb[56].mxu1 %vm1450_vm0, %v19590_v34 }
 0x2b9   : > { %16508 = vmatpush3.bf16.xpose.msk.msra.mxu1 %vm18827_vm1, %v16503_v5  ;;  %15530 = vmatprep.mubr.msk.f32.mxu1 %vm1450_vm0, %v19650_v53 }
 0x2ba   : > { %17329 = vrot.lane.b32.xlu0 %v19264_v23, %s18556_s21  ;;  %17324 = vrot.lane.b32.xlu1 %v19242_v18, %s18556_s21 }
 0x2bb   : > { %v751_v39 = vpop.permute.xlu0 %750  ;;  %v19735_v50 = vpop.permute.xlu1 %816 }
 0x2bc   : > { %15524 = vmatmul.mubr.msk.f32.vlgmr.msra.gmra.mrb[66].mxu0 %vm1450_vm0, %v19604_v1 }
 0x2bd   : > { %16514 = vmatpush3.bf16.xpose.msk.msra.mxu0 %vm18827_vm1, %v23388_v20  ;;  %15537 = vmatprep.mubr.msk.f32.mxu0 %vm1450_vm0, %v18918_v56 }
 0x2be   : > { %17339 = vrot.lane.b32.xlu0 %v19310_v48, %s18556_s21  ;;  %17334 = vrot.lane.b32.xlu1 %v19286_v27, %s18556_s21 }
 0x2bf   : > { %v783_v34 = vpop.permute.xlu0 %782  ;;  %v19748_v30 = vpop.permute.xlu1 %848 }
 0x2c0   : > { %15531 = vmatmul.mubr.msk.f32.vlgmr.msra.gmra.mrb[58].mxu1 %vm1450_vm0, %v19615_v49 }
 0x2c1   : > { %15544 = vmatprep.mubr.msk.f32.mxu1 %vm1450_vm0, %v655_v16 }
 0x2c2   : > { %17349 = vrot.lane.b32.xlu0 %v19357_v25, %s18556_s21  ;;  %17344 = vrot.lane.b32.xlu1 %v19335_v54, %s18556_s21 }
 0x2c3   : > { %v19757_v56 = vpop.permute.xlu0 %814  ;;  %v17215_v1 = vpop.permute.xlu1 %17214 }
 0x2c4   : > { %v17217_v22 = vunpack.i.h.bf16 %v17215_v1  ;;  %v17216_v45 = vunpack.i.l.bf16 %v17215_v1  ;;  %15538 = vmatmul.mubr.msk.f32.vlgmr.msra.gmra.mrb[68].mxu0 %vm1450_vm0, %v18920_v58 }
 0x2c5   : > { %15551 = vmatprep.mubr.msk.f32.mxu0 %vm1450_vm0, %v687_v60 }
 0x2c6   : > { %v16515_v47 = vpack.c.bf16 %v17217_v22, %v17216_v45  ;;  %17359 = vrot.lane.b32.xlu0 %v19222_v61, %s18557_s23  ;;  %17354 = vrot.lane.b32.xlu1 %v19380_v38, %s18556_s21 }
 0x2c7   : > { %v19766_v49 = vpop.permute.xlu0 %846  ;;  %v17225_v53 = vpop.permute.xlu1 %17224 }
 0x2c8   : > { %v17227_v40 = vunpack.i.h.bf16 %v17225_v53  ;;  %v17226_v52 = vunpack.i.l.bf16 %v17225_v53  ;;  %16517 = vmatprep.subr.msk.bf16.mxu1 %vm18827_vm1, %v16515_v47 }
 0x2c9   : > { %16520 = vmatpush3.bf16.xpose.msk.msra.mxu1 %vm18827_vm1, %v16515_v47 }
 0x2ca   : > { %v16527_v58 = vpack.c.bf16 %v17227_v40, %v17226_v52  ;;  %17369 = vrot.lane.b32.xlu0 %v19264_v23, %s18557_s23  ;;  %17364 = vrot.lane.b32.xlu1 %v19242_v18, %s18557_s23 }
 0x2cb   : > { %v17220_v31 = vpop.permute.xlu0 %17219  ;;  %v19776_v32 = vpop.permute.xlu1 %660 }
 0x2cc   : > { %v17222_v36 = vunpack.i.h.bf16 %v17220_v31  ;;  %v17221_v62 = vunpack.i.l.bf16 %v17220_v31  ;;  %16529 = vmatprep.subr.msk.bf16.mxu1 %vm18827_vm1, %v16527_v58 }
 0x2ce   : > { %v16521_v35 = vpack.c.bf16 %v17222_v36, %v17221_v62  ;;  %17379 = vrot.lane.b32.xlu0 %v19310_v48, %s18557_s23  ;;  %17374 = vrot.lane.b32.xlu1 %v19286_v27, %s18557_s23 }
 0x2cf   : > { %v19784_v7 = vpop.permute.xlu0 %658  ;;  %v19786_v55 = vpop.permute.xlu1 %692 }
 0x2d0   : > { %15545 = vmatmul.mubr.msk.f32.vlgmr.msra.gmra.mrb[60].mxu1 %vm1450_vm0, %v19667_v9  ;;  %16523 = vmatprep.subr.msk.bf16.mxu0 %vm18827_vm1, %v16521_v35 }
 0x2d1   : > { %16526 = vmatpush3.bf16.xpose.msk.msra.mxu0 %vm18827_vm1, %v16521_v35  ;;  %16532 = vmatpush3.bf16.xpose.msk.msra.mxu1 %vm18827_vm1, %v16527_v58 }
 0x2d2   : > { %15558 = vmatprep.mubr.msk.f32.mxu1 %vm1450_vm0, %v719_v59  ;;  %17389 = vrot.lane.b32.xlu0 %v19357_v25, %s18557_s23 }
 0x2d3   : > { %17384 = vrot.lane.b32.xlu1 %v19335_v54, %s18557_s23  ;;  %v19801_v33 = vpop.permute.xlu0 %690  ;;  %v19803_v9 = vpop.permute.xlu1 %724 }
 0x2d6   : > { %17399 = vrot.lane.b32.xlu0 %v19222_v61, %s18558_s7  ;;  %v19807_v63 = vpop.f32.mrb[18].mxu1 }
 0x2d7   : > { %17394 = vrot.lane.b32.xlu1 %v19380_v38, %s18557_s23  ;;  %v19811_v24 = vpop.permute.xlu0 %722  ;;  %v19813_v21 = vpop.permute.xlu1 %756 }
 0x2d8   : > { %v19815_v3 = vpop.f32.mrb[19].mxu1  ;;  %15552 = vmatmul.mubr.msk.f32.vlgmr.msra.gmra.mrb[70].mxu0 %vm1450_vm0, %v19682_v41  ;;  %15559 = vmatmul.mubr.msk.f32.vlgmr.msra.gmra.mrb[62].mxu1 %vm1450_vm0, %v19692_v46 }
 0x2d9   : > { %23389 = vst [vmem:[#allocation12_spill] sm:$0xff] %v19815_v3  ;;  %15565 = vmatprep.mubr.msk.f32.mxu0 %vm1450_vm0, %v751_v39  ;;  %15572 = vmatprep.mubr.msk.f32.mxu1 %vm1450_vm0, %v783_v34 }
 0x2da   : > { %17409 = vrot.lane.b32.xlu0 %v19264_v23, %s18558_s7 }
 0x2db   : > { %17404 = vrot.lane.b32.xlu1 %v19242_v18, %s18558_s7  ;;  %v19827_v13 = vpop.permute.xlu0 %754  ;;  %v19829_v43 = vpop.permute.xlu1 %788 }
 0x2de   : > { %17419 = vrot.lane.b32.xlu0 %v19310_v48, %s18558_s7  ;;  %v19833_v41 = vpop.f32.mrb[20].mxu1 }
 0x2df   : > { %23390 = vst [vmem:[#allocation15_spill] sm:$0xff] %v19833_v41  ;;  %17414 = vrot.lane.b32.xlu1 %v19286_v27, %s18558_s7  ;;  %v19837_v44 = vpop.permute.xlu0 %786  ;;  %v19839_v28 = vpop.permute.xlu1 %820 }
 0x2e0   : > { %v19841_v51 = vpop.f32.mrb[21].mxu1 }
 0x2e1   : > { %23391 = vst [vmem:[#allocation13_spill] sm:$0xff] %v19841_v51 }
 0x2e2   : > { %17429 = vrot.lane.b32.xlu0 %v19357_v25, %s18558_s7  ;;  %v19845_v16 = vpop.f32.mrb[32].mxu0 }
 0x2e3   : > { %17424 = vrot.lane.b32.xlu1 %v19335_v54, %s18558_s7  ;;  %v19849_v46 = vpop.permute.xlu0 %818  ;;  %v19851_v5 = vpop.f32.mrb[33].mxu0 }
 0x2e4   : > { %23392 = vst [vmem:[#allocation31_spill] sm:$0xff] %v19851_v5  ;;  %v19853_v60 = vpop.permute.xlu1 %852 }
 0x2e6   : > { %17439 = vrot.lane.b32.xlu0 %v19222_v61, %s18559_s8  ;;  %v19857_v20 = vpop.f32.mrb[22].mxu1 }
 0x2e7   : > { %23393 = vst [vmem:[#allocation32_spill] sm:$0xff] %v19857_v20  ;;  %17434 = vrot.lane.b32.xlu1 %v19380_v38, %s18558_s7  ;;  %v19861_v59 = vpop.permute.xlu0 %850  ;;  %v19863_v39 = vpop.f32.mrb[23].mxu1 }
 0x2e8   : > { %23394 = vst [vmem:[#allocation33_spill] sm:$0xff] %v19863_v39  ;;  %v19865_v34 = vpop.permute.xlu1 %17234 }
 0x2ea   : > { %17449 = vrot.lane.b32.xlu0 %v19264_v23, %s18559_s8  ;;  %v19869_v1 = vpop.f32.mrb[34].mxu0 }
 0x2eb   : > { %23395 = vst [vmem:[#allocation34_spill] sm:$0xff] %v19869_v1  ;;  %17444 = vrot.lane.b32.xlu1 %v19242_v18, %s18559_s8  ;;  %v19873_v22 = vpop.permute.xlu0 %17229  ;;  %v19875_v45 = vpop.f32.mrb[35].mxu0 }
 0x2ec   : > { %23396 = vst [vmem:[#allocation35_spill] sm:$0xff] %v19875_v45  ;;  %v19877_v47 = vpop.permute.xlu1 %17249 }
 0x2ee   : > { %17459 = vrot.lane.b32.xlu0 %v19310_v48, %s18559_s8  ;;  %v19881_v53 = vpop.f32.mrb[24].mxu1 }
 0x2ef   : > { %23397 = vst [vmem:[#allocation36_spill] sm:$0xff] %v19881_v53  ;;  %17454 = vrot.lane.b32.xlu1 %v19286_v27, %s18559_s8  ;;  %v19885_v40 = vpop.permute.xlu0 %17239  ;;  %v19887_v52 = vpop.f32.mrb[25].mxu1 }
 0x2f0   : > { %23398 = vst [vmem:[#allocation37_spill] sm:$0xff] %v19887_v52  ;;  %v19889_v58 = vpop.permute.xlu1 %664 }
 0x2f2   : > { %17469 = vrot.lane.b32.xlu0 %v19357_v25, %s18559_s8  ;;  %v19893_v31 = vpop.f32.mrb[36].mxu0 }
 0x2f3   : > { %23399 = vst [vmem:[#allocation38_spill] sm:$0xff] %v19893_v31  ;;  %17464 = vrot.lane.b32.xlu1 %v19335_v54, %s18559_s8  ;;  %v19897_v36 = vpop.permute.xlu0 %662  ;;  %v19899_v62 = vpop.f32.mrb[37].mxu0 }
 0x2f4   : > { %23400 = vst [vmem:[#allocation39_spill] sm:$0xff] %v19899_v62  ;;  %v19901_v35 = vpop.permute.xlu1 %696 }
 0x2f6   : > { %17479 = vrot.lane.b32.xlu0 %v19222_v61, %s18560_s30  ;;  %v19905_v11 = vpop.f32.mrb[26].mxu1 }
 0x2f7   : > { %23401 = vst [vmem:[#allocation40_spill] sm:$0xff] %v19905_v11  ;;  %17474 = vrot.lane.b32.xlu1 %v19380_v38, %s18559_s8  ;;  %v19909_v10 = vpop.permute.xlu0 %694  ;;  %v19911_v8 = vpop.f32.mrb[27].mxu1 }
 0x2f8   : > { %23402 = vst [vmem:[#allocation41_spill] sm:$0xff] %v19911_v8  ;;  %v19913_v6 = vpop.permute.xlu1 %728 }
 0x2fa   : > { %17489 = vrot.lane.b32.xlu0 %v19264_v23, %s18560_s30 }
 0x2fb   : > { %17484 = vrot.lane.b32.xlu1 %v19242_v18, %s18560_s30 }
 0x2fc   : > { %v19919_v4 = vpop.permute.xlu0 %726  ;;  %v19921_v2 = vpop.permute.xlu1 %760 }
 0x2fd   : > { %23403 = vst [vmem:[#allocation42_spill] sm:$0xff] %v19921_v2 }
 0x2fe   : > { %17499 = vrot.lane.b32.xlu0 %v19310_v48, %s18560_s30  ;;  %v19925_v19 = vpop.f32.mrb[28].mxu1 }
 0x2ff   : > { %23404 = vst [vmem:[#allocation43_spill] sm:$0xff] %v19925_v19  ;;  %17494 = vrot.lane.b32.xlu1 %v19286_v27, %s18560_s30  ;;  %v19929_v8 = vpop.f32.mrb[29].mxu1 }
 0x300   : > { %23405 = vst [vmem:[#allocation44_spill] sm:$0xff] %v19929_v8  ;;  %v19931_v52 = vpop.permute.xlu0 %758  ;;  %v19933_v62 = vpop.permute.xlu1 %792 }
 0x301   : > { %23406 = vst [vmem:[#allocation45_spill] sm:$0xff] %v19933_v62 }
 0x302   : > { %17509 = vrot.lane.b32.xlu0 %v19357_v25, %s18560_s30  ;;  %v19937_v39 = vpop.f32.mrb[38].mxu0 }
 0x303   : > { %23407 = vst [vmem:[#allocation46_spill] sm:$0xff] %v19937_v39  ;;  %17504 = vrot.lane.b32.xlu1 %v19335_v54, %s18560_s30  ;;  %v19941_v45 = vpop.f32.mrb[39].mxu0 }
 0x304   : > { %23408 = vst [vmem:[#allocation47_spill] sm:$0xff] %v19941_v45  ;;  %v19943_v51 = vpop.permute.xlu0 %790  ;;  %v19945_v5 = vpop.permute.xlu1 %824 }
 0x305   : > { %23409 = vst [vmem:[#allocation48_spill] sm:$0xff] %v19943_v51  ;;  %23410 = vst [vmem:[#allocation49_spill] sm:$0xff] %v19945_v5 }
 0x306   : > { %17519 = vrot.lane.b32.xlu0 %v19222_v61, %s18561_s6  ;;  %v19949_v8 = vpop.f32.mrb[30].mxu1 }
 0x307   : > { %23411 = vst [vmem:[#allocation50_spill] sm:$0xff] %v19949_v8  ;;  %17514 = vrot.lane.b32.xlu1 %v19380_v38, %s18560_s30  ;;  %v19953_v3 = vpop.f32.mrb[31].mxu1 }
 0x308   : > { %23412 = vst [vmem:[#allocation51_spill] sm:$0xff] %v19953_v3  ;;  %v19955_v19 = vpop.permute.xlu0 %822  ;;  %v19957_v62 = vpop.permute.xlu1 %856 }
 0x309   : > { %23413 = vst [vmem:[#allocation52_spill] sm:$0xff] %v19955_v19  ;;  %23414 = vst [vmem:[#allocation53_spill] sm:$0xff] %v19957_v62 }
 0x30a   : > { %17529 = vrot.lane.b32.xlu0 %v19264_v23, %s18561_s6  ;;  %v19961_v45 = vpop.f32.mrb[40].mxu0 }
 0x30b   : > { %23415 = vst [vmem:[#allocation54_spill] sm:$0xff] %v19961_v45  ;;  %17524 = vrot.lane.b32.xlu1 %v19242_v18, %s18561_s6  ;;  %v19965_v5 = vpop.f32.mrb[41].mxu0 }
 0x30c   : > { %23416 = vst [vmem:[#allocation55_spill] sm:$0xff] %v19965_v5  ;;  %v19967_v8 = vpop.permute.xlu0 %854  ;;  %v19969_v29 = vpop.permute.xlu1 %17254  ;;  %v23469_v0 = vld [vmem:[#allocation49_spill] sm:$0xff] }
 0x30d   : > { %23417 = vst [vmem:[#allocation56_spill] sm:$0xff] %v19967_v8 }
 0x30e   : > { %17539 = vrot.lane.b32.xlu0 %v19310_v48, %s18561_s6  ;;  %v19973_v3 = vpop.f32.mrb[32].mxu1 }
 0x30f   : > { %23418 = vst [vmem:[#allocation57_spill] sm:$0xff] %v19973_v3  ;;  %17534 = vrot.lane.b32.xlu1 %v19286_v27, %s18561_s6  ;;  %v19977_v23 = vpop.f32.mrb[33].mxu1 }
 0x310   : > { %23419 = vst [vmem:[#allocation58_spill] sm:$0xff] %v19977_v23  ;;  %v17245_v62 = vpop.permute.xlu0 %17244  ;;  %v19979_v45 = vpop.permute.xlu1 %17259 }
 0x311   : > { %v17247_v19 = vunpack.i.h.bf16 %v17245_v62  ;;  %v17246_v2 = vunpack.i.l.bf16 %v17245_v62 }
 0x312   : > { %17549 = vrot.lane.b32.xlu0 %v19357_v25, %s18561_s6  ;;  %v19983_v5 = vpop.f32.mrb[42].mxu0 }
 0x313   : > { %23420 = vst [vmem:[#allocation59_spill] sm:$0xff] %v19983_v5  ;;  %v16533_v8 = vpack.c.bf16 %v17247_v19, %v17246_v2  ;;  %17544 = vrot.lane.b32.xlu1 %v19335_v54, %s18561_s6  ;;  %v19987_v48 = vpop.f32.mrb[43].mxu0 }
 0x314   : > { %23421 = vst [vmem:[#allocation60_spill] sm:$0xff] %v19987_v48  ;;  %v19989_v3 = vpop.permute.xlu0 %17269  ;;  %v19991_v27 = vpop.permute.xlu1 %17264 }
 0x315   : > { %16535 = vmatprep.subr.msk.bf16.mxu0 %vm18827_vm1, %v16533_v8 }
 0x316   : > { %16538 = vmatpush3.bf16.xpose.msk.msra.mxu0 %vm18827_vm1, %v16533_v8  ;;  %17559 = vrot.lane.b32.xlu0 %v19222_v61, %s18562_s9  ;;  %v19999_v62 = vpop.f32.mrb[34].mxu1 }
 0x317   : > { %23422 = vst [vmem:[#allocation61_spill] sm:$0xff] %v19999_v62  ;;  %17554 = vrot.lane.b32.xlu1 %v19380_v38, %s18561_s6  ;;  %v20003_v19 = vpop.f32.mrb[35].mxu1  ;;  %v17232_v38 = vunpack.i.h.bf16 %v19873_v22 }
 0x318   : > { %23423 = vst [vmem:[#allocation62_spill] sm:$0xff] %v20003_v19  ;;  %v20005_v2 = vpop.permute.xlu0 %17279  ;;  %v17275_v54 = vpop.permute.xlu1 %17274 }
 0x319   : > { %v17277_v25 = vunpack.i.h.bf16 %v17275_v54  ;;  %v17276_v23 = vunpack.i.l.bf16 %v17275_v54 }
 0x31a   : > { %v20007_v48 = vpop.f32.mrb[44].mxu0 }
 0x31b   : > { %23424 = vst [vmem:[#allocation63_spill] sm:$0xff] %v20007_v48  ;;  %v16539_v5 = vpack.c.bf16 %v17277_v25, %v17276_v23  ;;  %v20009_v11 = vpop.f32.mrb[45].mxu0 }
 0x31c   : > { %23425 = vst [vmem:[#allocation64_spill] sm:$0xff] %v20009_v11  ;;  %v17290_v8 = vpop.permute.xlu0 %17289  ;;  %v20011_v51 = vpop.permute.xlu1 %17284 }
 0x31d   : > { %v17292_v61 = vunpack.i.h.bf16 %v17290_v8  ;;  %v17291_v62 = vunpack.i.l.bf16 %v17290_v8  ;;  %15566 = vmatmul.mubr.msk.f32.vlgmr.msra.gmra.mrb[72].mxu0 %vm1450_vm0, %v19708_v26  ;;  %16541 = vmatprep.subr.msk.bf16.mxu1 %vm18827_vm1, %v16539_v5  ;;  %v17231_v8 = vunpack.i.l.bf16 %v19873_v22 }
 0x31e   : > { %16544 = vmatpush3.bf16.xpose.msk.msra.mxu1 %vm18827_vm1, %v16539_v5  ;;  %15579 = vmatprep.mubr.msk.f32.mxu0 %vm1450_vm0, %v19757_v56  ;;  %v23426_v5 = vld [vmem:[#allocation14_spill] sm:$0xff]  ;;  %v17237_v56 = vunpack.i.h.bf16 %v19865_v34 }
 0x31f   : > { %v16545_v23 = vpack.c.bf16 %v17292_v61, %v17291_v62  ;;  %v17236_v62 = vunpack.i.l.bf16 %v19865_v34  ;;  %v16563_v61 = vpack.c.bf16 %v17232_v38, %v17231_v8  ;;  %v17242_v34 = vunpack.i.h.bf16 %v19885_v40 }
 0x320   : > { %v20021_v54 = vpop.permute.xlu0 %17299  ;;  %v17295_v25 = vpop.permute.xlu1 %17294  ;;  %v17241_v38 = vunpack.i.l.bf16 %v19885_v40 }
 0x321   : > { %v17297_v19 = vunpack.i.h.bf16 %v17295_v25  ;;  %v17296_v48 = vunpack.i.l.bf16 %v17295_v25  ;;  %16547 = vmatprep.subr.msk.bf16.mxu0 %vm18827_vm1, %v16545_v23 }
 0x322   : > { %16550 = vmatpush3.bf16.xpose.msk.msra.mxu0 %vm18827_vm1, %v16545_v23  ;;  %v17251_v23 = vunpack.i.l.bf16 %v19877_v47  ;;  %v16575_v25 = vpack.c.bf16 %v17242_v34, %v17241_v38  ;;  %v17301_v34 = vunpack.i.l.bf16 %v20021_v54 }
 0x323   : > { %v16551_v26 = vpack.c.bf16 %v17297_v19, %v17296_v48  ;;  %16559 = vmatprep.subr.msk.bf16.mxu0 %vm18827_vm1, %v23426_v5  ;;  %v16569_v48 = vpack.c.bf16 %v17237_v56, %v17236_v62 }
 0x324   : > { %v17310_v22 = vpop.permute.xlu0 %17309 }
 0x325   : > { %15573 = vmatmul.mubr.msk.f32.vlgmr.msra.gmra.mrb[64].mxu1 %vm1450_vm0, %v19723_v14  ;;  %16553 = vmatprep.subr.msk.bf16.mxu1 %vm18827_vm1, %v16551_v26 }
 0x326   : > { %16556 = vmatpush3.bf16.xpose.msk.msra.mxu1 %vm18827_vm1, %v16551_v26  ;;  %15586 = vmatprep.mubr.msk.f32.mxu1 %vm1450_vm0, %v19766_v49  ;;  %v20055_v49 = vpop.permute.xlu1 %17304 }
 0x327   : > { %16565 = vmatprep.subr.msk.bf16.mxu1 %vm18827_vm1, %v16563_v61 }
 0x328   : > { %v20061_v40 = vpop.permute.xlu0 %17319 }
 0x329   : > { %15580 = vmatmul.mubr.msk.f32.vlgmr.msra.gmra.mrb[74].mxu0 %vm1450_vm0, %v19735_v50  ;;  %v17252_v50 = vunpack.i.h.bf16 %v19877_v47  ;;  %v17282_v47 = vunpack.i.h.bf16 %v20005_v2 }
 0x32a   : > { %16562 = vmatpush3.bf16.xpose.msk.msra.mxu0 %vm18827_vm1, %v23426_v5  ;;  %15593 = vmatprep.mubr.msk.f32.mxu0 %vm1450_vm0, %v18994_v15  ;;  %v20053_v14 = vpop.f32.mrb[36].mxu1  ;;  %v17281_v5 = vunpack.i.l.bf16 %v20005_v2  ;;  %v20079_v56 = vpop.permute.xlu1 %17314  ;;  %v6766_v2 = vsel %vm1450_vm0, %v19393_v12, -inf }
 0x32b   : > { %16571 = vmatprep.subr.msk.bf16.mxu0 %vm18827_vm1, %v16569_v48  ;;  %v20059_v19 = vpop.f32.mrb[37].mxu1  ;;  %v16581_v26 = vpack.c.bf16 %v17252_v50, %v17251_v23  ;;  %v17312_v23 = vunpack.i.h.bf16 %v17310_v22 }
 0x32d   : > { %15587 = vmatmul.mubr.msk.f32.vlgmr.msra.gmra.mrb[66].mxu1 %vm1450_vm0, %v19748_v30  ;;  %v20083_v30 = vpop.permute.xlu0 %17329 }
 0x32e   : > { %16568 = vmatpush3.bf16.xpose.msk.msra.mxu1 %vm18827_vm1, %v16563_v61  ;;  %15600 = vmatprep.mubr.msk.f32.mxu1 %vm1450_vm0, %v19784_v7  ;;  %v20071_v15 = vpop.f32.mrb[46].mxu0  ;;  %23429 = vst [vmem:[#allocation66_spill] sm:$0xff] %v20083_v30  ;;  %v16587_v61 = vpack.c.bf16 %v17282_v47, %v17281_v5 }
 0x32f   : > { %23427 = vst [vmem:[#allocation14_spill] sm:$0xff] %v20071_v15  ;;  %16577 = vmatprep.subr.msk.bf16.mxu1 %vm18827_vm1, %v16575_v25  ;;  %v20075_v8 = vpop.f32.mrb[47].mxu0 }
 0x330   : > { %23428 = vst [vmem:[#allocation65_spill] sm:$0xff] %v20075_v8 }
 0x331   : > { %15594 = vmatmul.mubr.msk.f32.vlgmr.msra.gmra.mrb[76].mxu0 %vm1450_vm0, %v18996_v17  ;;  %v17302_v17 = vunpack.i.h.bf16 %v20021_v54  ;;  %v20113_v54 = vpop.permute.xlu0 %17339 }
 0x332   : > { %16574 = vmatpush3.bf16.xpose.msk.msra.mxu0 %vm18827_vm1, %v16569_v48  ;;  %15607 = vmatprep.mubr.msk.f32.mxu0 %vm1450_vm0, %v19801_v33  ;;  %v20089_v7 = vpop.f32.mrb[38].mxu1  ;;  %v20107_v48 = vpop.permute.xlu1 %17324  ;;  %23432 = vst [vmem:[#allocation69_spill] sm:$0xff] %v20113_v54 }
 0x333   : > { %16583 = vmatprep.subr.msk.bf16.mxu0 %vm18827_vm1, %v16581_v26  ;;  %v20093_v62 = vpop.f32.mrb[39].mxu1  ;;  %23431 = vst [vmem:[#allocation68_spill] sm:$0xff] %v20107_v48  ;;  %v16593_v50 = vpack.c.bf16 %v17302_v17, %v17301_v34  ;;  %v17256_v17 = vunpack.i.l.bf16 %v19969_v29 }
 0x335   : > { %6767 = vmax.xlane.f32.xlu0 %v6766_v2  ;;  %15601 = vmatmul.mubr.msk.f32.vlgmr.msra.gmra.mrb[68].mxu1 %vm1450_vm0, %v19776_v32  ;;  %v17311_v32 = vunpack.i.l.bf16 %v17310_v22 }
 0x336   : > { %16580 = vmatpush3.bf16.xpose.msk.msra.mxu1 %vm18827_vm1, %v16575_v25  ;;  %15614 = vmatprep.mubr.msk.f32.mxu1 %vm1450_vm0, %v19811_v24  ;;  %v20105_v33 = vpop.f32.mrb[48].mxu0  ;;  %v6763_v24 = vsel %vm1450_vm0, %v19397_v37, -inf  ;;  %v20129_v5 = vpop.permute.xlu1 %17334 }
 0x337   : > { %23430 = vst [vmem:[#allocation67_spill] sm:$0xff] %v20105_v33  ;;  %16589 = vmatprep.subr.msk.bf16.mxu1 %vm18827_vm1, %v16587_v61  ;;  %v20111_v38 = vpop.f32.mrb[49].mxu0  ;;  %v16599_v22 = vpack.c.bf16 %v17312_v23, %v17311_v32  ;;  %23434 = vst [vmem:[#allocation71_spill] sm:$0xff] %v20129_v5  ;;  %v23438_v23 = vld [vmem:[#allocation16_spill] sm:$0xff]  ;;  %v17261_v32 = vunpack.i.l.bf16 %v19979_v45 }
 0x339   : > { %15608 = vmatmul.mubr.msk.f32.vlgmr.msra.gmra.mrb[78].mxu0 %vm1450_vm0, %v19786_v55  ;;  %v20133_v55 = vpop.permute.xlu0 %17349 }
 0x33a   : > { %16586 = vmatpush3.bf16.xpose.msk.msra.mxu0 %vm18827_vm1, %v16581_v26  ;;  %15621 = vmatprep.mubr.msk.f32.mxu0 %vm1450_vm0, %v19827_v13  ;;  %v20123_v25 = vpop.f32.mrb[40].mxu1  ;;  %23435 = vst [vmem:[#allocation72_spill] sm:$0xff] %v20133_v55  ;;  %v6772_v13 = vsel %vm1450_vm0, %v19807_v63, -inf  ;;  %v20159_v34 = vpop.permute.xlu1 %17344 }
 0x33b   : > { %23433 = vst [vmem:[#allocation70_spill] sm:$0xff] %v20123_v25  ;;  %6764 = vmax.xlane.f32.xlu1 %v6763_v24  ;;  %16595 = vmatprep.subr.msk.bf16.mxu0 %vm18827_vm1, %v16593_v50  ;;  %v20127_v47 = vpop.f32.mrb[41].mxu1  ;;  %23437 = vst [vmem:[#allocation74_spill] sm:$0xff] %v20159_v34  ;;  %v6778_v24 = vsel %vm1450_vm0, %v19833_v41, -inf }
 0x33d   : > { %15615 = vmatmul.mubr.msk.f32.vlgmr.msra.gmra.mrb[70].mxu1 %vm1450_vm0, %v19803_v9  ;;  %v17257_v9 = vunpack.i.h.bf16 %v19969_v29 }
 0x33e   : > { %16592 = vmatpush3.bf16.xpose.msk.msra.mxu1 %vm18827_vm1, %v16587_v61  ;;  %15628 = vmatprep.mubr.msk.f32.mxu1 %vm1450_vm0, %v19837_v44  ;;  %v20141_v26 = vpop.f32.mrb[50].mxu0  ;;  %v6790_v44 = vsel %vm1450_vm0, %v19845_v16, -inf }
 0x33f   : > { %6773 = vmax.xlane.f32.xlu1 %v6772_v13  ;;  %16601 = vmatprep.subr.msk.bf16.mxu1 %vm18827_vm1, %v16599_v22  ;;  %v20145_v2 = vpop.f32.mrb[51].mxu0 }
 0x341   : > { %15622 = vmatmul.mubr.msk.f32.vlgmr.msra.gmra.mrb[80].mxu0 %vm1450_vm0, %v19813_v21  ;;  %v20166_v21 = vpop.permute.xlu0 %17359 }
 0x342   : > { %16598 = vmatpush3.bf16.xpose.msk.msra.mxu0 %vm18827_vm1, %v16593_v50  ;;  %15635 = vmatprep.mubr.msk.f32.mxu0 %vm1450_vm0, %v19849_v46  ;;  %v20157_v61 = vpop.f32.mrb[42].mxu1  ;;  %v16611_v50 = vpack.c.bf16 %v17257_v9, %v17256_v17  ;;  %v17262_v46 = vunpack.i.h.bf16 %v19979_v45  ;;  %v17267_v9 = vunpack.i.h.bf16 %v19991_v27  ;;  %v17266_v45 = vunpack.i.l.bf16 %v19991_v27  ;;  %v20186_v17 = vpop.permute.xlu1 %17354 }
 0x343   : > { %23436 = vst [vmem:[#allocation73_spill] sm:$0xff] %v20157_v61  ;;  %6791 = vmax.xlane.f32.xlu1 %v6790_v44  ;;  %16607 = vmatprep.subr.msk.bf16.mxu0 %vm18827_vm1, %v23438_v23  ;;  %v20164_v29 = vpop.f32.mrb[43].mxu1  ;;  %23440 = vst [vmem:[#allocation75_spill] sm:$0xff] %v20186_v17  ;;  %v6802_v44 = vsel %vm1450_vm0, %v19869_v1, -inf  ;;  %v17361_v55 = vunpack.i.l.bf16 %v20166_v21 }
 0x344   : > { %23439 = vst [vmem:[#allocation16_spill] sm:$0xff] %v20164_v29 }
 0x345   : > { %15629 = vmatmul.mubr.msk.f32.vlgmr.msra.gmra.mrb[72].mxu1 %vm1450_vm0, %v19829_v43 }
 0x346   : > { %16604 = vmatpush3.bf16.xpose.msk.msra.mxu1 %vm18827_vm1, %v16599_v22  ;;  %15642 = vmatprep.mubr.msk.f32.mxu1 %vm1450_vm0, %v19861_v59  ;;  %v20178_v13 = vpop.f32.mrb[52].mxu0  ;;  %v16617_v59 = vpack.c.bf16 %v17262_v46, %v17261_v32  ;;  %v20190_v22 = vpop.permute.xlu0 %17369  ;;  %v17272_v46 = vunpack.i.h.bf16 %v19989_v3  ;;  %v16623_v32 = vpack.c.bf16 %v17267_v9, %v17266_v45  ;;  %v6814_v45 = vsel %vm1450_vm0, %v19893_v31, -inf }
 0x347   : > { %6779 = vmax.xlane.f32.xlu1 %v6778_v24  ;;  %16613 = vmatprep.subr.msk.bf16.mxu1 %vm18827_vm1, %v16611_v50  ;;  %v20182_v43 = vpop.f32.mrb[53].mxu0  ;;  %23441 = vst [vmem:[#allocation76_spill] sm:$0xff] %v20190_v22  ;;  %v23488_v22 = vld [vmem:[#allocation33_spill] sm:$0xff] }
 0x349   : > { %15636 = vmatmul.mubr.msk.f32.vlgmr.msra.gmra.mrb[82].mxu0 %vm1450_vm0, %v19839_v28 }
 0x34a   : > { %16610 = vmatpush3.bf16.xpose.msk.msra.mxu0 %vm18827_vm1, %v23438_v23  ;;  %15649 = vmatprep.mubr.msk.f32.mxu0 %vm1450_vm0, %v19062_v42  ;;  %v17271_v23 = vunpack.i.l.bf16 %v19989_v3  ;;  %v6784_v42 = vsel %vm1450_vm0, %v19857_v20, -inf  ;;  %v20223_v24 = vpop.permute.xlu0 %17379  ;;  %v23514_v20 = vld [vmem:[#allocation60_spill] sm:$0xff] }
 0x34b   : > { %6803 = vmax.xlane.f32.xlu1 %v6802_v44  ;;  %17564 = vrot.lane.b32.xlu0 %v19242_v18, %s18562_s9  ;;  %v20201_v27 = vpop.f32.mrb[44].mxu1  ;;  %v20217_v18 = vpop.permute.xlu1 %17364  ;;  %23445 = vst [vmem:[#allocation80_spill] sm:$0xff] %v20223_v24 }
 0x34c   : > { %23442 = vst [vmem:[#allocation77_spill] sm:$0xff] %v20201_v27  ;;  %16619 = vmatprep.subr.msk.bf16.mxu0 %vm18827_vm1, %v16617_v59  ;;  %v20205_v28 = vpop.f32.mrb[45].mxu1  ;;  %23444 = vst [vmem:[#allocation79_spill] sm:$0xff] %v20217_v18  ;;  %v16629_v9 = vpack.c.bf16 %v17272_v46, %v17271_v23  ;;  %v17307_v46 = vunpack.i.h.bf16 %v20055_v49  ;;  %v23492_v18 = vld [vmem:[#allocation39_spill] sm:$0xff] }
 0x34d   : > { %23443 = vst [vmem:[#allocation78_spill] sm:$0xff] %v20205_v28  ;;  %15643 = vmatmul.mubr.msk.f32.vlgmr.msra.gmra.mrb[74].mxu1 %vm1450_vm0, %v19853_v60 }
 0x34e   : > { %16616 = vmatpush3.bf16.xpose.msk.msra.mxu1 %vm18827_vm1, %v16611_v50  ;;  %15656 = vmatprep.mubr.msk.f32.mxu1 %vm1450_vm0, %v19897_v36  ;;  %v17287_v50 = vunpack.i.h.bf16 %v20011_v51  ;;  %v17286_v36 = vunpack.i.l.bf16 %v20011_v51  ;;  %v17306_v51 = vunpack.i.l.bf16 %v20055_v49 }
 0x34f   : > { %6785 = vmax.xlane.f32.xlu1 %v6784_v42  ;;  %16625 = vmatprep.subr.msk.bf16.mxu1 %vm18827_vm1, %v16623_v32  ;;  %v20221_v3 = vpop.f32.mrb[54].mxu0  ;;  %v20241_v23 = vpop.permute.xlu1 %17374 }
 0x350   : > { %v20225_v60 = vpop.f32.mrb[55].mxu0  ;;  %v16635_v44 = vpack.c.bf16 %v17287_v50, %v17286_v36  ;;  %23446 = vst [vmem:[#allocation81_spill] sm:$0xff] %v20241_v23  ;;  %v16641_v49 = vpack.c.bf16 %v17307_v46, %v17306_v51  ;;  %v17322_v51 = vunpack.i.h.bf16 %v20061_v40 }
 0x351   : > { %15650 = vmatmul.mubr.msk.f32.vlgmr.msra.gmra.mrb[84].mxu0 %vm1450_vm0, %v19068_v57  ;;  %v20245_v57 = vpop.permute.xlu0 %17389 }
 0x352   : > { %16622 = vmatpush3.bf16.xpose.msk.msra.mxu0 %vm18827_vm1, %v16617_v59  ;;  %15663 = vmatprep.mubr.msk.f32.mxu0 %vm1450_vm0, %v19909_v10  ;;  %23447 = vst [vmem:[#allocation82_spill] sm:$0xff] %v20245_v57  ;;  %v6796_v10 = vsel %vm1450_vm0, %v19881_v53, -inf  ;;  %v17317_v59 = vunpack.i.h.bf16 %v20079_v56 }
 0x353   : > { %6815 = vmax.xlane.f32.xlu1 %v6814_v45  ;;  %16631 = vmatprep.subr.msk.bf16.mxu0 %vm18827_vm1, %v16629_v9 }
 0x355   : > { %15657 = vmatmul.mubr.msk.f32.vlgmr.msra.gmra.mrb[76].mxu1 %vm1450_vm0, %v19889_v58  ;;  %v17316_v58 = vunpack.i.l.bf16 %v20079_v56  ;;  %v17400_v56 = vpop.permute.xlu0 %17399 }
 0x356   : > { %16628 = vmatpush3.bf16.xpose.msk.msra.mxu1 %vm18827_vm1, %v16623_v32  ;;  %15670 = vmatprep.mubr.msk.f32.mxu1 %vm1450_vm0, %v19919_v4  ;;  %v6826_v4 = vsel %vm1450_vm0, %v19937_v39, -inf  ;;  %v20265_v32 = vpop.permute.xlu1 %17384 }
 0x357   : > { %6797 = vmax.xlane.f32.xlu1 %v6796_v10  ;;  %16637 = vmatprep.subr.msk.bf16.mxu1 %vm18827_vm1, %v16635_v44  ;;  %23448 = vst [vmem:[#allocation83_spill] sm:$0xff] %v20265_v32 }
 0x359   : > { %15664 = vmatmul.mubr.msk.f32.vlgmr.msra.gmra.mrb[86].mxu0 %vm1450_vm0, %v19901_v35  ;;  %v16647_v35 = vpack.c.bf16 %v17317_v59, %v17316_v58  ;;  %v20293_v59 = vpop.permute.xlu0 %17409  ;;  %v23457_v58 = vld [vmem:[#allocation52_spill] sm:$0xff] }
 0x35a   : > { %16634 = vmatpush3.bf16.xpose.msk.msra.mxu0 %vm18827_vm1, %v16629_v9  ;;  %15677 = vmatprep.mubr.msk.f32.mxu0 %vm1450_vm0, %v19931_v52  ;;  %v23451_v52 = vld [vmem:[#allocation48_spill] sm:$0xff]  ;;  %v20289_v10 = vpop.permute.xlu1 %17394 }
 0x35b   : > { %6827 = vmax.xlane.f32.xlu1 %v6826_v4  ;;  %16643 = vmatprep.subr.msk.bf16.mxu0 %vm18827_vm1, %v16641_v49  ;;  %v20269_v42 = vpop.f32.mrb[46].mxu1  ;;  %v23452_v9 = vld [vmem:[#allocation40_spill] sm:$0xff]  ;;  %23454 = vst [vmem:[#allocation86_spill] sm:$0xff] %v20289_v10  ;;  %v23458_v4 = vld [vmem:[#allocation54_spill] sm:$0xff]  ;;  %v23462_v10 = vld [vmem:[#allocation45_spill] sm:$0xff] }
 0x35c   : > { %23449 = vst [vmem:[#allocation84_spill] sm:$0xff] %v20269_v42  ;;  %v20271_v50 = vpop.f32.mrb[47].mxu1  ;;  %v6808_v36 = vsel %vm1450_vm0, %v23452_v9, -inf }
 0x35d   : > { %23450 = vst [vmem:[#allocation85_spill] sm:$0xff] %v20271_v50  ;;  %15671 = vmatmul.mubr.msk.f32.vlgmr.msra.gmra.mrb[78].mxu1 %vm1450_vm0, %v19913_v6  ;;  %v17321_v6 = vunpack.i.l.bf16 %v20061_v40 }
 0x35e   : > { %16640 = vmatpush3.bf16.xpose.msk.msra.mxu1 %vm18827_vm1, %v16635_v44  ;;  %15684 = vmatprep.mubr.msk.f32.mxu1 %vm1450_vm0, %v23451_v52  ;;  %v23455_v44 = vld [vmem:[#allocation42_spill] sm:$0xff]  ;;  %v6838_v52 = vsel %vm1450_vm0, %v23458_v4, -inf  ;;  %v20316_v34 = vpop.permute.xlu1 %17404  ;;  %v23498_v4 = vld [vmem:[#allocation47_spill] sm:$0xff] }
 0x35f   : > { %6809 = vmax.xlane.f32.xlu1 %v6808_v36  ;;  %16649 = vmatprep.subr.msk.bf16.mxu1 %vm18827_vm1, %v16647_v35  ;;  %v20283_v45 = vpop.f32.mrb[56].mxu0  ;;  %23456 = vst [vmem:[#allocation42_spill] sm:$0xff] %v20293_v59  ;;  %v23459_v36 = vld [vmem:[#allocation17_spill] sm:$0xff]  ;;  %23465 = vst [vmem:[#allocation45_spill] sm:$0xff] %v20316_v34  ;;  %v6781_v34 = vsel %vm1450_vm0, %v23488_v22, -inf  ;;  %v6823_v9 = vsel %vm1450_vm0, %v23498_v4, -inf }
 0x360   : > { %v20285_v46 = vpop.f32.mrb[57].mxu0  ;;  %v23481_v59 = vld [vmem:[#allocation13_spill] sm:$0xff]  ;;  %v23506_v4 = vld [vmem:[#allocation55_spill] sm:$0xff] }
 0x361   : > { %23453 = vst [vmem:[#allocation48_spill] sm:$0xff] %v20285_v46  ;;  %15678 = vmatmul.mubr.msk.f32.vlgmr.msra.gmra.mrb[88].mxu0 %vm1450_vm0, %v23455_v44  ;;  %v17362_v44 = vunpack.i.h.bf16 %v20166_v21  ;;  %v20320_v21 = vpop.permute.xlu0 %17419 }
 0x362   : > { %16646 = vmatpush3.bf16.xpose.msk.msra.mxu0 %vm18827_vm1, %v16641_v49  ;;  %15691 = vmatprep.mubr.msk.f32.mxu0 %vm1450_vm0, %v23457_v58  ;;  %v16657_v49 = vpack.c.bf16 %v17322_v51, %v17321_v6  ;;  %v23463_v58 = vld [vmem:[#allocation56_spill] sm:$0xff]  ;;  %23467 = vst [vmem:[#allocation87_spill] sm:$0xff] %v20320_v21  ;;  %v17402_v51 = vunpack.i.h.bf16 %v17400_v56  ;;  %v17401_v6 = vunpack.i.l.bf16 %v17400_v56  ;;  %v20338_v5 = vpop.permute.xlu1 %17414 }
 0x363   : > { %6839 = vmax.xlane.f32.xlu1 %v6838_v52  ;;  %16654 = vmatprep.subr.bf16.mxu0 %v23459_v36  ;;  %v20302_v40 = vpop.f32.mrb[48].mxu1  ;;  %v23464_v52 = vld [vmem:[#allocation43_spill] sm:$0xff]  ;;  %23475 = vst [vmem:[#allocation90_spill] sm:$0xff] %v20338_v5  ;;  %v6775_v5 = vsel %vm1450_vm0, %v23481_v59, -inf }
 0x364   : > { %23460 = vst [vmem:[#allocation52_spill] sm:$0xff] %v20302_v40  ;;  %v20304_v17 = vpop.f32.mrb[49].mxu1  ;;  %v6820_v57 = vsel %vm1450_vm0, %v23464_v52, -inf  ;;  %v23495_v52 = vld [vmem:[#allocation37_spill] sm:$0xff] }
 0x365   : > { %23461 = vst [vmem:[#allocation17_spill] sm:$0xff] %v20304_v17  ;;  %15685 = vmatmul.mubr.msk.f32.vlgmr.msra.gmra.mrb[80].mxu1 %vm1450_vm0, %v23462_v10 }
 0x366   : > { %16652 = vmatpush3.bf16.xpose.msk.msra.mxu1 %vm18827_vm1, %v16647_v35  ;;  %15698 = vmatprep.mubr.msk.f32.mxu1 %vm1450_vm0, %v23463_v58  ;;  %v23470_v35 = vld [vmem:[#allocation12_spill] sm:$0xff]  ;;  %v20328_v58 = vpack.c.bf16 %v17362_v44, %v17361_v55  ;;  %v23477_v55 = vld [vmem:[#allocation31_spill] sm:$0xff] }
 0x367   : > { %6821 = vmax.xlane.f32.xlu1 %v6820_v57  ;;  %16658 = vmatprep.subr.bf16.mxu1 %v16657_v49  ;;  %v20318_v54 = vpop.f32.mrb[58].mxu0  ;;  %v6769_v10 = vsel %vm1450_vm0, %v23470_v35, -inf  ;;  %v23472_v57 = vld [vmem:[#allocation59_spill] sm:$0xff]  ;;  %v6787_v44 = vsel %vm1450_vm0, %v23477_v55, -inf }
 0x368   : > { %23466 = vst [vmem:[#allocation56_spill] sm:$0xff] %v20318_v54  ;;  %v20322_v32 = vpop.f32.mrb[59].mxu0  ;;  %23471 = vst [vmem:[#allocation49_spill] sm:$0xff] %v20328_v58  ;;  %v6850_v24 = vsel %vm1450_vm0, %v23472_v57, -inf }
 0x369   : > { %23468 = vst [vmem:[#allocation88_spill] sm:$0xff] %v20322_v32  ;;  %15692 = vmatmul.mubr.msk.f32.vlgmr.msra.gmra.mrb[90].mxu0 %vm1450_vm0, %v23469_v0  ;;  %v23476_v0 = vld [vmem:[#allocation53_spill] sm:$0xff] }
 0x36a   : > { %6770 = vmax.xlane.f32.xlu0 %v6769_v10  ;;  %16656 = vmatpush3.bf16.msra.mxu0 %v23459_v36  ;;  %v20344_v10 = vpack.c.bf16 %v17402_v51, %v17401_v6  ;;  %v20346_v36 = vpop.permute.xlu0 %17429  ;;  %v23484_v51 = vld [vmem:[#allocation35_spill] sm:$0xff] }
 0x36b   : > { %6851 = vmax.xlane.f32.xlu1 %v6850_v24  ;;  %16662 = vmatprep.subr.bf16.mxu0 %v20328_v58  ;;  %v20334_v21 = vpop.f32.mrb[50].mxu1  ;;  %23479 = vst [vmem:[#allocation31_spill] sm:$0xff] %v20346_v36  ;;  %v6799_v6 = vsel %vm1450_vm0, %v23484_v51, -inf }
 0x36c   : > { %23473 = vst [vmem:[#allocation12_spill] sm:$0xff] %v20334_v21  ;;  %v20336_v56 = vpop.f32.mrb[51].mxu1  ;;  %23478 = vst [vmem:[#allocation53_spill] sm:$0xff] %v20344_v10 }
 0x36d   : > { %23474 = vst [vmem:[#allocation89_spill] sm:$0xff] %v20336_v56  ;;  %15699 = vmatmul.mubr.msk.f32.vlgmr.msra.gmra.mrb[82].mxu1 %vm1450_vm0, %v23476_v0  ;;  %v20355_v0 = vpop.permute.xlu1 %17424 }
 0x36e   : > { %16660 = vmatpush3.bf16.msra.mxu1 %v16657_v49  ;;  %6788 = vmax.xlane.f32.xlu0 %v6787_v44  ;;  %23482 = vst [vmem:[#allocation92_spill] sm:$0xff] %v20355_v0  ;;  %v20357_v30 = vpop.permute.xlu0 %17439 }
 0x36f   : > { %16666 = vmatprep.subr.bf16.mxu1 %v20344_v10  ;;  %v20349_v24 = vpop.f32.mrb[60].mxu0  ;;  %23483 = vst [vmem:[#allocation93_spill] sm:$0xff] %v20357_v30  ;;  %v6811_v10 = vsel %vm1450_vm0, %v23492_v18, -inf }
 0x370   : > { %v20351_v23 = vpop.f32.mrb[61].mxu0 }
 0x371   : > { %23480 = vst [vmem:[#allocation91_spill] sm:$0xff] %v20351_v23  ;;  %v20365_v36 = vpop.permute.xlu1 %17434 }
 0x372   : > { %6776 = vmax.xlane.f32.xlu0 %v6775_v5  ;;  %23487 = vst [vmem:[#allocation96_spill] sm:$0xff] %v20365_v36  ;;  %v20369_v48 = vpop.permute.xlu0 %17449  ;;  %v6793_v36 = vsel %vm1450_vm0, %v23495_v52, -inf }
 0x373   : > { %23489 = vst [vmem:[#allocation97_spill] sm:$0xff] %v20369_v48 }
 0x376   : > { %6800 = vmax.xlane.f32.xlu0 %v6799_v6  ;;  %v20377_v6 = vpop.permute.xlu1 %17444  ;;  %v20379_v57 = vpop.permute.xlu0 %17459 }
 0x377   : > { %v20361_v49 = vpop.f32.mrb[52].mxu1  ;;  %23493 = vst [vmem:[#allocation100_spill] sm:$0xff] %v20377_v6  ;;  %23494 = vst [vmem:[#allocation101_spill] sm:$0xff] %v20379_v57  ;;  %v23501_v57 = vld [vmem:[#allocation41_spill] sm:$0xff] }
 0x378   : > { %23485 = vst [vmem:[#allocation94_spill] sm:$0xff] %v20361_v49  ;;  %v20363_v44 = vpop.f32.mrb[53].mxu1  ;;  %v6805_v52 = vsel %vm1450_vm0, %v23501_v57, -inf  ;;  %v23510_v57 = vld [vmem:[#allocation44_spill] sm:$0xff] }
 0x379   : > { %23486 = vst [vmem:[#allocation95_spill] sm:$0xff] %v20363_v44 }
 0x37a   : > { %6782 = vmax.xlane.f32.xlu0 %v6781_v34  ;;  %v20387_v34 = vpop.permute.xlu1 %17454  ;;  %v20391_v30 = vpop.permute.xlu0 %17469 }
 0x37b   : > { %v20371_v5 = vpop.f32.mrb[62].mxu0  ;;  %23497 = vst [vmem:[#allocation103_spill] sm:$0xff] %v20387_v34  ;;  %23499 = vst [vmem:[#allocation104_spill] sm:$0xff] %v20391_v30  ;;  %v6835_v30 = vsel %vm1450_vm0, %v23506_v4, -inf  ;;  %v6847_v4 = vsel %vm1450_vm0, %v23514_v20, -inf }
 0x37c   : > { %23490 = vst [vmem:[#allocation98_spill] sm:$0xff] %v20371_v5  ;;  %v20373_v0 = vpop.f32.mrb[63].mxu0 }
 0x37d   : > { %23491 = vst [vmem:[#allocation99_spill] sm:$0xff] %v20373_v0 }
 0x37e   : > { %6812 = vmax.xlane.f32.xlu0 %v6811_v10  ;;  %v20403_v53 = vpop.permute.xlu0 %17479 }
 0x37f   : > { %23504 = vst [vmem:[#allocation108_spill] sm:$0xff] %v20403_v53 }
 0x382   : > { %6794 = vmax.xlane.f32.xlu0 %v6793_v36  ;;  %v20399_v36 = vpop.permute.xlu1 %17464 }
 0x383   : > { %v20383_v58 = vpop.f32.mrb[54].mxu1  ;;  %23502 = vst [vmem:[#allocation106_spill] sm:$0xff] %v20399_v36  ;;  %v20417_v36 = vpop.permute.xlu0 %17489 }
 0x384   : > { %23496 = vst [vmem:[#allocation102_spill] sm:$0xff] %v20383_v58  ;;  %v20385_v48 = vpop.f32.mrb[55].mxu1  ;;  %23511 = vst [vmem:[#allocation113_spill] sm:$0xff] %v20417_v36 }
 0x386   : > { %6824 = vmax.xlane.f32.xlu0 %v6823_v9  ;;  %v20413_v22 = vpop.permute.xlu1 %17474 }
 0x387   : > { %v20393_v10 = vpop.f32.mrb[64].mxu0  ;;  %23509 = vst [vmem:[#allocation112_spill] sm:$0xff] %v20413_v22  ;;  %v20429_v59 = vpop.permute.xlu0 %17499 }
 0x388   : > { %v20395_v6 = vpop.f32.mrb[65].mxu0  ;;  %23517 = vst [vmem:[#allocation118_spill] sm:$0xff] %v20429_v59 }
 0x389   : > { %23500 = vst [vmem:[#allocation105_spill] sm:$0xff] %v20395_v6 }
 0x38a   : > { %6806 = vmax.xlane.f32.xlu0 %v6805_v52  ;;  %v6817_v52 = vsel %vm1450_vm0, %v23510_v57, -inf }
 0x38b   : > { %v20401_v39 = vpop.f32.mrb[56].mxu1  ;;  %v20435_v36 = vpop.permute.xlu0 %17509 }
 0x38c   : > { %23503 = vst [vmem:[#allocation107_spill] sm:$0xff] %v20401_v39  ;;  %v20405_v34 = vpop.f32.mrb[57].mxu1  ;;  %23520 = vst [vmem:[#allocation121_spill] sm:$0xff] %v20435_v36 }
 0x38d   : > { %23505 = vst [vmem:[#allocation109_spill] sm:$0xff] %v20405_v34 }
 0x38e   : > { %6836 = vmax.xlane.f32.xlu0 %v6835_v30  ;;  %v20425_v30 = vpop.permute.xlu1 %17484 }
 0x38f   : > { %v20409_v9 = vpop.f32.mrb[66].mxu0  ;;  %23515 = vst [vmem:[#allocation116_spill] sm:$0xff] %v20425_v30 }
 0x390   : > { %23507 = vst [vmem:[#allocation110_spill] sm:$0xff] %v20409_v9  ;;  %v20411_v18 = vpop.f32.mrb[67].mxu0 }
 0x391   : > { %23508 = vst [vmem:[#allocation111_spill] sm:$0xff] %v20411_v18 }
 0x392   : > { %6818 = vmax.xlane.f32.xlu0 %v6817_v52  ;;  %v20433_v57 = vpop.permute.xlu1 %17494 }
 0x393   : > { %v20419_v31 = vpop.f32.mrb[58].mxu1  ;;  %23519 = vst [vmem:[#allocation120_spill] sm:$0xff] %v20433_v57 }
 0x394   : > { %23512 = vst [vmem:[#allocation114_spill] sm:$0xff] %v20419_v31  ;;  %v20421_v53 = vpop.f32.mrb[59].mxu1 }
 0x395   : > { %23513 = vst [vmem:[#allocation115_spill] sm:$0xff] %v20421_v53  ;;  %v20441_v53 = vpop.permute.xlu0 %17519 }
 0x396   : > { %6848 = vmax.xlane.f32.xlu0 %v6847_v4  ;;  %v20437_v52 = vpop.permute.xlu1 %17504  ;;  %23523 = vst [vmem:[#allocation124_spill] sm:$0xff] %v20441_v53 }
 0x397   : > { %v20427_v51 = vpop.f32.mrb[68].mxu0  ;;  %23521 = vst [vmem:[#allocation122_spill] sm:$0xff] %v20437_v52 }
 0x398   : > { %23516 = vst [vmem:[#allocation117_spill] sm:$0xff] %v20427_v51  ;;  %v20431_v22 = vpop.f32.mrb[69].mxu0 }
 0x399   : > { %23518 = vst [vmem:[#allocation119_spill] sm:$0xff] %v20431_v22  ;;  %v20447_v30 = vpop.permute.xlu0 %17529 }
 0x39a   : > { %v20445_v4 = vpop.permute.xlu1 %17514  ;;  %23526 = vst [vmem:[#allocation127_spill] sm:$0xff] %v20447_v30 }
 0x39b   : > { %23525 = vst [vmem:[#allocation126_spill] sm:$0xff] %v20445_v4 }
 0x39d   : > { %v20459_v52 = vpop.permute.xlu0 %17539 }
 0x39e   : > { %v20457_v36 = vpop.permute.xlu1 %17524  ;;  %23532 = vst [vmem:[#allocation133_spill] sm:$0xff] %v20459_v52 }
 0x39f   : > { %23531 = vst [vmem:[#allocation132_spill] sm:$0xff] %v20457_v36 }
 0x3a1   : > { %v20463_v53 = vpop.permute.xlu0 %17549 }
 0x3a2   : > { %23534 = vst [vmem:[#allocation135_spill] sm:$0xff] %v20463_v53 }
 0x3a3   : > { %v20439_v31 = vpop.f32.mrb[60].mxu1 }
 0x3a4   : > { %23522 = vst [vmem:[#allocation123_spill] sm:$0xff] %v20439_v31  ;;  %v20443_v20 = vpop.f32.mrb[61].mxu1  ;;  %v20461_v31 = vpop.permute.xlu1 %17534 }
 0x3a5   : > { %23524 = vst [vmem:[#allocation125_spill] sm:$0xff] %v20443_v20  ;;  %23533 = vst [vmem:[#allocation134_spill] sm:$0xff] %v20461_v31  ;;  %v20467_v4 = vpop.permute.xlu0 %17559 }
 0x3a6   : > { %23536 = vst [vmem:[#allocation137_spill] sm:$0xff] %v20467_v4 }
 0x3a8   : > { %v20465_v20 = vpop.permute.xlu1 %17544 }
 0x3a9   : > { %23535 = vst [vmem:[#allocation136_spill] sm:$0xff] %v20465_v20  ;;  %v23538_v20 = vld [vmem:[#allocation51_spill] sm:$0xff] }
 0x3aa   : > { %v6829_v31 = vsel %vm1450_vm0, %v23538_v20, -inf }
 0x3ab   : > { %v20449_v1 = vpop.f32.mrb[70].mxu0  ;;  %v20451_v59 = vpop.f32.mrb[62].mxu1 }
 0x3ac   : > { %23527 = vst [vmem:[#allocation128_spill] sm:$0xff] %v20449_v1  ;;  %23528 = vst [vmem:[#allocation129_spill] sm:$0xff] %v20451_v59  ;;  %v20453_v39 = vpop.f32.mrb[71].mxu0  ;;  %v20455_v57 = vpop.f32.mrb[63].mxu1 }
 0x3ad   : > { %23529 = vst [vmem:[#allocation130_spill] sm:$0xff] %v20453_v39  ;;  %23530 = vst [vmem:[#allocation131_spill] sm:$0xff] %v20455_v57  ;;  %v20470_v59 = vpop.permute.xlu1 %17554 }
 0x3ae   : > { %23537 = vst [vmem:[#allocation138_spill] sm:$0xff] %v20470_v59 }
 0x3c2   : > { %v6768_v30 = vpop.xlane.xlu0 %6767 }
 0x3c3   : > { %v7148_v1 = vsub.f32 %v19393_v12, %v6768_v30  ;;  %v23542_v30 = vld [vmem:[#allocation57_spill] sm:$0xff] }
 0x3c5   : > { %v7277_v39 = vmul.f32 1.442695, %v7148_v1  ;;  %v23540_v1 = vld [vmem:[#allocation58_spill] sm:$0xff] }
 0x3c7   : > { %17878 = vpow2.f32 %v7277_v39 }
 0x3c8   : > { %v6765_v57 = vpop.xlane.xlu1 %6764 }
 0x3c9   : > { %v7147_v36 = vsub.f32 %v19397_v37, %v6765_v57  ;;  %v6859_v37 = vsel %vm1450_vm0, %v20009_v11, -inf  ;;  %v23541_v57 = vld [vmem:[#allocation63_spill] sm:$0xff] }
 0x3cb   : > { %v7275_v41 = vmul.f32 1.442695, %v7147_v36  ;;  %v6862_v36 = vsel %vm1450_vm0, %v23541_v57, -inf }
 0x3cd   : > { %17880 = vpow2.f32 %v7275_v41  ;;  %v23539_v41 = vld [vmem:[#allocation50_spill] sm:$0xff] }
 0x3ce   : > { %v6832_v39 = vsel %vm1450_vm0, %v23539_v41, -inf }
 0x3d1   : > { %v20473_v52 = vpop.eup %17878 }
 0x3d2   : > { %v7534_v53 = vsel %vm1450_vm0, %v20473_v52, 0.0 }
 0x3d3   : > { %7535 = vadd.xlane.f32.xlu0 %v7534_v53  ;;  %v6841_v53 = vsel %vm1450_vm0, %v23540_v1, -inf }
 0x3d7   : > { %v20479_v4 = vpop.eup %17880  ;;  %6830 = vmax.xlane.f32.xlu0 %v6829_v31  ;;  %v6871_v31 = vsel %vm1450_vm0, %v20075_v8, -inf }
 0x3d8   : > { %v7531_v12 = vsel %vm1450_vm0, %v20479_v4, 0.0 }
 0x3d9   : > { %7532 = vadd.xlane.f32.xlu1 %v7531_v12  ;;  %v6844_v12 = vsel %vm1450_vm0, %v23542_v30, -inf }
 0x3db   : > { %6860 = vmax.xlane.f32.xlu0 %v6859_v37  ;;  %v23543_v37 = vld [vmem:[#allocation62_spill] sm:$0xff] }
 0x3dc   : > { %v6853_v59 = vsel %vm1450_vm0, %v23543_v37, -inf }
 0x3dd   : > { %6833 = vmax.xlane.f32.xlu1 %v6832_v39  ;;  %v6874_v39 = vsel %vm1450_vm0, %v20071_v15, -inf }
 0x3df   : > { %6842 = vmax.xlane.f32.xlu0 %v6841_v53  ;;  %v6883_v53 = vsel %vm1450_vm0, %v20111_v38, -inf }
 0x3e1   : > { %6863 = vmax.xlane.f32.xlu1 %v6862_v36  ;;  %v23544_v36 = vld [vmem:[#allocation61_spill] sm:$0xff] }
 0x3e2   : > { %v6856_v8 = vsel %vm1450_vm0, %v23544_v36, -inf  ;;  %v6907_v36 = vsel %vm1450_vm0, %v20182_v43, -inf }
 0x3e3   : > { %6872 = vmax.xlane.f32.xlu0 %v6871_v31  ;;  %v6865_v31 = vsel %vm1450_vm0, %v20059_v19, -inf }
 0x3e5   : > { %6845 = vmax.xlane.f32.xlu1 %v6844_v12  ;;  %v6886_v12 = vsel %vm1450_vm0, %v20105_v33, -inf  ;;  %v6898_v33 = vsel %vm1450_vm0, %v20141_v26, -inf }
 0x3e7   : > { %6854 = vmax.xlane.f32.xlu0 %v6853_v59 }
 0x3e9   : > { %6875 = vmax.xlane.f32.xlu1 %v6874_v39  ;;  %v6895_v39 = vsel %vm1450_vm0, %v20145_v2, -inf }
 0x3eb   : > { %6884 = vmax.xlane.f32.xlu0 %v6883_v53  ;;  %v6868_v53 = vsel %vm1450_vm0, %v20053_v14, -inf }
 0x3ed   : > { %6857 = vmax.xlane.f32.xlu1 %v6856_v8  ;;  %v6877_v8 = vsel %vm1450_vm0, %v20093_v62, -inf }
 0x3ef   : > { %6866 = vmax.xlane.f32.xlu0 %v6865_v31 }
 0x3f0   : > { %v20507_v59 = vpop.f32.mrb[72].mxu0 }
 0x3f1   : > { %23545 = vst [vmem:[#allocation62_spill] sm:$0xff] %v20507_v59  ;;  %6887 = vmax.xlane.f32.xlu1 %v6886_v12  ;;  %v20509_v1 = vpop.f32.mrb[73].mxu0 }
 0x3f2   : > { %23546 = vst [vmem:[#allocation139_spill] sm:$0xff] %v20509_v1 }
 0x3f3   : > { %6896 = vmax.xlane.f32.xlu0 %v6895_v39  ;;  %v6880_v39 = vsel %vm1450_vm0, %v20089_v7, -inf }
 0x3f5   : > { %6869 = vmax.xlane.f32.xlu1 %v6868_v53 }
 0x3f7   : > { %6878 = vmax.xlane.f32.xlu0 %v6877_v8  ;;  %v6889_v8 = vsel %vm1450_vm0, %v20127_v47, -inf }
 0x3f8   : > { %v20517_v31 = vpop.f32.mrb[64].mxu1 }
 0x3f9   : > { %23547 = vst [vmem:[#allocation140_spill] sm:$0xff] %v20517_v31  ;;  %6899 = vmax.xlane.f32.xlu1 %v6898_v33  ;;  %v20521_v12 = vpop.f32.mrb[65].mxu1  ;;  %v6910_v33 = vsel %vm1450_vm0, %v20178_v13, -inf }
 0x3fa   : > { %23548 = vst [vmem:[#allocation141_spill] sm:$0xff] %v20521_v12 }
 0x3fb   : > { %6908 = vmax.xlane.f32.xlu0 %v6907_v36  ;;  %v6919_v36 = vsel %vm1450_vm0, %v20225_v60, -inf }
 0x3fc   : > { %v20527_v53 = vpop.f32.mrb[74].mxu0 }
 0x3fd   : > { %23549 = vst [vmem:[#allocation142_spill] sm:$0xff] %v20527_v53  ;;  %6881 = vmax.xlane.f32.xlu1 %v6880_v39  ;;  %v20529_v15 = vpop.f32.mrb[75].mxu0  ;;  %v6892_v39 = vsel %vm1450_vm0, %v20123_v25, -inf }
 0x3fe   : > { %23550 = vst [vmem:[#allocation143_spill] sm:$0xff] %v20529_v15 }
 0x3ff   : > { %6890 = vmax.xlane.f32.xlu0 %v6889_v8  ;;  %v6901_v8 = vsel %vm1450_vm0, %v20164_v29, -inf }
 0x400   : > { %v20533_v30 = vpop.f32.mrb[66].mxu1 }
 0x401   : > { %23551 = vst [vmem:[#allocation144_spill] sm:$0xff] %v20533_v30  ;;  %6911 = vmax.xlane.f32.xlu1 %v6910_v33  ;;  %v20537_v11 = vpop.f32.mrb[67].mxu1  ;;  %v6922_v33 = vsel %vm1450_vm0, %v20221_v3, -inf }
 0x402   : > { %23552 = vst [vmem:[#allocation145_spill] sm:$0xff] %v20537_v11 }
 0x403   : > { %6920 = vmax.xlane.f32.xlu0 %v6919_v36  ;;  %v6931_v36 = vsel %vm1450_vm0, %v20285_v46, -inf }
 0x404   : > { %v20543_v20 = vpop.f32.mrb[76].mxu0 }
 0x405   : > { %23553 = vst [vmem:[#allocation146_spill] sm:$0xff] %v20543_v20  ;;  %6893 = vmax.xlane.f32.xlu1 %v6892_v39  ;;  %v20545_v57 = vpop.f32.mrb[77].mxu0  ;;  %v6904_v39 = vsel %vm1450_vm0, %v20157_v61, -inf }
 0x406   : > { %23554 = vst [vmem:[#allocation147_spill] sm:$0xff] %v20545_v57 }
 0x407   : > { %6902 = vmax.xlane.f32.xlu0 %v6901_v8  ;;  %v6913_v8 = vsel %vm1450_vm0, %v20205_v28, -inf }
 0x408   : > { %v20549_v41 = vpop.f32.mrb[68].mxu1 }
 0x409   : > { %23555 = vst [vmem:[#allocation148_spill] sm:$0xff] %v20549_v41  ;;  %6923 = vmax.xlane.f32.xlu1 %v6922_v33  ;;  %v20553_v11 = vpop.f32.mrb[69].mxu1  ;;  %v6934_v33 = vsel %vm1450_vm0, %v20283_v45, -inf }
 0x40a   : > { %23556 = vst [vmem:[#allocation149_spill] sm:$0xff] %v20553_v11 }
 0x40b   : > { %6932 = vmax.xlane.f32.xlu0 %v6931_v36  ;;  %v6943_v36 = vsel %vm1450_vm0, %v20322_v32, -inf }
 0x40c   : > { %v20559_v25 = vpop.f32.mrb[78].mxu0 }
 0x40d   : > { %23557 = vst [vmem:[#allocation150_spill] sm:$0xff] %v20559_v25  ;;  %6905 = vmax.xlane.f32.xlu1 %v6904_v39  ;;  %v20561_v29 = vpop.f32.mrb[79].mxu0  ;;  %v6916_v39 = vsel %vm1450_vm0, %v20201_v27, -inf }
 0x40e   : > { %23558 = vst [vmem:[#allocation151_spill] sm:$0xff] %v20561_v29 }
 0x40f   : > { %6914 = vmax.xlane.f32.xlu0 %v6913_v8  ;;  %v20579_v8 = vpop.permute.xlu0 %17564 }
 0x410   : > { %v20565_v41 = vpop.f32.mrb[70].mxu1  ;;  %23563 = vst [vmem:[#allocation156_spill] sm:$0xff] %v20579_v8  ;;  %v6928_v8 = vsel %vm1450_vm0, %v20269_v42, -inf  ;;  %v6940_v42 = vsel %vm1450_vm0, %v20302_v40, -inf  ;;  %v6979_v40 = vsel %vm1450_vm0, %v20395_v6, -inf }
 0x411   : > { %23559 = vst [vmem:[#allocation152_spill] sm:$0xff] %v20565_v41  ;;  %6935 = vmax.xlane.f32.xlu1 %v6934_v33  ;;  %v20569_v11 = vpop.f32.mrb[71].mxu1  ;;  %v6925_v41 = vsel %vm1450_vm0, %v20271_v50, -inf }
 0x412   : > { %23560 = vst [vmem:[#allocation153_spill] sm:$0xff] %v20569_v11  ;;  %v6946_v11 = vsel %vm1450_vm0, %v20318_v54, -inf }
 0x413   : > { %6944 = vmax.xlane.f32.xlu0 %v6943_v36  ;;  %v20589_v27 = vpop.xlane.xlu0 %6770 }
 0x414   : > { %v20575_v61 = vpop.f32.mrb[80].mxu0 }
 0x415   : > { %23561 = vst [vmem:[#allocation154_spill] sm:$0xff] %v20575_v61  ;;  %6917 = vmax.xlane.f32.xlu1 %v6916_v39  ;;  %v20577_v28 = vpop.f32.mrb[81].mxu0  ;;  %v6955_v39 = vsel %vm1450_vm0, %v20351_v23, -inf }
 0x416   : > { %23562 = vst [vmem:[#allocation155_spill] sm:$0xff] %v20577_v28 }
 0x417   : > { %6926 = vmax.xlane.f32.xlu0 %v6925_v41 }
 0x418   : > { %v20583_v33 = vpop.f32.mrb[72].mxu1 }
 0x419   : > { %23564 = vst [vmem:[#allocation157_spill] sm:$0xff] %v20583_v33  ;;  %6947 = vmax.xlane.f32.xlu1 %v6946_v11  ;;  %v20587_v36 = vpop.f32.mrb[73].mxu1  ;;  %v6937_v33 = vsel %vm1450_vm0, %v20304_v17, -inf  ;;  %v6774_v11 = vpop.xlane.xlu1 %6773 }
 0x41a   : > { %23565 = vst [vmem:[#allocation158_spill] sm:$0xff] %v20587_v36  ;;  %v20601_v36 = vpop.xlane.xlu0 %6788 }
 0x41b   : > { %6956 = vmax.xlane.f32.xlu0 %v6955_v39  ;;  %v6958_v39 = vsel %vm1450_vm0, %v20349_v24, -inf }
 0x41c   : > { %v20595_v32 = vpop.f32.mrb[82].mxu0 }
 0x41d   : > { %23566 = vst [vmem:[#allocation159_spill] sm:$0xff] %v20595_v32  ;;  %6929 = vmax.xlane.f32.xlu1 %v6928_v8  ;;  %v20597_v41 = vpop.f32.mrb[83].mxu0  ;;  %v6967_v8 = vsel %vm1450_vm0, %v20373_v0, -inf }
 0x41e   : > { %23567 = vst [vmem:[#allocation160_spill] sm:$0xff] %v20597_v41 }
 0x41f   : > { %6938 = vmax.xlane.f32.xlu0 %v6937_v33  ;;  %v6792_v33 = vpop.xlane.xlu1 %6791 }
 0x420   : > { %v20603_v54 = vpop.f32.mrb[74].mxu1 }
 0x421   : > { %23568 = vst [vmem:[#allocation161_spill] sm:$0xff] %v20603_v54  ;;  %6959 = vmax.xlane.f32.xlu1 %v6958_v39  ;;  %v20607_v23 = vpop.f32.mrb[75].mxu1  ;;  %v20617_v54 = vpop.xlane.xlu0 %6776  ;;  %v6949_v39 = vsel %vm1450_vm0, %v20336_v56, -inf }
 0x422   : > { %23569 = vst [vmem:[#allocation162_spill] sm:$0xff] %v20607_v23 }
 0x423   : > { %6968 = vmax.xlane.f32.xlu0 %v6967_v8  ;;  %v6970_v8 = vsel %vm1450_vm0, %v20371_v5, -inf }
 0x424   : > { %v20613_v17 = vpop.f32.mrb[84].mxu0 }
 0x425   : > { %23570 = vst [vmem:[#allocation163_spill] sm:$0xff] %v20613_v17  ;;  %6941 = vmax.xlane.f32.xlu1 %v6940_v42  ;;  %v20615_v41 = vpop.f32.mrb[85].mxu0  ;;  %v6780_v42 = vpop.xlane.xlu1 %6779  ;;  %v6952_v17 = vsel %vm1450_vm0, %v20334_v21, -inf }
 0x426   : > { %23571 = vst [vmem:[#allocation164_spill] sm:$0xff] %v20615_v41  ;;  %v20629_v41 = vpop.xlane.xlu0 %6800 }
 0x427   : > { %6950 = vmax.xlane.f32.xlu0 %v6949_v39 }
 0x428   : > { %v20621_v23 = vpop.f32.mrb[76].mxu1 }
 0x429   : > { %23572 = vst [vmem:[#allocation165_spill] sm:$0xff] %v20621_v23  ;;  %6971 = vmax.xlane.f32.xlu1 %v6970_v8  ;;  %v20625_v0 = vpop.f32.mrb[77].mxu1  ;;  %v6961_v8 = vsel %vm1450_vm0, %v20363_v44, -inf  ;;  %v6982_v23 = vsel %vm1450_vm0, %v20393_v10, -inf  ;;  %v6804_v6 = vpop.xlane.xlu1 %6803 }
 0x42a   : > { %23573 = vst [vmem:[#allocation166_spill] sm:$0xff] %v20625_v0  ;;  %v20646_v21 = vpop.xlane.xlu0 %6782 }
 0x42b   : > { %6980 = vmax.xlane.f32.xlu0 %v6979_v40  ;;  %v7156_v40 = vsub.f32 %v19845_v16, %v6792_v33  ;;  %v6973_v16 = vsel %vm1450_vm0, %v20385_v48, -inf }
 0x42c   : > { %v20633_v56 = vpop.f32.mrb[86].mxu0 }
 0x42d   : > { %23574 = vst [vmem:[#allocation167_spill] sm:$0xff] %v20633_v56  ;;  %6953 = vmax.xlane.f32.xlu1 %v6952_v17  ;;  %v20635_v39 = vpop.f32.mrb[87].mxu0  ;;  %v6991_v17 = vsel %vm1450_vm0, %v20411_v18, -inf  ;;  %v20659_v33 = vpop.xlane.xlu1 %6785 }
 0x42e   : > { %23575 = vst [vmem:[#allocation168_spill] sm:$0xff] %v20635_v39 }
 0x42f   : > { %6962 = vmax.xlane.f32.xlu0 %v6961_v8  ;;  %v6964_v8 = vsel %vm1450_vm0, %v20361_v49, -inf  ;;  %v6994_v49 = vsel %vm1450_vm0, %v20409_v9, -inf }
 0x430   : > { %v20639_v0 = vpop.f32.mrb[78].mxu1 }
 0x431   : > { %23576 = vst [vmem:[#allocation169_spill] sm:$0xff] %v20639_v0  ;;  %6983 = vmax.xlane.f32.xlu1 %v6982_v23  ;;  %v20644_v5 = vpop.f32.mrb[79].mxu1  ;;  %v7293_v0 = vmul.f32 1.442695, %v7156_v40  ;;  %v7150_v23 = vsub.f32 %v19807_v63, %v6774_v11  ;;  %v7149_v63 = vsub.f32 %v23470_v35, %v20589_v27  ;;  %v6976_v11 = vsel %vm1450_vm0, %v20383_v58, -inf }
 0x432   : > { %23577 = vst [vmem:[#allocation170_spill] sm:$0xff] %v20644_v5  ;;  %v20661_v5 = vpop.xlane.xlu0 %6812  ;;  %v7155_v27 = vsub.f32 %v23477_v55, %v20601_v36 }
 0x433   : > { %6992 = vmax.xlane.f32.xlu0 %v6991_v17  ;;  %17882 = vpow2.f32 %v7293_v0  ;;  %v20679_v0 = vpop.xlane.xlu1 %6815 }
 0x434   : > { %v20652_v44 = vpop.f32.mrb[88].mxu0 }
 0x435   : > { %23578 = vst [vmem:[#allocation171_spill] sm:$0xff] %v20652_v44  ;;  %6965 = vmax.xlane.f32.xlu1 %v6964_v8  ;;  %v20654_v39 = vpop.f32.mrb[89].mxu0  ;;  %v7003_v8 = vsel %vm1450_vm0, %v20431_v22, -inf  ;;  %v23587_v44 = vld [vmem:[#allocation130_spill] sm:$0xff] }
 0x436   : > { %23579 = vst [vmem:[#allocation172_spill] sm:$0xff] %v20654_v39  ;;  %v7281_v39 = vmul.f32 1.442695, %v7150_v23  ;;  %v7279_v23 = vmul.f32 1.442695, %v7149_v63  ;;  %v7015_v58 = vsel %vm1450_vm0, %v23587_v44, -inf }
 0x437   : > { %6974 = vmax.xlane.f32.xlu0 %v6973_v16  ;;  %v20698_v55 = vpop.xlane.xlu1 %6797 }
 0x438   : > { %v20663_v17 = vpop.f32.mrb[80].mxu1  ;;  %17884 = vpow2.f32 %v7281_v39  ;;  %v7291_v39 = vmul.f32 1.442695, %v7155_v27 }
 0x439   : > { %23580 = vst [vmem:[#allocation173_spill] sm:$0xff] %v20663_v17  ;;  %6995 = vmax.xlane.f32.xlu1 %v6994_v49  ;;  %v20667_v40 = vpop.f32.mrb[81].mxu1  ;;  %v20681_v49 = vpop.xlane.xlu0 %6794  ;;  %17886 = vpow2.f32 %v7279_v23 }
 0x43a   : > { %23581 = vst [vmem:[#allocation174_spill] sm:$0xff] %v20667_v40  ;;  %v6985_v40 = vsel %vm1450_vm0, %v20405_v34, -inf  ;;  %17888 = vpow2.f32 %v7291_v39 }
 0x43b   : > { %7004 = vmax.xlane.f32.xlu0 %v7003_v8  ;;  %v7006_v8 = vsel %vm1450_vm0, %v20427_v51, -inf }
 0x43c   : > { %v20675_v16 = vpop.f32.mrb[90].mxu0 }
 0x43d   : > { %23582 = vst [vmem:[#allocation175_spill] sm:$0xff] %v20675_v16  ;;  %6977 = vmax.xlane.f32.xlu1 %v6976_v11  ;;  %v20677_v17 = vpop.f32.mrb[91].mxu0  ;;  %v23585_v11 = vld [vmem:[#allocation15_spill] sm:$0xff]  ;;  %v20696_v34 = vpop.eup %17882  ;;  %v23723_v18 = vld [vmem:[#allocation172_spill] sm:$0xff] }
 0x43e   : > { %23583 = vst [vmem:[#allocation176_spill] sm:$0xff] %v20677_v17  ;;  %v7152_v17 = vsub.f32 %v23585_v11, %v6780_v42  ;;  %23588 = vst [vmem:[#allocation178_spill] sm:$0xff] %v20696_v34  ;;  %v20700_v36 = vpop.xlane.xlu0 %6824  ;;  %v23590_v42 = vld [vmem:[#allocation34_spill] sm:$0xff]  ;;  %v7558_v11 = vsel %vm1450_vm0, %v20696_v34, 0.0 }
 0x43f   : > { %6986 = vmax.xlane.f32.xlu0 %v6985_v40  ;;  %v23589_v40 = vld [vmem:[#allocation107_spill] sm:$0xff] }
 0x440   : > { %v20687_v35 = vpop.f32.mrb[82].mxu1  ;;  %v6988_v63 = vsel %vm1450_vm0, %v23589_v40, -inf }
 0x441   : > { %23584 = vst [vmem:[#allocation177_spill] sm:$0xff] %v20687_v35  ;;  %7007 = vmax.xlane.f32.xlu1 %v7006_v8  ;;  %v20692_v16 = vpop.f32.mrb[83].mxu1  ;;  %v7285_v35 = vmul.f32 1.442695, %v7152_v17  ;;  %v7160_v8 = vsub.f32 %v23590_v42, %v6804_v6  ;;  %v20713_v17 = vpop.xlane.xlu1 %6827  ;;  %v23594_v42 = vld [vmem:[#allocation35_spill] sm:$0xff] }
 0x442   : > { %23586 = vst [vmem:[#allocation15_spill] sm:$0xff] %v20692_v16  ;;  %v23591_v16 = vld [vmem:[#allocation13_spill] sm:$0xff]  ;;  %v20711_v44 = vpop.eup %17884  ;;  %v20715_v6 = vpop.xlane.xlu0 %6806 }
 0x443   : > { %7016 = vmax.xlane.f32.xlu0 %v7015_v58  ;;  %v7151_v23 = vsub.f32 %v23591_v16, %v20617_v54  ;;  %v23592_v58 = vld [vmem:[#allocation128_spill] sm:$0xff]  ;;  %23593 = vst [vmem:[#allocation34_spill] sm:$0xff] %v20711_v44  ;;  %17890 = vpow2.f32 %v7285_v35  ;;  %v7301_v51 = vmul.f32 1.442695, %v7160_v8  ;;  %v7159_v54 = vsub.f32 %v23594_v42, %v20629_v41  ;;  %v23596_v35 = vld [vmem:[#allocation115_spill] sm:$0xff] }
 0x444   : > { %v7018_v27 = vsel %vm1450_vm0, %v23592_v58, -inf  ;;  %v7540_v16 = vsel %vm1450_vm0, %v20711_v44, 0.0  ;;  %v6997_v8 = vsel %vm1450_vm0, %v23596_v35, -inf }
 0x445   : > { %6989 = vmax.xlane.f32.xlu1 %v6988_v63  ;;  %v7030_v63 = vsel %vm1450_vm0, %v20507_v59, -inf  ;;  %v7283_v39 = vmul.f32 1.442695, %v7151_v23  ;;  %17892 = vpow2.f32 %v7301_v51  ;;  %v20727_v34 = vpop.xlane.xlu1 %6809  ;;  %v7027_v51 = vsel %vm1450_vm0, %v20509_v1, -inf }
 0x446   : > { %v20729_v23 = vpop.xlane.xlu0 %6836 }
 0x447   : > { %7559 = vadd.xlane.f32.xlu0 %v7558_v11  ;;  %v20723_v11 = vpop.eup %17886  ;;  %17894 = vpow2.f32 %v7283_v39 }
 0x448   : > { %23595 = vst [vmem:[#allocation13_spill] sm:$0xff] %v20723_v11  ;;  %v7537_v41 = vsel %vm1450_vm0, %v20723_v11, 0.0 }
 0x449   : > { %7019 = vmax.xlane.f32.xlu1 %v7018_v27  ;;  %v7299_v27 = vmul.f32 1.442695, %v7159_v54  ;;  %v20745_v35 = vpop.xlane.xlu1 %6839 }
 0x44b   : > { %7031 = vmax.xlane.f32.xlu0 %v7030_v63  ;;  %v20733_v63 = vpop.eup %17888  ;;  %17896 = vpow2.f32 %v7299_v27 }
 0x44c   : > { %23597 = vst [vmem:[#allocation35_spill] sm:$0xff] %v20733_v63  ;;  %v7555_v54 = vsel %vm1450_vm0, %v20733_v63, 0.0 }
 0x44d   : > { %7541 = vadd.xlane.f32.xlu1 %v7540_v16  ;;  %v20737_v42 = vpop.eup %17890  ;;  %v23599_v16 = vld [vmem:[#allocation32_spill] sm:$0xff] }
 0x44e   : > { %23598 = vst [vmem:[#allocation179_spill] sm:$0xff] %v20737_v42  ;;  %v7154_v39 = vsub.f32 %v23599_v16, %v20659_v33  ;;  %v7546_v1 = vsel %vm1450_vm0, %v20737_v42, 0.0  ;;  %v23602_v33 = vld [vmem:[#allocation33_spill] sm:$0xff]  ;;  %v23605_v42 = vld [vmem:[#allocation39_spill] sm:$0xff] }
 0x44f   : > { %6998 = vmax.xlane.f32.xlu0 %v6997_v8  ;;  %v23600_v8 = vld [vmem:[#allocation38_spill] sm:$0xff]  ;;  %v20751_v44 = vpop.eup %17892  ;;  %v7153_v27 = vsub.f32 %v23602_v33, %v20646_v21  ;;  %v7163_v58 = vsub.f32 %v23605_v42, %v20661_v5 }
 0x450   : > { %v7164_v59 = vsub.f32 %v23600_v8, %v20679_v0  ;;  %23601 = vst [vmem:[#allocation32_spill] sm:$0xff] %v20751_v44  ;;  %v7289_v11 = vmul.f32 1.442695, %v7154_v39  ;;  %v20763_v39 = vpop.xlane.xlu1 %6821 }
 0x451   : > { %7538 = vadd.xlane.f32.xlu1 %v7537_v41  ;;  %v20747_v41 = vpop.xlane.xlu0 %6818  ;;  %v20757_v63 = vpop.eup %17894  ;;  %v7287_v8 = vmul.f32 1.442695, %v7153_v27 }
 0x452   : > { %23604 = vst [vmem:[#allocation38_spill] sm:$0xff] %v20757_v63  ;;  %v7309_v0 = vmul.f32 1.442695, %v7164_v59  ;;  %17898 = vpow2.f32 %v7289_v11  ;;  %v7042_v59 = vsel %vm1450_vm0, %v20527_v53, -inf  ;;  %v7307_v11 = vmul.f32 1.442695, %v7163_v58 }
 0x453   : > { %7028 = vmax.xlane.f32.xlu0 %v7027_v51  ;;  %v23603_v51 = vld [vmem:[#allocation114_spill] sm:$0xff] }
 0x454   : > { %v7000_v16 = vsel %vm1450_vm0, %v23603_v51, -inf  ;;  %17900 = vpow2.f32 %v7309_v0  ;;  %v20775_v42 = vpop.xlane.xlu1 %6851  ;;  %v23611_v53 = vld [vmem:[#allocation46_spill] sm:$0xff] }
 0x455   : > { %7556 = vadd.xlane.f32.xlu1 %v7555_v54  ;;  %v7570_v54 = vsel %vm1450_vm0, %v20751_v44, 0.0  ;;  %v20765_v21 = vpop.xlane.xlu0 %6848  ;;  %v20769_v33 = vpop.eup %17896  ;;  %17902 = vpow2.f32 %v7287_v8  ;;  %v23608_v44 = vld [vmem:[#allocation36_spill] sm:$0xff]  ;;  %v23609_v8 = vld [vmem:[#allocation123_spill] sm:$0xff] }
 0x456   : > { %23606 = vst [vmem:[#allocation33_spill] sm:$0xff] %v20769_v33  ;;  %v7567_v5 = vsel %vm1450_vm0, %v20769_v33, 0.0  ;;  %v7158_v0 = vsub.f32 %v23608_v44, %v20698_v55  ;;  %17904 = vpow2.f32 %v7307_v11  ;;  %v7012_v58 = vsel %vm1450_vm0, %v23609_v8, -inf  ;;  %v23613_v55 = vld [vmem:[#allocation37_spill] sm:$0xff] }
 0x457   : > { %7547 = vadd.xlane.f32.xlu0 %v7546_v1  ;;  %v7543_v1 = vsel %vm1450_vm0, %v20757_v63, 0.0  ;;  %v7157_v11 = vsub.f32 %v23613_v55, %v20681_v49  ;;  %v23615_v49 = vld [vmem:[#allocation47_spill] sm:$0xff] }
 0x458   : > { %v7297_v44 = vmul.f32 1.442695, %v7158_v0 }
 0x459   : > { %7001 = vmax.xlane.f32.xlu1 %v7000_v16  ;;  %v23607_v16 = vld [vmem:[#allocation125_spill] sm:$0xff]  ;;  %v7295_v0 = vmul.f32 1.442695, %v7157_v11 }
 0x45b   : > { %7571 = vadd.xlane.f32.xlu0 %v7570_v54  ;;  %v7009_v54 = vsel %vm1450_vm0, %v23607_v16, -inf  ;;  %v7039_v16 = vsel %vm1450_vm0, %v20529_v15, -inf }
 0x45d   : > { %7544 = vadd.xlane.f32.xlu1 %v7543_v1 }
 0x45f   : > { %7043 = vmax.xlane.f32.xlu0 %v7042_v59  ;;  %v20785_v59 = vpop.eup %17898 }
 0x460   : > { %v7536_v27 = vpop.xlane.xlu0 %7535  ;;  %23610 = vst [vmem:[#allocation39_spill] sm:$0xff] %v20785_v59  ;;  %v20791_v63 = vpop.eup %17900  ;;  %v7552_v8 = vsel %vm1450_vm0, %v20785_v59, 0.0 }
 0x461   : > { %7568 = vadd.xlane.f32.xlu1 %v7567_v5  ;;  %v7168_v5 = vsub.f32 %v23611_v53, %v20713_v17  ;;  %17906 = vrcp.f32 %v7536_v27  ;;  %23612 = vst [vmem:[#allocation36_spill] sm:$0xff] %v20791_v63  ;;  %v20799_v53 = vpop.eup %17902 }
 0x462   : > { %23614 = vst [vmem:[#allocation46_spill] sm:$0xff] %v20799_v53  ;;  %v7549_v55 = vsel %vm1450_vm0, %v20799_v53, 0.0  ;;  %v20811_v15 = vpop.eup %17904 }
 0x463   : > { %7010 = vmax.xlane.f32.xlu0 %v7009_v54  ;;  %v7317_v17 = vmul.f32 1.442695, %v7168_v5  ;;  %23616 = vst [vmem:[#allocation37_spill] sm:$0xff] %v20811_v15  ;;  %v7054_v5 = vsel %vm1450_vm0, %v20543_v20, -inf  ;;  %v23618_v20 = vld [vmem:[#allocation131_spill] sm:$0xff] }
 0x464   : > { %v20781_v1 = vpop.xlane.xlu0 %6830 }
 0x465   : > { %7013 = vmax.xlane.f32.xlu1 %v7012_v58  ;;  %v7582_v58 = vsel %vm1450_vm0, %v20791_v63, 0.0  ;;  %v23617_v63 = vld [vmem:[#allocation93_spill] sm:$0xff] }
 0x466   : > { %v7533_v33 = vpop.xlane.xlu1 %7532  ;;  %v17442_v59 = vunpack.i.h.bf16 %v23617_v63 }
 0x467   : > { %17908 = vrcp.f32 %v7533_v33  ;;  %7040 = vmax.xlane.f32.xlu0 %v7039_v16  ;;  %v7167_v33 = vsub.f32 %v23615_v49, %v20700_v36 }
 0x468   : > { %v20795_v54 = vpop.xlane.xlu0 %6860  ;;  %17910 = vpow2.f32 %v7297_v44 }
 0x469   : > { %7553 = vadd.xlane.f32.xlu1 %v7552_v8  ;;  %17912 = vpow2.f32 %v7317_v17  ;;  %v7315_v44 = vmul.f32 1.442695, %v7167_v33  ;;  %v17441_v17 = vunpack.i.l.bf16 %v23617_v63  ;;  %v23619_v33 = vld [vmem:[#allocation40_spill] sm:$0xff]  ;;  %v23620_v63 = vld [vmem:[#allocation129_spill] sm:$0xff] }
 0x46a   : > { %v20801_v27 = vpop.xlane.xlu1 %6833  ;;  %17914 = vpow2.f32 %v7295_v0  ;;  %v7021_v0 = vsel %vm1450_vm0, %v23618_v20, -inf }
 0x46b   : > { %7583 = vadd.xlane.f32.xlu0 %v7582_v58  ;;  %v17907_v11 = vpop.eup %17906  ;;  %v7579_v58 = vsel %vm1450_vm0, %v20811_v15, 0.0  ;;  %17916 = vpow2.f32 %v7315_v44  ;;  %v20843_v44 = vpack.c.bf16 %v17442_v59, %v17441_v17 }
 0x46c   : > { %v20807_v16 = vpop.xlane.xlu0 %6842  ;;  %v7918_v15 = vmul.f32 %v17907_v11, %v20473_v52  ;;  %v23624_v52 = vld [vmem:[#allocation49_spill] sm:$0xff]  ;;  %v7051_v11 = vsel %vm1450_vm0, %v20545_v57, -inf }
 0x46d   : > { %7550 = vadd.xlane.f32.xlu1 %v7549_v55  ;;  %23623 = vst [vmem:[#allocation93_spill] sm:$0xff] %v20843_v44 }
 0x46e   : > { %v20813_v8 = vpop.xlane.xlu1 %6863 }
 0x46f   : > { %7055 = vmax.xlane.f32.xlu0 %v7054_v5  ;;  %v7162_v5 = vsub.f32 %v23619_v33, %v20727_v34 }
 0x470   : > { %v20817_v36 = vpop.xlane.xlu0 %6872 }
 0x471   : > { %v17909_v49 = vpop.eup %17908  ;;  %7580 = vadd.xlane.f32.xlu1 %v7579_v58  ;;  %v7024_v58 = vsel %vm1450_vm0, %v23620_v63, -inf  ;;  %v7305_v33 = vmul.f32 1.442695, %v7162_v5  ;;  %v23650_v63 = vld [vmem:[#allocation73_spill] sm:$0xff] }
 0x472   : > { %v20823_v55 = vpop.xlane.xlu1 %6845  ;;  %v7916_v53 = vmul.f32 %v17909_v49, %v20479_v4  ;;  %v20836_v40 = vpop.eup %17910  ;;  %v23622_v4 = vld [vmem:[#allocation54_spill] sm:$0xff] }
 0x473   : > { %7022 = vmax.xlane.f32.xlu0 %v7021_v0  ;;  %23621 = vst [vmem:[#allocation47_spill] sm:$0xff] %v20836_v40  ;;  %v7172_v49 = vsub.f32 %v23622_v4, %v20745_v35  ;;  %v20850_v0 = vpop.eup %17912  ;;  %v23626_v35 = vld [vmem:[#allocation41_spill] sm:$0xff]  ;;  %v7564_v59 = vsel %vm1450_vm0, %v20836_v40, 0.0  ;;  %17918 = vpow2.f32 %v7305_v33  ;;  %v7036_v33 = vsel %vm1450_vm0, %v20517_v31, -inf }
 0x474   : > { %15705 = vmatprep.mubr.msk.f32.mxu0 %vm1450_vm0, %v7916_v53  ;;  %v20832_v51 = vpop.xlane.xlu0 %6854  ;;  %23625 = vst [vmem:[#allocation40_spill] sm:$0xff] %v20850_v0  ;;  %v7161_v4 = vsub.f32 %v23626_v35, %v20715_v6  ;;  %v20859_v17 = vpop.eup %17914  ;;  %v7594_v6 = vsel %vm1450_vm0, %v20850_v0, 0.0 }
 0x475   : > { %15706 = vmatmul.mubr.msk.f32.vlgmr.msra.gmra.mrb[92].mxu0 %vm1450_vm0, %v7918_v15  ;;  %7025 = vmax.xlane.f32.xlu1 %v7024_v58  ;;  %23627 = vst [vmem:[#allocation54_spill] sm:$0xff] %v20859_v17  ;;  %v7325_v58 = vmul.f32 1.442695, %v7172_v49  ;;  %v7561_v49 = vsel %vm1450_vm0, %v20859_v17, 0.0  ;;  %v20873_v20 = vpop.eup %17916 }
 0x476   : > { %16664 = vmatpush3.bf16.msra.mxu0 %v23624_v52  ;;  %v20846_v53 = vpop.xlane.xlu1 %6875  ;;  %v7303_v5 = vmul.f32 1.442695, %v7161_v4  ;;  %23629 = vst [vmem:[#allocation49_spill] sm:$0xff] %v20873_v20 }
 0x477   : > { %16670 = vmatprep.subr.bf16.mxu0 %v20843_v44  ;;  %7052 = vmax.xlane.f32.xlu0 %v7051_v11  ;;  %v23628_v11 = vld [vmem:[#allocation55_spill] sm:$0xff]  ;;  %17920 = vpow2.f32 %v7325_v58 }
 0x478   : > { %v20855_v15 = vpop.xlane.xlu0 %6884  ;;  %v7171_v35 = vsub.f32 %v23628_v11, %v20729_v23  ;;  %17922 = vpow2.f32 %v7303_v5  ;;  %v23634_v5 = vld [vmem:[#allocation44_spill] sm:$0xff] }
 0x479   : > { %7565 = vadd.xlane.f32.xlu1 %v7564_v59  ;;  %v23630_v59 = vld [vmem:[#allocation43_spill] sm:$0xff] }
 0x47a   : > { %v20863_v34 = vpop.xlane.xlu1 %6857  ;;  %v7323_v23 = vmul.f32 1.442695, %v7171_v35  ;;  %v7166_v31 = vsub.f32 %v23630_v59, %v20763_v39  ;;  %v7063_v59 = vsel %vm1450_vm0, %v20561_v29, -inf }
 0x47b   : > { %7595 = vadd.xlane.f32.xlu0 %v7594_v6  ;;  %v7591_v6 = vsel %vm1450_vm0, %v20873_v20, 0.0 }
 0x47c   : > { %v20869_v57 = vpop.xlane.xlu0 %6866  ;;  %17924 = vpow2.f32 %v7323_v23 }
 0x47d   : > { %7562 = vadd.xlane.f32.xlu1 %v7561_v49  ;;  %v7066_v49 = vsel %vm1450_vm0, %v20559_v25, -inf  ;;  %v20899_v58 = vpop.eup %17918 }
 0x47e   : > { %v20877_v52 = vpop.xlane.xlu1 %6887  ;;  %23631 = vst [vmem:[#allocation41_spill] sm:$0xff] %v20899_v58 }
 0x47f   : > { %7037 = vmax.xlane.f32.xlu0 %v7036_v33  ;;  %v7033_v33 = vsel %vm1450_vm0, %v20521_v12, -inf  ;;  %v7165_v12 = vsub.f32 %v23634_v5, %v20747_v41 }
 0x480   : > { %v20881_v4 = vpop.xlane.xlu0 %6896 }
 0x481   : > { %7592 = vadd.xlane.f32.xlu1 %v7591_v6  ;;  %v23632_v6 = vld [vmem:[#allocation59_spill] sm:$0xff]  ;;  %v20909_v23 = vpop.eup %17920  ;;  %v7311_v5 = vmul.f32 1.442695, %v7165_v12 }
 0x482   : > { %v20887_v11 = vpop.xlane.xlu1 %6869  ;;  %v7176_v0 = vsub.f32 %v23632_v6, %v20775_v42  ;;  %23633 = vst [vmem:[#allocation55_spill] sm:$0xff] %v20909_v23  ;;  %v20919_v6 = vpop.eup %17922  ;;  %v7606_v41 = vsel %vm1450_vm0, %v20909_v23, 0.0  ;;  %v23641_v23 = vld [vmem:[#allocation145_spill] sm:$0xff] }
 0x483   : > { %7067 = vmax.xlane.f32.xlu0 %v7066_v49  ;;  %v7313_v49 = vmul.f32 1.442695, %v7166_v31  ;;  %23635 = vst [vmem:[#allocation43_spill] sm:$0xff] %v20919_v6 }
 0x484   : > { %v20895_v35 = vpop.xlane.xlu0 %6878  ;;  %v7333_v25 = vmul.f32 1.442695, %v7176_v0  ;;  %v7573_v0 = vsel %vm1450_vm0, %v20919_v6, 0.0 }
 0x485   : > { %7034 = vmax.xlane.f32.xlu1 %v7033_v33  ;;  %v7576_v33 = vsel %vm1450_vm0, %v20899_v58, 0.0  ;;  %17926 = vpow2.f32 %v7313_v49  ;;  %v7078_v58 = vsel %vm1450_vm0, %v20575_v61, -inf  ;;  %v23644_v61 = vld [vmem:[#allocation16_spill] sm:$0xff] }
 0x486   : > { %v20905_v39 = vpop.xlane.xlu1 %6899  ;;  %17928 = vpow2.f32 %v7333_v25 }
 0x487   : > { %7064 = vmax.xlane.f32.xlu0 %v7063_v59  ;;  %v23636_v59 = vld [vmem:[#allocation60_spill] sm:$0xff]  ;;  %17930 = vpow2.f32 %v7311_v5 }
 0x488   : > { %v20915_v42 = vpop.xlane.xlu0 %6908  ;;  %v7175_v20 = vsub.f32 %v23636_v59, %v20765_v21  ;;  %v7048_v21 = vsel %vm1450_vm0, %v20533_v30, -inf }
 0x489   : > { %7577 = vadd.xlane.f32.xlu1 %v7576_v33  ;;  %v20935_v33 = vpop.eup %17924 }
 0x48a   : > { %v20923_v31 = vpop.xlane.xlu1 %6881  ;;  %23637 = vst [vmem:[#allocation59_spill] sm:$0xff] %v20935_v33  ;;  %v7331_v49 = vmul.f32 1.442695, %v7175_v20  ;;  %v7603_v25 = vsel %vm1450_vm0, %v20935_v33, 0.0  ;;  %v23639_v20 = vld [vmem:[#allocation50_spill] sm:$0xff]  ;;  %v7045_v33 = vsel %vm1450_vm0, %v23641_v23, -inf }
 0x48b   : > { %7607 = vadd.xlane.f32.xlu0 %v7606_v41  ;;  %v7170_v5 = vsub.f32 %v23639_v20, %v20801_v27  ;;  %v7075_v27 = vsel %vm1450_vm0, %v20577_v28, -inf  ;;  %v23646_v20 = vld [vmem:[#allocation51_spill] sm:$0xff]  ;;  %v23652_v28 = vld [vmem:[#allocation78_spill] sm:$0xff] }
 0x48c   : > { %v20931_v40 = vpop.xlane.xlu0 %6890  ;;  %17932 = vpow2.f32 %v7331_v49  ;;  %v7169_v41 = vsub.f32 %v23646_v20, %v20781_v1 }
 0x48d   : > { %7574 = vadd.xlane.f32.xlu1 %v7573_v0  ;;  %v7321_v23 = vmul.f32 1.442695, %v7170_v5 }
 0x48e   : > { %v20939_v12 = vpop.xlane.xlu1 %6911  ;;  %v7319_v5 = vmul.f32 1.442695, %v7169_v41 }
 0x48f   : > { %7049 = vmax.xlane.f32.xlu0 %v7048_v21  ;;  %v23640_v21 = vld [vmem:[#allocation70_spill] sm:$0xff]  ;;  %v20963_v29 = vpop.eup %17926  ;;  %17934 = vpow2.f32 %v7321_v23  ;;  %v23730_v9 = vsub.f32 %v20178_v13, %v20939_v12 }
 0x490   : > { %v20945_v59 = vpop.xlane.xlu0 %6920  ;;  %23642 = vst [vmem:[#allocation60_spill] sm:$0xff] %v20963_v29 }
 0x491   : > { %23638 = vst [vmem:[#allocation44_spill] sm:$0xff] %v20945_v59  ;;  %7604 = vadd.xlane.f32.xlu1 %v7603_v25  ;;  %v23643_v25 = vld [vmem:[#allocation63_spill] sm:$0xff] }
 0x492   : > { %v20951_v0 = vpop.xlane.xlu1 %6893  ;;  %v7180_v6 = vsub.f32 %v23643_v25, %v20813_v8 }
 0x493   : > { %7079 = vmax.xlane.f32.xlu0 %v7078_v58  ;;  %v20973_v58 = vpop.eup %17928 }
 0x494   : > { %v20959_v30 = vpop.xlane.xlu0 %6902  ;;  %23645 = vst [vmem:[#allocation50_spill] sm:$0xff] %v20973_v58  ;;  %v20983_v25 = vpop.eup %17930  ;;  %v7341_v49 = vmul.f32 1.442695, %v7180_v6  ;;  %v7618_v1 = vsel %vm1450_vm0, %v20973_v58, 0.0 }
 0x495   : > { %7046 = vmax.xlane.f32.xlu1 %v7045_v33  ;;  %v7588_v33 = vsel %vm1450_vm0, %v20963_v29, 0.0  ;;  %23648 = vst [vmem:[#allocation63_spill] sm:$0xff] %v20983_v25  ;;  %v7585_v6 = vsel %vm1450_vm0, %v20983_v25, 0.0 }
 0x496   : > { %v20969_v17 = vpop.xlane.xlu1 %6923  ;;  %17936 = vpow2.f32 %v7341_v49 }
 0x497   : > { %7076 = vmax.xlane.f32.xlu0 %v7075_v27  ;;  %v23649_v27 = vld [vmem:[#allocation64_spill] sm:$0xff]  ;;  %17938 = vpow2.f32 %v7319_v5  ;;  %v23657_v5 = vld [vmem:[#allocation57_spill] sm:$0xff] }
 0x498   : > { %v20979_v8 = vpop.xlane.xlu0 %6932  ;;  %v7179_v20 = vsub.f32 %v23649_v27, %v20795_v54  ;;  %v23653_v54 = vld [vmem:[#allocation148_spill] sm:$0xff] }
 0x499   : > { %23647 = vst [vmem:[#allocation70_spill] sm:$0xff] %v20979_v8  ;;  %7589 = vadd.xlane.f32.xlu1 %v7588_v33  ;;  %v20999_v33 = vpop.eup %17932  ;;  %v7060_v23 = vsel %vm1450_vm0, %v23653_v54, -inf  ;;  %v7090_v54 = vsel %vm1450_vm0, %v20595_v32, -inf }
 0x49a   : > { %v20987_v44 = vpop.xlane.xlu1 %6905  ;;  %23651 = vst [vmem:[#allocation16_spill] sm:$0xff] %v20999_v33  ;;  %v7339_v27 = vmul.f32 1.442695, %v7179_v20  ;;  %v7615_v49 = vsel %vm1450_vm0, %v20999_v33, 0.0  ;;  %v7174_v20 = vsub.f32 %v23657_v5, %v20823_v55  ;;  %v23660_v33 = vld [vmem:[#allocation149_spill] sm:$0xff]  ;;  %v21027_v58 = vpop.eup %17934  ;;  %v23664_v55 = vld [vmem:[#allocation160_spill] sm:$0xff] }
 0x49b   : > { %7619 = vadd.xlane.f32.xlu0 %v7618_v1  ;;  %v7057_v46 = vsel %vm1450_vm0, %v23660_v33, -inf  ;;  %23661 = vst [vmem:[#allocation78_spill] sm:$0xff] %v21027_v58  ;;  %v7087_v5 = vsel %vm1450_vm0, %v23664_v55, -inf  ;;  %v23666_v1 = vld [vmem:[#allocation58_spill] sm:$0xff] }
 0x49c   : > { %v20995_v59 = vpop.xlane.xlu0 %6914  ;;  %17940 = vpow2.f32 %v7339_v27  ;;  %v7173_v25 = vsub.f32 %v23666_v1, %v20807_v16  ;;  %v7329_v33 = vmul.f32 1.442695, %v7174_v20  ;;  %v23671_v20 = vld [vmem:[#allocation65_spill] sm:$0xff] }
 0x49d   : > { %7586 = vadd.xlane.f32.xlu1 %v7585_v6 }
 0x49e   : > { %v21003_v41 = vpop.xlane.xlu1 %6935  ;;  %v7327_v1 = vmul.f32 1.442695, %v7173_v25  ;;  %17942 = vpow2.f32 %v7329_v33 }
 0x49f   : > { %7061 = vmax.xlane.f32.xlu0 %v7060_v23  ;;  %v23672_v23 = vld [vmem:[#allocation84_spill] sm:$0xff] }
 0x4a0   : > { %v21009_v29 = vpop.xlane.xlu0 %6944 }
 0x4a1   : > { %23654 = vst [vmem:[#allocation51_spill] sm:$0xff] %v21009_v29  ;;  %7616 = vadd.xlane.f32.xlu1 %v7615_v49  ;;  %v23662_v49 = vld [vmem:[#allocation14_spill] sm:$0xff] }
 0x4a2   : > { %v21015_v6 = vpop.xlane.xlu1 %6917  ;;  %v7184_v29 = vsub.f32 %v23662_v49, %v20846_v53 }
 0x4a3   : > { %23656 = vst [vmem:[#allocation64_spill] sm:$0xff] %v21015_v6  ;;  %7091 = vmax.xlane.f32.xlu0 %v7090_v54  ;;  %v21037_v54 = vpop.eup %17936  ;;  %v23667_v6 = vld [vmem:[#allocation56_spill] sm:$0xff] }
 0x4a4   : > { %v21023_v8 = vpop.xlane.xlu0 %6926  ;;  %23665 = vst [vmem:[#allocation14_spill] sm:$0xff] %v21037_v54  ;;  %v21047_v49 = vpop.eup %17938  ;;  %v7349_v27 = vmul.f32 1.442695, %v7184_v29  ;;  %v7630_v16 = vsel %vm1450_vm0, %v21037_v54, 0.0 }
 0x4a5   : > { %23659 = vst [vmem:[#allocation73_spill] sm:$0xff] %v21023_v8  ;;  %7058 = vmax.xlane.f32.xlu1 %v7057_v46  ;;  %v7600_v46 = vsel %vm1450_vm0, %v21027_v58, 0.0  ;;  %23669 = vst [vmem:[#allocation56_spill] sm:$0xff] %v21047_v49  ;;  %v7597_v29 = vsel %vm1450_vm0, %v21047_v49, 0.0  ;;  %v23674_v8 = vld [vmem:[#allocation17_spill] sm:$0xff] }
 0x4a6   : > { %v21033_v32 = vpop.xlane.xlu1 %6947  ;;  %17944 = vpow2.f32 %v7349_v27 }
 0x4a7   : > { %23663 = vst [vmem:[#allocation57_spill] sm:$0xff] %v21033_v32  ;;  %7088 = vmax.xlane.f32.xlu0 %v7087_v5  ;;  %v7183_v5 = vsub.f32 %v23671_v20, %v20817_v36  ;;  %v23676_v36 = vld [vmem:[#allocation152_spill] sm:$0xff]  ;;  %17946 = vpow2.f32 %v7327_v1  ;;  %v23681_v1 = vld [vmem:[#allocation61_spill] sm:$0xff] }
 0x4a8   : > { %v21043_v53 = vpop.xlane.xlu0 %6956  ;;  %v7072_v33 = vsel %vm1450_vm0, %v23676_v36, -inf }
 0x4a9   : > { %23668 = vst [vmem:[#allocation58_spill] sm:$0xff] %v21043_v53  ;;  %7601 = vadd.xlane.f32.xlu1 %v7600_v46  ;;  %v21063_v46 = vpop.eup %17940  ;;  %v7347_v20 = vmul.f32 1.442695, %v7183_v5  ;;  %v23680_v53 = vld [vmem:[#allocation163_spill] sm:$0xff]  ;;  %v7178_v5 = vsub.f32 %v23681_v1, %v20863_v34 }
 0x4aa   : > { %v21051_v50 = vpop.xlane.xlu1 %6929  ;;  %23673 = vst [vmem:[#allocation65_spill] sm:$0xff] %v21063_v46  ;;  %v7627_v27 = vsel %vm1450_vm0, %v21063_v46, 0.0  ;;  %v7102_v36 = vsel %vm1450_vm0, %v23680_v53, -inf  ;;  %v23684_v46 = vld [vmem:[#allocation153_spill] sm:$0xff]  ;;  %v21091_v54 = vpop.eup %17942 }
 0x4ab   : > { %7631 = vadd.xlane.f32.xlu0 %v7630_v16  ;;  %17948 = vpow2.f32 %v7347_v20  ;;  %23685 = vst [vmem:[#allocation181_spill] sm:$0xff] %v21091_v54  ;;  %v23688_v20 = vld [vmem:[#allocation164_spill] sm:$0xff]  ;;  %v7337_v16 = vmul.f32 1.442695, %v7178_v5  ;;  %v23694_v5 = vld [vmem:[#allocation105_spill] sm:$0xff] }
 0x4ac   : > { %v21059_v32 = vpop.xlane.xlu0 %6938  ;;  %v7099_v34 = vsel %vm1450_vm0, %v23688_v20, -inf  ;;  %v23693_v20 = vsub.f32 %v20111_v38, %v20855_v15 }
 0x4ad   : > { %7598 = vadd.xlane.f32.xlu1 %v7597_v29  ;;  %17950 = vpow2.f32 %v7337_v16 }
 0x4ae   : > { %v21067_v25 = vpop.xlane.xlu1 %6959 }
 0x4af   : > { %23675 = vst [vmem:[#allocation84_spill] sm:$0xff] %v21067_v25  ;;  %7073 = vmax.xlane.f32.xlu0 %v7072_v33  ;;  %v7069_v25 = vsel %vm1450_vm0, %v23684_v46, -inf  ;;  %v23695_v46 = vld [vmem:[#allocation12_spill] sm:$0xff] }
 0x4b0   : > { %v21073_v58 = vpop.xlane.xlu0 %6968  ;;  %v21099_v1 = vpop.eup %17944 }
 0x4b1   : > { %23677 = vst [vmem:[#allocation17_spill] sm:$0xff] %v21073_v58  ;;  %7628 = vadd.xlane.f32.xlu1 %v7627_v27  ;;  %23689 = vst [vmem:[#allocation183_spill] sm:$0xff] %v21099_v1  ;;  %v21109_v58 = vpop.eup %17946 }
 0x4b2   : > { %v21079_v29 = vpop.xlane.xlu1 %6941  ;;  %v7609_v38 = vsel %vm1450_vm0, %v21109_v58, 0.0 }
 0x4b3   : > { %23679 = vst [vmem:[#allocation180_spill] sm:$0xff] %v21079_v29  ;;  %7103 = vmax.xlane.f32.xlu0 %v7102_v36  ;;  %v23690_v36 = vld [vmem:[#allocation67_spill] sm:$0xff]  ;;  %v23691_v29 = vld [vmem:[#allocation98_spill] sm:$0xff] }
 0x4b4   : > { %v21087_v55 = vpop.xlane.xlu0 %6950  ;;  %v7188_v49 = vsub.f32 %v23690_v36, %v20877_v52  ;;  %23692 = vst [vmem:[#allocation67_spill] sm:$0xff] %v21109_v58 }
 0x4b5   : > { %23683 = vst [vmem:[#allocation61_spill] sm:$0xff] %v21087_v55  ;;  %7070 = vmax.xlane.f32.xlu1 %v7069_v25  ;;  %v7612_v25 = vsel %vm1450_vm0, %v21091_v54, 0.0  ;;  %v7355_v55 = vmul.f32 1.442695, %v23693_v20  ;;  %v21126_v15 = vpop.eup %17948 }
 0x4b6   : > { %v21095_v53 = vpop.xlane.xlu1 %6971  ;;  %v7357_v36 = vmul.f32 1.442695, %v7188_v49  ;;  %23696 = vst [vmem:[#allocation98_spill] sm:$0xff] %v21126_v15  ;;  %v23698_v49 = vsub.f32 %v23543_v37, %v20832_v51  ;;  %v7114_v37 = vsel %vm1450_vm0, %v20633_v56, -inf  ;;  %v23700_v51 = vld [vmem:[#allocation94_spill] sm:$0xff] }
 0x4b7   : > { %23687 = vst [vmem:[#allocation182_spill] sm:$0xff] %v21095_v53  ;;  %7100 = vmax.xlane.f32.xlu0 %v7099_v34  ;;  %v7642_v34 = vsel %vm1450_vm0, %v21099_v1, 0.0  ;;  %17952 = vpow2.f32 %v7355_v55  ;;  %v7639_v55 = vsel %vm1450_vm0, %v21126_v15, 0.0  ;;  %v23704_v15 = vld [vmem:[#allocation168_spill] sm:$0xff] }
 0x4b8   : > { %v21105_v33 = vpop.xlane.xlu0 %6980  ;;  %v7335_v16 = vmul.f32 1.442695, %v23698_v49  ;;  %17954 = vpow2.f32 %v7357_v36  ;;  %v23701_v49 = vld [vmem:[#allocation158_spill] sm:$0xff] }
 0x4b9   : > { %7613 = vadd.xlane.f32.xlu1 %v7612_v25  ;;  %v23697_v25 = vld [vmem:[#allocation157_spill] sm:$0xff] }
 0x4ba   : > { %v21116_v52 = vpop.xlane.xlu1 %6953  ;;  %v7084_v27 = vsel %vm1450_vm0, %v23697_v25, -inf  ;;  %17956 = vpow2.f32 %v7335_v16  ;;  %v21153_v25 = vpop.eup %17950  ;;  %v7111_v16 = vsel %vm1450_vm0, %v23704_v15, -inf  ;;  %v23709_v15 = vsub.f32 %v20145_v2, %v20881_v4 }
 0x4bb   : > { %7643 = vadd.xlane.f32.xlu0 %v7642_v34  ;;  %v7081_v34 = vsel %vm1450_vm0, %v23701_v49, -inf  ;;  %23702 = vst [vmem:[#allocation12_spill] sm:$0xff] %v21153_v25  ;;  %v23711_v49 = vld [vmem:[#allocation102_spill] sm:$0xff] }
 0x4bc   : > { %v21122_v53 = vpop.xlane.xlu0 %6962 }
 0x4bd   : > { %7610 = vadd.xlane.f32.xlu1 %v7609_v38 }
 0x4be   : > { %v21128_v20 = vpop.xlane.xlu1 %6983 }
 0x4bf   : > { %7085 = vmax.xlane.f32.xlu0 %v7084_v27 }
 0x4c0   : > { %v21137_v54 = vpop.xlane.xlu0 %6992 }
 0x4c1   : > { %23699 = vst [vmem:[#allocation105_spill] sm:$0xff] %v21137_v54  ;;  %7640 = vadd.xlane.f32.xlu1 %v7639_v55  ;;  %v21161_v56 = vpop.eup %17952  ;;  %v7363_v54 = vmul.f32 1.442695, %v23709_v15 }
 0x4c2   : > { %v21143_v1 = vpop.xlane.xlu1 %6965  ;;  %23705 = vst [vmem:[#allocation184_spill] sm:$0xff] %v21161_v56  ;;  %v21172_v55 = vpop.eup %17954 }
 0x4c3   : > { %7115 = vmax.xlane.f32.xlu0 %v7114_v37  ;;  %v23706_v37 = vsub.f32 %v20053_v14, %v20887_v11  ;;  %23708 = vst [vmem:[#allocation186_spill] sm:$0xff] %v21172_v55  ;;  %v7651_v11 = vsel %vm1450_vm0, %v21161_v56, 0.0  ;;  %v7654_v4 = vsel %vm1450_vm0, %v21172_v55, 0.0 }
 0x4c4   : > { %v21149_v27 = vpop.xlane.xlu0 %6974  ;;  %v21192_v15 = vpop.eup %17956 }
 0x4c5   : > { %7082 = vmax.xlane.f32.xlu1 %v7081_v34  ;;  %v7345_v36 = vmul.f32 1.442695, %v23706_v37  ;;  %v7624_v34 = vsel %vm1450_vm0, %v21153_v25, 0.0  ;;  %23712 = vst [vmem:[#allocation102_spill] sm:$0xff] %v21192_v15 }
 0x4c6   : > { %v21157_v38 = vpop.xlane.xlu1 %6995 }
 0x4c7   : > { %23703 = vst [vmem:[#allocation94_spill] sm:$0xff] %v21157_v38  ;;  %7112 = vmax.xlane.f32.xlu0 %v7111_v16  ;;  %17958 = vpow2.f32 %v7345_v36  ;;  %v23710_v16 = vsub.f32 %v20141_v26, %v20905_v39  ;;  %v23715_v26 = vld [vmem:[#allocation161_spill] sm:$0xff] }
 0x4c8   : > { %v21168_v58 = vpop.xlane.xlu0 %7004  ;;  %17960 = vpow2.f32 %v7363_v54  ;;  %v7096_v39 = vsel %vm1450_vm0, %v23715_v26, -inf  ;;  %v7621_v54 = vsel %vm1450_vm0, %v21192_v15, 0.0  ;;  %v23719_v26 = vld [vmem:[#allocation171_spill] sm:$0xff] }
 0x4c9   : > { %23707 = vst [vmem:[#allocation185_spill] sm:$0xff] %v21168_v58  ;;  %7625 = vadd.xlane.f32.xlu1 %v7624_v34  ;;  %v7365_v37 = vmul.f32 1.442695, %v23710_v16  ;;  %v23713_v34 = vld [vmem:[#allocation109_spill] sm:$0xff] }
 0x4ca   : > { %v21179_v14 = vpop.xlane.xlu1 %6977 }
 0x4cb   : > { %7652 = vadd.xlane.f32.xlu0 %v7651_v11  ;;  %v23716_v11 = vsub.f32 %v20059_v19, %v20869_v57  ;;  %17962 = vpow2.f32 %v7365_v37  ;;  %v7126_v19 = vsel %vm1450_vm0, %v23719_v26, -inf  ;;  %v23720_v57 = vld [vmem:[#allocation107_spill] sm:$0xff] }
 0x4cc   : > { %v21188_v2 = vpop.xlane.xlu0 %6986 }
 0x4cd   : > { %7655 = vadd.xlane.f32.xlu1 %v7654_v4  ;;  %v7343_v16 = vmul.f32 1.442695, %v23716_v11  ;;  %v23718_v4 = vld [vmem:[#allocation130_spill] sm:$0xff] }
 0x4ce   : > { %v21196_v36 = vpop.xlane.xlu1 %7007 }
 0x4cf   : > { %23714 = vst [vmem:[#allocation109_spill] sm:$0xff] %v21196_v36  ;;  %7097 = vmax.xlane.f32.xlu0 %v7096_v39  ;;  %17964 = vpow2.f32 %v7343_v16  ;;  %v23721_v39 = vld [vmem:[#allocation162_spill] sm:$0xff]  ;;  %v7123_v36 = vsel %vm1450_vm0, %v23723_v18, -inf  ;;  %v23725_v16 = vsub.f32 %v20089_v7, %v20923_v31  ;;  %v7373_v7 = vmul.f32 1.442695, %v23730_v9  ;;  %v23732_v9 = vld [vmem:[#allocation165_spill] sm:$0xff] }
 0x4d0   : > { %v21207_v56 = vpop.xlane.xlu0 %7016  ;;  %v7093_v11 = vsel %vm1450_vm0, %v23721_v39, -inf  ;;  %v23727_v39 = vsub.f32 %v20182_v43, %v20915_v42  ;;  %v7108_v12 = vsel %vm1450_vm0, %v23732_v9, -inf }
 0x4d1   : > { %7622 = vadd.xlane.f32.xlu1 %v7621_v54  ;;  %v21221_v15 = vpop.eup %17958  ;;  %v7353_v37 = vmul.f32 1.442695, %v23725_v16  ;;  %v23733_v16 = vsub.f32 %v20093_v62, %v20895_v35  ;;  %v23736_v62 = vld [vmem:[#allocation166_spill] sm:$0xff] }
 0x4d2   : > { %v21211_v58 = vpop.xlane.xlu1 %6989  ;;  %23722 = vst [vmem:[#allocation130_spill] sm:$0xff] %v21221_v15  ;;  %v21227_v25 = vpop.eup %17960  ;;  %v7371_v22 = vmul.f32 1.442695, %v23727_v39  ;;  %v7105_v35 = vsel %vm1450_vm0, %v23736_v62, -inf  ;;  %v23744_v62 = vsub.f32 %v20221_v3, %v20969_v17  ;;  %v23748_v17 = vld [vmem:[#allocation44_spill] sm:$0xff] }
 0x4d3   : > { %7127 = vmax.xlane.f32.xlu0 %v7126_v19  ;;  %23724 = vst [vmem:[#allocation107_spill] sm:$0xff] %v21227_v25  ;;  %v23726_v19 = vld [vmem:[#allocation128_spill] sm:$0xff]  ;;  %17966 = vpow2.f32 %v7353_v37  ;;  %v7351_v37 = vmul.f32 1.442695, %v23733_v16  ;;  %v23738_v16 = vsub.f32 %v23640_v21, %v20951_v0 }
 0x4d4   : > { %v21219_v55 = vpop.xlane.xlu0 %7559  ;;  %17968 = vpow2.f32 %v7371_v22 }
 0x4d5   : > { %7094 = vmax.xlane.f32.xlu1 %v7093_v11  ;;  %v7636_v11 = vsel %vm1450_vm0, %v21221_v15, 0.0  ;;  %v21241_v18 = vpop.eup %17962  ;;  %17970 = vpow2.f32 %v7373_v7  ;;  %v23734_v7 = vsub.f32 %v20127_v47, %v20931_v40  ;;  %v7361_v9 = vmul.f32 1.442695, %v23738_v16 }
 0x4d6   : > { %v21223_v54 = vpop.xlane.xlu1 %7019  ;;  %23729 = vst [vmem:[#allocation187_spill] sm:$0xff] %v21241_v18  ;;  %v7666_v43 = vsel %vm1450_vm0, %v21241_v18, 0.0  ;;  %v23745_v18 = vld [vmem:[#allocation13_spill] sm:$0xff] }
 0x4d7   : > { %7124 = vmax.xlane.f32.xlu0 %v7123_v36  ;;  %v7663_v36 = vsel %vm1450_vm0, %v21227_v25, 0.0 }
 0x4d8   : > { %v21239_v38 = vpop.xlane.xlu0 %7031 }
 0x4d9   : > { %23728 = vst [vmem:[#allocation128_spill] sm:$0xff] %v21239_v38  ;;  %7637 = vadd.xlane.f32.xlu1 %v7636_v11  ;;  %v21252_v39 = vpop.eup %17964 }
 0x4da   : > { %v7542_v31 = vpop.xlane.xlu1 %7541  ;;  %23731 = vst [vmem:[#allocation188_spill] sm:$0xff] %v21252_v39  ;;  %v7633_v22 = vsel %vm1450_vm0, %v21252_v39, 0.0 }
 0x4db   : > { %7664 = vadd.xlane.f32.xlu0 %v7663_v36  ;;  %17972 = vrcp.f32 %v7542_v31  ;;  %v7359_v36 = vmul.f32 1.442695, %v23734_v7  ;;  %v23741_v7 = vld [vmem:[#allocation114_spill] sm:$0xff] }
 0x4dc   : > { %v21250_v42 = vpop.xlane.xlu0 %6998 }
 0x4dd   : > { %7667 = vadd.xlane.f32.xlu1 %v7666_v43  ;;  %v23735_v43 = vld [vmem:[#allocation175_spill] sm:$0xff] }
 0x4de   : > { %v7539_v13 = vpop.xlane.xlu1 %7538  ;;  %v7138_v26 = vsel %vm1450_vm0, %v23735_v43, -inf }
 0x4df   : > { %17974 = vrcp.f32 %v7539_v13  ;;  %7109 = vmax.xlane.f32.xlu0 %v7108_v12  ;;  %v21270_v12 = vpop.eup %17966 }
 0x4e0   : > { %v21261_v11 = vpop.xlane.xlu0 %7028  ;;  %17976 = vpow2.f32 %v7351_v37  ;;  %23737 = vst [vmem:[#allocation189_spill] sm:$0xff] %v21270_v12  ;;  %v21275_v47 = vpop.eup %17968 }
 0x4e1   : > { %7634 = vadd.xlane.f32.xlu1 %v7633_v22  ;;  %17978 = vpow2.f32 %v7359_v36  ;;  %v23739_v22 = vld [vmem:[#allocation176_spill] sm:$0xff]  ;;  %v7648_v36 = vsel %vm1450_vm0, %v21270_v12, 0.0  ;;  %v7675_v25 = vsel %vm1450_vm0, %v21275_v47, 0.0 }
 0x4e2   : > { %v7557_v31 = vpop.xlane.xlu1 %7556  ;;  %v7135_v37 = vsel %vm1450_vm0, %v23739_v22, -inf  ;;  %17980 = vpow2.f32 %v7361_v9  ;;  %v23743_v22 = vsub.f32 %v23644_v61, %v20959_v30 }
 0x4e3   : > { %7139 = vmax.xlane.f32.xlu0 %v7138_v26  ;;  %v21281_v26 = vpop.eup %17970  ;;  %17982 = vrcp.f32 %v7557_v31 }
 0x4e4   : > { %v7548_v13 = vpop.xlane.xlu0 %7547  ;;  %23740 = vst [vmem:[#allocation190_spill] sm:$0xff] %v21281_v26  ;;  %v7367_v15 = vmul.f32 1.442695, %v23743_v22  ;;  %v7678_v61 = vsel %vm1450_vm0, %v21281_v26, 0.0  ;;  %v23792_v26 = vld [vmem:[#allocation100_spill] sm:$0xff] }
 0x4e5   : > { %7106 = vmax.xlane.f32.xlu1 %v7105_v35  ;;  %v17973_v43 = vpop.eup %17972  ;;  %v23742_v35 = vld [vmem:[#allocation108_spill] sm:$0xff]  ;;  %17984 = vrcp.f32 %v7548_v13 }
 0x4e6   : > { %v21277_v40 = vpop.xlane.xlu1 %7001  ;;  %v17482_v16 = vunpack.i.h.bf16 %v23742_v35  ;;  %v17481_v38 = vunpack.i.l.bf16 %v23742_v35  ;;  %v23746_v35 = vld [vmem:[#allocation34_spill] sm:$0xff] }
 0x4e7   : > { %7136 = vmax.xlane.f32.xlu0 %v7135_v37  ;;  %v7381_v37 = vmul.f32 1.442695, %v23744_v62  ;;  %v7922_v9 = vmul.f32 %v17973_v43, %v23746_v35  ;;  %v23751_v62 = vld [vmem:[#allocation169_spill] sm:$0xff] }
 0x4e8   : > { %v7572_v0 = vpop.xlane.xlu0 %7571  ;;  %v7120_v13 = vsel %vm1450_vm0, %v23751_v62, -inf  ;;  %v23763_v62 = vld [vmem:[#allocation38_spill] sm:$0xff] }
 0x4e9   : > { %v17975_v21 = vpop.eup %17974  ;;  %7649 = vadd.xlane.f32.xlu1 %v7648_v36 }
 0x4ea   : > { %v7545_v39 = vpop.xlane.xlu1 %7544  ;;  %v7920_v12 = vmul.f32 %v17975_v21, %v23745_v18  ;;  %v21304_v3 = vpop.eup %17976  ;;  %v21307_v18 = vpack.c.bf16 %v17482_v16, %v17481_v38  ;;  %v23755_v16 = vld [vmem:[#allocation123_spill] sm:$0xff] }
 0x4eb   : > { %7676 = vadd.xlane.f32.xlu0 %v7675_v25  ;;  %17986 = vrcp.f32 %v7545_v39  ;;  %23747 = vst [vmem:[#allocation114_spill] sm:$0xff] %v21304_v3  ;;  %v23749_v25 = vsub.f32 %v20225_v60, %v23748_v17  ;;  %v23750_v39 = vld [vmem:[#allocation53_spill] sm:$0xff]  ;;  %v7645_v38 = vsel %vm1450_vm0, %v21304_v3, 0.0  ;;  %v23757_v17 = vld [vmem:[#allocation170_spill] sm:$0xff] }
 0x4ec   : > { %15712 = vmatprep.mubr.msk.f32.mxu1 %vm1450_vm0, %v7920_v12  ;;  %v21302_v30 = vpop.xlane.xlu0 %7043  ;;  %17988 = vpow2.f32 %v7367_v15  ;;  %v21315_v12 = vpop.eup %17978  ;;  %v23753_v15 = vsub.f32 %v23652_v28, %v20995_v59  ;;  %v7117_v28 = vsel %vm1450_vm0, %v23757_v17, -inf }
 0x4ed   : > { %7679 = vadd.xlane.f32.xlu1 %v7678_v61  ;;  %15713 = vmatmul.mubr.msk.f32.vlgmr.msra.gmra.mrb[84].mxu1 %vm1450_vm0, %v7922_v9  ;;  %v7379_v31 = vmul.f32 1.442695, %v23749_v25  ;;  %17990 = vpow2.f32 %v7381_v37  ;;  %23752 = vst [vmem:[#allocation108_spill] sm:$0xff] %v21315_v12  ;;  %v21330_v21 = vpop.eup %17980  ;;  %v23756_v9 = vsub.f32 %v23650_v63, %v20987_v44 }
 0x4ee   : > { %16668 = vmatpush3.bf16.msra.mxu1 %v23750_v39  ;;  %v7569_v43 = vpop.xlane.xlu1 %7568  ;;  %17992 = vrcp.f32 %v21219_v55  ;;  %v7375_v22 = vmul.f32 1.442695, %v23753_v15  ;;  %v7657_v55 = vsel %vm1450_vm0, %v21315_v12, 0.0  ;;  %23754 = vst [vmem:[#allocation13_spill] sm:$0xff] %v21330_v21  ;;  %v17983_v35 = vpop.eup %17982 }
 0x4ef   : > { %16674 = vmatprep.subr.bf16.mxu1 %v21307_v18  ;;  %7121 = vmax.xlane.f32.xlu0 %v7120_v13  ;;  %17994 = vrcp.f32 %v7569_v43  ;;  %v7369_v61 = vmul.f32 1.442695, %v23756_v9  ;;  %v17985_v25 = vpop.eup %17984 }
 0x4f0   : > { %v21321_v60 = vpop.xlane.xlu0 %7010  ;;  %17996 = vpow2.f32 %v7379_v31  ;;  %v23758_v31 = vsub.f32 %v23674_v8, %v21059_v32  ;;  %v23765_v8 = vsub.f32 %v20283_v45, %v21003_v41 }
 0x4f1   : > { %7646 = vadd.xlane.f32.xlu1 %v7645_v38  ;;  %17998 = vrcp.f32 %v7572_v0  ;;  %v23759_v0 = vld [vmem:[#allocation95_spill] sm:$0xff]  ;;  %v23760_v38 = vld [vmem:[#allocation124_spill] sm:$0xff] }
 0x4f2   : > { %v21326_v36 = vpop.xlane.xlu1 %7013  ;;  %v7391_v39 = vmul.f32 1.442695, %v23758_v31  ;;  %v7213_v43 = vsub.f32 %v23759_v0, %v21122_v53  ;;  %v17522_v15 = vunpack.i.h.bf16 %v23760_v38  ;;  %v17521_v63 = vunpack.i.l.bf16 %v23760_v38 }
 0x4f3   : > { %7658 = vadd.xlane.f32.xlu0 %v7657_v55  ;;  %18000 = vpow2.f32 %v7375_v22  ;;  %v23761_v55 = vld [vmem:[#allocation173_spill] sm:$0xff]  ;;  %v7389_v53 = vmul.f32 1.442695, %v23765_v8  ;;  %v23766_v22 = vld [vmem:[#allocation179_spill] sm:$0xff] }
 0x4f4   : > { %v21339_v59 = vpop.xlane.xlu0 %7040  ;;  %v7132_v9 = vsel %vm1450_vm0, %v23761_v55, -inf  ;;  %18002 = vpow2.f32 %v7369_v61  ;;  %v7926_v31 = vmul.f32 %v17985_v25, %v23766_v22  ;;  %v7407_v55 = vmul.f32 1.442695, %v7213_v43  ;;  %v23768_v61 = vld [vmem:[#allocation93_spill] sm:$0xff] }
 0x4f5   : > { %7118 = vmax.xlane.f32.xlu1 %v7117_v28  ;;  %v17987_v13 = vpop.eup %17986  ;;  %v7660_v28 = vsel %vm1450_vm0, %v21330_v21, 0.0  ;;  %18004 = vpow2.f32 %v7391_v39  ;;  %v16677_v41 = vpack.c.bf16 %v17522_v15, %v17521_v63  ;;  %v23771_v63 = vld [vmem:[#allocation33_spill] sm:$0xff]  ;;  %v23791_v21 = vld [vmem:[#allocation39_spill] sm:$0xff] }
 0x4f6   : > { %v7554_v44 = vpop.xlane.xlu1 %7553  ;;  %v21350_v37 = vpop.eup %17988  ;;  %v7924_v17 = vmul.f32 %v17987_v13, %v23763_v62  ;;  %v23767_v62 = vld [vmem:[#allocation35_spill] sm:$0xff] }
 0x4f7   : > { %23762 = vst [vmem:[#allocation34_spill] sm:$0xff] %v21350_v37  ;;  %7133 = vmax.xlane.f32.xlu0 %v7132_v9  ;;  %v21353_v32 = vpop.eup %17990  ;;  %v7932_v13 = vmul.f32 %v17983_v35, %v23767_v62  ;;  %18006 = vrcp.f32 %v7554_v44  ;;  %v7669_v25 = vsel %vm1450_vm0, %v21350_v37, 0.0  ;;  %v23773_v62 = vld [vmem:[#allocation48_spill] sm:$0xff] }
 0x4f8   : > { %23764 = vst [vmem:[#allocation44_spill] sm:$0xff] %v21353_v32  ;;  %v7584_v0 = vpop.xlane.xlu0 %7583  ;;  %v17993_v38 = vpop.eup %17992  ;;  %15719 = vmatprep.mubr.msk.f32.mxu0 %vm1450_vm0, %v7924_v17  ;;  %v7690_v35 = vsel %vm1450_vm0, %v21353_v32, 0.0  ;;  %v23770_v17 = vld [vmem:[#allocation178_spill] sm:$0xff] }
 0x4f9   : > { %7661 = vadd.xlane.f32.xlu1 %v7660_v28  ;;  %v17995_v9 = vpop.eup %17994  ;;  %15720 = vmatmul.mubr.msk.f32.vlgmr.msra.gmra.mrb[94].mxu0 %vm1450_vm0, %v7926_v31  ;;  %v7934_v43 = vmul.f32 %v17993_v38, %v23770_v17  ;;  %v23772_v28 = vld [vmem:[#allocation79_spill] sm:$0xff] }
 0x4fa   : > { %v7551_v45 = vpop.xlane.xlu1 %7550  ;;  %16672 = vmatpush3.bf16.msra.mxu0 %v23768_v61  ;;  %15733 = vmatprep.mubr.msk.f32.mxu0 %vm1450_vm0, %v7932_v13  ;;  %v21368_v39 = vpop.eup %17996  ;;  %v7940_v8 = vmul.f32 %v17995_v9, %v23771_v63  ;;  %v17367_v22 = vunpack.i.h.bf16 %v23772_v28  ;;  %v17366_v31 = vunpack.i.l.bf16 %v23772_v28  ;;  %v23774_v13 = vld [vmem:[#allocation70_spill] sm:$0xff] }
 0x4fb   : > { %18008 = vrcp.f32 %v7551_v45  ;;  %23769 = vst [vmem:[#allocation53_spill] sm:$0xff] %v21368_v39  ;;  %16678 = vmatprep.subr.bf16.mxu0 %v16677_v41  ;;  %7670 = vadd.xlane.f32.xlu0 %v7669_v25  ;;  %v17999_v15 = vpop.eup %17998  ;;  %v23775_v45 = vsub.f32 %v23773_v62, %v23774_v13  ;;  %v23778_v25 = vld [vmem:[#allocation18_spill] sm:$0xff] }
 0x4fc   : > { %18010 = vpow2.f32 %v7389_v53  ;;  %v21373_v44 = vpop.xlane.xlu0 %7055 }
 0x4fd   : > { %18012 = vpow2.f32 %v7407_v55  ;;  %7691 = vadd.xlane.f32.xlu1 %v7690_v35  ;;  %15734 = vmatmul.mubr.msk.f32.vlgmr.msra.gmra.mrb[96].mxu0 %vm1450_vm0, %v7934_v43  ;;  %v7387_v61 = vmul.f32 1.442695, %v23775_v45  ;;  %v23776_v55 = vld [vmem:[#allocation177_spill] sm:$0xff]  ;;  %v21385_v9 = vpop.eup %18000  ;;  %v23779_v35 = vld [vmem:[#allocation32_spill] sm:$0xff]  ;;  %v23783_v45 = vld [vmem:[#allocation174_spill] sm:$0xff] }
 0x4fe   : > { %18014 = vrcp.f32 %v7584_v0  ;;  %v7581_v53 = vpop.xlane.xlu1 %7580  ;;  %16680 = vmatpush3.bf16.msra.mxu0 %v16677_v41  ;;  %15747 = vmatprep.mubr.msk.f32.mxu0 %vm1450_vm0, %v7940_v8  ;;  %v7144_v38 = vsel %vm1450_vm0, %v23776_v55, -inf  ;;  %23777 = vst [vmem:[#allocation123_spill] sm:$0xff] %v21385_v9  ;;  %v7687_v0 = vsel %vm1450_vm0, %v21368_v39, 0.0  ;;  %v7942_v17 = vmul.f32 %v17999_v15, %v23779_v35  ;;  %v21393_v41 = vpop.eup %18002  ;;  %v23789_v39 = vld [vmem:[#allocation46_spill] sm:$0xff] }
 0x4ff   : > { %18016 = vrcp.f32 %v7581_v53  ;;  %16686 = vmatprep.subr.bf16.mxu0 %v23778_v25  ;;  %7145 = vmax.xlane.f32.xlu0 %v7144_v38  ;;  %23780 = vst [vmem:[#allocation95_spill] sm:$0xff] %v21393_v41  ;;  %v16693_v8 = vpack.c.bf16 %v17367_v22, %v17366_v31  ;;  %v21398_v28 = vpop.eup %18004  ;;  %v23782_v53 = vld [vmem:[#allocation129_spill] sm:$0xff]  ;;  %v7681_v15 = vsel %vm1450_vm0, %v21385_v9, 0.0  ;;  %v7129_v38 = vsel %vm1450_vm0, %v23783_v45, -inf }
 0x500   : > { %v21391_v43 = vpop.xlane.xlu0 %7022  ;;  %23781 = vst [vmem:[#allocation124_spill] sm:$0xff] %v21398_v28  ;;  %18018 = vpow2.f32 %v7387_v61  ;;  %v23784_v31 = vld [vmem:[#allocation137_spill] sm:$0xff]  ;;  %v7705_v45 = vsel %vm1450_vm0, %v21398_v28, 0.0 }
 0x501   : > { %7688 = vadd.xlane.f32.xlu1 %v7687_v0  ;;  %15748 = vmatmul.mubr.msk.f32.vlgmr.msra.gmra.mrb[98].mxu0 %vm1450_vm0, %v7942_v17  ;;  %v18007_v13 = vpop.eup %18006  ;;  %v17562_v35 = vunpack.i.h.bf16 %v23784_v31  ;;  %v17561_v61 = vunpack.i.l.bf16 %v23784_v31  ;;  %v23786_v17 = vld [vmem:[#allocation64_spill] sm:$0xff]  ;;  %v17447_v31 = vunpack.i.h.bf16 %v23792_v26 }
 0x502   : > { %v21396_v63 = vpop.xlane.xlu1 %7025  ;;  %16688 = vmatpush3.bf16.msra.mxu0 %v23778_v25  ;;  %v23785_v25 = vld [vmem:[#allocation77_spill] sm:$0xff]  ;;  %v7930_v12 = vmul.f32 %v18007_v13, %v23791_v21 }
 0x503   : > { %16694 = vmatprep.subr.bf16.mxu0 %v16693_v8  ;;  %7682 = vadd.xlane.f32.xlu0 %v7681_v15  ;;  %v23787_v55 = vsub.f32 %v23785_v25, %v23786_v17  ;;  %v16681_v21 = vpack.c.bf16 %v17562_v35, %v17561_v61  ;;  %v23798_v61 = vld [vmem:[#allocation88_spill] sm:$0xff] }
 0x504   : > { %v21407_v0 = vpop.xlane.xlu0 %7052 }
 0x505   : > { %v18009_v22 = vpop.eup %18008  ;;  %v7377_v62 = vmul.f32 1.442695, %v23787_v55  ;;  %7130 = vmax.xlane.f32.xlu1 %v7129_v38  ;;  %v7672_v55 = vsel %vm1450_vm0, %v21393_v41, 0.0 }
 0x506   : > { %v21414_v32 = vpop.eup %18010  ;;  %v7566_v9 = vpop.xlane.xlu1 %7565  ;;  %v7928_v15 = vmul.f32 %v18009_v22, %v23789_v39  ;;  %v17446_v39 = vunpack.i.l.bf16 %v23792_v26  ;;  %v23793_v22 = vld [vmem:[#allocation57_spill] sm:$0xff] }
 0x507   : > { %23788 = vst [vmem:[#allocation38_spill] sm:$0xff] %v21414_v32  ;;  %v21417_v37 = vpop.eup %18012  ;;  %7706 = vadd.xlane.f32.xlu0 %v7705_v45  ;;  %18020 = vpow2.f32 %v7377_v62  ;;  %v23794_v17 = vsub.f32 %v23667_v6, %v23793_v22  ;;  %v23795_v45 = vld [vmem:[#allocation37_spill] sm:$0xff]  ;;  %v23796_v62 = vld [vmem:[#allocation36_spill] sm:$0xff]  ;;  %v7702_v6 = vsel %vm1450_vm0, %v21414_v32, 0.0 }
 0x508   : > { %23790 = vst [vmem:[#allocation179_spill] sm:$0xff] %v21417_v37  ;;  %v18015_v3 = vpop.eup %18014  ;;  %15726 = vmatprep.mubr.msk.f32.mxu1 %vm1450_vm0, %v7928_v15  ;;  %v7596_v38 = vpop.xlane.xlu0 %7595  ;;  %18022 = vrcp.f32 %v7566_v9  ;;  %v7729_v26 = vsel %vm1450_vm0, %v21417_v37, 0.0 }
 0x509   : > { %v18017_v25 = vpop.eup %18016  ;;  %v7397_v28 = vmul.f32 1.442695, %v23794_v17  ;;  %7673 = vadd.xlane.f32.xlu1 %v7672_v55  ;;  %15727 = vmatmul.mubr.msk.f32.vlgmr.msra.gmra.mrb[86].mxu1 %vm1450_vm0, %v7930_v12  ;;  %v7950_v41 = vmul.f32 %v18015_v3, %v23796_v62  ;;  %v23799_v3 = vld [vmem:[#allocation51_spill] sm:$0xff] }
 0x50a   : > { %16676 = vmatpush3.bf16.msra.mxu1 %v21307_v18  ;;  %v7563_v13 = vpop.xlane.xlu1 %7562  ;;  %v7948_v15 = vmul.f32 %v18017_v25, %v23795_v45  ;;  %v21441_v9 = vpop.eup %18018  ;;  %v16701_v18 = vpack.c.bf16 %v17447_v31, %v17446_v39  ;;  %v23800_v55 = vsub.f32 %v23798_v61, %v23799_v3 }
 0x50b   : > { %16682 = vmatprep.subr.bf16.mxu1 %v16681_v21  ;;  %18024 = vrcp.f32 %v7563_v13  ;;  %7730 = vadd.xlane.f32.xlu0 %v7729_v26  ;;  %23797 = vst [vmem:[#allocation35_spill] sm:$0xff] %v21441_v9  ;;  %v7699_v22 = vsel %vm1450_vm0, %v21441_v9, 0.0 }
 0x50c   : > { %15761 = vmatprep.mubr.msk.f32.mxu0 %vm1450_vm0, %v7948_v15  ;;  %v21439_v12 = vpop.xlane.xlu0 %7037  ;;  %18026 = vpow2.f32 %v7397_v28  ;;  %v7395_v25 = vmul.f32 1.442695, %v23800_v55  ;;  %v23805_v15 = vld [vmem:[#allocation15_spill] sm:$0xff] }
 0x50d   : > { %7703 = vadd.xlane.f32.xlu1 %v7702_v6  ;;  %15762 = vmatmul.mubr.msk.f32.vlgmr.msra.gmra.mrb[100].mxu0 %vm1450_vm0, %v7950_v41  ;;  %18028 = vrcp.f32 %v7596_v38  ;;  %v23803_v41 = vsub.f32 %v23672_v23, %v21051_v50  ;;  %v23804_v38 = vld [vmem:[#allocation68_spill] sm:$0xff]  ;;  %v7141_v26 = vsel %vm1450_vm0, %v23805_v15, -inf }
 0x50e   : > { %16696 = vmatpush3.bf16.msra.mxu0 %v16693_v8  ;;  %v7593_v35 = vpop.xlane.xlu1 %7592  ;;  %v17327_v39 = vunpack.i.h.bf16 %v23804_v38  ;;  %v17326_v45 = vunpack.i.l.bf16 %v23804_v38 }
 0x50f   : > { %18030 = vrcp.f32 %v7593_v35  ;;  %16702 = vmatprep.subr.bf16.mxu0 %v16701_v18  ;;  %v7385_v8 = vmul.f32 1.442695, %v23803_v41  ;;  %v23806_v35 = vld [vmem:[#allocation84_spill] sm:$0xff] }
 0x510   : > { %v21449_v17 = vpop.xlane.xlu0 %7067  ;;  %18032 = vpow2.f32 %v7395_v25  ;;  %v23807_v61 = vsub.f32 %v20349_v24, %v23806_v35  ;;  %v23808_v25 = vld [vmem:[#allocation54_spill] sm:$0xff]  ;;  %v16689_v32 = vpack.c.bf16 %v17327_v39, %v17326_v45  ;;  %v23811_v24 = vld [vmem:[#allocation132_spill] sm:$0xff] }
 0x511   : > { %23801 = vst [vmem:[#allocation93_spill] sm:$0xff] %v21449_v17  ;;  %7700 = vadd.xlane.f32.xlu1 %v7699_v22  ;;  %v21453_v13 = vpop.eup %18020  ;;  %18034 = vpow2.f32 %v7385_v8  ;;  %v23810_v22 = vld [vmem:[#allocation47_spill] sm:$0xff]  ;;  %v17527_v35 = vunpack.i.h.bf16 %v23811_v24  ;;  %v23816_v39 = vld [vmem:[#allocation40_spill] sm:$0xff] }
 0x512   : > { %v21451_v28 = vpop.xlane.xlu1 %7034  ;;  %23802 = vst [vmem:[#allocation178_spill] sm:$0xff] %v21453_v13  ;;  %v18023_v31 = vpop.eup %18022  ;;  %v7405_v3 = vmul.f32 1.442695, %v23807_v61  ;;  %v7684_v37 = vsel %vm1450_vm0, %v21453_v13, 0.0  ;;  %v23812_v61 = vld [vmem:[#allocation85_spill] sm:$0xff] }
 0x513   : > { %v7938_v41 = vmul.f32 %v18023_v31, %v23810_v22  ;;  %v23815_v31 = vld [vmem:[#allocation49_spill] sm:$0xff] }
 0x514   : > { %v21462_v62 = vpop.xlane.xlu0 %7064  ;;  %18036 = vpow2.f32 %v7405_v3 }
 0x515   : > { %v18025_v6 = vpop.eup %18024  ;;  %7142 = vmax.xlane.f32.xlu1 %v7141_v26  ;;  %v17526_v26 = vunpack.i.l.bf16 %v23811_v24 }
 0x516   : > { %v7578_v55 = vpop.xlane.xlu1 %7577  ;;  %v7936_v50 = vmul.f32 %v18025_v6, %v23808_v25  ;;  %v21468_v23 = vpop.eup %18026  ;;  %v23813_v6 = vld [vmem:[#allocation73_spill] sm:$0xff] }
 0x517   : > { %23809 = vst [vmem:[#allocation33_spill] sm:$0xff] %v21468_v23  ;;  %v18029_v38 = vpop.eup %18028  ;;  %v23814_v25 = vsub.f32 %v23812_v61, %v23813_v6  ;;  %18038 = vrcp.f32 %v7578_v55  ;;  %v7714_v22 = vsel %vm1450_vm0, %v21468_v23, 0.0  ;;  %v23819_v55 = vld [vmem:[#allocation58_spill] sm:$0xff] }
 0x518   : > { %15740 = vmatprep.mubr.msk.f32.mxu1 %vm1450_vm0, %v7936_v50  ;;  %v7608_v15 = vpop.xlane.xlu0 %7607  ;;  %v7958_v45 = vmul.f32 %v18029_v38, %v23816_v39 }
 0x519   : > { %v18031_v9 = vpop.eup %18030  ;;  %v7383_v17 = vmul.f32 1.442695, %v23814_v25  ;;  %7685 = vadd.xlane.f32.xlu1 %v7684_v37  ;;  %15741 = vmatmul.mubr.msk.f32.vlgmr.msra.gmra.mrb[88].mxu1 %vm1450_vm0, %v7938_v41  ;;  %v16709_v37 = vpack.c.bf16 %v17527_v35, %v17526_v26  ;;  %v23824_v35 = vld [vmem:[#allocation52_spill] sm:$0xff] }
 0x51a   : > { %16684 = vmatpush3.bf16.msra.mxu1 %v16681_v21  ;;  %v7575_v8 = vpop.xlane.xlu1 %7574  ;;  %v7956_v50 = vmul.f32 %v18031_v9, %v23815_v31  ;;  %v21487_v3 = vpop.eup %18032  ;;  %v23818_v9 = vld [vmem:[#allocation91_spill] sm:$0xff]  ;;  %v23825_v26 = vld [vmem:[#allocation180_spill] sm:$0xff] }
 0x51b   : > { %16690 = vmatprep.subr.bf16.mxu1 %v16689_v32  ;;  %18040 = vrcp.f32 %v7575_v8  ;;  %23817 = vst [vmem:[#allocation79_spill] sm:$0xff] %v21487_v3  ;;  %v23820_v41 = vsub.f32 %v23818_v9, %v23819_v55  ;;  %v7711_v61 = vsel %vm1450_vm0, %v21487_v3, 0.0  ;;  %v21497_v25 = vpop.eup %18034  ;;  %v23826_v8 = vsub.f32 %v23824_v35, %v23825_v26 }
 0x51c   : > { %15775 = vmatprep.mubr.msk.f32.mxu0 %vm1450_vm0, %v7956_v50  ;;  %v21485_v24 = vpop.xlane.xlu0 %7049  ;;  %18042 = vpow2.f32 %v7383_v17  ;;  %23821 = vst [vmem:[#allocation48_spill] sm:$0xff] %v21497_v25  ;;  %v7696_v39 = vsel %vm1450_vm0, %v21497_v25, 0.0 }
 0x51d   : > { %7715 = vadd.xlane.f32.xlu1 %v7714_v22  ;;  %15776 = vmatmul.mubr.msk.f32.vlgmr.msra.gmra.mrb[102].mxu0 %vm1450_vm0, %v7958_v45  ;;  %18044 = vrcp.f32 %v7608_v15  ;;  %v7403_v38 = vmul.f32 1.442695, %v23820_v41  ;;  %v23822_v15 = vld [vmem:[#allocation19_spill] sm:$0xff]  ;;  %v7393_v31 = vmul.f32 1.442695, %v23826_v8  ;;  %v23829_v41 = vsub.f32 %v23695_v46, %v21116_v52  ;;  %v23831_v8 = vld [vmem:[#allocation41_spill] sm:$0xff] }
 0x51e   : > { %16704 = vmatpush3.bf16.msra.mxu0 %v16701_v18  ;;  %v7605_v21 = vpop.xlane.xlu1 %7604  ;;  %v21503_v18 = vpop.eup %18036  ;;  %v23833_v46 = vld [vmem:[#allocation61_spill] sm:$0xff] }
 0x51f   : > { %18046 = vrcp.f32 %v7605_v21  ;;  %16710 = vmatprep.subr.bf16.mxu0 %v16709_v37  ;;  %23823 = vst [vmem:[#allocation70_spill] sm:$0xff] %v21503_v18  ;;  %v23828_v21 = vld [vmem:[#allocation45_spill] sm:$0xff]  ;;  %v7726_v3 = vsel %vm1450_vm0, %v21503_v18, 0.0 }
 0x520   : > { %v21495_v6 = vpop.xlane.xlu0 %7079  ;;  %18048 = vpow2.f32 %v7403_v38  ;;  %v17407_v9 = vunpack.i.h.bf16 %v23828_v21  ;;  %v17406_v55 = vunpack.i.l.bf16 %v23828_v21 }
 0x521   : > { %7712 = vadd.xlane.f32.xlu1 %v7711_v61  ;;  %17569 = vrot.lane.b32.xlu0 %v23822_v15, %s18562_s9  ;;  %v18039_v50 = vpop.eup %18038  ;;  %v7401_v61 = vmul.f32 1.442695, %v23829_v41  ;;  %v23830_v15 = vld [vmem:[#allocation43_spill] sm:$0xff]  ;;  %18050 = vpow2.f32 %v7393_v31 }
 0x522   : > { %v21499_v17 = vpop.xlane.xlu1 %7046  ;;  %v7946_v25 = vmul.f32 %v18039_v50, %v23831_v8  ;;  %v23835_v50 = vld [vmem:[#allocation59_spill] sm:$0xff] }
 0x523   : > { %18052 = vpow2.f32 %v7401_v61 }
 0x524   : > { %v21510_v45 = vpop.xlane.xlu0 %7076 }
 0x525   : > { %23827 = vst [vmem:[#allocation18_spill] sm:$0xff] %v21510_v45  ;;  %v18041_v22 = vpop.eup %18040  ;;  %7697 = vadd.xlane.f32.xlu1 %v7696_v39  ;;  %v23832_v45 = vld [vmem:[#allocation89_spill] sm:$0xff] }
 0x526   : > { %v7590_v38 = vpop.xlane.xlu1 %7589  ;;  %v7944_v35 = vmul.f32 %v18041_v22, %v23830_v15  ;;  %v21518_v26 = vpop.eup %18042  ;;  %v23834_v52 = vsub.f32 %v23832_v45, %v23833_v46  ;;  %v16697_v22 = vpack.c.bf16 %v17407_v9, %v17406_v55  ;;  %v23836_v15 = vld [vmem:[#allocation55_spill] sm:$0xff]  ;;  %v23839_v55 = vld [vmem:[#allocation20_spill] sm:$0xff] }
 0x527   : > { %v18045_v23 = vpop.eup %18044  ;;  %18054 = vrcp.f32 %v7590_v38  ;;  %v7693_v45 = vsel %vm1450_vm0, %v21518_v26, 0.0 }
 0x528   : > { %15754 = vmatprep.mubr.msk.f32.mxu1 %vm1450_vm0, %v7944_v35  ;;  %v7620_v21 = vpop.xlane.xlu0 %7619  ;;  %v7399_v39 = vmul.f32 1.442695, %v23834_v52  ;;  %v7966_v35 = vmul.f32 %v18045_v23, %v23836_v15 }
 0x529   : > { %v18047_v13 = vpop.eup %18046  ;;  %7727 = vadd.xlane.f32.xlu1 %v7726_v3  ;;  %15755 = vmatmul.mubr.msk.f32.vlgmr.msra.gmra.mrb[90].mxu1 %vm1450_vm0, %v7946_v25  ;;  %v23838_v25 = vsub.f32 %v23713_v34, %v21188_v2  ;;  %v23844_v34 = vsub.f32 %v23755_v16, %v21326_v36  ;;  %v23848_v36 = vld [vmem:[#allocation63_spill] sm:$0xff] }
 0x52a   : > { %16692 = vmatpush3.bf16.msra.mxu1 %v16689_v32  ;;  %v7587_v31 = vpop.xlane.xlu1 %7586  ;;  %v7964_v41 = vmul.f32 %v18047_v13, %v23835_v50  ;;  %v21535_v3 = vpop.eup %18048  ;;  %v23837_v32 = vsub.f32 %v23700_v51, %v21143_v1  ;;  %v23841_v1 = vld [vmem:[#allocation99_spill] sm:$0xff]  ;;  %v23842_v51 = vld [vmem:[#allocation17_spill] sm:$0xff] }
 0x52b   : > { %16698 = vmatprep.subr.bf16.mxu1 %v16697_v22  ;;  %18056 = vrcp.f32 %v7587_v31  ;;  %v7423_v9 = vmul.f32 1.442695, %v23838_v25  ;;  %v7723_v61 = vsel %vm1450_vm0, %v21535_v3, 0.0  ;;  %v21549_v46 = vpop.eup %18050 }
 0x52c   : > { %15789 = vmatprep.mubr.msk.f32.mxu0 %vm1450_vm0, %v7964_v41  ;;  %v21533_v8 = vpop.xlane.xlu0 %7061  ;;  %18058 = vpow2.f32 %v7399_v39  ;;  %v7409_v13 = vmul.f32 1.442695, %v23837_v32  ;;  %23840 = vst [vmem:[#allocation32_spill] sm:$0xff] %v21549_v46  ;;  %v7441_v39 = vmul.f32 1.442695, %v23844_v34  ;;  %v7708_v50 = vsel %vm1450_vm0, %v21549_v46, 0.0 }
 0x52d   : > { %7694 = vadd.xlane.f32.xlu1 %v7693_v45  ;;  %15790 = vmatmul.mubr.msk.f32.vlgmr.msra.gmra.mrb[104].mxu0 %vm1450_vm0, %v7966_v35  ;;  %18060 = vrcp.f32 %v7620_v21  ;;  %v23843_v21 = vsub.f32 %v23841_v1, %v23842_v51  ;;  %v21556_v2 = vpop.eup %18052  ;;  %v23845_v35 = vld [vmem:[#allocation116_spill] sm:$0xff] }
 0x52e   : > { %16712 = vmatpush3.bf16.msra.mxu0 %v16709_v37  ;;  %v7617_v23 = vpop.xlane.xlu1 %7616  ;;  %v17487_v45 = vunpack.i.h.bf16 %v23845_v35  ;;  %v17486_v32 = vunpack.i.l.bf16 %v23845_v35  ;;  %v23849_v1 = vld [vmem:[#allocation60_spill] sm:$0xff]  ;;  %v23851_v35 = vsub.f32 %v23718_v4, %v21207_v56 }
 0x52f   : > { %18062 = vrcp.f32 %v7617_v23  ;;  %16718 = vmatprep.subr.bf16.mxu0 %v23839_v55  ;;  %v7411_v37 = vmul.f32 1.442695, %v23843_v21  ;;  %v23850_v34 = vld [vmem:[#allocation76_spill] sm:$0xff] }
 0x530   : > { %v21547_v38 = vpop.xlane.xlu0 %7091  ;;  %18064 = vpow2.f32 %v7409_v13  ;;  %v23846_v13 = vld [vmem:[#allocation182_spill] sm:$0xff]  ;;  %v17372_v46 = vunpack.i.h.bf16 %v23850_v34  ;;  %v7443_v18 = vmul.f32 1.442695, %v23851_v35  ;;  %v23853_v4 = vld [vmem:[#allocation16_spill] sm:$0xff] }
 0x531   : > { %7724 = vadd.xlane.f32.xlu1 %v7723_v61  ;;  %18066 = vpow2.f32 %v7423_v9  ;;  %v18055_v31 = vpop.eup %18054  ;;  %v23847_v23 = vsub.f32 %v23691_v29, %v23846_v13  ;;  %v7720_v29 = vsel %vm1450_vm0, %v21556_v2, 0.0  ;;  %v21586_v13 = vpack.c.bf16 %v17487_v45, %v17486_v32  ;;  %v23857_v45 = vld [vmem:[#allocation131_spill] sm:$0xff] }
 0x532   : > { %v21554_v52 = vpop.xlane.xlu1 %7058  ;;  %18068 = vpow2.f32 %v7411_v37  ;;  %v7954_v51 = vmul.f32 %v18055_v31, %v23849_v1  ;;  %v7233_v32 = vsub.f32 %v23857_v45, %v21391_v43 }
 0x533   : > { %v7413_v25 = vmul.f32 1.442695, %v23847_v23  ;;  %18070 = vpow2.f32 %v7441_v39  ;;  %v23852_v39 = vsub.f32 %v23694_v5, %v21105_v33  ;;  %v23856_v33 = vsub.f32 %v23726_v19, %v21223_v54 }
 0x534   : > { %v21563_v41 = vpop.xlane.xlu0 %7088  ;;  %v23859_v19 = vsub.f32 %v20393_v10, %v21128_v20 }
 0x535   : > { %v18057_v15 = vpop.eup %18056  ;;  %7709 = vadd.xlane.f32.xlu1 %v7708_v50  ;;  %18072 = vpow2.f32 %v7413_v25  ;;  %v7419_v31 = vmul.f32 1.442695, %v23852_v39  ;;  %v7445_v5 = vmul.f32 1.442695, %v23856_v33  ;;  %v23865_v33 = vld [vmem:[#allocation156_spill] sm:$0xff] }
 0x536   : > { %v7602_v9 = vpop.xlane.xlu1 %7601  ;;  %v7952_v16 = vmul.f32 %v18057_v15, %v23848_v36  ;;  %v21571_v61 = vpop.eup %18058  ;;  %v17371_v15 = vunpack.i.l.bf16 %v23850_v34  ;;  %v23854_v36 = vld [vmem:[#allocation50_spill] sm:$0xff]  ;;  %v7421_v43 = vmul.f32 1.442695, %v23859_v19  ;;  %v17566_v45 = vunpack.i.l.bf16 %v23865_v33 }
 0x537   : > { %v18061_v21 = vpop.eup %18060  ;;  %18074 = vrcp.f32 %v7602_v9 }
 0x538   : > { %15768 = vmatprep.mubr.msk.f32.mxu1 %vm1450_vm0, %v7952_v16  ;;  %v7632_v37 = vpop.xlane.xlu0 %7631  ;;  %v7974_v16 = vmul.f32 %v18061_v21, %v23854_v36  ;;  %v7447_v21 = vmul.f32 1.442695, %v7233_v32  ;;  %v23866_v32 = vsub.f32 %v20385_v48, %v21149_v27  ;;  %v23870_v48 = vld [vmem:[#allocation141_spill] sm:$0xff] }
 0x539   : > { %v18063_v50 = vpop.eup %18062  ;;  %7721 = vadd.xlane.f32.xlu1 %v7720_v29  ;;  %15769 = vmatmul.mubr.msk.f32.vlgmr.msra.gmra.mrb[92].mxu1 %vm1450_vm0, %v7954_v51  ;;  %v23861_v29 = vsub.f32 %v23711_v49, %v21179_v14  ;;  %v7237_v27 = vsub.f32 %v23870_v48, %v21451_v28  ;;  %v23879_v48 = vld [vmem:[#allocation111_spill] sm:$0xff] }
 0x53a   : > { %16700 = vmatpush3.bf16.msra.mxu1 %v16697_v22  ;;  %v7599_v56 = vpop.xlane.xlu1 %7598  ;;  %v7972_v23 = vmul.f32 %v18063_v50, %v23853_v4  ;;  %v21591_v25 = vpop.eup %18064  ;;  %v7717_v22 = vsel %vm1450_vm0, %v21571_v61, 0.0  ;;  %v23862_v50 = vld [vmem:[#allocation153_spill] sm:$0xff] }
 0x53b   : > { %16706 = vmatprep.subr.bf16.mxu1 %v21586_v13  ;;  %18076 = vrcp.f32 %v7599_v56  ;;  %23855 = vst [vmem:[#allocation129_spill] sm:$0xff] %v21591_v25  ;;  %v21603_v1 = vpop.eup %18066  ;;  %v7732_v34 = vsel %vm1450_vm0, %v21591_v25, 0.0  ;;  %v23863_v56 = vld [vmem:[#allocation139_spill] sm:$0xff] }
 0x53c   : > { %18078 = vpow2.f32 %v7443_v18  ;;  %15803 = vmatprep.mubr.msk.f32.mxu0 %vm1450_vm0, %v7972_v23  ;;  %v21601_v9 = vpop.xlane.xlu0 %7073  ;;  %23858 = vst [vmem:[#allocation137_spill] sm:$0xff] %v21603_v1  ;;  %v21606_v18 = vpack.c.bf16 %v17372_v46, %v17371_v15  ;;  %v21613_v51 = vpop.eup %18068  ;;  %v7235_v4 = vsub.f32 %v23863_v56, %v21261_v11  ;;  %v23864_v23 = vsub.f32 %v23782_v53, %v21396_v63  ;;  %v23867_v53 = vld [vmem:[#allocation56_spill] sm:$0xff] }
 0x53d   : > { %18080 = vpow2.f32 %v7419_v31  ;;  %7718 = vadd.xlane.f32.xlu1 %v7717_v22  ;;  %15804 = vmatmul.mubr.msk.f32.vlgmr.msra.gmra.mrb[106].mxu0 %vm1450_vm0, %v7974_v16  ;;  %v21621_v35 = vpop.eup %18070  ;;  %v7735_v39 = vsel %vm1450_vm0, %v21613_v51, 0.0  ;;  %v7415_v22 = vmul.f32 1.442695, %v23866_v32 }
 0x53e   : > { %18082 = vrcp.f32 %v7632_v37  ;;  %16720 = vmatpush3.bf16.msra.mxu0 %v23839_v55  ;;  %v7629_v54 = vpop.xlane.xlu1 %7628  ;;  %v7753_v55 = vsel %vm1450_vm0, %v21603_v1, 0.0  ;;  %23860 = vst [vmem:[#allocation77_spill] sm:$0xff] %v21621_v35  ;;  %v7417_v37 = vmul.f32 1.442695, %v23861_v29  ;;  %v7449_v36 = vmul.f32 1.442695, %v23864_v23 }
 0x53f   : > { %18084 = vrcp.f32 %v7629_v54  ;;  %16726 = vmatprep.subr.bf16.mxu0 %v21606_v18  ;;  %v21625_v20 = vpop.eup %18072  ;;  %v7780_v49 = vsel %vm1450_vm0, %v21621_v35, 0.0  ;;  %v7451_v23 = vmul.f32 1.442695, %v7235_v4 }
 0x540   : > { %18086 = vpow2.f32 %v7445_v5  ;;  %v21617_v46 = vpop.xlane.xlu0 %7103  ;;  %7754 = vadd.xlane.f32.xlu0 %v7753_v55  ;;  %v17567_v5 = vunpack.i.h.bf16 %v23865_v33  ;;  %v23869_v55 = vld [vmem:[#allocation78_spill] sm:$0xff] }
 0x541   : > { %7733 = vadd.xlane.f32.xlu1 %v7732_v34  ;;  %18088 = vpow2.f32 %v7421_v43  ;;  %v18075_v31 = vpop.eup %18074  ;;  %v23868_v43 = vld [vmem:[#allocation97_spill] sm:$0xff] }
 0x542   : > { %v21623_v10 = vpop.xlane.xlu1 %7070  ;;  %18090 = vpow2.f32 %v7447_v21  ;;  %v17452_v21 = vunpack.i.h.bf16 %v23868_v43  ;;  %v17451_v34 = vunpack.i.l.bf16 %v23868_v43  ;;  %v7962_v29 = vmul.f32 %v18075_v31, %v23869_v55  ;;  %v23877_v43 = vld [vmem:[#allocation140_spill] sm:$0xff] }
 0x543   : > { %18092 = vpow2.f32 %v7417_v37  ;;  %v23872_v37 = vsub.f32 %v23720_v57, %v21211_v58  ;;  %v23876_v57 = vld [vmem:[#allocation14_spill] sm:$0xff]  ;;  %v7238_v55 = vsub.f32 %v23877_v43, %v21439_v12 }
 0x544   : > { %v21639_v16 = vpop.xlane.xlu0 %7100  ;;  %7781 = vadd.xlane.f32.xlu0 %v7780_v49  ;;  %18094 = vpow2.f32 %v7449_v36  ;;  %v7738_v49 = vsel %vm1450_vm0, %v21625_v20, 0.0  ;;  %v21671_v36 = vpack.c.bf16 %v17567_v5, %v17566_v45  ;;  %v7455_v5 = vmul.f32 1.442695, %v7237_v27  ;;  %v23880_v27 = vld [vmem:[#allocation105_spill] sm:$0xff] }
 0x545   : > { %v18077_v14 = vpop.eup %18076  ;;  %7736 = vadd.xlane.f32.xlu1 %v7735_v39  ;;  %18096 = vpow2.f32 %v7415_v22  ;;  %v7425_v31 = vmul.f32 1.442695, %v23872_v37  ;;  %v23882_v37 = vld [vmem:[#allocation143_spill] sm:$0xff] }
 0x546   : > { %v21648_v11 = vpop.eup %18078  ;;  %v7614_v63 = vpop.xlane.xlu1 %7613  ;;  %v7960_v54 = vmul.f32 %v18077_v14, %v23867_v53  ;;  %v23875_v53 = vld [vmem:[#allocation65_spill] sm:$0xff] }
 0x547   : > { %v21651_v19 = vpop.eup %18080  ;;  %v7783_v28 = vsel %vm1450_vm0, %v21648_v11, 0.0  ;;  %18098 = vrcp.f32 %v7614_v63 }
 0x548   : > { %v18083_v56 = vpop.eup %18082  ;;  %v21658_v39 = vpop.f32.mrb[92].mxu0  ;;  %15782 = vmatprep.mubr.msk.f32.mxu1 %vm1450_vm0, %v7960_v54  ;;  %7784 = vadd.xlane.f32.xlu0 %v7783_v28  ;;  %v7747_v45 = vsel %vm1450_vm0, %v21651_v19, 0.0  ;;  %v7457_v28 = vmul.f32 1.442695, %v7238_v55 }
 0x549   : > { %23871 = vst [vmem:[#allocation64_spill] sm:$0xff] %v21658_v39  ;;  %v7644_v14 = vpop.xlane.xlu0 %7643  ;;  %v18085_v33 = vpop.eup %18084  ;;  %7739 = vadd.xlane.f32.xlu1 %v7738_v49  ;;  %15783 = vmatmul.mubr.msk.f32.vlgmr.msra.gmra.mrb[94].mxu1 %vm1450_vm0, %v7962_v29  ;;  %v7982_v54 = vmul.f32 %v18083_v56, %v23876_v57  ;;  %v21691_v56 = vpack.c.bf16 %v17452_v21, %v17451_v34  ;;  %v23897_v39 = vld [vmem:[#allocation145_spill] sm:$0xff] }
 0x54a   : > { %v21667_v4 = vpop.f32.mrb[93].mxu0  ;;  %v21673_v32 = vpop.eup %18086  ;;  %16708 = vmatpush3.bf16.msra.mxu1 %v21586_v13  ;;  %v7980_v58 = vmul.f32 %v18085_v33, %v23875_v53  ;;  %v23881_v49 = vsub.f32 %v23879_v48, %v23880_v27  ;;  %v23891_v48 = vld [vmem:[#allocation142_spill] sm:$0xff] }
 0x54b   : > { %23873 = vst [vmem:[#allocation46_spill] sm:$0xff] %v21667_v4  ;;  %23874 = vst [vmem:[#allocation39_spill] sm:$0xff] %v21673_v32  ;;  %v7611_v22 = vpop.xlane.xlu1 %7610  ;;  %16714 = vmatprep.subr.bf16.mxu1 %v21671_v36  ;;  %v21686_v63 = vpop.eup %18088  ;;  %v7786_v29 = vsel %vm1450_vm0, %v21673_v32, 0.0  ;;  %v7240_v27 = vsub.f32 %v23891_v48, %v21302_v30  ;;  %v23896_v48 = vld [vmem:[#allocation181_spill] sm:$0xff] }
 0x54c   : > { %18100 = vrcp.f32 %v7611_v22  ;;  %15817 = vmatprep.mubr.msk.f32.mxu0 %vm1450_vm0, %v7980_v58  ;;  %v21693_v12 = vpop.eup %18090  ;;  %7787 = vadd.xlane.f32.xlu0 %v7786_v29  ;;  %v7427_v33 = vmul.f32 1.442695, %v23881_v49  ;;  %v7750_v21 = vsel %vm1450_vm0, %v21686_v63, 0.0 }
 0x54d   : > { %18102 = vpow2.f32 %v7451_v23  ;;  %v21684_v13 = vpop.xlane.xlu0 %7085  ;;  %7748 = vadd.xlane.f32.xlu1 %v7747_v45  ;;  %15818 = vmatmul.mubr.msk.f32.vlgmr.msra.gmra.mrb[108].mxu0 %vm1450_vm0, %v7982_v54  ;;  %23878 = vst [vmem:[#allocation100_spill] sm:$0xff] %v21693_v12  ;;  %v7789_v53 = vsel %vm1450_vm0, %v21693_v12, 0.0  ;;  %v23887_v54 = vld [vmem:[#allocation66_spill] sm:$0xff] }
 0x54e   : > { %18104 = vpow2.f32 %v7425_v31  ;;  %16728 = vmatpush3.bf16.msra.mxu0 %v21606_v18  ;;  %v7239_v31 = vsub.f32 %v23882_v37, %v21339_v59  ;;  %v21706_v18 = vpop.eup %18092  ;;  %v17332_v43 = vunpack.i.h.bf16 %v23887_v54  ;;  %v17331_v55 = vunpack.i.l.bf16 %v23887_v54  ;;  %v23889_v45 = vld [vmem:[#allocation94_spill] sm:$0xff] }
 0x54f   : > { %18106 = vrcp.f32 %v7644_v14  ;;  %v7641_v23 = vpop.xlane.xlu1 %7640  ;;  %16734 = vmatprep.subr.bf16.mxu0 %v21691_v56  ;;  %23883 = vst [vmem:[#allocation57_spill] sm:$0xff] %v21706_v18  ;;  %v23884_v14 = vld [vmem:[#allocation115_spill] sm:$0xff]  ;;  %v21712_v58 = vpop.eup %18094  ;;  %v7744_v37 = vsel %vm1450_vm0, %v21706_v18, 0.0 }
 0x550   : > { %18108 = vrcp.f32 %v7641_v23  ;;  %v7225_v22 = vsub.f32 %v23884_v14, %v21250_v42  ;;  %23885 = vst [vmem:[#allocation37_spill] sm:$0xff] %v21712_v58  ;;  %7790 = vadd.xlane.f32.xlu0 %v7789_v53  ;;  %v21716_v57 = vpop.eup %18096  ;;  %v7459_v49 = vmul.f32 1.442695, %v7239_v31  ;;  %v23895_v31 = vld [vmem:[#allocation127_spill] sm:$0xff]  ;;  %v21738_v4 = vpack.c.bf16 %v17332_v43, %v17331_v55 }
 0x551   : > { %18110 = vpow2.f32 %v7455_v5  ;;  %v21704_v34 = vpop.xlane.xlu0 %7115  ;;  %7751 = vadd.xlane.f32.xlu1 %v7750_v21  ;;  %23886 = vst [vmem:[#allocation36_spill] sm:$0xff] %v21716_v57  ;;  %v23888_v5 = vld [vmem:[#allocation110_spill] sm:$0xff]  ;;  %v18099_v23 = vpop.eup %18098  ;;  %v17531_v12 = vunpack.i.l.bf16 %v23895_v31  ;;  %v23898_v43 = vsub.f32 %v23741_v7, %v21277_v40  ;;  %v23901_v40 = vld [vmem:[#allocation183_spill] sm:$0xff] }
 0x552   : > { %18112 = vpow2.f32 %v7427_v33  ;;  %v23890_v29 = vsub.f32 %v23888_v5, %v23889_v45  ;;  %v7431_v53 = vmul.f32 1.442695, %v7225_v22  ;;  %v7792_v33 = vsel %vm1450_vm0, %v21712_v58, 0.0  ;;  %v23893_v45 = vld [vmem:[#allocation67_spill] sm:$0xff] }
 0x553   : > { %v21714_v59 = vpop.xlane.xlu1 %7082  ;;  %18114 = vpow2.f32 %v7457_v28  ;;  %v17532_v28 = vunpack.i.h.bf16 %v23895_v31  ;;  %v7970_v15 = vmul.f32 %v18099_v23, %v23896_v48  ;;  %v7241_v58 = vsub.f32 %v23897_v39, %v21499_v17  ;;  %v23900_v23 = vld [vmem:[#allocation98_spill] sm:$0xff] }
 0x554   : > { %v7429_v42 = vmul.f32 1.442695, %v23890_v29  ;;  %7793 = vadd.xlane.f32.xlu0 %v7792_v33  ;;  %v7433_v55 = vmul.f32 1.442695, %v23898_v43  ;;  %v23907_v43 = vld [vmem:[#allocation147_spill] sm:$0xff] }
 0x555   : > { %v21727_v21 = vpop.xlane.xlu0 %7112  ;;  %7745 = vadd.xlane.f32.xlu1 %v7744_v37  ;;  %v7461_v37 = vmul.f32 1.442695, %v7240_v27 }
 0x556   : > { %v18101_v14 = vpop.eup %18100  ;;  %18116 = vpow2.f32 %v7429_v42 }
 0x557   : > { %v21731_v54 = vpop.eup %18102  ;;  %v7626_v5 = vpop.xlane.xlu1 %7625  ;;  %v7968_v29 = vmul.f32 %v18101_v14, %v23893_v45  ;;  %18118 = vpow2.f32 %v7459_v49  ;;  %v7741_v14 = vsel %vm1450_vm0, %v21716_v57, 0.0 }
 0x558   : > { %23892 = vst [vmem:[#allocation88_spill] sm:$0xff] %v21731_v54  ;;  %v21734_v30 = vpop.eup %18104  ;;  %18120 = vpow2.f32 %v7431_v53  ;;  %v7795_v17 = vsel %vm1450_vm0, %v21731_v54, 0.0  ;;  %v7463_v53 = vmul.f32 1.442695, %v7241_v58  ;;  %v23904_v58 = vld [vmem:[#allocation119_spill] sm:$0xff] }
 0x559   : > { %23894 = vst [vmem:[#allocation51_spill] sm:$0xff] %v21734_v30  ;;  %v18107_v22 = vpop.eup %18106  ;;  %15796 = vmatprep.mubr.msk.f32.mxu1 %vm1450_vm0, %v7968_v29  ;;  %v7653_v33 = vpop.xlane.xlu0 %7652  ;;  %7742 = vadd.xlane.f32.xlu1 %v7741_v14  ;;  %v23905_v14 = vld [vmem:[#allocation185_spill] sm:$0xff] }
 0x55a   : > { %v18109_v45 = vpop.eup %18108  ;;  %15797 = vmatmul.mubr.msk.f32.vlgmr.msra.gmra.mrb[96].mxu1 %vm1450_vm0, %v7970_v15  ;;  %18122 = vrcp.f32 %v7653_v33  ;;  %7796 = vadd.xlane.f32.xlu0 %v7795_v17  ;;  %v7990_v7 = vmul.f32 %v18107_v22, %v23901_v40  ;;  %v23902_v15 = vld [vmem:[#allocation144_spill] sm:$0xff]  ;;  %v16741_v22 = vpack.c.bf16 %v17532_v28, %v17531_v12  ;;  %v23906_v33 = vsub.f32 %v23904_v58, %v23905_v14 }
 0x55b   : > { %v21752_v39 = vpop.eup %18110  ;;  %16716 = vmatpush3.bf16.msra.mxu1 %v21671_v36  ;;  %v7656_v42 = vpop.xlane.xlu1 %7655  ;;  %v7988_v27 = vmul.f32 %v18109_v45, %v23900_v23  ;;  %v7242_v49 = vsub.f32 %v23902_v15, %v21485_v24  ;;  %v7756_v36 = vsel %vm1450_vm0, %v21734_v30, 0.0  ;;  %v23912_v15 = vld [vmem:[#allocation109_spill] sm:$0xff] }
 0x55c   : > { %23899 = vst [vmem:[#allocation68_spill] sm:$0xff] %v21752_v39  ;;  %16722 = vmatprep.subr.bf16.mxu1 %v21738_v4  ;;  %18124 = vrcp.f32 %v7656_v42  ;;  %v21765_v31 = vpop.eup %18112  ;;  %v7801_v48 = vsel %vm1450_vm0, %v21752_v39, 0.0  ;;  %v7435_v45 = vmul.f32 1.442695, %v23906_v33  ;;  %v23948_v30 = vld [vmem:[#allocation53_spill] sm:$0xff] }
 0x55d   : > { %18126 = vpow2.f32 %v7461_v37  ;;  %15831 = vmatprep.mubr.msk.f32.mxu0 %vm1450_vm0, %v7988_v27  ;;  %v21763_v29 = vpop.xlane.xlu0 %7097  ;;  %7757 = vadd.xlane.f32.xlu1 %v7756_v36  ;;  %v21770_v37 = vpop.eup %18114  ;;  %v7465_v17 = vmul.f32 1.442695, %v7242_v49  ;;  %v7759_v12 = vsel %vm1450_vm0, %v21765_v31, 0.0 }
 0x55e   : > { %18128 = vpow2.f32 %v7433_v55  ;;  %15832 = vmatmul.mubr.msk.f32.vlgmr.msra.gmra.mrb[110].mxu0 %vm1450_vm0, %v7990_v7  ;;  %23903 = vst [vmem:[#allocation84_spill] sm:$0xff] %v21770_v37  ;;  %7802 = vadd.xlane.f32.xlu0 %v7801_v48  ;;  %v7243_v55 = vsub.f32 %v23907_v43, %v21407_v0  ;;  %v7804_v23 = vsel %vm1450_vm0, %v21770_v37, 0.0  ;;  %v23911_v7 = vld [vmem:[#allocation117_spill] sm:$0xff]  ;;  %v23914_v48 = vld [vmem:[#allocation146_spill] sm:$0xff] }
 0x55f   : > { %18130 = vrcp.f32 %v7626_v5  ;;  %16736 = vmatpush3.bf16.msra.mxu0 %v21691_v56  ;;  %v7623_v24 = vpop.xlane.xlu1 %7622  ;;  %v23908_v56 = vld [vmem:[#allocation125_spill] sm:$0xff]  ;;  %v23913_v49 = vsub.f32 %v23911_v7, %v23912_v15 }
 0x560   : > { %18132 = vrcp.f32 %v7623_v24  ;;  %16742 = vmatprep.subr.bf16.mxu0 %v16741_v22  ;;  %v21782_v5 = vpop.eup %18116  ;;  %v7229_v42 = vsub.f32 %v23908_v56, %v21321_v60  ;;  %v7244_v60 = vsub.f32 %v23914_v48, %v21373_v44  ;;  %v7467_v24 = vmul.f32 1.442695, %v7243_v55  ;;  %v23917_v44 = vld [vmem:[#allocation186_spill] sm:$0xff] }
 0x561   : > { %18134 = vpow2.f32 %v7463_v53  ;;  %v21780_v28 = vpop.xlane.xlu0 %7127  ;;  %7760 = vadd.xlane.f32.xlu1 %v7759_v12  ;;  %v21788_v27 = vpop.eup %18118  ;;  %v7437_v53 = vmul.f32 1.442695, %v23913_v49  ;;  %v7762_v58 = vsel %vm1450_vm0, %v21782_v5, 0.0  ;;  %v23915_v12 = vld [vmem:[#allocation184_spill] sm:$0xff] }
 0x562   : > { %23909 = vst [vmem:[#allocation54_spill] sm:$0xff] %v21788_v27  ;;  %7805 = vadd.xlane.f32.xlu0 %v7804_v23  ;;  %v21792_v40 = vpop.eup %18120  ;;  %18136 = vpow2.f32 %v7435_v45  ;;  %v7439_v43 = vmul.f32 1.442695, %v7229_v42  ;;  %v7807_v45 = vsel %vm1450_vm0, %v21788_v27, 0.0  ;;  %v7469_v49 = vmul.f32 1.442695, %v7244_v60 }
 0x563   : > { %v21790_v0 = vpop.xlane.xlu1 %7094  ;;  %23910 = vst [vmem:[#allocation47_spill] sm:$0xff] %v21792_v40  ;;  %18138 = vpow2.f32 %v7465_v17  ;;  %v23919_v42 = vld [vmem:[#allocation149_spill] sm:$0xff] }
 0x564   : > { %v18123_v36 = vpop.eup %18122  ;;  %18140 = vpow2.f32 %v7437_v53  ;;  %v7245_v48 = vsub.f32 %v23919_v42, %v21554_v52  ;;  %v23922_v52 = vld [vmem:[#allocation22_spill] sm:$0xff]  ;;  %v23924_v42 = vld [vmem:[#allocation12_spill] sm:$0xff] }
 0x565   : > { %v21801_v14 = vpop.xlane.xlu0 %7124  ;;  %7763 = vadd.xlane.f32.xlu1 %v7762_v58  ;;  %v7996_v56 = vmul.f32 %v18123_v36, %v23915_v12  ;;  %18142 = vpow2.f32 %v7467_v24  ;;  %v7765_v36 = vsel %vm1450_vm0, %v21792_v40, 0.0  ;;  %v23920_v12 = vld [vmem:[#allocation42_spill] sm:$0xff] }
 0x566   : > { %v18125_v33 = vpop.eup %18124  ;;  %7808 = vadd.xlane.f32.xlu0 %v7807_v45  ;;  %18144 = vpow2.f32 %v7439_v43 }
 0x567   : > { %v21806_v23 = vpop.eup %18126  ;;  %v7638_v7 = vpop.xlane.xlu1 %7637  ;;  %v7998_v55 = vmul.f32 %v18125_v33, %v23917_v44  ;;  %15845 = vmatprep.mubr.msk.f32.mxu0 %vm1450_vm0, %v7996_v56  ;;  %v17412_v33 = vunpack.i.h.bf16 %v23920_v12  ;;  %v17411_v44 = vunpack.i.l.bf16 %v23920_v12  ;;  %v23923_v56 = vld [vmem:[#allocation102_spill] sm:$0xff]  ;;  %v7471_v12 = vmul.f32 1.442695, %v7245_v48 }
 0x568   : > { %23916 = vst [vmem:[#allocation132_spill] sm:$0xff] %v21806_v23  ;;  %v21809_v17 = vpop.eup %18128  ;;  %v7810_v53 = vsel %vm1450_vm0, %v21806_v23, 0.0 }
 0x569   : > { %23918 = vst [vmem:[#allocation85_spill] sm:$0xff] %v21809_v17  ;;  %v18131_v15 = vpop.eup %18130  ;;  %15846 = vmatmul.mubr.msk.f32.vlgmr.msra.gmra.mrb[112].mxu0 %vm1450_vm0, %v7998_v55  ;;  %v7665_v58 = vpop.xlane.xlu0 %7664  ;;  %7766 = vadd.xlane.f32.xlu1 %v7765_v36 }
 0x56a   : > { %v18133_v45 = vpop.eup %18132  ;;  %16744 = vmatpush3.bf16.msra.mxu0 %v16741_v22  ;;  %18146 = vrcp.f32 %v7665_v58  ;;  %7811 = vadd.xlane.f32.xlu0 %v7810_v53  ;;  %v7978_v27 = vmul.f32 %v18131_v15, %v23924_v42  ;;  %v7768_v22 = vsel %vm1450_vm0, %v21809_v17, 0.0 }
 0x56b   : > { %v21821_v60 = vpop.eup %18134  ;;  %16750 = vmatprep.subr.bf16.mxu0 %v23922_v52  ;;  %v7668_v24 = vpop.xlane.xlu1 %7667  ;;  %v7976_v55 = vmul.f32 %v18133_v45, %v23923_v56  ;;  %v16729_v45 = vpack.c.bf16 %v17412_v33, %v17411_v44  ;;  %v23928_v56 = vld [vmem:[#allocation81_spill] sm:$0xff] }
 0x56c   : > { %23921 = vst [vmem:[#allocation73_spill] sm:$0xff] %v21821_v60  ;;  %18148 = vrcp.f32 %v7668_v24  ;;  %v21831_v36 = vpop.eup %18136  ;;  %v7813_v58 = vsel %vm1450_vm0, %v21821_v60, 0.0  ;;  %v17376_v42 = vunpack.i.l.bf16 %v23928_v56  ;;  %v23931_v60 = vld [vmem:[#allocation187_spill] sm:$0xff] }
 0x56d   : > { %18150 = vpow2.f32 %v7469_v49  ;;  %15810 = vmatprep.mubr.msk.f32.mxu1 %vm1450_vm0, %v7976_v55  ;;  %v21829_v43 = vpop.xlane.xlu0 %7109  ;;  %7769 = vadd.xlane.f32.xlu1 %v7768_v22  ;;  %v21836_v53 = vpop.eup %18138  ;;  %v7771_v49 = vsel %vm1450_vm0, %v21831_v36, 0.0  ;;  %v17377_v55 = vunpack.i.h.bf16 %v23928_v56 }
 0x56e   : > { %15811 = vmatmul.mubr.msk.f32.vlgmr.msra.gmra.mrb[98].mxu1 %vm1450_vm0, %v7978_v27  ;;  %23925 = vst [vmem:[#allocation49_spill] sm:$0xff] %v21836_v53  ;;  %18152 = vrcp.f32 %v7638_v7  ;;  %7814 = vadd.xlane.f32.xlu0 %v7813_v58  ;;  %v21843_v27 = vpop.eup %18140  ;;  %v7816_v33 = vsel %vm1450_vm0, %v21836_v53, 0.0 }
 0x56f   : > { %16724 = vmatpush3.bf16.msra.mxu1 %v21738_v4  ;;  %v7635_v15 = vpop.xlane.xlu1 %7634  ;;  %v21847_v44 = vpop.eup %18142 }
 0x570   : > { %16730 = vmatprep.subr.bf16.mxu1 %v16729_v45  ;;  %18154 = vrcp.f32 %v7635_v15  ;;  %23926 = vst [vmem:[#allocation40_spill] sm:$0xff] %v21847_v44  ;;  %v21851_v7 = vpop.eup %18144  ;;  %v7819_v15 = vsel %vm1450_vm0, %v21847_v44, 0.0  ;;  %v23932_v44 = vld [vmem:[#allocation113_spill] sm:$0xff] }
 0x571   : > { %18156 = vpow2.f32 %v7471_v12  ;;  %v21841_v48 = vpop.xlane.xlu0 %7139  ;;  %7772 = vadd.xlane.f32.xlu1 %v7771_v49  ;;  %23927 = vst [vmem:[#allocation91_spill] sm:$0xff] %v21851_v7  ;;  %v7774_v12 = vsel %vm1450_vm0, %v21843_v27, 0.0  ;;  %v23929_v49 = vld [vmem:[#allocation107_spill] sm:$0xff]  ;;  %v7777_v39 = vsel %vm1450_vm0, %v21851_v7, 0.0  ;;  %v17492_v40 = vunpack.i.h.bf16 %v23932_v44 }
 0x572   : > { %7817 = vadd.xlane.f32.xlu0 %v7816_v33 }
 0x573   : > { %v21849_v4 = vpop.xlane.xlu1 %7106 }
 0x574   : > { %v18147_v24 = vpop.eup %18146 }
 0x575   : > { %v21857_v22 = vpop.xlane.xlu0 %7136  ;;  %7775 = vadd.xlane.f32.xlu1 %v7774_v12  ;;  %v8004_v33 = vmul.f32 %v18147_v24, %v23929_v49  ;;  %v16757_v12 = vpack.c.bf16 %v17377_v55, %v17376_v42  ;;  %v17491_v24 = vunpack.i.l.bf16 %v23932_v44  ;;  %v23935_v42 = vld [vmem:[#allocation130_spill] sm:$0xff] }
 0x576   : > { %v18149_v58 = vpop.eup %18148  ;;  %7820 = vadd.xlane.f32.xlu0 %v7819_v15  ;;  %v23934_v15 = vld [vmem:[#allocation188_spill] sm:$0xff] }
 0x577   : > { %v21862_v53 = vpop.eup %18150  ;;  %v7650_v23 = vpop.xlane.xlu1 %7649  ;;  %v8006_v37 = vmul.f32 %v18149_v58, %v23931_v60  ;;  %15859 = vmatprep.mubr.msk.f32.mxu0 %vm1450_vm0, %v8004_v33 }
 0x578   : > { %23930 = vst [vmem:[#allocation58_spill] sm:$0xff] %v21862_v53  ;;  %v18153_v56 = vpop.eup %18152  ;;  %v7822_v60 = vsel %vm1450_vm0, %v21862_v53, 0.0  ;;  %v23940_v53 = vld [vmem:[#allocation189_spill] sm:$0xff] }
 0x579   : > { %15860 = vmatmul.mubr.msk.f32.vlgmr.msra.gmra.mrb[114].mxu0 %vm1450_vm0, %v8006_v37  ;;  %v7677_v35 = vpop.xlane.xlu0 %7676  ;;  %7778 = vadd.xlane.f32.xlu1 %v7777_v39  ;;  %v7986_v49 = vmul.f32 %v18153_v56, %v23935_v42 }
 0x57a   : > { %v18155_v17 = vpop.eup %18154  ;;  %16752 = vmatpush3.bf16.msra.mxu0 %v23922_v52  ;;  %7823 = vadd.xlane.f32.xlu0 %v7822_v60  ;;  %18158 = vrcp.f32 %v7677_v35  ;;  %v16737_v52 = vpack.c.bf16 %v17492_v40, %v17491_v24  ;;  %v23936_v60 = vld [vmem:[#allocation103_spill] sm:$0xff] }
 0x57b   : > { %v21874_v58 = vpop.eup %18156  ;;  %16758 = vmatprep.subr.bf16.mxu0 %v16757_v12  ;;  %v7680_v37 = vpop.xlane.xlu1 %7679  ;;  %v7984_v55 = vmul.f32 %v18155_v17, %v23934_v15  ;;  %v17456_v15 = vunpack.i.l.bf16 %v23936_v60 }
 0x57c   : > { %23933 = vst [vmem:[#allocation19_spill] sm:$0xff] %v21874_v58  ;;  %18160 = vrcp.f32 %v7680_v37  ;;  %v7825_v39 = vsel %vm1450_vm0, %v21874_v58, 0.0  ;;  %v17457_v37 = vunpack.i.h.bf16 %v23936_v60  ;;  %v23938_v58 = vld [vmem:[#allocation21_spill] sm:$0xff] }
 0x57d   : > { %15824 = vmatprep.mubr.msk.f32.mxu1 %vm1450_vm0, %v7984_v55  ;;  %v21879_v44 = vpop.xlane.xlu0 %7121  ;;  %18162 = vrcp.f32 %v7650_v23 }
 0x57e   : > { %15825 = vmatmul.mubr.msk.f32.vlgmr.msra.gmra.mrb[100].mxu1 %vm1450_vm0, %v7986_v49  ;;  %7826 = vadd.xlane.f32.xlu0 %v7825_v39  ;;  %v16765_v39 = vpack.c.bf16 %v17457_v37, %v17456_v15  ;;  %v23941_v37 = vld [vmem:[#allocation108_spill] sm:$0xff] }
 0x57f   : > { %16732 = vmatpush3.bf16.msra.mxu1 %v16729_v45  ;;  %v7647_v35 = vpop.xlane.xlu1 %7646  ;;  %v23937_v45 = vld [vmem:[#allocation190_spill] sm:$0xff] }
 0x580   : > { %16738 = vmatprep.subr.bf16.mxu1 %v16737_v52  ;;  %18164 = vrcp.f32 %v7647_v35 }
 0x581   : > { %v7659_v17 = vpop.xlane.xlu0 %7658 }
 0x582   : > { %18166 = vrcp.f32 %v7659_v17 }
 0x583   : > { %v21884_v33 = vpop.xlane.xlu1 %7118 }
 0x584   : > { %v18159_v56 = vpop.eup %18158 }
 0x585   : > { %v21888_v55 = vpop.xlane.xlu0 %7133  ;;  %v8012_v40 = vmul.f32 %v18159_v56, %v21275_v47  ;;  %v23939_v47 = vld [vmem:[#allocation114_spill] sm:$0xff] }
 0x586   : > { %v18161_v42 = vpop.eup %18160 }
 0x587   : > { %v7662_v23 = vpop.xlane.xlu1 %7661  ;;  %v8014_v24 = vmul.f32 %v18161_v42, %v23937_v45  ;;  %15873 = vmatprep.mubr.msk.f32.mxu0 %vm1450_vm0, %v8012_v40  ;;  %v18163_v49 = vpop.eup %18162 }
 0x588   : > { %18168 = vrcp.f32 %v7662_v23  ;;  %v7994_v42 = vmul.f32 %v18163_v49, %v23940_v53  ;;  %v23942_v53 = vld [vmem:[#allocation13_spill] sm:$0xff] }
 0x589   : > { %15874 = vmatmul.mubr.msk.f32.vlgmr.msra.gmra.mrb[116].mxu0 %vm1450_vm0, %v8014_v24  ;;  %v7671_v17 = vpop.xlane.xlu0 %7670 }
 0x58a   : > { %v18165_v35 = vpop.eup %18164  ;;  %16760 = vmatpush3.bf16.msra.mxu0 %v16757_v12  ;;  %18170 = vrcp.f32 %v7671_v17  ;;  %17574 = vrot.lane.b32.xlu1 %v23938_v58, %s18562_s9  ;;  %v23943_v17 = vld [vmem:[#allocation23_spill] sm:$0xff] }
 0x58b   : > { %16766 = vmatprep.subr.bf16.mxu0 %v16765_v39  ;;  %v7692_v60 = vpop.xlane.xlu1 %7691  ;;  %v7992_v56 = vmul.f32 %v18165_v35, %v23939_v47 }
 0x58c   : > { %v18167_v45 = vpop.eup %18166  ;;  %18172 = vrcp.f32 %v7692_v60  ;;  %v23944_v60 = vld [vmem:[#allocation34_spill] sm:$0xff] }
 0x58d   : > { %15838 = vmatprep.mubr.msk.f32.mxu1 %vm1450_vm0, %v7992_v56  ;;  %v21900_v40 = vpop.xlane.xlu0 %7145  ;;  %v8000_v12 = vmul.f32 %v18167_v45, %v23941_v37  ;;  %v23945_v45 = vld [vmem:[#allocation128_spill] sm:$0xff]  ;;  %v23946_v37 = vld [vmem:[#allocation62_spill] sm:$0xff] }
 0x58e   : > { %15839 = vmatmul.mubr.msk.f32.vlgmr.msra.gmra.mrb[102].mxu1 %vm1450_vm0, %v7994_v42 }
 0x58f   : > { %16740 = vmatpush3.bf16.msra.mxu1 %v16737_v52  ;;  %v7689_v15 = vpop.xlane.xlu1 %7688  ;;  %15852 = vmatprep.mubr.msk.f32.mxu1 %vm1450_vm0, %v8000_v12  ;;  %v7236_v12 = vsub.f32 %v23946_v37, %v23945_v45  ;;  %v23951_v45 = vld [vmem:[#allocation71_spill] sm:$0xff]  ;;  %v23952_v37 = vld [vmem:[#allocation158_spill] sm:$0xff] }
 0x590   : > { %18174 = vrcp.f32 %v7689_v15  ;;  %v7253_v57 = vsub.f32 %v23952_v37, %v21714_v59  ;;  %v17336_v54 = vunpack.i.l.bf16 %v23951_v45 }
 0x591   : > { %v7683_v58 = vpop.xlane.xlu0 %7682 }
 0x592   : > { %v18169_v23 = vpop.eup %18168  ;;  %18176 = vrcp.f32 %v7683_v58  ;;  %v7453_v58 = vmul.f32 1.442695, %v7236_v12 }
 0x593   : > { %v21904_v24 = vpop.xlane.xlu1 %7130  ;;  %v8002_v49 = vmul.f32 %v18169_v23, %v23942_v53  ;;  %v23947_v23 = vld [vmem:[#allocation134_spill] sm:$0xff] }
 0x594   : > { %v18171_v35 = vpop.eup %18170  ;;  %17579 = vrot.lane.b32.xlu0 %v23943_v17, %s18562_s9  ;;  %v17537_v53 = vunpack.i.h.bf16 %v23947_v23  ;;  %v17536_v17 = vunpack.i.l.bf16 %v23947_v23 }
 0x595   : > { %15853 = vmatmul.mubr.msk.f32.vlgmr.msra.gmra.mrb[104].mxu1 %vm1450_vm0, %v8002_v49  ;;  %v21910_v47 = vpop.xlane.xlu0 %7706  ;;  %v8008_v52 = vmul.f32 %v18171_v35, %v23944_v60  ;;  %v23949_v35 = vld [vmem:[#allocation44_spill] sm:$0xff] }
 0x596   : > { %v18173_v42 = vpop.eup %18172  ;;  %v16773_v25 = vpack.c.bf16 %v17537_v53, %v17536_v17 }
 0x597   : > { %v7674_v56 = vpop.xlane.xlu1 %7673  ;;  %15866 = vmatprep.mubr.msk.f32.mxu1 %vm1450_vm0, %v8008_v52  ;;  %v8022_v60 = vmul.f32 %v18173_v42, %v23949_v35  ;;  %v23950_v52 = vld [vmem:[#allocation148_spill] sm:$0xff] }
 0x598   : > { %18178 = vrcp.f32 %v7674_v56  ;;  %v7246_v18 = vsub.f32 %v23950_v52, %v21533_v8  ;;  %v17337_v56 = vunpack.i.h.bf16 %v23951_v45  ;;  %v23953_v8 = vld [vmem:[#allocation151_spill] sm:$0xff]  ;;  %v7487_v52 = vmul.f32 1.442695, %v7253_v57  ;;  %v23955_v45 = vld [vmem:[#allocation90_spill] sm:$0xff] }
 0x599   : > { %v21918_v7 = vpop.xlane.xlu0 %7730  ;;  %v23958_v57 = vld [vmem:[#allocation95_spill] sm:$0xff] }
 0x59a   : > { %v18175_v15 = vpop.eup %18174 }
 0x59b   : > { %v7704_v49 = vpop.xlane.xlu1 %7703  ;;  %v8020_v1 = vmul.f32 %v18175_v15, %v23948_v30  ;;  %v7247_v15 = vsub.f32 %v23953_v8, %v21462_v62 }
 0x59c   : > { %18180 = vrcp.f32 %v7704_v49  ;;  %v18177_v59 = vpop.eup %18176  ;;  %v17417_v49 = vunpack.i.h.bf16 %v23955_v45 }
 0x59d   : > { %15887 = vmatprep.mubr.msk.f32.mxu0 %vm1450_vm0, %v8020_v1  ;;  %v17570_v23 = vpop.permute.xlu0 %17569  ;;  %v7473_v1 = vmul.f32 1.442695, %v7246_v18  ;;  %v7475_v62 = vmul.f32 1.442695, %v7247_v15 }
 0x59e   : > { %15888 = vmatmul.mubr.msk.f32.vlgmr.msra.gmra.mrb[118].mxu0 %vm1450_vm0, %v8022_v60  ;;  %v17572_v30 = vunpack.i.h.bf16 %v17570_v23  ;;  %v17571_v42 = vunpack.i.l.bf16 %v17570_v23  ;;  %v23954_v60 = vld [vmem:[#allocation165_spill] sm:$0xff]  ;;  %v16753_v23 = vpack.c.bf16 %v17337_v56, %v17336_v54 }
 0x59f   : > { %16768 = vmatpush3.bf16.msra.mxu0 %v16765_v39  ;;  %v7701_v12 = vpop.xlane.xlu1 %7700  ;;  %v7262_v53 = vsub.f32 %v23954_v60, %v21829_v43  ;;  %v17416_v39 = vunpack.i.l.bf16 %v23955_v45  ;;  %v23959_v43 = vld [vmem:[#allocation168_spill] sm:$0xff]  ;;  %v23960_v60 = vld [vmem:[#allocation123_spill] sm:$0xff] }
 0x5a0   : > { %18182 = vrcp.f32 %v7701_v12  ;;  %16774 = vmatprep.subr.bf16.mxu0 %v16773_v25  ;;  %v16745_v35 = vpack.c.bf16 %v17572_v30, %v17571_v42  ;;  %v23956_v12 = vld [vmem:[#allocation93_spill] sm:$0xff]  ;;  %v7263_v42 = vsub.f32 %v23959_v43, %v21727_v21  ;;  %v8016_v45 = vmul.f32 %v18177_v59, %v23960_v60 }
 0x5a1   : > { %18184 = vpow2.f32 %v7453_v58  ;;  %v23957_v58 = vld [vmem:[#allocation150_spill] sm:$0xff]  ;;  %v7505_v8 = vmul.f32 1.442695, %v7262_v53  ;;  %v16761_v54 = vpack.c.bf16 %v17417_v49, %v17416_v39 }
 0x5a2   : > { %v18179_v17 = vpop.eup %18178  ;;  %16746 = vmatprep.subr.bf16.mxu1 %v16745_v35  ;;  %v7248_v18 = vsub.f32 %v23957_v58, %v23956_v12  ;;  %18186 = vpow2.f32 %v7473_v1  ;;  %v7507_v21 = vmul.f32 1.442695, %v7263_v42  ;;  %v23963_v49 = vld [vmem:[#allocation38_spill] sm:$0xff] }
 0x5a3   : > { %v21936_v37 = vpop.xlane.xlu1 %7142  ;;  %16748 = vmatpush3.bf16.msra.mxu1 %v16745_v35  ;;  %v8010_v30 = vmul.f32 %v18179_v17, %v23958_v57  ;;  %18188 = vpow2.f32 %v7487_v52  ;;  %v23961_v35 = vld [vmem:[#allocation167_spill] sm:$0xff] }
 0x5a4   : > { %16754 = vmatprep.subr.bf16.mxu1 %v16753_v23  ;;  %18190 = vpow2.f32 %v7475_v62  ;;  %v7477_v15 = vmul.f32 1.442695, %v7248_v18  ;;  %v7264_v52 = vsub.f32 %v23961_v35, %v21704_v34  ;;  %v23962_v17 = vld [vmem:[#allocation35_spill] sm:$0xff]  ;;  %v23966_v18 = vld [vmem:[#allocation170_spill] sm:$0xff] }
 0x5a5   : > { %v7265_v57 = vsub.f32 %v23966_v18, %v21884_v33  ;;  %v23969_v33 = vld [vmem:[#allocation24_spill] sm:$0xff] }
 0x5a6   : > { %15867 = vmatmul.mubr.msk.f32.vlgmr.msra.gmra.mrb[106].mxu1 %vm1450_vm0, %v8010_v30  ;;  %v18181_v56 = vpop.eup %18180  ;;  %v7509_v34 = vmul.f32 1.442695, %v7264_v52  ;;  %v23972_v52 = vld [vmem:[#allocation169_spill] sm:$0xff] }
 0x5a7   : > { %v7686_v32 = vpop.xlane.xlu1 %7685  ;;  %16756 = vmatpush3.bf16.msra.mxu1 %v16753_v23  ;;  %15880 = vmatprep.mubr.msk.f32.mxu1 %vm1450_vm0, %v8016_v45  ;;  %v8030_v39 = vmul.f32 %v18181_v56, %v23963_v49  ;;  %v23964_v23 = vld [vmem:[#allocation152_spill] sm:$0xff]  ;;  %v23970_v56 = vld [vmem:[#allocation18_spill] sm:$0xff] }
 0x5a8   : > { %18192 = vrcp.f32 %v7686_v32  ;;  %16762 = vmatprep.subr.bf16.mxu1 %v16761_v54  ;;  %v7250_v62 = vsub.f32 %v23964_v23, %v21601_v9  ;;  %v23965_v32 = vsub.f32 %v23862_v50, %v21623_v10  ;;  %v23967_v50 = vld [vmem:[#allocation120_spill] sm:$0xff] }
 0x5a9   : > { %18194 = vpow2.f32 %v7505_v8  ;;  %v17497_v42 = vunpack.i.h.bf16 %v23967_v50  ;;  %v23968_v8 = vld [vmem:[#allocation154_spill] sm:$0xff]  ;;  %v17496_v45 = vunpack.i.l.bf16 %v23967_v50 }
 0x5aa   : > { %v18183_v1 = vpop.eup %18182  ;;  %18196 = vpow2.f32 %v7477_v15  ;;  %v7479_v58 = vmul.f32 1.442695, %v23965_v32  ;;  %v7252_v60 = vsub.f32 %v23968_v8, %v21495_v6  ;;  %v23971_v15 = vld [vmem:[#allocation155_spill] sm:$0xff]  ;;  %v7481_v35 = vmul.f32 1.442695, %v7250_v62  ;;  %v23973_v62 = vld [vmem:[#allocation178_spill] sm:$0xff] }
 0x5ab   : > { %v21948_v53 = vpop.eup %18184  ;;  %v7716_v59 = vpop.xlane.xlu1 %7715  ;;  %v8028_v12 = vmul.f32 %v18183_v1, %v23962_v17  ;;  %18198 = vpow2.f32 %v7507_v21  ;;  %v7251_v1 = vsub.f32 %v23971_v15, %v23970_v56  ;;  %v7266_v21 = vsub.f32 %v23972_v52, %v21879_v44  ;;  %v23974_v44 = vld [vmem:[#allocation172_spill] sm:$0xff]  ;;  %v23976_v15 = vld [vmem:[#allocation157_spill] sm:$0xff]  ;;  %v23977_v52 = vld [vmem:[#allocation174_spill] sm:$0xff] }
 0x5ac   : > { %v7798_v30 = vsel %vm1450_vm0, %v21948_v53, 0.0  ;;  %v21963_v43 = vpop.eup %18186  ;;  %18200 = vrcp.f32 %v7716_v59  ;;  %v7511_v59 = vmul.f32 1.442695, %v7265_v57  ;;  %v7485_v23 = vmul.f32 1.442695, %v7252_v60  ;;  %v23975_v60 = vld [vmem:[#allocation80_spill] sm:$0xff] }
 0x5ad   : > { %15901 = vmatprep.mubr.msk.f32.mxu0 %vm1450_vm0, %v8028_v12  ;;  %v21965_v10 = vpop.eup %18188  ;;  %v7828_v6 = vsel %vm1450_vm0, %v21963_v43, 0.0  ;;  %v7267_v18 = vsub.f32 %v23974_v44, %v21801_v14  ;;  %v7513_v57 = vmul.f32 1.442695, %v7266_v21  ;;  %v17381_v56 = vunpack.i.l.bf16 %v23975_v60 }
 0x5ae   : > { %15902 = vmatmul.mubr.msk.f32.vlgmr.msra.gmra.mrb[120].mxu0 %vm1450_vm0, %v8030_v39  ;;  %7799 = vadd.xlane.f32.xlu1 %v7798_v30  ;;  %v7849_v49 = vsel %vm1450_vm0, %v21965_v10, 0.0  ;;  %v7269_v21 = vsub.f32 %v23977_v52, %v21904_v24  ;;  %v23980_v24 = vld [vmem:[#allocation160_spill] sm:$0xff] }
 0x5af   : > { %16776 = vmatpush3.bf16.msra.mxu0 %v16773_v25  ;;  %v7713_v9 = vpop.xlane.xlu1 %7712  ;;  %v21974_v25 = vpop.eup %18190  ;;  %v7255_v44 = vsub.f32 %v23980_v24, %v21563_v41  ;;  %v23987_v24 = vld [vmem:[#allocation175_spill] sm:$0xff] }
 0x5b0   : > { %18202 = vrcp.f32 %v7713_v9  ;;  %16782 = vmatprep.subr.bf16.mxu0 %v23969_v33  ;;  %v7831_v30 = vsel %vm1450_vm0, %v21974_v25, 0.0 }
 0x5b1   : > { %18204 = vpow2.f32 %v7479_v58  ;;  %v7483_v58 = vmul.f32 1.442695, %v7251_v1 }
 0x5b2   : > { %18206 = vpow2.f32 %v7509_v34  ;;  %v18193_v17 = vpop.eup %18192  ;;  %7829 = vadd.xlane.f32.xlu1 %v7828_v6  ;;  %v21985_v34 = vpack.c.bf16 %v17497_v42, %v17496_v45  ;;  %v17382_v45 = vunpack.i.h.bf16 %v23975_v60 }
 0x5b3   : > { %v7698_v12 = vpop.xlane.xlu1 %7697  ;;  %v21982_v39 = vpop.eup %18194  ;;  %7850 = vadd.xlane.f32.xlu0 %v7849_v49  ;;  %v8018_v32 = vmul.f32 %v18193_v17, %v23973_v62  ;;  %18208 = vpow2.f32 %v7481_v35  ;;  %v7515_v35 = vmul.f32 1.442695, %v7267_v18 }
 0x5b4   : > { %18210 = vpow2.f32 %v7511_v59  ;;  %v21992_v9 = vpop.eup %18196  ;;  %v7876_v8 = vsel %vm1450_vm0, %v21982_v39, 0.0 }
 0x5b5   : > { %15881 = vmatmul.mubr.msk.f32.vlgmr.msra.gmra.mrb[108].mxu1 %vm1450_vm0, %v8018_v32  ;;  %v21996_v42 = vpop.eup %18198  ;;  %18212 = vpow2.f32 %v7485_v23  ;;  %v7834_v59 = vsel %vm1450_vm0, %v21992_v9, 0.0  ;;  %v23978_v23 = vld [vmem:[#allocation79_spill] sm:$0xff]  ;;  %v23979_v32 = vld [vmem:[#allocation33_spill] sm:$0xff] }
 0x5b6   : > { %16764 = vmatpush3.bf16.msra.mxu1 %v16761_v54  ;;  %7832 = vadd.xlane.f32.xlu1 %v7831_v30  ;;  %v18201_v14 = vpop.eup %18200  ;;  %18214 = vpow2.f32 %v7483_v58  ;;  %v7254_v54 = vsub.f32 %v23976_v15, %v21684_v13  ;;  %v7879_v49 = vsel %vm1450_vm0, %v21996_v42, 0.0  ;;  %v7491_v15 = vmul.f32 1.442695, %v7255_v44 }
 0x5b7   : > { %v7728_v50 = vpop.xlane.xlu1 %7727  ;;  %16770 = vmatprep.subr.bf16.mxu1 %v21985_v34  ;;  %7877 = vadd.xlane.f32.xlu0 %v7876_v8  ;;  %18216 = vpow2.f32 %v7513_v57  ;;  %v8038_v58 = vmul.f32 %v18201_v14, %v23979_v32  ;;  %v23981_v57 = vld [vmem:[#allocation173_spill] sm:$0xff]  ;;  %v7519_v8 = vmul.f32 1.442695, %v7269_v21  ;;  %v7272_v44 = vsub.f32 %v23987_v24, %v21841_v48 }
 0x5b8   : > { %18218 = vrcp.f32 %v7698_v12  ;;  %v7489_v18 = vmul.f32 1.442695, %v7254_v54  ;;  %v22019_v12 = vpack.c.bf16 %v17382_v45, %v17381_v56  ;;  %v7270_v30 = vsub.f32 %v23981_v57, %v21888_v55  ;;  %v23982_v55 = vld [vmem:[#allocation159_spill] sm:$0xff] }
 0x5b9   : > { %v7256_v56 = vsub.f32 %v23982_v55, %v21547_v38 }
 0x5ba   : > { %v18203_v1 = vpop.eup %18202  ;;  %7835 = vadd.xlane.f32.xlu1 %v7834_v59 }
 0x5bb   : > { %v22007_v6 = vpop.eup %18204  ;;  %v7695_v17 = vpop.xlane.xlu1 %7694  ;;  %v8036_v62 = vmul.f32 %v18203_v1, %v23978_v23  ;;  %7880 = vadd.xlane.f32.xlu0 %v7879_v49 }
 0x5bc   : > { %v22012_v13 = vpop.eup %18206  ;;  %18220 = vrcp.f32 %v7695_v17  ;;  %v7837_v14 = vsel %vm1450_vm0, %v22007_v6, 0.0 }
 0x5bd   : > { %18222 = vrcp.f32 %v21910_v47  ;;  %15915 = vmatprep.mubr.msk.f32.mxu0 %vm1450_vm0, %v8036_v62  ;;  %v22026_v60 = vpop.eup %18208  ;;  %v7882_v47 = vsel %vm1450_vm0, %v22012_v13, 0.0  ;;  %v23986_v62 = vld [vmem:[#allocation162_spill] sm:$0xff] }
 0x5be   : > { %18224 = vpow2.f32 %v7515_v35  ;;  %15916 = vmatmul.mubr.msk.f32.vlgmr.msra.gmra.mrb[122].mxu0 %vm1450_vm0, %v8038_v58  ;;  %7838 = vadd.xlane.f32.xlu1 %v7837_v14  ;;  %v22031_v45 = vpop.eup %18210  ;;  %v7521_v35 = vmul.f32 1.442695, %v7270_v30  ;;  %v7840_v21 = vsel %vm1450_vm0, %v22026_v60, 0.0  ;;  %v7257_v32 = vsub.f32 %v23986_v62, %v21790_v0  ;;  %v23988_v0 = vld [vmem:[#allocation101_spill] sm:$0xff]  ;;  %v23991_v62 = vld [vmem:[#allocation15_spill] sm:$0xff] }
 0x5bf   : > { %18226 = vrcp.f32 %v7728_v50  ;;  %16784 = vmatpush3.bf16.msra.mxu0 %v23969_v33  ;;  %v7725_v41 = vpop.xlane.xlu1 %7724  ;;  %7883 = vadd.xlane.f32.xlu0 %v7882_v47  ;;  %v22038_v50 = vpop.eup %18212  ;;  %v23984_v33 = vld [vmem:[#allocation176_spill] sm:$0xff]  ;;  %v7885_v38 = vsel %vm1450_vm0, %v22031_v45, 0.0  ;;  %v17462_v55 = vunpack.i.h.bf16 %v23988_v0  ;;  %v17461_v48 = vunpack.i.l.bf16 %v23988_v0 }
 0x5c0   : > { %18228 = vrcp.f32 %v7725_v41  ;;  %16790 = vmatprep.subr.bf16.mxu0 %v22019_v12  ;;  %v22036_v54 = vpop.f32.mrb[84].mxu1  ;;  %v7271_v1 = vsub.f32 %v23984_v33, %v21857_v22  ;;  %v22046_v59 = vpop.eup %18214  ;;  %v7493_v22 = vmul.f32 1.442695, %v7256_v56  ;;  %v23989_v56 = vld [vmem:[#allocation48_spill] sm:$0xff] }
 0x5c1   : > { %18230 = vpow2.f32 %v7489_v18  ;;  %23983 = vst [vmem:[#allocation52_spill] sm:$0xff] %v22036_v54  ;;  %v22042_v52 = vpop.f32.mrb[85].mxu1  ;;  %v22050_v49 = vpop.eup %18216  ;;  %v7843_v57 = vsel %vm1450_vm0, %v22046_v59, 0.0 }
 0x5c2   : > { %18232 = vpow2.f32 %v7519_v8  ;;  %23985 = vst [vmem:[#allocation180_spill] sm:$0xff] %v22042_v52  ;;  %7841 = vadd.xlane.f32.xlu1 %v7840_v21  ;;  %v18219_v23 = vpop.eup %18218  ;;  %v7523_v18 = vmul.f32 1.442695, %v7271_v1  ;;  %v7888_v14 = vsel %vm1450_vm0, %v22050_v49, 0.0  ;;  %v23990_v1 = vld [vmem:[#allocation161_spill] sm:$0xff] }
 0x5c3   : > { %v7710_v17 = vpop.xlane.xlu1 %7709  ;;  %7886 = vadd.xlane.f32.xlu0 %v7885_v38  ;;  %v7495_v21 = vmul.f32 1.442695, %v7257_v32  ;;  %v7525_v38 = vmul.f32 1.442695, %v7272_v44 }
 0x5c4   : > { %18234 = vrcp.f32 %v7710_v17 }
 0x5c5   : > { %18236 = vpow2.f32 %v7491_v15  ;;  %v8026_v15 = vmul.f32 %v18219_v23, %v23989_v56  ;;  %v23992_v23 = vld [vmem:[#allocation124_spill] sm:$0xff] }
 0x5c6   : > { %v18221_v58 = vpop.eup %18220  ;;  %18238 = vpow2.f32 %v7521_v35  ;;  %7844 = vadd.xlane.f32.xlu1 %v7843_v57  ;;  %v7258_v35 = vsub.f32 %v23990_v1, %v21763_v29 }
 0x5c7   : > { %v18223_v30 = vpop.eup %18222  ;;  %v22058_v8 = vpop.xlane.xlu1 %7721  ;;  %v8024_v41 = vmul.f32 %v18221_v58, %v21518_v26  ;;  %7889 = vadd.xlane.f32.xlu0 %v7888_v14  ;;  %18240 = vpow2.f32 %v7493_v22  ;;  %v7846_v26 = vsel %vm1450_vm0, %v22038_v50, 0.0  ;;  %v7273_v58 = vsub.f32 %v23991_v62, %v21936_v37  ;;  %v23994_v37 = vld [vmem:[#allocation70_spill] sm:$0xff] }
 0x5c8   : > { %v22063_v47 = vpop.eup %18224  ;;  %18242 = vpow2.f32 %v7523_v18  ;;  %v8032_v24 = vmul.f32 %v18223_v30, %v23992_v23  ;;  %v23995_v30 = vld [vmem:[#allocation164_spill] sm:$0xff] }
 0x5c9   : > { %v18227_v33 = vpop.eup %18226  ;;  %15894 = vmatprep.mubr.msk.f32.mxu1 %vm1450_vm0, %v8024_v41  ;;  %v7891_v32 = vsel %vm1450_vm0, %v22063_v47, 0.0  ;;  %v7259_v14 = vsub.f32 %v23995_v30, %v21639_v16  ;;  %v7497_v41 = vmul.f32 1.442695, %v7258_v35 }
 0x5ca   : > { %v18229_v17 = vpop.eup %18228  ;;  %15895 = vmatmul.mubr.msk.f32.vlgmr.msra.gmra.mrb[110].mxu1 %vm1450_vm0, %v8026_v15  ;;  %7847 = vadd.xlane.f32.xlu1 %v7846_v26  ;;  %v8046_v18 = vmul.f32 %v18227_v33, %v23994_v37  ;;  %v7527_v15 = vmul.f32 1.442695, %v7273_v58 }
 0x5cb   : > { %v22077_v22 = vpop.eup %18230  ;;  %16772 = vmatpush3.bf16.msra.mxu1 %v21985_v34  ;;  %v7719_v29 = vpop.xlane.xlu1 %7718  ;;  %v8044_v57 = vmul.f32 %v18229_v17, %v21535_v3  ;;  %7892 = vadd.xlane.f32.xlu0 %v7891_v32  ;;  %v22090_v34 = vpack.c.bf16 %v17462_v55, %v17461_v48  ;;  %v23996_v3 = vld [vmem:[#allocation177_spill] sm:$0xff]  ;;  %v23999_v48 = vld [vmem:[#allocation32_spill] sm:$0xff]  ;;  %v7499_v58 = vmul.f32 1.442695, %v7259_v14  ;;  %v24005_v14 = vld [vmem:[#allocation166_spill] sm:$0xff] }
 0x5cc   : > { %v22083_v44 = vpop.eup %18232  ;;  %18244 = vrcp.f32 %v7719_v29  ;;  %15908 = vmatprep.mubr.msk.f32.mxu1 %vm1450_vm0, %v8032_v24  ;;  %v7274_v56 = vsub.f32 %v23996_v3, %v21900_v40  ;;  %v22094_v1 = vpop.f32.mrb[94].mxu0  ;;  %v7852_v33 = vsel %vm1450_vm0, %v22077_v22, 0.0 }
 0x5cd   : > { %23993 = vst [vmem:[#allocation45_spill] sm:$0xff] %v22083_v44  ;;  %18246 = vpow2.f32 %v7495_v21  ;;  %15929 = vmatprep.mubr.msk.f32.mxu0 %vm1450_vm0, %v8044_v57  ;;  %23997 = vst [vmem:[#allocation43_spill] sm:$0xff] %v22094_v1  ;;  %v22101_v35 = vpop.f32.mrb[95].mxu0  ;;  %v7897_v40 = vsel %vm1450_vm0, %v22083_v44, 0.0  ;;  %v22112_v17 = vpop.xlane.xlu0 %7754 }
 0x5ce   : > { %v18235_v0 = vpop.eup %18234  ;;  %18248 = vpow2.f32 %v7525_v38  ;;  %15930 = vmatmul.mubr.msk.f32.vlgmr.msra.gmra.mrb[124].mxu0 %vm1450_vm0, %v8046_v18  ;;  %23998 = vst [vmem:[#allocation41_spill] sm:$0xff] %v22101_v35  ;;  %7853 = vadd.xlane.f32.xlu1 %v7852_v33  ;;  %v24001_v38 = vld [vmem:[#allocation163_spill] sm:$0xff] }
 0x5cf   : > { %v22099_v16 = vpop.eup %18236  ;;  %16792 = vmatpush3.bf16.msra.mxu0 %v22019_v12  ;;  %v22104_v55 = vpop.xlane.xlu1 %7733  ;;  %v8034_v21 = vmul.f32 %v18235_v0, %v23999_v48  ;;  %7898 = vadd.xlane.f32.xlu0 %v7897_v40  ;;  %v7260_v62 = vsub.f32 %v24001_v38, %v21617_v46  ;;  %18250 = vpow2.f32 %v7497_v41  ;;  %v7529_v12 = vmul.f32 1.442695, %v7274_v56 }
 0x5d0   : > { %v22109_v26 = vpop.eup %18238  ;;  %16798 = vmatprep.subr.bf16.mxu0 %v22090_v34  ;;  %18252 = vpow2.f32 %v7527_v15  ;;  %v22117_v23 = vpop.f32.mrb[96].mxu0  ;;  %v7855_v24 = vsel %vm1450_vm0, %v22099_v16, 0.0  ;;  %v7261_v41 = vsub.f32 %v24005_v14, %v21849_v4 }
 0x5d1   : > { %24000 = vst [vmem:[#allocation89_spill] sm:$0xff] %v22109_v26  ;;  %15909 = vmatmul.mubr.msk.f32.vlgmr.msra.gmra.mrb[112].mxu1 %vm1450_vm0, %v8034_v21  ;;  %24002 = vst [vmem:[#allocation61_spill] sm:$0xff] %v22117_v23  ;;  %v22121_v29 = vpop.eup %18240  ;;  %v22123_v32 = vpop.f32.mrb[97].mxu0  ;;  %v7900_v46 = vsel %vm1450_vm0, %v22109_v26, 0.0  ;;  %v7501_v30 = vmul.f32 1.442695, %v7260_v62 }
 0x5d2   : > { %24003 = vst [vmem:[#allocation59_spill] sm:$0xff] %v22123_v32  ;;  %7856 = vadd.xlane.f32.xlu1 %v7855_v24  ;;  %v22127_v37 = vpop.eup %18242  ;;  %v22129_v18 = vpop.xlane.xlu0 %7781  ;;  %v7858_v56 = vsel %vm1450_vm0, %v22121_v29, 0.0  ;;  %v7503_v62 = vmul.f32 1.442695, %v7261_v41  ;;  %v24033_v26 = vld [vmem:[#allocation87_spill] sm:$0xff] }
 0x5d3   : > { %v7737_v57 = vpop.xlane.xlu1 %7736  ;;  %24004 = vst [vmem:[#allocation55_spill] sm:$0xff] %v22127_v37  ;;  %7901 = vadd.xlane.f32.xlu0 %v7900_v46  ;;  %v7903_v48 = vsel %vm1450_vm0, %v22127_v37, 0.0 }
 0x5d4   : > { %18254 = vrcp.f32 %v7737_v57  ;;  %v22133_v3 = vpop.f32.mrb[98].mxu0 }
 0x5d5   : > { %18256 = vpow2.f32 %v7499_v58  ;;  %24006 = vst [vmem:[#allocation20_spill] sm:$0xff] %v22133_v3  ;;  %v22139_v33 = vpop.f32.mrb[99].mxu0 }
 0x5d6   : > { %v18245_v0 = vpop.eup %18244  ;;  %18258 = vpow2.f32 %v7529_v12  ;;  %24007 = vst [vmem:[#allocation99_spill] sm:$0xff] %v22139_v33  ;;  %7859 = vadd.xlane.f32.xlu1 %v7858_v56  ;;  %v22146_v4 = vpop.xlane.xlu0 %7784 }
 0x5d7   : > { %v22137_v15 = vpop.eup %18246  ;;  %v7740_v40 = vpop.xlane.xlu1 %7739  ;;  %v8040_v21 = vmul.f32 %v18245_v0, %v21571_v61  ;;  %7904 = vadd.xlane.f32.xlu0 %v7903_v48 }
 0x5d8   : > { %v22144_v38 = vpop.eup %18248  ;;  %18260 = vrcp.f32 %v7740_v40  ;;  %v7861_v58 = vsel %vm1450_vm0, %v22137_v15, 0.0 }
 0x5d9   : > { %24008 = vst [vmem:[#allocation17_spill] sm:$0xff] %v22144_v38  ;;  %18262 = vpow2.f32 %v7501_v30  ;;  %15922 = vmatprep.mubr.msk.f32.mxu1 %vm1450_vm0, %v8040_v21  ;;  %v22151_v12 = vpop.eup %18250  ;;  %v7906_v61 = vsel %vm1450_vm0, %v22144_v38, 0.0 }
 0x5da   : > { %7862 = vadd.xlane.f32.xlu1 %v7861_v58  ;;  %v22155_v57 = vpop.eup %18252  ;;  %v22157_v46 = vpop.xlane.xlu0 %7787  ;;  %v7864_v0 = vsel %vm1450_vm0, %v22151_v12, 0.0 }
 0x5db   : > { %v7749_v24 = vpop.xlane.xlu1 %7748  ;;  %24009 = vst [vmem:[#allocation116_spill] sm:$0xff] %v22155_v57  ;;  %7907 = vadd.xlane.f32.xlu0 %v7906_v61  ;;  %v7909_v48 = vsel %vm1450_vm0, %v22155_v57, 0.0 }
 0x5dc   : > { %18264 = vrcp.f32 %v7749_v24  ;;  %v22159_v30 = vpop.f32.mrb[86].mxu1  ;;  %v24013_v24 = vld [vmem:[#allocation133_spill] sm:$0xff] }
 0x5dd   : > { %18266 = vpow2.f32 %v7503_v62  ;;  %24010 = vst [vmem:[#allocation182_spill] sm:$0xff] %v22159_v30  ;;  %v22161_v41 = vpop.f32.mrb[87].mxu1  ;;  %v17542_v61 = vunpack.i.h.bf16 %v24013_v24 }
 0x5de   : > { %v18255_v14 = vpop.eup %18254  ;;  %24011 = vst [vmem:[#allocation63_spill] sm:$0xff] %v22161_v41  ;;  %7865 = vadd.xlane.f32.xlu1 %v7864_v0  ;;  %v22172_v62 = vpop.xlane.xlu0 %7790  ;;  %v17541_v41 = vunpack.i.l.bf16 %v24013_v24 }
 0x5df   : > { %v22165_v56 = vpop.eup %18256  ;;  %v7752_v40 = vpop.xlane.xlu1 %7751  ;;  %v8052_v21 = vmul.f32 %v18255_v14, %v21613_v51  ;;  %7910 = vadd.xlane.f32.xlu0 %v7909_v48 }
 0x5e0   : > { %v22170_v58 = vpop.eup %18258  ;;  %18268 = vrcp.f32 %v7752_v40  ;;  %v22176_v30 = vpop.f32.mrb[100].mxu0  ;;  %v7867_v51 = vsel %vm1450_vm0, %v22165_v56, 0.0 }
 0x5e1   : > { %24012 = vst [vmem:[#allocation60_spill] sm:$0xff] %v22170_v58  ;;  %24014 = vst [vmem:[#allocation76_spill] sm:$0xff] %v22176_v30  ;;  %15943 = vmatprep.mubr.msk.f32.mxu0 %vm1450_vm0, %v8052_v21  ;;  %v22179_v52 = vpop.f32.mrb[101].mxu0  ;;  %v7912_v48 = vsel %vm1450_vm0, %v22170_v58, 0.0  ;;  %v16805_v21 = vpack.c.bf16 %v17542_v61, %v17541_v41 }
 0x5e2   : > { %v18261_v0 = vpop.eup %18260  ;;  %24015 = vst [vmem:[#allocation16_spill] sm:$0xff] %v22179_v52  ;;  %7868 = vadd.xlane.f32.xlu1 %v7867_v51  ;;  %v22190_v30 = vpop.xlane.xlu0 %7793 }
 0x5e3   : > { %v22183_v14 = vpop.eup %18262  ;;  %v22185_v40 = vpop.xlane.xlu1 %7745  ;;  %v8054_v24 = vmul.f32 %v18261_v0, %v21625_v20  ;;  %7913 = vadd.xlane.f32.xlu0 %v7912_v48 }
 0x5e4   : > { %v7870_v54 = vsel %vm1450_vm0, %v22183_v14, 0.0 }
 0x5e5   : > { %15944 = vmatmul.mubr.msk.f32.vlgmr.msra.gmra.mrb[126].mxu0 %vm1450_vm0, %v8054_v24 }
 0x5e6   : > { %v18265_v52 = vpop.eup %18264  ;;  %16800 = vmatpush3.bf16.msra.mxu0 %v22090_v34  ;;  %7871 = vadd.xlane.f32.xlu1 %v7870_v54  ;;  %v24018_v54 = vld [vmem:[#allocation26_spill] sm:$0xff] }
 0x5e7   : > { %v22196_v33 = vpop.eup %18266  ;;  %16806 = vmatprep.subr.bf16.mxu0 %v16805_v21  ;;  %v7743_v51 = vpop.xlane.xlu1 %7742  ;;  %v8060_v3 = vmul.f32 %v18265_v52, %v21651_v19 }
 0x5e8   : > { %v7797_v20 = vpop.xlane.xlu0 %7796  ;;  %v7873_v41 = vsel %vm1450_vm0, %v22196_v33, 0.0 }
 0x5e9   : > { %15957 = vmatprep.mubr.msk.f32.mxu0 %vm1450_vm0, %v8060_v3 }
 0x5ea   : > { %v18269_v0 = vpop.eup %18268  ;;  %7874 = vadd.xlane.f32.xlu1 %v7873_v41 }
 0x5eb   : > { %v22202_v61 = vpop.xlane.xlu1 %7757  ;;  %v8062_v34 = vmul.f32 %v18269_v0, %v21686_v63 }
 0x5ec   : > { %v22205_v48 = vpop.xlane.xlu0 %7802  ;;  %v22207_v24 = vpop.f32.mrb[88].mxu1 }
 0x5ed   : > { %24016 = vst [vmem:[#allocation50_spill] sm:$0xff] %v22207_v24  ;;  %15958 = vmatmul.mubr.msk.f32.vlgmr.msra.gmra.mrb[128].mxu0 %vm1450_vm0, %v8062_v34  ;;  %v22210_v19 = vpop.f32.mrb[89].mxu1 }
 0x5ee   : > { %16808 = vmatpush3.bf16.msra.mxu0 %v16805_v21  ;;  %24017 = vst [vmem:[#allocation131_spill] sm:$0xff] %v22210_v19  ;;  %v24021_v19 = vld [vmem:[#allocation27_spill] sm:$0xff] }
 0x5ef   : > { %16814 = vmatprep.subr.bf16.mxu0 %v24018_v54  ;;  %v7761_v52 = vpop.xlane.xlu1 %7760 }
 0x5f0   : > { %18270 = vrcp.f32 %v7761_v52  ;;  %v22213_v3 = vpop.xlane.xlu0 %7805  ;;  %v22215_v32 = vpop.f32.mrb[102].mxu0 }
 0x5f1   : > { %24019 = vst [vmem:[#allocation153_spill] sm:$0xff] %v22215_v32  ;;  %v22217_v41 = vpop.f32.mrb[103].mxu0 }
 0x5f2   : > { %24020 = vst [vmem:[#allocation139_spill] sm:$0xff] %v22217_v41  ;;  %v24022_v41 = vld [vmem:[#allocation25_spill] sm:$0xff] }
 0x5f3   : > { %v7764_v63 = vpop.xlane.xlu1 %7763 }
 0x5f4   : > { %18272 = vrcp.f32 %v7764_v63  ;;  %v22219_v0 = vpop.xlane.xlu0 %7808  ;;  %v24023_v63 = vld [vmem:[#allocation83_spill] sm:$0xff] }
 0x5f5   : > { %v17387_v32 = vunpack.i.h.bf16 %v24023_v63  ;;  %v17386_v37 = vunpack.i.l.bf16 %v24023_v63 }
 0x5f7   : > { %v22221_v24 = vpop.xlane.xlu1 %7766 }
 0x5f8   : > { %v22223_v34 = vpop.xlane.xlu0 %7811 }
 0x5f9   : > { %17589 = vrot.lane.b32.xlu0 %v24021_v19, %s18562_s9 }
 0x5fa   : > { %v18271_v21 = vpop.eup %18270 }
 0x5fb   : > { %v22227_v23 = vpop.xlane.xlu1 %7769  ;;  %v8068_v52 = vmul.f32 %v18271_v21, %v21765_v31  ;;  %17584 = vrot.lane.b32.xlu1 %v24022_v41, %s18562_s9  ;;  %v16821_v41 = vpack.c.bf16 %v17387_v32, %v17386_v37 }
 0x5fc   : > { %v22230_v38 = vpop.xlane.xlu0 %7814  ;;  %v22236_v35 = vpop.f32.mrb[90].mxu1 }
 0x5fd   : > { %24024 = vst [vmem:[#allocation156_spill] sm:$0xff] %v22236_v35  ;;  %15971 = vmatprep.mubr.msk.f32.mxu0 %vm1450_vm0, %v8068_v52  ;;  %v22239_v58 = vpop.f32.mrb[91].mxu1  ;;  %v24030_v35 = vld [vmem:[#allocation106_spill] sm:$0xff] }
 0x5fe   : > { %v18273_v1 = vpop.eup %18272  ;;  %24025 = vst [vmem:[#allocation56_spill] sm:$0xff] %v22239_v58 }
 0x5ff   : > { %v7773_v19 = vpop.xlane.xlu1 %7772  ;;  %v8070_v57 = vmul.f32 %v18273_v1, %v21782_v5  ;;  %v24028_v1 = vld [vmem:[#allocation171_spill] sm:$0xff] }
 0x600   : > { %18274 = vrcp.f32 %v7773_v19  ;;  %v22242_v31 = vpop.xlane.xlu0 %7817  ;;  %v22244_v21 = vpop.f32.mrb[104].mxu0  ;;  %v7268_v32 = vsub.f32 %v24028_v1, %v21780_v28  ;;  %v17467_v28 = vunpack.i.h.bf16 %v24030_v35 }
 0x601   : > { %24026 = vst [vmem:[#allocation97_spill] sm:$0xff] %v22244_v21  ;;  %15972 = vmatmul.mubr.msk.f32.vlgmr.msra.gmra.mrb[130].mxu0 %vm1450_vm0, %v8070_v57  ;;  %v22248_v63 = vpop.f32.mrb[105].mxu0  ;;  %18276 = vrcp.f32 %v22146_v4  ;;  %v24029_v57 = vld [vmem:[#allocation69_spill] sm:$0xff] }
 0x602   : > { %16816 = vmatpush3.bf16.msra.mxu0 %v24018_v54  ;;  %24027 = vst [vmem:[#allocation78_spill] sm:$0xff] %v22248_v63  ;;  %v17342_v54 = vunpack.i.h.bf16 %v24029_v57 }
 0x603   : > { %16822 = vmatprep.subr.bf16.mxu0 %v16821_v41  ;;  %v7776_v52 = vpop.xlane.xlu1 %7775 }
 0x604   : > { %18278 = vrcp.f32 %v7776_v52  ;;  %v22251_v58 = vpop.xlane.xlu0 %7820 }
 0x605   : > { %18280 = vrcp.f32 %v22058_v8 }
 0x606   : > { %18282 = vrcp.f32 %v21918_v7  ;;  %v17341_v7 = vunpack.i.l.bf16 %v24029_v57 }
 0x607   : > { %18284 = vrcp.f32 %v22157_v46  ;;  %v22256_v5 = vpop.xlane.xlu1 %7778  ;;  %v7517_v46 = vmul.f32 1.442695, %v7268_v32 }
 0x608   : > { %18286 = vrcp.f32 %v7797_v20  ;;  %v22261_v37 = vpop.xlane.xlu0 %7823  ;;  %v17466_v20 = vunpack.i.l.bf16 %v24030_v35  ;;  %v17422_v35 = vunpack.i.h.bf16 %v24033_v26 }
 0x609   : > { %18288 = vrcp.f32 %v22104_v55 }
 0x60a   : > { %v18275_v4 = vpop.eup %18274  ;;  %18290 = vrcp.f32 %v7743_v51 }
 0x60b   : > { %v17575_v19 = vpop.permute.xlu1 %17574  ;;  %v8076_v8 = vmul.f32 %v18275_v4, %v21831_v36  ;;  %v18277_v21 = vpop.eup %18276  ;;  %18292 = vrcp.f32 %v22185_v40  ;;  %v17421_v40 = vunpack.i.l.bf16 %v24033_v26 }
 0x60c   : > { %v17577_v52 = vunpack.i.h.bf16 %v17575_v19  ;;  %v17576_v63 = vunpack.i.l.bf16 %v17575_v19  ;;  %v22269_v55 = vpop.f32.mrb[92].mxu1  ;;  %18294 = vrcp.f32 %v22112_v17  ;;  %v22275_v4 = vpop.xlane.xlu0 %7826 }
 0x60d   : > { %24031 = vst [vmem:[#allocation141_spill] sm:$0xff] %v22269_v55  ;;  %15985 = vmatprep.mubr.msk.f32.mxu0 %vm1450_vm0, %v8076_v8  ;;  %v22273_v1 = vpop.f32.mrb[93].mxu1  ;;  %18296 = vpow2.f32 %v7517_v46  ;;  %v16785_v55 = vpack.c.bf16 %v17342_v54, %v17341_v7  ;;  %v24035_v7 = vld [vmem:[#allocation179_spill] sm:$0xff]  ;;  %v24036_v46 = vld [vmem:[#allocation118_spill] sm:$0xff] }
 0x60e   : > { %v18279_v51 = vpop.eup %18278  ;;  %v16777_v36 = vpack.c.bf16 %v17577_v52, %v17576_v63  ;;  %24032 = vst [vmem:[#allocation65_spill] sm:$0xff] %v22273_v1  ;;  %18298 = vrcp.f32 %v22202_v61  ;;  %v8084_v63 = vmul.f32 %v18277_v21, %v21648_v11  ;;  %v16829_v52 = vpack.c.bf16 %v17467_v28, %v17466_v20 }
 0x60f   : > { %v18281_v32 = vpop.eup %18280  ;;  %v8078_v57 = vmul.f32 %v18279_v51, %v21843_v27  ;;  %v24034_v51 = vld [vmem:[#allocation136_spill] sm:$0xff]  ;;  %18300 = vrcp.f32 %v22221_v24  ;;  %v17502_v28 = vunpack.i.h.bf16 %v24036_v46  ;;  %v17501_v20 = vunpack.i.l.bf16 %v24036_v46  ;;  %v24037_v24 = vld [vmem:[#allocation39_spill] sm:$0xff] }
 0x610   : > { %v18283_v19 = vpop.eup %18282  ;;  %16778 = vmatprep.subr.bf16.mxu1 %v16777_v36  ;;  %v22281_v17 = vpop.f32.mrb[106].mxu0  ;;  %v17547_v1 = vunpack.i.h.bf16 %v24034_v51  ;;  %v17546_v44 = vunpack.i.l.bf16 %v24034_v51  ;;  %v8042_v61 = vmul.f32 %v18281_v32, %v21556_v2  ;;  %18302 = vrcp.f32 %v22227_v23  ;;  %v24038_v2 = vld [vmem:[#allocation88_spill] sm:$0xff] }
 0x611   : > { %v18285_v8 = vpop.eup %18284  ;;  %16780 = vmatpush3.bf16.msra.mxu1 %v16777_v36  ;;  %15986 = vmatmul.mubr.msk.f32.vlgmr.msra.gmra.mrb[132].mxu0 %vm1450_vm0, %v8078_v57  ;;  %v22288_v26 = vpop.f32.mrb[107].mxu0  ;;  %v8048_v11 = vmul.f32 %v18283_v19, %v24035_v7  ;;  %v16793_v36 = vpack.c.bf16 %v17422_v35, %v17421_v40  ;;  %18304 = vrcp.f32 %v22256_v5  ;;  %v24040_v23 = vld [vmem:[#allocation36_spill] sm:$0xff]  ;;  %v16801_v5 = vpack.c.bf16 %v17502_v28, %v17501_v20 }
 0x612   : > { %v18287_v27 = vpop.eup %18286  ;;  %16824 = vmatpush3.bf16.msra.mxu0 %v16821_v41  ;;  %16786 = vmatprep.subr.bf16.mxu1 %v16785_v55  ;;  %v8086_v41 = vmul.f32 %v18285_v8, %v24037_v24  ;;  %v17580_v57 = vpop.permute.xlu0 %17579  ;;  %v22302_v19 = vpack.c.bf16 %v17547_v1, %v17546_v44  ;;  %18306 = vrcp.f32 %v22129_v18  ;;  %v24041_v1 = vld [vmem:[#allocation57_spill] sm:$0xff]  ;;  %v24044_v24 = vld [vmem:[#allocation51_spill] sm:$0xff] }
 0x613   : > { %v18289_v54 = vpop.eup %18288  ;;  %15999 = vmatprep.mubr.msk.f32.mxu0 %vm1450_vm0, %v8084_v63  ;;  %16830 = vmatprep.subr.bf16.mxu0 %v16829_v52  ;;  %v8092_v32 = vmul.f32 %v18287_v27, %v24038_v2  ;;  %v24039_v63 = vld [vmem:[#allocation129_spill] sm:$0xff]  ;;  %v17582_v40 = vunpack.i.h.bf16 %v17580_v57  ;;  %v17581_v8 = vunpack.i.l.bf16 %v17580_v57  ;;  %18308 = vrcp.f32 %v22172_v62  ;;  %v24045_v2 = vld [vmem:[#allocation47_spill] sm:$0xff] }
 0x614   : > { %v18291_v21 = vpop.eup %18290  ;;  %15923 = vmatmul.mubr.msk.f32.vlgmr.msra.gmra.mrb[114].mxu1 %vm1450_vm0, %v8042_v61  ;;  %v8050_v51 = vmul.f32 %v18289_v54, %v24039_v63  ;;  %v24042_v54 = vld [vmem:[#allocation137_spill] sm:$0xff]  ;;  %18310 = vrcp.f32 %v22190_v30  ;;  %v24046_v30 = vld [vmem:[#allocation92_spill] sm:$0xff] }
 0x615   : > { %16788 = vmatpush3.bf16.msra.mxu1 %v16785_v55  ;;  %15936 = vmatprep.mubr.msk.f32.mxu1 %vm1450_vm0, %v8048_v11  ;;  %v18293_v61 = vpop.eup %18292  ;;  %v8056_v35 = vmul.f32 %v18291_v21, %v24040_v23  ;;  %v24043_v21 = vld [vmem:[#allocation74_spill] sm:$0xff]  ;;  %v16809_v20 = vpack.c.bf16 %v17582_v40, %v17581_v8  ;;  %18312 = vrcp.f32 %v22205_v48 }
 0x616   : > { %16000 = vmatmul.mubr.msk.f32.vlgmr.msra.gmra.mrb[134].mxu0 %vm1450_vm0, %v8086_v41  ;;  %16794 = vmatprep.subr.bf16.mxu1 %v16793_v36  ;;  %v18295_v55 = vpop.eup %18294  ;;  %v17347_v46 = vunpack.i.h.bf16 %v24043_v21  ;;  %v17346_v28 = vunpack.i.l.bf16 %v24043_v21  ;;  %18314 = vrcp.f32 %v22213_v3 }
 0x617   : > { %16832 = vmatpush3.bf16.msra.mxu0 %v16829_v52  ;;  %16013 = vmatprep.mubr.msk.f32.mxu0 %vm1450_vm0, %v8092_v32  ;;  %v22311_v44 = vpop.eup %18296  ;;  %v8058_v52 = vmul.f32 %v18293_v61, %v24041_v1  ;;  %v8064_v7 = vmul.f32 %v18295_v55, %v24042_v54  ;;  %v17426_v61 = vunpack.i.l.bf16 %v24046_v30  ;;  %18316 = vrcp.f32 %v22230_v38  ;;  %v24049_v55 = vld [vmem:[#allocation85_spill] sm:$0xff] }
 0x618   : > { %16838 = vmatprep.subr.bf16.mxu0 %v22302_v19  ;;  %15937 = vmatmul.mubr.msk.f32.vlgmr.msra.gmra.mrb[116].mxu1 %vm1450_vm0, %v8050_v51  ;;  %v18299_v27 = vpop.eup %18298  ;;  %v7894_v57 = vsel %vm1450_vm0, %v22311_v44, 0.0  ;;  %v17427_v51 = vunpack.i.h.bf16 %v24046_v30  ;;  %v16817_v48 = vpack.c.bf16 %v17347_v46, %v17346_v28  ;;  %v24052_v38 = vld [vmem:[#allocation77_spill] sm:$0xff]  ;;  %v24053_v46 = vld [vmem:[#allocation100_spill] sm:$0xff]  ;;  %18318 = vrcp.f32 %v22219_v0 }
 0x619   : > { %16796 = vmatpush3.bf16.msra.mxu1 %v16793_v36  ;;  %15950 = vmatprep.mubr.msk.f32.mxu1 %vm1450_vm0, %v8056_v35  ;;  %v18301_v11 = vpop.eup %18300  ;;  %v8066_v41 = vmul.f32 %v18299_v27, %v24044_v24  ;;  %v24051_v27 = vld [vmem:[#allocation122_spill] sm:$0xff] }
 0x61a   : > { %16802 = vmatprep.subr.bf16.mxu1 %v16801_v5  ;;  %v18303_v36 = vpop.eup %18302  ;;  %v8072_v32 = vmul.f32 %v18301_v11, %v24045_v2  ;;  %v17507_v54 = vunpack.i.h.bf16 %v24051_v27  ;;  %v17506_v3 = vunpack.i.l.bf16 %v24051_v27  ;;  %v24055_v2 = vld [vmem:[#allocation68_spill] sm:$0xff] }
 0x61b   : > { %v18305_v63 = vpop.eup %18304  ;;  %v8074_v40 = vmul.f32 %v18303_v36, %v24049_v55  ;;  %v24057_v55 = vld [vmem:[#allocation73_spill] sm:$0xff] }
 0x61c   : > { %15951 = vmatmul.mubr.msk.f32.vlgmr.msra.gmra.mrb[118].mxu1 %vm1450_vm0, %v8058_v52  ;;  %v22320_v18 = vpop.f32.mrb[94].mxu1  ;;  %v18307_v8 = vpop.eup %18306  ;;  %v16833_v24 = vpack.c.bf16 %v17507_v54, %v17506_v3 }
 0x61d   : > { %16804 = vmatpush3.bf16.msra.mxu1 %v16801_v5  ;;  %15964 = vmatprep.mubr.msk.f32.mxu1 %vm1450_vm0, %v8064_v7  ;;  %v22324_v62 = vpop.f32.mrb[95].mxu1  ;;  %v24050_v5 = vld [vmem:[#allocation91_spill] sm:$0xff]  ;;  %v18309_v52 = vpop.eup %18308  ;;  %v16825_v7 = vpack.c.bf16 %v17427_v51, %v17426_v61  ;;  %v8082_v11 = vmul.f32 %v18307_v8, %v24052_v38  ;;  %v24056_v61 = vld [vmem:[#allocation84_spill] sm:$0xff]  ;;  %v24058_v8 = vld [vmem:[#allocation29_spill] sm:$0xff] }
 0x61e   : > { %16810 = vmatprep.subr.bf16.mxu1 %v16809_v20  ;;  %v8080_v1 = vmul.f32 %v18305_v63, %v24050_v5  ;;  %v18311_v21 = vpop.eup %18310  ;;  %v8088_v28 = vmul.f32 %v18309_v52, %v24053_v46 }
 0x61f   : > { %7895 = vadd.xlane.f32.xlu1 %v7894_v57 }
 0x620   : > { %15965 = vmatmul.mubr.msk.f32.vlgmr.msra.gmra.mrb[120].mxu1 %vm1450_vm0, %v8066_v41  ;;  %v22334_v23 = vpop.f32.mrb[108].mxu0  ;;  %v24054_v41 = vld [vmem:[#allocation37_spill] sm:$0xff] }
 0x621   : > { %24047 = vst [vmem:[#allocation14_spill] sm:$0xff] %v22334_v23  ;;  %16812 = vmatpush3.bf16.msra.mxu1 %v16809_v20  ;;  %15978 = vmatprep.mubr.msk.f32.mxu1 %vm1450_vm0, %v8072_v32  ;;  %v22338_v35 = vpop.f32.mrb[109].mxu0  ;;  %v18313_v20 = vpop.eup %18312  ;;  %v8090_v36 = vmul.f32 %v18311_v21, %v24054_v41  ;;  %v24060_v41 = vld [vmem:[#allocation54_spill] sm:$0xff] }
 0x622   : > { %24048 = vst [vmem:[#allocation140_spill] sm:$0xff] %v22338_v35  ;;  %16818 = vmatprep.subr.bf16.mxu1 %v16817_v48  ;;  %v18315_v57 = vpop.eup %18314  ;;  %v8096_v32 = vmul.f32 %v18313_v20, %v24055_v2  ;;  %v24061_v2 = vld [vmem:[#allocation82_spill] sm:$0xff] }
 0x623   : > { %v18317_v63 = vpop.eup %18316 }
 0x624   : > { %15979 = vmatmul.mubr.msk.f32.vlgmr.msra.gmra.mrb[122].mxu1 %vm1450_vm0, %v8074_v40  ;;  %v8104_v40 = vmul.f32 %v18317_v63, %v24057_v55  ;;  %v18319_v46 = vpop.eup %18318  ;;  %v24062_v63 = vld [vmem:[#allocation132_spill] sm:$0xff] }
 0x625   : > { %16820 = vmatpush3.bf16.msra.mxu1 %v16817_v48  ;;  %15992 = vmatprep.mubr.msk.f32.mxu1 %vm1450_vm0, %v8080_v1  ;;  %v8098_v48 = vmul.f32 %v18315_v57, %v24056_v61  ;;  %v24063_v61 = vld [vmem:[#allocation28_spill] sm:$0xff] }
 0x626   : > { %16826 = vmatprep.subr.bf16.mxu1 %v16825_v7 }
 0x628   : > { %15993 = vmatmul.mubr.msk.f32.vlgmr.msra.gmra.mrb[124].mxu1 %vm1450_vm0, %v8082_v11 }
 0x629   : > { %16828 = vmatpush3.bf16.msra.mxu1 %v16825_v7  ;;  %16006 = vmatprep.mubr.msk.f32.mxu1 %vm1450_vm0, %v8088_v28 }
 0x62a   : > { %16834 = vmatprep.subr.bf16.mxu1 %v16833_v24 }
 0x62c   : > { %16007 = vmatmul.mubr.msk.f32.vlgmr.msra.gmra.mrb[126].mxu1 %vm1450_vm0, %v8090_v36  ;;  %v8100_v36 = vmul.f32 %v18319_v46, %v24060_v41  ;;  %v24066_v41 = vld [vmem:[#allocation58_spill] sm:$0xff] }
 0x62d   : > { %v22353_v30 = vpop.f32.mrb[96].mxu1  ;;  %16836 = vmatpush3.bf16.msra.mxu1 %v16833_v24  ;;  %16020 = vmatprep.mubr.msk.f32.mxu1 %vm1450_vm0, %v8096_v32  ;;  %v17392_v32 = vunpack.i.h.bf16 %v24061_v2 }
 0x62e   : > { %v22356_v51 = vpop.f32.mrb[97].mxu1 }
 0x630   : > { %16021 = vmatmul.mubr.msk.f32.vlgmr.msra.gmra.mrb[128].mxu1 %vm1450_vm0, %v8098_v48  ;;  %17594 = vrot.lane.b32.xlu1 %v24058_v8, %s18562_s9 }
 0x631   : > { %v22363_v5 = vpop.f32.mrb[110].mxu0  ;;  %16034 = vmatprep.mubr.msk.f32.mxu1 %vm1450_vm0, %v8104_v40 }
 0x632   : > { %v22366_v1 = vpop.f32.mrb[111].mxu0 }
 0x63b   : > { %v7800_v52 = vpop.xlane.xlu1 %7799 }
 0x63c   : > { %v22369_v27 = vpop.f32.mrb[112].mxu0  ;;  %18320 = vrcp.f32 %v7800_v52 }
 0x63d   : > { %v22371_v54 = vpop.f32.mrb[113].mxu0  ;;  %18322 = vrcp.f32 %v22223_v34 }
 0x63e   : > { %18324 = vrcp.f32 %v22251_v58 }
 0x63f   : > { %v22375_v3 = vpop.xlane.xlu1 %7829  ;;  %18326 = vrcp.f32 %v22261_v37  ;;  %v17391_v37 = vunpack.i.l.bf16 %v24061_v2 }
 0x640   : > { %v22377_v7 = vpop.xlane.xlu0 %7850 }
 0x641   : > { %v22379_v38 = vpop.f32.mrb[98].mxu1 }
 0x642   : > { %v22381_v11 = vpop.f32.mrb[99].mxu1 }
 0x643   : > { %24059 = vst [vmem:[#allocation111_spill] sm:$0xff] %v22381_v11  ;;  %v7833_v0 = vpop.xlane.xlu1 %7832  ;;  %v24087_v11 = vld [vmem:[#allocation49_spill] sm:$0xff] }
 0x644   : > { %18328 = vrcp.f32 %v7833_v0  ;;  %v22384_v21 = vpop.xlane.xlu0 %7877  ;;  %v24064_v0 = vld [vmem:[#allocation40_spill] sm:$0xff] }
 0x646   : > { %v18321_v28 = vpop.eup %18320 }
 0x647   : > { %v8094_v34 = vmul.f32 %v18321_v28, %v21948_v53  ;;  %v7836_v20 = vpop.xlane.xlu1 %7835  ;;  %v18323_v58 = vpop.eup %18322  ;;  %v24065_v28 = vld [vmem:[#allocation104_spill] sm:$0xff] }
 0x648   : > { %18330 = vrcp.f32 %v7836_v20  ;;  %v22387_v24 = vpop.xlane.xlu0 %7880  ;;  %v18325_v57 = vpop.eup %18324  ;;  %v8102_v53 = vmul.f32 %v18323_v58, %v24062_v63  ;;  %v16853_v20 = vpack.c.bf16 %v17392_v32, %v17391_v37 }
 0x649   : > { %16014 = vmatmul.mubr.msk.f32.vlgmr.msra.gmra.mrb[136].mxu0 %vm1450_vm0, %v8094_v34  ;;  %v18327_v40 = vpop.eup %18326  ;;  %v8108_v46 = vmul.f32 %v18325_v57, %v24064_v0  ;;  %v17472_v34 = vunpack.i.h.bf16 %v24065_v28 }
 0x64a   : > { %16840 = vmatpush3.bf16.msra.mxu0 %v22302_v19  ;;  %16027 = vmatprep.mubr.msk.f32.mxu0 %vm1450_vm0, %v8100_v36  ;;  %v17471_v19 = vunpack.i.l.bf16 %v24065_v28  ;;  %v8110_v36 = vmul.f32 %v18327_v40, %v24066_v41  ;;  %v24068_v28 = vld [vmem:[#allocation135_spill] sm:$0xff] }
 0x64b   : > { %16846 = vmatprep.subr.bf16.mxu0 %v24063_v61  ;;  %v22397_v48 = vpop.xlane.xlu1 %7838  ;;  %v17552_v35 = vunpack.i.h.bf16 %v24068_v28  ;;  %v17551_v32 = vunpack.i.l.bf16 %v24068_v28 }
 0x64c   : > { %v22399_v55 = vpop.f32.mrb[114].mxu0  ;;  %v22401_v8 = vpop.xlane.xlu0 %7883 }
 0x64d   : > { %v22403_v52 = vpop.f32.mrb[115].mxu0  ;;  %16028 = vmatmul.mubr.msk.f32.vlgmr.msra.gmra.mrb[138].mxu0 %vm1450_vm0, %v8102_v53  ;;  %v16861_v53 = vpack.c.bf16 %v17472_v34, %v17471_v19 }
 0x64e   : > { %v18329_v58 = vpop.eup %18328  ;;  %16848 = vmatpush3.bf16.msra.mxu0 %v24063_v61  ;;  %16041 = vmatprep.mubr.msk.f32.mxu0 %vm1450_vm0, %v8108_v46 }
 0x64f   : > { %16854 = vmatprep.subr.bf16.mxu0 %v16853_v20  ;;  %v22412_v2 = vpop.xlane.xlu1 %7841  ;;  %v8116_v63 = vmul.f32 %v18329_v58, %v21974_v25  ;;  %v16869_v58 = vpack.c.bf16 %v17552_v35, %v17551_v32 }
 0x650   : > { %v22415_v57 = vpop.xlane.xlu0 %7886 }
 0x651   : > { %v22417_v0 = vpop.f32.mrb[100].mxu1  ;;  %16042 = vmatmul.mubr.msk.f32.vlgmr.msra.gmra.mrb[140].mxu0 %vm1450_vm0, %v8110_v36 }
 0x652   : > { %24067 = vst [vmem:[#allocation105_spill] sm:$0xff] %v22417_v0  ;;  %v22421_v37 = vpop.f32.mrb[101].mxu1  ;;  %v18331_v61 = vpop.eup %18330  ;;  %16856 = vmatpush3.bf16.msra.mxu0 %v16853_v20  ;;  %16055 = vmatprep.mubr.msk.f32.mxu0 %vm1450_vm0, %v8116_v63 }
 0x653   : > { %24069 = vst [vmem:[#allocation143_spill] sm:$0xff] %v22421_v37  ;;  %v8118_v40 = vmul.f32 %v18331_v61, %v21992_v9  ;;  %16862 = vmatprep.subr.bf16.mxu0 %v16861_v53  ;;  %v7845_v25 = vpop.xlane.xlu1 %7844 }
 0x654   : > { %18332 = vrcp.f32 %v7845_v25  ;;  %v22426_v46 = vpop.xlane.xlu0 %7889 }
 0x655   : > { %16056 = vmatmul.mubr.msk.f32.vlgmr.msra.gmra.mrb[142].mxu0 %vm1450_vm0, %v8118_v40 }
 0x656   : > { %16864 = vmatpush3.bf16.msra.mxu0 %v16861_v53 }
 0x657   : > { %16870 = vmatprep.subr.bf16.mxu0 %v16869_v58  ;;  %v7848_v41 = vpop.xlane.xlu1 %7847 }
 0x658   : > { %18334 = vrcp.f32 %v7848_v41  ;;  %v7893_v36 = vpop.xlane.xlu0 %7892 }
 0x65b   : > { %v22429_v34 = vpop.xlane.xlu1 %7853 }
 0x65c   : > { %v22431_v19 = vpop.f32.mrb[116].mxu0  ;;  %v22438_v40 = vpop.xlane.xlu0 %7898 }
 0x65d   : > { %24070 = vst [vmem:[#allocation115_spill] sm:$0xff] %v22431_v19  ;;  %v22433_v20 = vpop.f32.mrb[117].mxu0 }
 0x65e   : > { %24071 = vst [vmem:[#allocation66_spill] sm:$0xff] %v22433_v20  ;;  %v18333_v9 = vpop.eup %18332 }
 0x65f   : > { %v7857_v63 = vpop.xlane.xlu1 %7856  ;;  %v8124_v28 = vmul.f32 %v18333_v9, %v22046_v59  ;;  %v24074_v59 = vld [vmem:[#allocation30_spill] sm:$0xff] }
 0x660   : > { %18336 = vrcp.f32 %v7857_v63  ;;  %v22445_v41 = vpop.xlane.xlu0 %7901 }
 0x661   : > { %v22436_v61 = vpop.f32.mrb[102].mxu1  ;;  %16069 = vmatprep.mubr.msk.f32.mxu0 %vm1450_vm0, %v8124_v28 }
 0x662   : > { %24072 = vst [vmem:[#allocation110_spill] sm:$0xff] %v22436_v61  ;;  %v22440_v35 = vpop.f32.mrb[103].mxu1  ;;  %v18335_v32 = vpop.eup %18334 }
 0x663   : > { %24073 = vst [vmem:[#allocation94_spill] sm:$0xff] %v22440_v35  ;;  %v8126_v53 = vmul.f32 %v18335_v32, %v22038_v50  ;;  %v7860_v25 = vpop.xlane.xlu1 %7859  ;;  %v24077_v32 = vld [vmem:[#allocation86_spill] sm:$0xff] }
 0x664   : > { %18338 = vrcp.f32 %v7860_v25  ;;  %v17397_v25 = vunpack.i.h.bf16 %v24077_v32 }
 0x665   : > { %16070 = vmatmul.mubr.msk.f32.vlgmr.msra.gmra.mrb[144].mxu0 %vm1450_vm0, %v8126_v53  ;;  %v17396_v53 = vunpack.i.l.bf16 %v24077_v32  ;;  %v24082_v32 = vld [vmem:[#allocation72_spill] sm:$0xff] }
 0x666   : > { %16872 = vmatpush3.bf16.msra.mxu0 %v16869_v58  ;;  %v22459_v58 = vpop.xlane.xlu0 %7904 }
 0x667   : > { %16878 = vmatprep.subr.bf16.mxu0 %v24074_v59  ;;  %v22448_v9 = vpop.xlane.xlu1 %7862 }
 0x668   : > { %v22450_v63 = vpop.f32.mrb[104].mxu1 }
 0x669   : > { %24075 = vst [vmem:[#allocation142_spill] sm:$0xff] %v22450_v63  ;;  %v22452_v20 = vpop.f32.mrb[105].mxu1 }
 0x66a   : > { %24076 = vst [vmem:[#allocation67_spill] sm:$0xff] %v22452_v20  ;;  %v18337_v19 = vpop.eup %18336 }
 0x66b   : > { %v22454_v28 = vpop.xlane.xlu1 %7865  ;;  %v8132_v50 = vmul.f32 %v18337_v19, %v22099_v16  ;;  %v16885_v16 = vpack.c.bf16 %v17397_v25, %v17396_v53  ;;  %v22470_v19 = vpop.xlane.xlu0 %7907 }
 0x66d   : > { %16083 = vmatprep.mubr.msk.f32.mxu0 %vm1450_vm0, %v8132_v50 }
 0x66e   : > { %v18339_v23 = vpop.eup %18338 }
 0x66f   : > { %v8134_v35 = vmul.f32 %v18339_v23, %v22121_v29  ;;  %v7869_v61 = vpop.xlane.xlu1 %7868  ;;  %v22476_v23 = vpop.xlane.xlu0 %7910 }
 0x670   : > { %18340 = vrcp.f32 %v7869_v61 }
 0x671   : > { %v22463_v63 = vpop.f32.mrb[118].mxu0  ;;  %16084 = vmatmul.mubr.msk.f32.vlgmr.msra.gmra.mrb[146].mxu0 %vm1450_vm0, %v8134_v35  ;;  %18342 = vrcp.f32 %v22387_v24 }
 0x672   : > { %24078 = vst [vmem:[#allocation127_spill] sm:$0xff] %v22463_v63  ;;  %v22465_v20 = vpop.f32.mrb[119].mxu0  ;;  %16880 = vmatpush3.bf16.msra.mxu0 %v24074_v59 }
 0x673   : > { %24079 = vst [vmem:[#allocation181_spill] sm:$0xff] %v22465_v20  ;;  %16886 = vmatprep.subr.bf16.mxu0 %v16885_v16  ;;  %v7872_v50 = vpop.xlane.xlu1 %7871 }
 0x674   : > { %18344 = vrcp.f32 %v7872_v50 }
 0x675   : > { %18346 = vrcp.f32 %v22242_v31 }
 0x676   : > { %18348 = vrcp.f32 %v22275_v4  ;;  %v17352_v4 = vunpack.i.h.bf16 %v24082_v32 }
 0x677   : > { %18350 = vrcp.f32 %v22401_v8  ;;  %v7875_v29 = vpop.xlane.xlu1 %7874  ;;  %v17351_v8 = vunpack.i.l.bf16 %v24082_v32 }
 0x678   : > { %18352 = vrcp.f32 %v7893_v36 }
 0x679   : > { %18354 = vrcp.f32 %v22375_v3  ;;  %v22478_v61 = vpop.f32.mrb[106].mxu1  ;;  %v24083_v3 = vld [vmem:[#allocation112_spill] sm:$0xff] }
 0x67a   : > { %24080 = vst [vmem:[#allocation145_spill] sm:$0xff] %v22478_v61  ;;  %v18341_v24 = vpop.eup %18340  ;;  %18356 = vrcp.f32 %v22397_v48  ;;  %v22481_v35 = vpop.f32.mrb[107].mxu1  ;;  %v17477_v50 = vunpack.i.h.bf16 %v24083_v3  ;;  %v17476_v37 = vunpack.i.l.bf16 %v24083_v3 }
 0x67b   : > { %24081 = vst [vmem:[#allocation98_spill] sm:$0xff] %v22481_v35  ;;  %v17585_v59 = vpop.permute.xlu1 %17584  ;;  %v8140_v31 = vmul.f32 %v18341_v24, %v22165_v56  ;;  %v18343_v53 = vpop.eup %18342  ;;  %18358 = vrcp.f32 %v22412_v2  ;;  %v16849_v2 = vpack.c.bf16 %v17352_v4, %v17351_v8 }
 0x67c   : > { %v17587_v25 = vunpack.i.h.bf16 %v17585_v59  ;;  %v17586_v36 = vunpack.i.l.bf16 %v17585_v59  ;;  %18360 = vrcp.f32 %v22377_v7  ;;  %v22491_v24 = vpop.xlane.xlu0 %7913  ;;  %v24084_v59 = vld [vmem:[#allocation31_spill] sm:$0xff]  ;;  %v8148_v7 = vmul.f32 %v18343_v53, %v21996_v42  ;;  %v24089_v42 = vld [vmem:[#allocation121_spill] sm:$0xff] }
 0x67d   : > { %16097 = vmatprep.mubr.msk.f32.mxu0 %vm1450_vm0, %v8140_v31  ;;  %v17432_v0 = vunpack.i.h.bf16 %v24084_v59  ;;  %v17431_v20 = vunpack.i.l.bf16 %v24084_v59  ;;  %18362 = vrcp.f32 %v22429_v34  ;;  %v17511_v53 = vunpack.i.l.bf16 %v24089_v42 }
 0x67e   : > { %v18345_v48 = vpop.eup %18344  ;;  %v16841_v35 = vpack.c.bf16 %v17587_v25, %v17586_v36  ;;  %v24086_v36 = vld [vmem:[#allocation138_spill] sm:$0xff]  ;;  %18364 = vrcp.f32 %v22448_v9 }
 0x67f   : > { %v18347_v56 = vpop.eup %18346  ;;  %v8142_v32 = vmul.f32 %v18345_v48, %v22183_v14  ;;  %v16893_v14 = vpack.c.bf16 %v17477_v50, %v17476_v37  ;;  %v17557_v48 = vunpack.i.h.bf16 %v24086_v36  ;;  %v17556_v59 = vunpack.i.l.bf16 %v24086_v36 }
 0x680   : > { %v18349_v61 = vpop.eup %18348  ;;  %16842 = vmatprep.subr.bf16.mxu1 %v16841_v35  ;;  %v17512_v37 = vunpack.i.h.bf16 %v24089_v42  ;;  %18366 = vrcp.f32 %v22454_v28  ;;  %v17590_v9 = vpop.permute.xlu0 %17589  ;;  %v24092_v42 = vld [vmem:[#allocation126_spill] sm:$0xff] }
 0x681   : > { %v22496_v63 = vpop.f32.mrb[120].mxu0  ;;  %v18351_v3 = vpop.eup %18350  ;;  %16844 = vmatpush3.bf16.msra.mxu1 %v16841_v35  ;;  %16098 = vmatmul.mubr.msk.f32.vlgmr.msra.gmra.mrb[148].mxu0 %vm1450_vm0, %v8142_v32  ;;  %v24088_v35 = vld [vmem:[#allocation19_spill] sm:$0xff]  ;;  %18368 = vrcp.f32 %v7875_v29  ;;  %v17591_v28 = vunpack.i.l.bf16 %v17590_v9 }
 0x682   : > { %24085 = vst [vmem:[#allocation183_spill] sm:$0xff] %v22496_v63  ;;  %v22499_v31 = vpop.f32.mrb[121].mxu0  ;;  %v18353_v25 = vpop.eup %18352  ;;  %v8106_v63 = vmul.f32 %v18347_v56, %v24087_v11  ;;  %16888 = vmatpush3.bf16.msra.mxu0 %v16885_v16  ;;  %16850 = vmatprep.subr.bf16.mxu1 %v16849_v2  ;;  %v8112_v4 = vmul.f32 %v18349_v61, %v24088_v35  ;;  %18370 = vrcp.f32 %v22384_v21 }
 0x683   : > { %v18355_v34 = vpop.eup %18354  ;;  %16111 = vmatprep.mubr.msk.f32.mxu0 %vm1450_vm0, %v8148_v7  ;;  %16894 = vmatprep.subr.bf16.mxu0 %v16893_v14  ;;  %v8150_v50 = vmul.f32 %v18351_v3, %v22012_v13  ;;  %v16857_v11 = vpack.c.bf16 %v17432_v0, %v17431_v20  ;;  %v8156_v16 = vmul.f32 %v18353_v25, %v22063_v47  ;;  %18372 = vrcp.f32 %v22415_v57  ;;  %v24090_v7 = vld [vmem:[#allocation75_spill] sm:$0xff] }
 0x684   : > { %v18357_v8 = vpop.eup %18356  ;;  %16035 = vmatmul.mubr.msk.f32.vlgmr.msra.gmra.mrb[130].mxu1 %vm1450_vm0, %v8106_v63  ;;  %v8114_v61 = vmul.f32 %v18355_v34, %v21963_v43  ;;  %v22518_v56 = vpack.c.bf16 %v17557_v48, %v17556_v59  ;;  %v17592_v63 = vunpack.i.h.bf16 %v17590_v9  ;;  %v16865_v43 = vpack.c.bf16 %v17512_v37, %v17511_v53  ;;  %v24091_v48 = vld [vmem:[#allocation96_spill] sm:$0xff] }
 0x685   : > { %16852 = vmatpush3.bf16.msra.mxu1 %v16849_v2  ;;  %16048 = vmatprep.mubr.msk.f32.mxu1 %vm1450_vm0, %v8112_v4  ;;  %v18359_v13 = vpop.eup %18358  ;;  %v8120_v0 = vmul.f32 %v18357_v8, %v22007_v6  ;;  %v17356_v25 = vunpack.i.l.bf16 %v24090_v7  ;;  %18374 = vrcp.f32 %v22426_v46  ;;  %v17437_v59 = vunpack.i.h.bf16 %v24091_v48 }
 0x686   : > { %16112 = vmatmul.mubr.msk.f32.vlgmr.msra.gmra.mrb[150].mxu0 %vm1450_vm0, %v8150_v50  ;;  %16858 = vmatprep.subr.bf16.mxu1 %v16857_v11  ;;  %v18361_v20 = vpop.eup %18360  ;;  %v8122_v32 = vmul.f32 %v18359_v13, %v22026_v60  ;;  %v16873_v36 = vpack.c.bf16 %v17592_v63, %v17591_v28  ;;  %18376 = vrcp.f32 %v22438_v40  ;;  %v17436_v34 = vunpack.i.l.bf16 %v24091_v48  ;;  %v24095_v28 = vld [vmem:[#allocation116_spill] sm:$0xff] }
 0x687   : > { %16896 = vmatpush3.bf16.msra.mxu0 %v16893_v14  ;;  %16125 = vmatprep.mubr.msk.f32.mxu0 %vm1450_vm0, %v8156_v16  ;;  %v18363_v6 = vpop.eup %18362  ;;  %v8128_v2 = vmul.f32 %v18361_v20, %v21965_v10  ;;  %v17357_v14 = vunpack.i.h.bf16 %v24090_v7  ;;  %18378 = vrcp.f32 %v22445_v41  ;;  %v17517_v37 = vunpack.i.h.bf16 %v24092_v42 }
 0x688   : > { %16902 = vmatprep.subr.bf16.mxu0 %v22518_v56  ;;  %v22523_v47 = vpop.f32.mrb[108].mxu1  ;;  %16049 = vmatmul.mubr.msk.f32.vlgmr.msra.gmra.mrb[132].mxu1 %vm1450_vm0, %v8114_v61  ;;  %v18365_v3 = vpop.eup %18364  ;;  %v8130_v60 = vmul.f32 %v18363_v6, %v22077_v22  ;;  %18380 = vrcp.f32 %v22476_v23  ;;  %v17516_v53 = vunpack.i.l.bf16 %v24092_v42  ;;  %v16889_v41 = vpack.c.bf16 %v17437_v59, %v17436_v34  ;;  %v24093_v61 = vld [vmem:[#allocation45_spill] sm:$0xff]  ;;  %v24097_v34 = vld [vmem:[#allocation43_spill] sm:$0xff] }
 0x689   : > { %v22527_v29 = vpop.f32.mrb[109].mxu1  ;;  %16860 = vmatpush3.bf16.msra.mxu1 %v16857_v11  ;;  %16062 = vmatprep.mubr.msk.f32.mxu1 %vm1450_vm0, %v8120_v0  ;;  %v8136_v10 = vmul.f32 %v18365_v3, %v22137_v15  ;;  %v16881_v46 = vpack.c.bf16 %v17357_v14, %v17356_v25  ;;  %18382 = vrcp.f32 %v22491_v24  ;;  %v24100_v42 = vld [vmem:[#allocation17_spill] sm:$0xff] }
 0x68a   : > { %16866 = vmatprep.subr.bf16.mxu1 %v16865_v43  ;;  %v18367_v21 = vpop.eup %18366  ;;  %18384 = vrcp.f32 %v22459_v58 }
 0x68b   : > { %v18369_v57 = vpop.eup %18368  ;;  %v8138_v22 = vmul.f32 %v18367_v21, %v22151_v12 }
 0x68c   : > { %16063 = vmatmul.mubr.msk.f32.vlgmr.msra.gmra.mrb[134].mxu1 %vm1450_vm0, %v8122_v32  ;;  %v18371_v15 = vpop.eup %18370  ;;  %v8144_v40 = vmul.f32 %v18369_v57, %v22196_v33  ;;  %v16897_v33 = vpack.c.bf16 %v17517_v37, %v17516_v53  ;;  %v24096_v57 = vld [vmem:[#allocation60_spill] sm:$0xff]  ;;  %v24101_v53 = vld [vmem:[#allocation61_spill] sm:$0xff] }
 0x68d   : > { %16868 = vmatpush3.bf16.msra.mxu1 %v16865_v43  ;;  %16076 = vmatprep.mubr.msk.f32.mxu1 %vm1450_vm0, %v8128_v2  ;;  %v18373_v8 = vpop.eup %18372  ;;  %v8146_v50 = vmul.f32 %v18371_v15, %v21982_v39  ;;  %v24098_v15 = vld [vmem:[#allocation41_spill] sm:$0xff] }
 0x68e   : > { %16874 = vmatprep.subr.bf16.mxu1 %v16873_v36  ;;  %v8152_v23 = vmul.f32 %v18373_v8, %v22031_v45  ;;  %v24094_v45 = vld [vmem:[#allocation89_spill] sm:$0xff] }
 0x68f   : > { %v18375_v12 = vpop.eup %18374 }
 0x690   : > { %16077 = vmatmul.mubr.msk.f32.vlgmr.msra.gmra.mrb[136].mxu1 %vm1450_vm0, %v8130_v60  ;;  %v18377_v11 = vpop.eup %18376  ;;  %v8154_v9 = vmul.f32 %v18375_v12, %v22050_v49  ;;  %v24102_v12 = vld [vmem:[#allocation59_spill] sm:$0xff] }
 0x691   : > { %v22543_v35 = vpop.f32.mrb[122].mxu0  ;;  %16876 = vmatpush3.bf16.msra.mxu1 %v16873_v36  ;;  %16090 = vmatprep.mubr.msk.f32.mxu1 %vm1450_vm0, %v8136_v10  ;;  %v18379_v16 = vpop.eup %18378  ;;  %v8160_v13 = vmul.f32 %v18377_v11, %v24093_v61 }
 0x692   : > { %v22547_v4 = vpop.f32.mrb[123].mxu0  ;;  %16882 = vmatprep.subr.bf16.mxu1 %v16881_v46  ;;  %v18381_v0 = vpop.eup %18380  ;;  %v8162_v63 = vmul.f32 %v18379_v16, %v24094_v45  ;;  %v24104_v16 = vld [vmem:[#allocation99_spill] sm:$0xff] }
 0x693   : > { %v8168_v43 = vmul.f32 %v18381_v0, %v24095_v28  ;;  %v18383_v60 = vpop.eup %18382  ;;  %v13922_v0 = vld [vmem:[#allocation7 + $0x8] sm:$0xff]  ;;  %v13924_v28 = vld [vmem:[#allocation7 + $0x18] sm:$0xff] }
 0x694   : > { %16091 = vmatmul.mubr.msk.f32.vlgmr.msra.gmra.mrb[138].mxu1 %vm1450_vm0, %v8138_v22  ;;  %v18385_v21 = vpop.eup %18384  ;;  %v8170_v48 = vmul.f32 %v18383_v60, %v24096_v57  ;;  %v13928_v60 = vld [vmem:[#allocation7 + $0x38] sm:$0xff] }
 0x695   : > { %16884 = vmatpush3.bf16.msra.mxu1 %v16881_v46  ;;  %16104 = vmatprep.mubr.msk.f32.mxu1 %vm1450_vm0, %v8144_v40  ;;  %v24099_v40 = vld [vmem:[#allocation55_spill] sm:$0xff] }
 0x696   : > { %16890 = vmatprep.subr.bf16.mxu1 %v16889_v41  ;;  %v8164_v8 = vmul.f32 %v18385_v21, %v24099_v40 }
 0x698   : > { %16105 = vmatmul.mubr.msk.f32.vlgmr.msra.gmra.mrb[140].mxu1 %vm1450_vm0, %v8146_v50 }
 0x699   : > { %16892 = vmatpush3.bf16.msra.mxu1 %v16889_v41  ;;  %16118 = vmatprep.mubr.msk.f32.mxu1 %vm1450_vm0, %v8152_v23 }
 0x69a   : > { %16898 = vmatprep.subr.bf16.mxu1 %v16897_v33 }
 0x69c   : > { %16119 = vmatmul.mubr.msk.f32.vlgmr.msra.gmra.mrb[142].mxu1 %vm1450_vm0, %v8154_v9 }
 0x69d   : > { %v22563_v20 = vpop.f32.mrb[110].mxu1  ;;  %16900 = vmatpush3.bf16.msra.mxu1 %v16897_v33  ;;  %16132 = vmatprep.mubr.msk.f32.mxu1 %vm1450_vm0, %v8160_v13  ;;  %v13921_v13 = vld [vmem:[#allocation7] sm:$0xff] }
 0x69e   : > { %v22566_v39 = vpop.f32.mrb[111].mxu1  ;;  %v16909_v45 = vpack.c.bf16 %v13922_v0, %v13921_v13  ;;  %v13933_v0 = vld [vmem:[#allocation7 + $0x60] sm:$0xff] }
 0x6a0   : > { %16133 = vmatmul.mubr.msk.f32.vlgmr.msra.gmra.mrb[144].mxu1 %vm1450_vm0, %v8162_v63  ;;  %v13923_v63 = vld [vmem:[#allocation7 + $0x10] sm:$0xff] }
 0x6a1   : > { %v22571_v32 = vpop.f32.mrb[124].mxu0  ;;  %16146 = vmatprep.mubr.msk.f32.mxu1 %vm1450_vm0, %v8168_v43  ;;  %v16913_v43 = vpack.c.bf16 %v13924_v28, %v13923_v63  ;;  %v24110_v63 = vld [vmem:[#allocation63_spill] sm:$0xff] }
 0x6a2   : > { %v22574_v49 = vpop.f32.mrb[125].mxu0 }
 0x6a4   : > { %v22577_v6 = vpop.f32.mrb[112].mxu1 }
 0x6a5   : > { %v22579_v2 = vpop.f32.mrb[113].mxu1 }
 0x6ac   : > { %v7896_v3 = vpop.xlane.xlu1 %7895 }
 0x6ad   : > { %18386 = vrcp.f32 %v7896_v3  ;;  %v13925_v3 = vld [vmem:[#allocation7 + $0x20] sm:$0xff] }
 0x6ae   : > { %18388 = vrcp.f32 %v22470_v19 }
 0x6b0   : > { %v17595_v7 = vpop.permute.xlu1 %17594 }
 0x6b1   : > { %v17597_v14 = vunpack.i.h.bf16 %v17595_v7  ;;  %v17596_v25 = vunpack.i.l.bf16 %v17595_v7  ;;  %v13926_v7 = vld [vmem:[#allocation7 + $0x28] sm:$0xff] }
 0x6b3   : > { %v16905_v36 = vpack.c.bf16 %v17597_v14, %v17596_v25  ;;  %v16917_v14 = vpack.c.bf16 %v13926_v7, %v13925_v3  ;;  %v24111_v7 = vld [vmem:[#allocation50_spill] sm:$0xff] }
 0x6b5   : > { %16906 = vmatprep.subr.bf16.mxu1 %v16905_v36 }
 0x6b6   : > { %16908 = vmatpush3.bf16.msra.mxu1 %v16905_v36  ;;  %v13927_v36 = vld [vmem:[#allocation7 + $0x30] sm:$0xff] }
 0x6b7   : > { %v18387_v10 = vpop.eup %18386  ;;  %16941 = vmatprep.subr.bf16.mxu1 %v16909_v45 }
 0x6b8   : > { %v15945_v59 = vpop.f32.mrb[126].mxu0  ;;  %v8158_v24 = vmul.f32 %v18387_v10, %v22311_v44  ;;  %v18389_v22 = vpop.eup %18388  ;;  %v16921_v10 = vpack.c.bf16 %v13928_v60, %v13927_v36  ;;  %v13935_v60 = vld [vmem:[#allocation7 + $0x70] sm:$0xff] }
 0x6b9   : > { %v17598_v58 = vpack.i.bf16 %v15945_v59, %v24097_v34  ;;  %v10997_v46 = vpop.f32.mrb[127].mxu0  ;;  %16147 = vmatmul.mubr.msk.f32.vlgmr.msra.gmra.mrb[146].mxu1 %vm1450_vm0, %v8170_v48  ;;  %v8166_v44 = vmul.f32 %v18389_v22, %v24100_v42  ;;  %v13929_v59 = vld [vmem:[#allocation7 + $0x40] sm:$0xff] }
 0x6ba   : > { %v17603_v19 = vpack.i.bf16 %v10997_v46, %v24098_v15  ;;  %16126 = vmatmul.mubr.msk.f32.vlgmr.msra.gmra.mrb[152].mxu0 %vm1450_vm0, %v8158_v24  ;;  %16949 = vmatpush3.bf16.msra.mxu1 %v16909_v45  ;;  %v13930_v24 = vld [vmem:[#allocation7 + $0x48] sm:$0xff]  ;;  %v24107_v42 = vld [vmem:[#allocation52_spill] sm:$0xff] }
 0x6bb   : > { %17599 = vrot.lane.b32.xlu1 %v17598_v58, %s18561_s6  ;;  %16904 = vmatpush3.bf16.msra.mxu0 %v22518_v56  ;;  %v24103_v56 = vld [vmem:[#allocation20_spill] sm:$0xff]  ;;  %v16925_v58 = vpack.c.bf16 %v13930_v24, %v13929_v59  ;;  %v24105_v46 = vld [vmem:[#allocation153_spill] sm:$0xff]  ;;  %v24112_v59 = vld [vmem:[#allocation131_spill] sm:$0xff] }
 0x6bc   : > { %17604 = vrot.lane.b32.xlu0 %v17603_v19, %s18561_s6  ;;  %16139 = vmatprep.mubr.msk.f32.mxu0 %vm1450_vm0, %v8164_v8  ;;  %v24106_v19 = vld [vmem:[#allocation139_spill] sm:$0xff] }
 0x6bd   : > { %16910 = vmatprep.subr.bf16.mxu0 %v16909_v45  ;;  %16942 = vmatprep.subr.bf16.mxu1 %v16913_v43 }
 0x6be   : > { %16140 = vmatmul.mubr.msk.f32.vlgmr.msra.gmra.mrb[154].mxu0 %vm1450_vm0, %v8166_v44  ;;  %16950 = vmatpush3.bf16.msra.mxu1 %v16913_v43 }
 0x6bf   : > { %16912 = vmatpush3.bf16.msra.mxu0 %v16909_v45  ;;  %16943 = vmatprep.subr.bf16.mxu1 %v16917_v14  ;;  %v13934_v45 = vld [vmem:[#allocation7 + $0x68] sm:$0xff] }
 0x6c0   : > { %v15959_v37 = vpop.f32.mrb[128].mxu0  ;;  %16914 = vmatprep.subr.bf16.mxu0 %v16913_v43 }
 0x6c1   : > { %v17608_v41 = vpack.i.bf16 %v15959_v37, %v24101_v53  ;;  %v11159_v50 = vpop.f32.mrb[129].mxu0  ;;  %v13931_v53 = vld [vmem:[#allocation7 + $0x50] sm:$0xff] }
 0x6c2   : > { %v17613_v23 = vpack.i.bf16 %v11159_v50, %v24102_v12  ;;  %16951 = vmatpush3.bf16.msra.mxu1 %v16917_v14  ;;  %v24108_v50 = vld [vmem:[#allocation180_spill] sm:$0xff] }
 0x6c3   : > { %17609 = vrot.lane.b32.xlu0 %v17608_v41, %s18559_s8  ;;  %16916 = vmatpush3.bf16.msra.mxu0 %v16913_v43  ;;  %v13932_v41 = vld [vmem:[#allocation7 + $0x58] sm:$0xff]  ;;  %v16933_v43 = vpack.c.bf16 %v13934_v45, %v13933_v0  ;;  %v24117_v0 = vld [vmem:[#allocation97_spill] sm:$0xff] }
 0x6c4   : > { %16918 = vmatprep.subr.bf16.mxu0 %v16917_v14  ;;  %16944 = vmatprep.subr.bf16.mxu1 %v16921_v10 }
 0x6c6   : > { %16952 = vmatpush3.bf16.msra.mxu1 %v16921_v10 }
 0x6c7   : > { %17614 = vrot.lane.b32.xlu0 %v17613_v23, %s18559_s8  ;;  %16920 = vmatpush3.bf16.msra.mxu0 %v16917_v14  ;;  %v16929_v23 = vpack.c.bf16 %v13932_v41, %v13931_v53 }
 0x6c8   : > { %16922 = vmatprep.subr.bf16.mxu0 %v16921_v10  ;;  %16945 = vmatprep.subr.bf16.mxu1 %v16925_v58 }
 0x6ca   : > { %16953 = vmatpush3.bf16.msra.mxu1 %v16925_v58 }
 0x6cb   : > { %16924 = vmatpush3.bf16.msra.mxu0 %v16921_v10  ;;  %16946 = vmatprep.subr.bf16.mxu1 %v16929_v23  ;;  %v13936_v10 = vld [vmem:[#allocation7 + $0x78] sm:$0xff] }
 0x6cc   : > { %16926 = vmatprep.subr.bf16.mxu0 %v16925_v58 }
 0x6ce   : > { %16954 = vmatpush3.bf16.msra.mxu1 %v16929_v23 }
 0x6cf   : > { %16928 = vmatpush3.bf16.msra.mxu0 %v16925_v58  ;;  %16947 = vmatprep.subr.bf16.mxu1 %v16933_v43 }
 0x6d0   : > { %16930 = vmatprep.subr.bf16.mxu0 %v16929_v23 }
 0x6d2   : > { %16955 = vmatpush3.bf16.msra.mxu1 %v16933_v43 }
 0x6d3   : > { %16932 = vmatpush3.bf16.msra.mxu0 %v16929_v23 }
 0x6d4   : > { %v15973_v11 = vpop.f32.mrb[130].mxu0  ;;  %16934 = vmatprep.subr.bf16.mxu0 %v16933_v43 }
 0x6d5   : > { %v17623_v33 = vpack.i.bf16 %v15973_v11, %v24103_v56  ;;  %v22602_v9 = vpop.f32.mrb[131].mxu0  ;;  %v24109_v56 = vld [vmem:[#allocation182_spill] sm:$0xff] }
 0x6d6   : > { %v17633_v61 = vpack.i.bf16 %v22602_v9, %v24104_v16  ;;  %v24113_v16 = vld [vmem:[#allocation156_spill] sm:$0xff] }
 0x6d7   : > { %17624 = vrot.lane.b32.xlu0 %v17623_v33, %s18557_s23  ;;  %16936 = vmatpush3.bf16.msra.mxu0 %v16933_v43 }
 0x6e4   : > { %v22607_v25 = vpop.f32.mrb[132].mxu0 }
 0x6e5   : > { %v22609_v21 = vpop.f32.mrb[133].mxu0 }
 0x6e7   : > { %v22611_v57 = vpop.f32.mrb[114].mxu1 }
 0x6e8   : > { %v22613_v48 = vpop.f32.mrb[115].mxu1 }
 0x6e9   : > { %v16001_v34 = vpop.f32.mrb[134].mxu0 }
 0x6ea   : > { %v17653_v22 = vpack.i.bf16 %v16001_v34, %v24105_v46  ;;  %v11645_v15 = vpop.f32.mrb[135].mxu0  ;;  %v16937_v34 = vpack.c.bf16 %v13936_v10, %v13935_v60  ;;  %v24114_v46 = vld [vmem:[#allocation56_spill] sm:$0xff] }
 0x6eb   : > { %v17663_v40 = vpack.i.bf16 %v11645_v15, %v24106_v19  ;;  %v15938_v8 = vpop.f32.mrb[116].mxu1 }
 0x6ec   : > { %v17618_v44 = vpack.i.bf16 %v15938_v8, %v24107_v42  ;;  %v10916_v37 = vpop.f32.mrb[117].mxu1  ;;  %16938 = vmatprep.subr.bf16.mxu0 %v16937_v34  ;;  %16948 = vmatprep.subr.bf16.mxu1 %v16937_v34  ;;  %v24115_v8 = vld [vmem:[#allocation141_spill] sm:$0xff] }
 0x6ed   : > { %v17628_v12 = vpack.i.bf16 %v10916_v37, %v24108_v50  ;;  %16940 = vmatpush3.bf16.msra.mxu0 %v16937_v34  ;;  %16956 = vmatpush3.bf16.msra.mxu1 %v16937_v34  ;;  %v24116_v37 = vld [vmem:[#allocation65_spill] sm:$0xff] }
 0x6ee   : > { %17619 = vrot.lane.b32.xlu1 %v17618_v44, %s18562_s9 }
 0x6ef   : > { %17629 = vrot.lane.b32.xlu0 %v17628_v12, %s18562_s9  ;;  %v15952_v11 = vpop.f32.mrb[118].mxu1 }
 0x6f0   : > { %v17638_v33 = vpack.i.bf16 %v15952_v11, %v24109_v56  ;;  %v11078_v13 = vpop.f32.mrb[119].mxu1 }
 0x6f1   : > { %v17643_v28 = vpack.i.bf16 %v11078_v13, %v24110_v63  ;;  %v24118_v63 = vld [vmem:[#allocation78_spill] sm:$0xff] }
 0x6f2   : > { %17634 = vrot.lane.b32.xlu1 %v17633_v61, %s18557_s23 }
 0x6f3   : > { %17644 = vrot.lane.b32.xlu0 %v17643_v28, %s18560_s30  ;;  %v15966_v3 = vpop.f32.mrb[120].mxu1 }
 0x6f4   : > { %v17648_v14 = vpack.i.bf16 %v15966_v3, %v24111_v7  ;;  %v11240_v36 = vpop.f32.mrb[121].mxu1 }
 0x6f5   : > { %v17658_v24 = vpack.i.bf16 %v11240_v36, %v24112_v59 }
 0x6f6   : > { %17639 = vrot.lane.b32.xlu1 %v17638_v33, %s18560_s30 }
 0x6f7   : > { %17649 = vrot.lane.b32.xlu0 %v17648_v14, %s18558_s7  ;;  %v15980_v9 = vpop.f32.mrb[122].mxu1 }
 0x6f8   : > { %v17668_v61 = vpack.i.bf16 %v15980_v9, %v24113_v16  ;;  %v11402_v58 = vpop.f32.mrb[123].mxu1 }
 0x6f9   : > { %v17678_v15 = vpack.i.bf16 %v11402_v58, %v24114_v46 }
 0x6fa   : > { %17659 = vrot.lane.b32.xlu1 %v17658_v24, %s18558_s7 }
 0x6fb   : > { %17654 = vrot.lane.b32.xlu0 %v17653_v22, %s18561_s6  ;;  %v15994_v19 = vpop.f32.mrb[124].mxu1 }
 0x6fc   : > { %v17688_v42 = vpack.i.bf16 %v15994_v19, %v24115_v8  ;;  %v11564_v44 = vpop.f32.mrb[125].mxu1  ;;  %v24119_v19 = vld [vmem:[#allocation111_spill] sm:$0xff] }
 0x6fd   : > { %v17698_v53 = vpack.i.bf16 %v11564_v44, %v24116_v37 }
 0x6fe   : > { %17664 = vrot.lane.b32.xlu1 %v17663_v40, %s18561_s6 }
 0x6ff   : > { %17669 = vrot.lane.b32.xlu0 %v17668_v61, %s18556_s21  ;;  %v16008_v41 = vpop.f32.mrb[126].mxu1 }
 0x700   : > { %v17708_v50 = vpack.i.bf16 %v16008_v41, %v22320_v18  ;;  %v11726_v12 = vpop.f32.mrb[127].mxu1 }
 0x701   : > { %v17713_v23 = vpack.i.bf16 %v11726_v12, %v22324_v62  ;;  %v24122_v12 = vld [vmem:[#allocation105_spill] sm:$0xff] }
 0x702   : > { %17679 = vrot.lane.b32.xlu1 %v17678_v15, %s18556_s21 }
 0x703   : > { %v16022_v11 = vpop.f32.mrb[128].mxu1 }
 0x704   : > { %v17718_v22 = vpack.i.bf16 %v16022_v11, %v22353_v30  ;;  %v11888_v56 = vpop.f32.mrb[129].mxu1 }
 0x705   : > { %v17728_v33 = vpack.i.bf16 %v11888_v56, %v22356_v51 }
 0x71c   : > { %v16015_v13 = vpop.f32.mrb[136].mxu0 }
 0x71d   : > { %v17673_v45 = vpack.i.bf16 %v16015_v13, %v24117_v0  ;;  %v11807_v40 = vpop.f32.mrb[137].mxu0  ;;  %v24124_v0 = vld [vmem:[#allocation110_spill] sm:$0xff] }
 0x71e   : > { %v17683_v28 = vpack.i.bf16 %v11807_v40, %v24118_v63 }
 0x71f   : > { %17674 = vrot.lane.b32.xlu0 %v17673_v45, %s18559_s8 }
 0x720   : > { %v16029_v18 = vpop.f32.mrb[138].mxu0  ;;  %17684 = vrot.lane.b32.xlu1 %v17683_v28, %s18559_s8  ;;  %v24125_v28 = vld [vmem:[#allocation94_spill] sm:$0xff] }
 0x721   : > { %v17693_v62 = vpack.i.bf16 %v16029_v18, %v22281_v17  ;;  %v11969_v43 = vpop.f32.mrb[139].mxu0 }
 0x722   : > { %v17703_v3 = vpack.i.bf16 %v11969_v43, %v22288_v26 }
 0x723   : > { %17689 = vrot.lane.b32.xlu0 %v17688_v42, %s18562_s9  ;;  %v24120_v42 = vld [vmem:[#allocation127_spill] sm:$0xff] }
 0x724   : > { %v22652_v30 = vpop.f32.mrb[140].mxu0  ;;  %17699 = vrot.lane.b32.xlu1 %v17698_v53, %s18562_s9  ;;  %v24121_v53 = vld [vmem:[#allocation181_spill] sm:$0xff] }
 0x725   : > { %v22655_v51 = vpop.f32.mrb[141].mxu0 }
 0x727   : > { %17694 = vrot.lane.b32.xlu0 %v17693_v62, %s18557_s23 }
 0x728   : > { %v16057_v7 = vpop.f32.mrb[142].mxu0  ;;  %17704 = vrot.lane.b32.xlu1 %v17703_v3, %s18557_s23 }
 0x729   : > { %v17723_v14 = vpack.i.bf16 %v16057_v7, %v22363_v5  ;;  %v12293_v36 = vpop.f32.mrb[143].mxu0 }
 0x72a   : > { %v17733_v17 = vpack.i.bf16 %v12293_v36, %v22366_v1  ;;  %v24126_v36 = vld [vmem:[#allocation142_spill] sm:$0xff] }
 0x72b   : > { %17709 = vrot.lane.b32.xlu0 %v17708_v50, %s18560_s30 }
 0x72c   : > { %17714 = vrot.lane.b32.xlu1 %v17713_v23, %s18560_s30 }
 0x72d   : > { %v22690_v37 = vpop.permute.xlu1 %17599 }
 0x72e   : > { %v22671_v9 = vpop.permute.xlu0 %17604 }
 0x72f   : > { %17719 = vrot.lane.b32.xlu0 %v17718_v22, %s18558_s7  ;;  %v24123_v22 = vld [vmem:[#allocation143_spill] sm:$0xff] }
 0x730   : > { %17729 = vrot.lane.b32.xlu1 %v17728_v33, %s18558_s7 }
 0x733   : > { %17724 = vrot.lane.b32.xlu0 %v17723_v14, %s18561_s6 }
 0x734   : > { %17734 = vrot.lane.b32.xlu1 %v17733_v17, %s18561_s6 }
 0x735   : > { %v22673_v16 = vpop.permute.xlu0 %17609 }
 0x738   : > { %v16071_v26 = vpop.f32.mrb[144].mxu0 }
 0x739   : > { %v17743_v60 = vpack.i.bf16 %v16071_v26, %v22369_v27  ;;  %v12455_v10 = vpop.f32.mrb[145].mxu0  ;;  %v22679_v15 = vpop.permute.xlu0 %17614 }
 0x73a   : > { %v17753_v5 = vpack.i.bf16 %v12455_v10, %v22371_v54 }
 0x744   : > { %v16085_v59 = vpop.f32.mrb[146].mxu0 }
 0x745   : > { %v17763_v1 = vpack.i.bf16 %v16085_v59, %v22399_v55  ;;  %v12617_v24 = vpop.f32.mrb[147].mxu0 }
 0x746   : > { %v17773_v34 = vpack.i.bf16 %v12617_v24, %v22403_v52  ;;  %v17602_v24 = vunpack.i.h.bf16 %v22690_v37 }
 0x749   : > { %v22695_v50 = vpop.permute.xlu0 %17624 }
 0x754   : > { %v22675_v61 = vpop.f32.mrb[148].mxu0 }
 0x755   : > { %v22677_v58 = vpop.f32.mrb[149].mxu0 }
 0x757   : > { %v16036_v46 = vpop.f32.mrb[130].mxu1 }
 0x758   : > { %v17738_v27 = vpack.i.bf16 %v16036_v46, %v22379_v38  ;;  %v12050_v54 = vpop.f32.mrb[131].mxu1  ;;  %v17601_v46 = vunpack.i.l.bf16 %v22690_v37 }
 0x759   : > { %v17748_v8 = vpack.i.bf16 %v12050_v54, %v24119_v19  ;;  %v22683_v55 = vpop.f32.mrb[150].mxu0 }
 0x75a   : > { %v17793_v52 = vpack.i.bf16 %v22683_v55, %v24120_v42  ;;  %v22687_v44 = vpop.f32.mrb[151].mxu0  ;;  %17739 = vrot.lane.b32.xlu0 %v17738_v27, %s18556_s21  ;;  %v17626_v55 = vunpack.i.l.bf16 %v22695_v50 }
 0x75b   : > { %v17803_v41 = vpack.i.bf16 %v22687_v44, %v24121_v53  ;;  %17749 = vrot.lane.b32.xlu1 %v17748_v8, %s18556_s21  ;;  %v16050_v38 = vpop.f32.mrb[132].mxu1  ;;  %v24128_v8 = vld [vmem:[#allocation64_spill] sm:$0xff] }
 0x75c   : > { %v17758_v23 = vpack.i.bf16 %v16050_v38, %v24122_v12  ;;  %v12212_v11 = vpop.f32.mrb[133].mxu1  ;;  %v24129_v12 = vld [vmem:[#allocation145_spill] sm:$0xff] }
 0x75d   : > { %v17768_v56 = vpack.i.bf16 %v12212_v11, %v24123_v22  ;;  %v24130_v22 = vld [vmem:[#allocation46_spill] sm:$0xff] }
 0x75e   : > { %17744 = vrot.lane.b32.xlu0 %v17743_v60, %s18559_s8 }
 0x75f   : > { %17754 = vrot.lane.b32.xlu1 %v17753_v5, %s18559_s8  ;;  %v16064_v13 = vpop.f32.mrb[134].mxu1  ;;  %v24127_v5 = vld [vmem:[#allocation67_spill] sm:$0xff] }
 0x760   : > { %v17620_v33 = vpop.permute.xlu1 %17619  ;;  %v17778_v45 = vpack.i.bf16 %v16064_v13, %v24124_v0  ;;  %v12374_v63 = vpop.f32.mrb[135].mxu1  ;;  %v24131_v13 = vld [vmem:[#allocation98_spill] sm:$0xff]  ;;  %v17607_v0 = vunpack.i.h.bf16 %v22671_v9 }
 0x761   : > { %v17630_v40 = vpop.permute.xlu0 %17629  ;;  %v17783_v18 = vpack.i.bf16 %v12374_v63, %v24125_v28  ;;  %v17622_v3 = vunpack.i.h.bf16 %v17620_v33  ;;  %v17621_v7 = vunpack.i.l.bf16 %v17620_v33  ;;  %v17612_v28 = vunpack.i.h.bf16 %v22673_v16 }
 0x762   : > { %17759 = vrot.lane.b32.xlu0 %v17758_v23, %s18562_s9  ;;  %v17632_v14 = vunpack.i.h.bf16 %v17630_v40  ;;  %v17631_v10 = vunpack.i.l.bf16 %v17630_v40  ;;  %v17606_v40 = vunpack.i.l.bf16 %v22671_v9 }
 0x763   : > { %17769 = vrot.lane.b32.xlu1 %v17768_v56, %s18562_s9  ;;  %v16078_v43 = vpop.f32.mrb[136].mxu1  ;;  %v13812_v19 = vsel %vm1450_vm0, %v22571_v32, %v17622_v3  ;;  %v13804_v38 = vsel %vm1450_vm0, %v24128_v8, %v17621_v7 }
 0x764   : > { %v22704_v62 = vpop.permute.xlu1 %17634  ;;  %v17788_v17 = vpack.i.bf16 %v16078_v43, %v24126_v36  ;;  %v12536_v60 = vpop.f32.mrb[137].mxu1  ;;  %v17611_v43 = vunpack.i.l.bf16 %v22673_v16  ;;  %v13821_v9 = vsel %vm13819_vm2, %v13804_v38, %v17601_v46  ;;  %v17616_v38 = vunpack.i.l.bf16 %v22679_v15 }
 0x765   : > { %v17645_v26 = vpop.permute.xlu0 %17644  ;;  %v17798_v59 = vpack.i.bf16 %v12536_v60, %v24127_v5 }
 0x766   : > { %17764 = vrot.lane.b32.xlu0 %v17763_v1, %s18557_s23  ;;  %v13811_v1 = vsel %vm1450_vm0, %v22574_v49, %v17632_v14  ;;  %v17647_v63 = vunpack.i.h.bf16 %v17645_v26  ;;  %v17646_v49 = vunpack.i.l.bf16 %v17645_v26  ;;  %v13829_v26 = vsel %vm13819_vm2, %v13812_v19, %v17602_v24 }
 0x767   : > { %17774 = vrot.lane.b32.xlu1 %v17773_v34, %s18557_s23  ;;  %v22713_v54 = vpop.f32.mrb[138].mxu1  ;;  %v13803_v34 = vsel %vm1450_vm0, %v24130_v22, %v17631_v10  ;;  %v13828_v36 = vsel %vm13819_vm2, %v13811_v1, %v17607_v0  ;;  %v17617_v19 = vunpack.i.h.bf16 %v22679_v15  ;;  %v17627_v15 = vunpack.i.h.bf16 %v22695_v50 }
 0x768   : > { %v17640_v27 = vpop.permute.xlu1 %17639  ;;  %v17808_v23 = vpack.i.bf16 %v22713_v54, %v24129_v12  ;;  %v22723_v11 = vpop.f32.mrb[139].mxu1  ;;  %v13820_v14 = vsel %vm13819_vm2, %v13803_v34, %v17606_v40 }
 0x769   : > { %v17650_v37 = vpop.permute.xlu0 %17649  ;;  %v17642_v56 = vunpack.i.h.bf16 %v17640_v27  ;;  %v17641_v33 = vunpack.i.l.bf16 %v17640_v27  ;;  %v17818_v32 = vpack.i.bf16 %v22723_v11, %v24131_v13  ;;  %v13845_v27 = vsel %vm13836_vm3, %v13828_v36, %v17647_v63  ;;  %v24133_v13 = vld [vmem:[#allocation76_spill] sm:$0xff] }
 0x76a   : > { %17779 = vrot.lane.b32.xlu0 %v17778_v45, %s18560_s30  ;;  %v13837_v46 = vsel %vm13836_vm3, %v13820_v14, %v17646_v49  ;;  %v17652_v1 = vunpack.i.h.bf16 %v17650_v37  ;;  %v17651_v22 = vunpack.i.l.bf16 %v17650_v37  ;;  %v13862_v63 = vsel %vm13853_vm4, %v13845_v27, %v17617_v19  ;;  %v24132_v19 = vld [vmem:[#allocation183_spill] sm:$0xff] }
 0x76b   : > { %17784 = vrot.lane.b32.xlu1 %v17783_v18, %s18560_s30  ;;  %v22735_v7 = vpop.f32.mrb[140].mxu1  ;;  %v13846_v16 = vsel %vm13836_vm3, %v13829_v26, %v17642_v56  ;;  %v13838_v10 = vsel %vm13836_vm3, %v13821_v9, %v17641_v33  ;;  %v17637_v49 = vunpack.i.h.bf16 %v22704_v62 }
 0x76c   : > { %v17660_v3 = vpop.permute.xlu1 %17659  ;;  %v22743_v60 = vpop.f32.mrb[141].mxu1  ;;  %v17828_v18 = vpack.i.bf16 %v22735_v7, %v22523_v47  ;;  %v13855_v56 = vsel %vm13853_vm4, %v13838_v10, %v17611_v43  ;;  %v13863_v33 = vsel %vm13853_vm4, %v13846_v16, %v17612_v28  ;;  %v17636_v28 = vunpack.i.l.bf16 %v22704_v62 }
 0x76d   : > { %v22741_v45 = vpop.permute.xlu0 %17654  ;;  %v17838_v5 = vpack.i.bf16 %v22743_v60, %v22527_v29  ;;  %v17662_v8 = vunpack.i.h.bf16 %v17660_v3  ;;  %v17661_v24 = vunpack.i.l.bf16 %v17660_v3  ;;  %v13880_v7 = vsel %vm13870_vm5, %v13863_v33, %v17652_v1 }
 0x76e   : > { %17789 = vrot.lane.b32.xlu0 %v17788_v17, %s18558_s7  ;;  %v13872_v14 = vsel %vm13870_vm5, %v13855_v56, %v17651_v22 }
 0x76f   : > { %17799 = vrot.lane.b32.xlu1 %v17798_v59, %s18558_s7  ;;  %v22759_v47 = vpop.f32.mrb[142].mxu1  ;;  %v13854_v59 = vsel %vm13853_vm4, %v13837_v46, %v17616_v38  ;;  %v13879_v3 = vsel %vm13870_vm5, %v13862_v63, %v17662_v8 }
 0x770   : > { %v22756_v34 = vpop.permute.xlu1 %17664  ;;  %v17848_v0 = vpack.i.bf16 %v22759_v47, %v22563_v20  ;;  %v22765_v40 = vpop.f32.mrb[143].mxu1  ;;  %v13871_v43 = vsel %vm13870_vm5, %v13854_v59, %v17661_v24  ;;  %v13896_v8 = vsel %vm13887_vm6, %v13879_v3, %v17637_v49 }
 0x771   : > { %v17670_v17 = vpop.permute.xlu0 %17669  ;;  %v17853_v37 = vpack.i.bf16 %v22765_v40, %v22566_v39  ;;  %v13888_v46 = vsel %vm13887_vm6, %v13871_v43, %v17636_v28  ;;  %v17657_v28 = vunpack.i.h.bf16 %v22741_v45  ;;  %v17656_v43 = vunpack.i.l.bf16 %v22741_v45 }
 0x772   : > { %17794 = vrot.lane.b32.xlu0 %v17793_v52, %s18561_s6  ;;  %v17672_v36 = vunpack.i.h.bf16 %v17670_v17  ;;  %v17671_v9 = vunpack.i.l.bf16 %v17670_v17 }
 0x773   : > { %17804 = vrot.lane.b32.xlu1 %v17803_v41, %s18561_s6  ;;  %v22786_v62 = vpop.f32.mrb[144].mxu1  ;;  %v13889_v41 = vsel %vm13887_vm6, %v13872_v14, %v17626_v55 }
 0x774   : > { %v17680_v26 = vpop.permute.xlu1 %17679  ;;  %v17858_v16 = vpack.i.bf16 %v22786_v62, %v22577_v6  ;;  %v13184_v10 = vpop.f32.mrb[145].mxu1  ;;  %v13897_v6 = vsel %vm13887_vm6, %v13880_v7, %v17627_v15  ;;  %v17667_v7 = vunpack.i.h.bf16 %v22756_v34 }
 0x775   : > { %v17682_v42 = vunpack.i.h.bf16 %v17680_v26  ;;  %v17681_v52 = vunpack.i.l.bf16 %v17680_v26  ;;  %v17863_v27 = vpack.i.bf16 %v13184_v10, %v22579_v2  ;;  %v13906_v2 = vsel %vm13904_vm7, %v13889_v41, %v17671_v9 }
 0x776   : > { %17809 = vrot.lane.b32.xlu0 %v17808_v23, %s18556_s21  ;;  %v13914_v50 = vsel %vm13904_vm7, %v13897_v6, %v17672_v36  ;;  %v24134_v36 = vld [vmem:[#allocation16_spill] sm:$0xff] }
 0x777   : > { %v13905_v44 = vsel %vm13904_vm7, %v13888_v46, %v17681_v52  ;;  %v13913_v53 = vsel %vm13904_vm7, %v13896_v8, %v17682_v42 }
 0x778   : > { %16181 = vmatprep.mubr.f32.mxu0 %v13905_v44  ;;  %16193 = vmatprep.mubr.f32.mxu1 %v13913_v53 }
 0x779   : > { %16182 = vmatmul.mubr.f32.vlgmr.msra.gmra.mrb[156].mxu0 %v13906_v2  ;;  %16194 = vmatmul.mubr.f32.vlgmr.msra.gmra.mrb[148].mxu1 %v13914_v50 }
 0x77a   : > { %17829 = vrot.lane.b32.xlu0 %v17828_v18, %s18562_s9 }
 0x78c   : > { %v16148_v54 = vpop.f32.mrb[146].mxu1 }
 0x78d   : > { %v17873_v12 = vpack.i.bf16 %v16148_v54, %v22611_v57  ;;  %v16127_v23 = vpop.f32.mrb[152].mxu0  ;;  %v13346_v24 = vpop.f32.mrb[147].mxu1 }
 0x78e   : > { %v17813_v38 = vpack.i.bf16 %v16127_v23, %v24132_v19  ;;  %v17868_v1 = vpack.i.bf16 %v13346_v24, %v22613_v48  ;;  %v13103_v22 = vpop.f32.mrb[153].mxu0 }
 0x78f   : > { %v17823_v56 = vpack.i.bf16 %v13103_v22, %v22499_v31 }
 0x790   : > { %17814 = vrot.lane.b32.xlu1 %v17813_v38, %s18559_s8 }
 0x791   : > { %v16141_v33 = vpop.f32.mrb[154].mxu0  ;;  %v22810_v17 = vpop.permute.xlu0 %17674 }
 0x792   : > { %v17833_v15 = vpack.i.bf16 %v16141_v33, %v22543_v35  ;;  %v13265_v18 = vpop.f32.mrb[155].mxu0  ;;  %v17685_v59 = vpop.permute.xlu1 %17684  ;;  %v17677_v6 = vunpack.i.h.bf16 %v22810_v17  ;;  %v17676_v2 = vunpack.i.l.bf16 %v22810_v17 }
 0x793   : > { %v17843_v57 = vpack.i.bf16 %v13265_v18, %v22547_v4  ;;  %v17666_v4 = vunpack.i.l.bf16 %v22756_v34  ;;  %v17687_v52 = vunpack.i.h.bf16 %v17685_v59  ;;  %v17686_v10 = vunpack.i.l.bf16 %v17685_v59 }
 0x794   : > { %17819 = vrot.lane.b32.xlu1 %v17818_v32, %s18556_s21 }
 0x795   : > { %v17690_v48 = vpop.permute.xlu0 %17689  ;;  %17844 = vrot.lane.b32.xlu0 %v17843_v57, %s18557_s23 }
 0x796   : > { %v17692_v31 = vunpack.i.h.bf16 %v17690_v48  ;;  %v17691_v63 = vunpack.i.l.bf16 %v17690_v48  ;;  %v17700_v49 = vpop.permute.xlu1 %17699 }
 0x797   : > { %v17702_v35 = vunpack.i.h.bf16 %v17700_v49  ;;  %v17701_v3 = vunpack.i.l.bf16 %v17700_v49 }
 0x798   : > { %v13814_v11 = vsel %vm1450_vm0, %v22607_v25, %v17692_v31  ;;  %v13806_v32 = vsel %vm1450_vm0, %v24133_v13, %v17691_v63  ;;  %17824 = vrot.lane.b32.xlu1 %v17823_v56, %s18559_s8 }
 0x799   : > { %v13813_v14 = vsel %vm1450_vm0, %v22609_v21, %v17702_v35  ;;  %v13805_v45 = vsel %vm1450_vm0, %v24134_v36, %v17701_v3  ;;  %17849 = vrot.lane.b32.xlu0 %v17848_v0, %s18560_s30  ;;  %v13823_v34 = vsel %vm13819_vm2, %v13806_v32, %v17656_v43  ;;  %v13831_v25 = vsel %vm13819_vm2, %v13814_v11, %v17657_v28  ;;  %v17695_v20 = vpop.permute.xlu0 %17694 }
 0x79a   : > { %v13822_v9 = vsel %vm13819_vm2, %v13805_v45, %v17666_v4  ;;  %v13830_v26 = vsel %vm13819_vm2, %v13813_v14, %v17667_v7  ;;  %v17705_v21 = vpop.permute.xlu1 %17704  ;;  %v17697_v59 = vunpack.i.h.bf16 %v17695_v20  ;;  %v17696_v57 = vunpack.i.l.bf16 %v17695_v20 }
 0x79b   : > { %v17707_v50 = vunpack.i.h.bf16 %v17705_v21  ;;  %v17706_v54 = vunpack.i.l.bf16 %v17705_v21 }
 0x79c   : > { %17834 = vrot.lane.b32.xlu1 %v17833_v15, %s18557_s23 }
 0x79d   : > { %17864 = vrot.lane.b32.xlu0 %v17863_v27, %s18558_s7  ;;  %v17710_v47 = vpop.permute.xlu0 %17709 }
 0x79e   : > { %v17715_v0 = vpop.permute.xlu1 %17714  ;;  %v17712_v60 = vunpack.i.h.bf16 %v17710_v47 }
 0x79f   : > { %v17717_v42 = vunpack.i.h.bf16 %v17715_v0  ;;  %v17716_v29 = vunpack.i.l.bf16 %v17715_v0 }
 0x7a0   : > { %17839 = vrot.lane.b32.xlu1 %v17838_v5, %s18562_s9  ;;  %v17711_v5 = vunpack.i.l.bf16 %v17710_v47  ;;  %v13848_v46 = vsel %vm13836_vm3, %v13831_v25, %v17712_v60  ;;  %v24135_v60 = vld [vmem:[#allocation14_spill] sm:$0xff] }
 0x7a1   : > { %17869 = vrot.lane.b32.xlu0 %v17868_v1, %s18556_s21  ;;  %v17720_v62 = vpop.permute.xlu0 %17719  ;;  %v13847_v27 = vsel %vm13836_vm3, %v13830_v26, %v17717_v42  ;;  %v13839_v39 = vsel %vm13836_vm3, %v13822_v9, %v17716_v29  ;;  %v13865_v22 = vsel %vm13853_vm4, %v13848_v46, %v17677_v6 }
 0x7a2   : > { %v17730_v55 = vpop.permute.xlu1 %17729  ;;  %v13840_v8 = vsel %vm13836_vm3, %v13823_v34, %v17711_v5  ;;  %v17722_v44 = vunpack.i.h.bf16 %v17720_v62  ;;  %v17721_v53 = vunpack.i.l.bf16 %v17720_v62  ;;  %v13864_v23 = vsel %vm13853_vm4, %v13847_v27, %v17687_v52 }
 0x7a3   : > { %v17732_v40 = vunpack.i.h.bf16 %v17730_v55  ;;  %v13857_v1 = vsel %vm13853_vm4, %v13840_v8, %v17676_v2 }
 0x7a4   : > { %17854 = vrot.lane.b32.xlu1 %v17853_v37, %s18560_s30  ;;  %v17731_v37 = vunpack.i.l.bf16 %v17730_v55  ;;  %v13874_v17 = vsel %vm13870_vm5, %v13857_v1, %v17721_v53  ;;  %v13882_v18 = vsel %vm13870_vm5, %v13865_v22, %v17722_v44 }
 0x7a5   : > { %v13881_v38 = vsel %vm13870_vm5, %v13864_v23, %v17732_v40  ;;  %v13891_v35 = vsel %vm13887_vm6, %v13874_v17, %v17696_v57  ;;  %v13899_v3 = vsel %vm13887_vm6, %v13882_v18, %v17697_v59 }
 0x7a6   : > { %v22859_v41 = vpop.permute.xlu1 %17734  ;;  %v13898_v49 = vsel %vm13887_vm6, %v13881_v38, %v17707_v50 }
 0x7a7   : > { %v17737_v46 = vunpack.i.h.bf16 %v22859_v41  ;;  %v17736_v8 = vunpack.i.l.bf16 %v22859_v41 }
 0x7a8   : > { %17859 = vrot.lane.b32.xlu1 %v17858_v16, %s18558_s7  ;;  %v22855_v16 = vpop.permute.xlu0 %17724 }
 0x7a9   : > { %v17727_v55 = vunpack.i.h.bf16 %v22855_v16  ;;  %v17726_v42 = vunpack.i.l.bf16 %v22855_v16 }
 0x7ac   : > { %17874 = vrot.lane.b32.xlu1 %v17873_v12, %s18556_s21  ;;  %v13856_v12 = vsel %vm13853_vm4, %v13839_v39, %v17686_v10  ;;  %v24136_v10 = vld [vmem:[#allocation140_spill] sm:$0xff]  ;;  %s18563_s21 = smov [#allocation8]  }
 0x7ad   : > { %v13873_v19 = vsel %vm13870_vm5, %v13856_v12, %v17731_v37  ;;  %s18480_s23 = sshll.u32 %s18563_s21, 4  ;;  %s18481_s23 = int_to_ptr.vmem [resolvable:$false] %s18480_s23 }
 0x7ae   : > { %v13890_v63 = vsel %vm13887_vm6, %v13873_v19, %v17706_v54  ;;  %s18482_s7 = scalar_lea.vmem %s18481_s23, 4096  ;;  %p18483_p5 = scmp.lt.s32.totalorder %s22993_s5, %s18481_s23 }
 0x7af   : > { %p18484_p9 = scmp.lt.s32.totalorder %s18482_s7, %s18476_s25 }
 0x7b1   : > { %p18485_p12 = por %p18484_p9, %p18483_p5 }
 0x7b3   : > { %p18486_p2 = pnand %p18485_p12, %p18479_p3 }
 0x7cc   : > { %v17740_v24 = vpop.permute.xlu0 %17739 }
 0x7cd   : > { %v17742_v56 = vunpack.i.h.bf16 %v17740_v24  ;;  %v17741_v33 = vunpack.i.l.bf16 %v17740_v24  ;;  %v17750_v15 = vpop.permute.xlu1 %17749 }
 0x7ce   : > { %v17752_v48 = vunpack.i.h.bf16 %v17750_v15  ;;  %v17751_v31 = vunpack.i.l.bf16 %v17750_v15 }
 0x7cf   : > { %v13908_v7 = vsel %vm13904_vm7, %v13891_v35, %v17741_v33  ;;  %v13916_v4 = vsel %vm13904_vm7, %v13899_v3, %v17742_v56 }
 0x7d0   : > { %v13907_v28 = vsel %vm13904_vm7, %v13890_v63, %v17751_v31  ;;  %v13915_v43 = vsel %vm13904_vm7, %v13898_v49, %v17752_v48  ;;  %v17745_v11 = vpop.permute.xlu0 %17744 }
 0x7d1   : > { %16184 = vmatprep.mubr.f32.mxu0 %v13907_v28  ;;  %16196 = vmatprep.mubr.f32.mxu1 %v13915_v43  ;;  %v17755_v32 = vpop.permute.xlu1 %17754  ;;  %v17747_v33 = vunpack.i.h.bf16 %v17745_v11  ;;  %v17746_v15 = vunpack.i.l.bf16 %v17745_v11 }
 0x7d2   : > { %16185 = vmatmul.mubr.f32.gmra.mrb[158].mxu0 %v13908_v7  ;;  %16197 = vmatmul.mubr.f32.gmra.mrb[150].mxu1 %v13916_v4  ;;  %v17756_v6 = vunpack.i.l.bf16 %v17755_v32 }
 0x7d4   : > { %v17760_v13 = vpop.permute.xlu0 %17759 }
 0x7d5   : > { %v17770_v36 = vpop.permute.xlu1 %17769  ;;  %v17762_v20 = vunpack.i.h.bf16 %v17760_v13  ;;  %v17761_v21 = vunpack.i.l.bf16 %v17760_v13 }
 0x7d6   : > { %v17772_v0 = vunpack.i.h.bf16 %v17770_v36  ;;  %v17771_v62 = vunpack.i.l.bf16 %v17770_v36 }
 0x7d7   : > { %v13816_v29 = vsel %vm1450_vm0, %v22652_v30, %v17762_v20  ;;  %v13808_v5 = vsel %vm1450_vm0, %v24135_v60, %v17761_v21  ;;  %v17757_v30 = vunpack.i.h.bf16 %v17755_v32 }
 0x7d8   : > { %v22879_v14 = vpop.permute.xlu0 %17764  ;;  %v13815_v52 = vsel %vm1450_vm0, %v22655_v51, %v17772_v0  ;;  %v13807_v27 = vsel %vm1450_vm0, %v24136_v10, %v17771_v62  ;;  %v13825_v2 = vsel %vm13819_vm2, %v13808_v5, %v17726_v42  ;;  %v13833_v51 = vsel %vm13819_vm2, %v13816_v29, %v17727_v55  ;;  %v24137_v10 = vld [vmem:[#allocation115_spill] sm:$0xff] }
 0x7d9   : > { %v17775_v34 = vpop.permute.xlu1 %17774  ;;  %v13824_v50 = vsel %vm13819_vm2, %v13807_v27, %v17736_v8  ;;  %v13832_v54 = vsel %vm13819_vm2, %v13815_v52, %v17737_v46  ;;  %v17767_v11 = vunpack.i.h.bf16 %v22879_v14  ;;  %v17766_v13 = vunpack.i.l.bf16 %v22879_v14 }
 0x7da   : > { %v17777_v18 = vunpack.i.h.bf16 %v17775_v34  ;;  %v17776_v59 = vunpack.i.l.bf16 %v17775_v34 }
 0x7dc   : > { %v17780_v45 = vpop.permute.xlu0 %17779 }
 0x7dd   : > { %v17785_v9 = vpop.permute.xlu1 %17784  ;;  %v17782_v16 = vunpack.i.h.bf16 %v17780_v45  ;;  %v17781_v44 = vunpack.i.l.bf16 %v17780_v45 }
 0x7de   : > { %v17787_v39 = vunpack.i.h.bf16 %v17785_v9  ;;  %v17786_v40 = vunpack.i.l.bf16 %v17785_v9 }
 0x7df   : > { %v13850_v19 = vsel %vm13836_vm3, %v13833_v51, %v17782_v16  ;;  %v13842_v38 = vsel %vm13836_vm3, %v13825_v2, %v17781_v44 }
 0x7e0   : > { %v17790_v25 = vpop.permute.xlu0 %17789  ;;  %v13849_v12 = vsel %vm13836_vm3, %v13832_v54, %v17787_v39  ;;  %v13841_v23 = vsel %vm13836_vm3, %v13824_v50, %v17786_v40  ;;  %v13859_v49 = vsel %vm13853_vm4, %v13842_v38, %v17746_v15  ;;  %v13867_v28 = vsel %vm13853_vm4, %v13850_v19, %v17747_v33  ;;  %v24138_v50 = vld [vmem:[#allocation66_spill] sm:$0xff] }
 0x7e1   : > { %v17800_v47 = vpop.permute.xlu1 %17799  ;;  %v17792_v1 = vunpack.i.h.bf16 %v17790_v25  ;;  %v17791_v22 = vunpack.i.l.bf16 %v17790_v25  ;;  %v13858_v57 = vsel %vm13853_vm4, %v13841_v23, %v17756_v6  ;;  %v13866_v48 = vsel %vm13853_vm4, %v13849_v12, %v17757_v30 }
 0x7e2   : > { %v17802_v24 = vunpack.i.h.bf16 %v17800_v47  ;;  %v17801_v41 = vunpack.i.l.bf16 %v17800_v47 }
 0x7e3   : > { %v13876_v7 = vsel %vm13870_vm5, %v13859_v49, %v17791_v22  ;;  %v13884_v4 = vsel %vm13870_vm5, %v13867_v28, %v17792_v1 }
 0x7e4   : > { %v22881_v26 = vpop.permute.xlu0 %17794  ;;  %v13875_v31 = vsel %vm13870_vm5, %v13858_v57, %v17801_v41  ;;  %v13883_v63 = vsel %vm13870_vm5, %v13866_v48, %v17802_v24  ;;  %v13893_v21 = vsel %vm13887_vm6, %v13876_v7, %v17766_v13  ;;  %v13901_v47 = vsel %vm13887_vm6, %v13884_v4, %v17767_v11 }
 0x7e5   : > { %v22895_v53 = vpop.permute.xlu1 %17804  ;;  %v13892_v34 = vsel %vm13887_vm6, %v13875_v31, %v17776_v59  ;;  %v13900_v25 = vsel %vm13887_vm6, %v13883_v63, %v17777_v18  ;;  %v17797_v40 = vunpack.i.h.bf16 %v22881_v26 }
 0x7e6   : > { %v17807_v16 = vunpack.i.h.bf16 %v22895_v53  ;;  %v17806_v44 = vunpack.i.l.bf16 %v22895_v53 }
 0x7e8   : > { %v17810_v37 = vpop.permute.xlu0 %17809 }
 0x7e9   : > { %v17812_v43 = vunpack.i.h.bf16 %v17810_v37  ;;  %v17811_v35 = vunpack.i.l.bf16 %v17810_v37  ;;  %v17796_v37 = vunpack.i.l.bf16 %v22881_v26 }
 0x7eb   : > { %v13910_v14 = vsel %vm13904_vm7, %v13893_v21, %v17811_v35  ;;  %v13918_v62 = vsel %vm13904_vm7, %v13901_v47, %v17812_v43 }
 0x7ec   : > { %v17830_v17 = vpop.permute.xlu0 %17829 }
 0x7ed   : > { %v17832_v42 = vunpack.i.h.bf16 %v17830_v17  ;;  %v17831_v29 = vunpack.i.l.bf16 %v17830_v17 }
 0x7ef   : > { %v13818_v52 = vsel %vm1450_vm0, %v22675_v61, %v17832_v42  ;;  %v13810_v27 = vsel %vm1450_vm0, %v24137_v10, %v17831_v29  ;;  %v14610_v29 = vld [vmem:[%s23044_s3] ss:$0 sm:$0xff] }
 0x7f0   : > { %v13827_v2 = vsel %vm13819_vm2, %v13810_v27, %v17796_v37  ;;  %v13835_v61 = vsel %vm13819_vm2, %v13818_v52, %v17797_v40 }
 0x802   : > { %v22905_v56 = vpop.permute.xlu1 %17814 }
 0x803   : > { %v17817_v26 = vunpack.i.h.bf16 %v22905_v56  ;;  %v17816_v12 = vunpack.i.l.bf16 %v22905_v56 }
 0x806   : > { %v17820_v3 = vpop.permute.xlu1 %17819 }
 0x807   : > { %v17822_v32 = vunpack.i.h.bf16 %v17820_v3  ;;  %v17821_v36 = vunpack.i.l.bf16 %v17820_v3  ;;  %v22917_v45 = vpop.permute.xlu0 %17844 }
 0x808   : > { %v17847_v23 = vunpack.i.h.bf16 %v22917_v45  ;;  %v17846_v53 = vunpack.i.l.bf16 %v22917_v45 }
 0x809   : > { %v13909_v9 = vsel %vm13904_vm7, %v13892_v34, %v17821_v36  ;;  %v13917_v20 = vsel %vm13904_vm7, %v13900_v25, %v17822_v32 }
 0x80a   : > { %v17825_v0 = vpop.permute.xlu1 %17824  ;;  %16187 = vmatprep.mubr.f32.mxu0 %v13909_v9  ;;  %16199 = vmatprep.mubr.f32.mxu1 %v13917_v20 }
 0x80b   : > { %16188 = vmatmul.mubr.f32.gmra.mrb[160].mxu0 %v13910_v14  ;;  %16200 = vmatmul.mubr.f32.gmra.mrb[152].mxu1 %v13918_v62  ;;  %v17850_v55 = vpop.permute.xlu0 %17849  ;;  %v17827_v41 = vunpack.i.h.bf16 %v17825_v0  ;;  %v17826_v19 = vunpack.i.l.bf16 %v17825_v0 }
 0x80c   : > { %v17852_v30 = vunpack.i.h.bf16 %v17850_v55  ;;  %v17851_v6 = vunpack.i.l.bf16 %v17850_v55 }
 0x80e   : > { %v17835_v60 = vpop.permute.xlu1 %17834  ;;  %v13852_v33 = vsel %vm13836_vm3, %v13835_v61, %v17852_v30 }
 0x80f   : > { %v17865_v5 = vpop.permute.xlu0 %17864  ;;  %v13869_v32 = vsel %vm13853_vm4, %v13852_v33, %v17817_v26  ;;  %v17837_v9 = vunpack.i.h.bf16 %v17835_v60  ;;  %v17836_v20 = vunpack.i.l.bf16 %v17835_v60 }
 0x810   : > { %v17867_v18 = vunpack.i.h.bf16 %v17865_v5  ;;  %v17866_v56 = vunpack.i.l.bf16 %v17865_v5 }
 0x812   : > { %v17840_v39 = vpop.permute.xlu1 %17839 }
 0x813   : > { %v17842_v46 = vunpack.i.h.bf16 %v17840_v39  ;;  %v17841_v8 = vunpack.i.l.bf16 %v17840_v39  ;;  %v17870_v38 = vpop.permute.xlu0 %17869 }
 0x814   : > { %v17872_v48 = vunpack.i.h.bf16 %v17870_v38  ;;  %v17871_v31 = vunpack.i.l.bf16 %v17870_v38 }
 0x815   : > { %v13817_v51 = vsel %vm1450_vm0, %v22677_v58, %v17842_v46  ;;  %v13809_v54 = vsel %vm1450_vm0, %v24138_v50, %v17841_v8  ;;  %v13844_v58 = vsel %vm13836_vm3, %v13827_v2, %v17851_v6 }
 0x816   : > { %v17855_v24 = vpop.permute.xlu1 %17854  ;;  %v13826_v15 = vsel %vm13819_vm2, %v13809_v54, %v17806_v44  ;;  %v13834_v17 = vsel %vm13819_vm2, %v13817_v51, %v17807_v16  ;;  %v13861_v13 = vsel %vm13853_vm4, %v13844_v58, %v17816_v12 }
 0x817   : > { %v17857_v1 = vunpack.i.h.bf16 %v17855_v24  ;;  %v17856_v22 = vunpack.i.l.bf16 %v17855_v24 }
 0x819   : > { %v13851_v59 = vsel %vm13836_vm3, %v13834_v17, %v17857_v1  ;;  %v13843_v57 = vsel %vm13836_vm3, %v13826_v15, %v17856_v22 }
 0x81a   : > { %v17860_v63 = vpop.permute.xlu1 %17859  ;;  %v13860_v49 = vsel %vm13853_vm4, %v13843_v57, %v17826_v19  ;;  %v13868_v28 = vsel %vm13853_vm4, %v13851_v59, %v17827_v41 }
 0x81b   : > { %v17862_v43 = vunpack.i.h.bf16 %v17860_v63  ;;  %v17861_v35 = vunpack.i.l.bf16 %v17860_v63  ;;  %v13877_v3 = vsel %vm13870_vm5, %v13860_v49, %v17866_v56  ;;  %v13885_v7 = vsel %vm13870_vm5, %v13868_v28, %v17867_v18 }
 0x81c   : > { %v13894_v4 = vsel %vm13887_vm6, %v13877_v3, %v17846_v53  ;;  %v13902_v11 = vsel %vm13887_vm6, %v13885_v7, %v17847_v23 }
 0x81d   : > { %v13911_v36 = vsel %vm13904_vm7, %v13894_v4, %v17871_v31  ;;  %v13919_v45 = vsel %vm13904_vm7, %v13902_v11, %v17872_v48  ;;  %v13878_v34 = vsel %vm13870_vm5, %v13861_v13, %v17861_v35  ;;  %v13886_v25 = vsel %vm13870_vm5, %v13869_v32, %v17862_v43 }
 0x81e   : > { %v17875_v21 = vpop.permute.xlu1 %17874  ;;  %16190 = vmatprep.mubr.f32.mxu0 %v13911_v36  ;;  %16202 = vmatprep.mubr.f32.mxu1 %v13919_v45  ;;  %v13895_v14 = vsel %vm13887_vm6, %v13878_v34, %v17836_v20  ;;  %v13903_v62 = vsel %vm13887_vm6, %v13886_v25, %v17837_v9 }
 0x81f   : > { %v17877_v47 = vunpack.i.h.bf16 %v17875_v21  ;;  %v17876_v0 = vunpack.i.l.bf16 %v17875_v21 }
 0x821   : > { %v13912_v55 = vsel %vm13904_vm7, %v13895_v14, %v17876_v0  ;;  %v13920_v42 = vsel %vm13904_vm7, %v13903_v62, %v17877_v47 }
 0x822   : > { %16191 = vmatmul.mubr.f32.gmra.mrb[162].mxu0 %v13912_v55  ;;  %16203 = vmatmul.mubr.f32.gmra.mrb[154].mxu1 %v13920_v42 }
 0x84c   : > { %v16183_v60 = vpop.f32.mrb[156].mxu0  ;;  %v16195_v5 = vpop.f32.mrb[148].mxu1 }
 0x84d   : > { %v14016_v52 = vadd.f32 %v16183_v60, %v14610_v29  ;;  %v14056_v10 = vadd.f32 %v16195_v5, %v14610_v29  ;;  %v14010_v27 = vpop.f32.mrb[157].mxu0  ;;  %v14050_v39 = vpop.f32.mrb[149].mxu1 }
 0x84e   : > { %v14011_v40 = vadd.f32 %v14610_v29, %v14010_v27  ;;  %v14051_v37 = vadd.f32 %v14610_v29, %v14050_v39 }
 0x84f   : > { %14090 = vst [vmem:[%s22972_s20 + $0x8] sm:$0xff] %v14016_v52  ;;  %14098 = vst [vmem:[%s22972_s20 + $0x48] sm:$0xff] %v14056_v10 }
 0x850   : > { %14089 = vst [vmem:[%s22972_s20] sm:$0xff] %v14011_v40  ;;  %14097 = vst [vmem:[%s22972_s20 + $0x40] sm:$0xff] %v14051_v37 }
 0x8a5   : > { %v16186_v46 = vpop.f32.mrb[158].mxu0  ;;  %v16198_v8 = vpop.f32.mrb[150].mxu1 }
 0x8a6   : > { %v14026_v16 = vadd.f32 %v16186_v46, %v14610_v29  ;;  %v14066_v44 = vadd.f32 %v16198_v8, %v14610_v29  ;;  %v14020_v30 = vpop.f32.mrb[159].mxu0  ;;  %v14060_v6 = vpop.f32.mrb[151].mxu1 }
 0x8a7   : > { %v14021_v2 = vadd.f32 %v14610_v29, %v14020_v30  ;;  %v14061_v61 = vadd.f32 %v14610_v29, %v14060_v6 }
 0x8a8   : > { %14092 = vst [vmem:[%s22972_s20 + $0x18] sm:$0xff] %v14026_v16  ;;  %14100 = vst [vmem:[%s22972_s20 + $0x58] sm:$0xff] %v14066_v44 }
 0x8a9   : > { %14091 = vst [vmem:[%s22972_s20 + $0x10] sm:$0xff] %v14021_v2  ;;  %14099 = vst [vmem:[%s22972_s20 + $0x50] sm:$0xff] %v14061_v61 }
 0x8de   : > { %v16189_v51 = vpop.f32.mrb[160].mxu0  ;;  %v16201_v50 = vpop.f32.mrb[152].mxu1 }
 0x8df   : > { %v14036_v54 = vadd.f32 %v16189_v51, %v14610_v29  ;;  %v14076_v26 = vadd.f32 %v16201_v50, %v14610_v29  ;;  %v14030_v12 = vpop.f32.mrb[161].mxu0  ;;  %v14070_v23 = vpop.f32.mrb[153].mxu1 }
 0x8e0   : > { %v14031_v53 = vadd.f32 %v14610_v29, %v14030_v12  ;;  %v14071_v24 = vadd.f32 %v14610_v29, %v14070_v23 }
 0x8e1   : > { %14094 = vst [vmem:[%s22972_s20 + $0x28] sm:$0xff] %v14036_v54  ;;  %14102 = vst [vmem:[%s22972_s20 + $0x68] sm:$0xff] %v14076_v26 }
 0x8e2   : > { %14093 = vst [vmem:[%s22972_s20 + $0x20] sm:$0xff] %v14031_v53  ;;  %14101 = vst [vmem:[%s22972_s20 + $0x60] sm:$0xff] %v14071_v24 }
 0x8f5   : > { %v16192_v41 = vpop.f32.mrb[162].mxu0  ;;  %v16204_v19 = vpop.f32.mrb[154].mxu1 }
 0x8f6   : > { %v14046_v38 = vadd.f32 %v16192_v41, %v14610_v29  ;;  %v14086_v1 = vadd.f32 %v16204_v19, %v14610_v29  ;;  %v14040_v22 = vpop.f32.mrb[163].mxu0  ;;  %v14080_v33 = vpop.f32.mrb[155].mxu1 }
 0x8f7   : > { %v14041_v58 = vadd.f32 %v14610_v29, %v14040_v22  ;;  %v14081_v15 = vadd.f32 %v14610_v29, %v14080_v33 }
 0x8f8   : > { %14096 = vst [vmem:[%s22972_s20 + $0x38] sm:$0xff] %v14046_v38  ;;  %14104 = vst [vmem:[%s22972_s20 + $0x78] sm:$0xff] %v14086_v1 }
 0x8f9   : > { %14095 = vst [vmem:[%s22972_s20 + $0x30] sm:$0xff] %v14041_v58  ;;  %14103 = vst [vmem:[%s22972_s20 + $0x70] sm:$0xff] %v14081_v15 }
 0x8fa   : > { %18489 = shalt.err (!%p18486_p2)
}
 0x8fb   : > { %s18490_s8 = scalar_lea.hbm %s22991_s24, 2048  ;;  %s18494_s9 = scalar_lea.hbm %s23045_s4, 4096 }
 0x8fc   : > { %p18491_p13 = scmp.ne.s32.totalorder %s22991_s24, %s18490_s8  ;;  %p18495_p4 = scmp.lt.u32.totalorder %s22991_s24, %s23045_s4 }
 0x8fd   : > { %p18496_p7 = scmp.lt.u32.totalorder %s18494_s9, %s18490_s8  ;;  %p18498_p11 = scmp.lt.u32.totalorder %s18490_s8, %s22991_s24 }
 0x8fe   : > { %p18492_p6 = pnand %p18491_p13, %p24139_p0 }
 0x8ff   : > { %p18497_p8 = por %p18496_p7, %p18495_p4 }
 0x900   : > { %p18493_p10 = pneg %p18492_p6 }
 0x901   : > { %p18499_p1 = por %p18498_p11, %p18497_p8 }
 0x903   : > { %p18500_p3 = pnand %p18499_p1, %p18493_p10 }
 0x905   : > { %18503 = shalt.err (!%p18500_p3)
}
 0x906   : > { %s18564_s20 = smov 128   ;;  %s18565_s29 = smov 8  }
 0x907   : > { %16967 = dma.vmem_to_hbm [thread:$0]  (%p24139_p0), %s22993_s5, 2048, %s22991_s24, %s14106_s19, %s18564_s20, %s18564_s20, %s18565_s29  }
 0x908 PF: > { %s14135_s12 = sand.u32 1, %s18534_s15   ;;  %p24140_p5 = scmp.ne.s32.totalorder %s23356_s22, 0 }
 0x909   : > { %p24141_p9 = scmp.ge.s32.totalorder %s18546_s18, 2  ;;  %s14136_s13 = scalar_lea.sflag [#allocation4], %s14135_s12 }
 0x90b   : > { %p16981_p12 = pnand %p24141_p9, %p24140_p5 }
 0x90d   : > { %18529 = dma.done.wait (!%p16981_p12), %s14136_s13, 2048  }
 0x90e   : > { %18531 = vsyncadd (!%p16981_p12), %s14136_s13, 4294965248  ;;  %p18_p2 = scmp.ge.s32.totalorder %s18704_s11, 4   ;;  %s24142_s15 = smov %s18538_s16 }
 0x90f   : > { %s24143_s16 = smov %s18542_s17  ;;  %s24144_s17 = smov %s18713_s14 }
 0x910   : > { %s24145_s18 = smov %s18704_s11  ;;  %20 = sbr.rel (!%p18_p2) target bundleno = 6 (0x6), region = 89 }
 0x917   :  { %14141 = vsyncpa [#allocation3], 1 }
 0x918   :  { %14143 = vsyncpa [#allocation3 + $0x1], 1 }
 0x919   :  { %14144 = vsyncpa [#allocation6], 1 }
 0x91a   :  { %14145 = vsyncpa [#allocation4], 1 }
 0x91b   :  { %14147 = vsyncpa [#allocation4 + $0x1], 1 }

</bundles_post_ra>
